<compile_context>
chip_gen: v5e
topology: v5e:2x2
jax: 0.10.0
libtpu: 0.0.40
codegen_flags: <defaults>
</compile_context>

<pallas_src>
import numpy as np
import jax
import jax.numpy as jnp
from jax.experimental import pallas as pl
from jax.experimental.pallas import tpu as pltpu


# ---------------------------------------------------------------------------
# Parameter preparation (runs once, outside the hot path).
# ---------------------------------------------------------------------------
def _toeplitz_conv1(w):
    """Conv1 Toeplitz: t[kh, c*3+ci, ow*16+co] = w[co,ci,kh,kw], c = ow+kw-1.

    Out-of-range columns (c<0 or c>31) are simply omitted -> the spatial zero
    padding needs no zero data anywhere."""
    w = np.asarray(w, np.float32)
    cout, cin, _, _ = w.shape                       # 16, 3
    t = np.zeros((3, 128, 32 * cout), np.float32)
    for kh in range(3):
        for kw in range(3):
            blk = w[:, :, kh, kw].T                 # (cin, cout)
            for ow in range(32):
                c = ow + kw - 1
                if 0 <= c < 32:
                    t[kh, c * cin:(c + 1) * cin, ow * cout:(ow + 1) * cout] = blk
    return t                                        # (3, 128, 512)


def _toeplitz_conv2(w):
    """Conv2 Toeplitz (stride 2 folded in): c = 2*ow + kw - 1, omit OOB taps."""
    w = np.asarray(w, np.float32)
    cout, cin, _, _ = w.shape                       # 32, 16
    t = np.zeros((3, 16 * 32, 16 * cout), np.float32)
    for kh in range(3):
        for kw in range(3):
            blk = w[:, :, kh, kw].T                 # (cin, cout)
            for ow in range(16):
                c = 2 * ow + kw - 1
                if 0 <= c < 32:
                    t[kh, c * cin:(c + 1) * cin, ow * cout:(ow + 1) * cout] = blk
    return t                                        # (3, 512, 512)


def _fc_wall(wf):
    """FC weights packed as per-output-row (oh) column blocks of 16 lanes.

    wall[ow*32+co, oh*16+c] = wf[c, co*256 + oh*16 + ow]   (PyTorch NCHW flatten).
    """
    wf = np.asarray(wf, np.float32)
    ncls = wf.shape[0]
    wr = wf.reshape(ncls, 32, 16, 16)               # (c, co, oh, ow)
    wall = np.zeros((512, 256), np.float32)
    for oh in range(16):
        blk = np.transpose(wr[:, :, oh, :], (2, 1, 0)).reshape(512, ncls)
        wall[:, oh * 16: oh * 16 + ncls] = blk
    return wall                                     # (512, 256)


def prepare_params(w1, b1, w2, b2, wf, bf):
    """PyTorch-layout params -> kernel-layout params (all permutations folded)."""
    ncls = wf.shape[0]
    assert ncls <= 16, "FC packing uses 16-wide per-row class blocks"
    bfp = np.zeros((1, 128), np.float32)
    bfp[0, :ncls] = np.asarray(bf, np.float32)
    return {
        "t1": jnp.asarray(_toeplitz_conv1(w1), jnp.bfloat16),      # (3,128,512)
        "b1": jnp.asarray(np.tile(np.asarray(b1, np.float32), 32).reshape(1, 512)),
        "t2": jnp.asarray(_toeplitz_conv2(w2), jnp.bfloat16),      # (3,512,512)
        "b2": jnp.asarray(np.tile(np.asarray(b2, np.float32), 16).reshape(1, 512)),
        "wall": jnp.asarray(_fc_wall(wf), jnp.bfloat16),           # (512,256)
        "bfp": jnp.asarray(bfp),                                   # (1,128)
        "bf": jnp.asarray(bf, jnp.float32),  # kept only so ncls is a static shape
    }


# ---------------------------------------------------------------------------
# Fused forward kernel (BLOCK_B images per grid step).
# ---------------------------------------------------------------------------
def _fused_forward_kernel(xin_ref, t1_ref, b1_ref, t2_ref, b2_ref,
                          wall_ref, bfp_ref, o_ref):
    # xin_ref : (3, 32B, 128) bf16  per-kh conv1 input windows;
    #           rows [0,16B)  -> even output rows (row = oh*B + b)
    #           rows [16B,32B)-> odd  output rows
    # t1_ref  : (3, 128, 512) bf16  conv1 Toeplitz (lane c*3+ci -> col ow*16+co)
    # t2_ref  : (3, 512, 512) bf16  conv2 Toeplitz (stride 2 folded in)
    # b1/b2   : (1, 512) f32 tiled biases
    # wall_ref: (512, 256) bf16  FC weights, column block oh at lanes [16oh,16oh+16)
    # bfp_ref : (1, 128) f32  FC bias padded to 128 lanes
    # o_ref   : (B, 128) f32  logits (first num_classes lanes valid)
    bsz = o_ref.shape[0]
    half = xin_ref.shape[1] // 2                     # 16 * B

    # ---- layer1: Conv2d(3 -> 16, k3, s1, p1) + ReLU, parity-merged ---------
    acc = jnp.dot(xin_ref[0], t1_ref[0], preferred_element_type=jnp.float32)
    acc = acc + jnp.dot(xin_ref[1], t1_ref[1], preferred_element_type=jnp.float32)
    acc = acc + jnp.dot(xin_ref[2], t1_ref[2], preferred_element_type=jnp.float32)
    a1 = jnp.maximum(acc + b1_ref[...], 0.0)         # (32B, 512) f32

    a1_even = a1[:half]                              # layer1 rows 2*oh
    a1_odd = a1[half:]                               # layer1 rows 2*oh + 1
    blk1 = a1_even.astype(jnp.bfloat16)              # conv2 tap kh=1 input
    blk2 = a1_odd.astype(jnp.bfloat16)               # conv2 tap kh=2 input
    # conv2 tap kh=0 reads layer1 rows 2*oh - 1: shift the odd block down by one
    # oh-group (B rows, tile-aligned); the zero top group is the row(-1) padding.
    blk0 = jnp.concatenate(
        [jnp.zeros((bsz, 512), jnp.float32), a1_odd[:half - bsz]], axis=0
    ).astype(jnp.bfloat16)

    # ---- layer2: Conv2d(16 -> 32, k3, s2, p1) + ReLU ------------------------
    acc2 = jnp.dot(blk0, t2_ref[0], preferred_element_type=jnp.float32)
    acc2 = acc2 + jnp.dot(blk1, t2_ref[1], preferred_element_type=jnp.float32)
    acc2 = acc2 + jnp.dot(blk2, t2_ref[2], preferred_element_type=jnp.float32)
    o2 = jnp.maximum(acc2 + b2_ref[...], 0.0)        # (16B, 512) f32, row = oh*B+b

    # ---- fully connected (MXU) ----------------------------------------------
    # fcp[oh*B + b, oh*16 + c] holds the per-oh partial logit; sum over oh.
    fcp = jnp.dot(o2.astype(jnp.bfloat16), wall_ref[...],
                  preferred_element_type=jnp.float32)          # (16B, 256)
    logits = fcp[0:bsz, 0:16]
    for oh in range(1, 16):
        logits = logits + fcp[oh * bsz:(oh + 1) * bsz, oh * 16:(oh + 1) * 16]
    out = jnp.concatenate(
        [logits, jnp.zeros((bsz, 112), jnp.float32)], axis=1) + bfp_ref[...]
    o_ref[...] = out                                 # lane-dense (B, 128) store


# ---------------------------------------------------------------------------
# Host-side input prep (pure XLA, tiny): window extraction + bf16 packing.
# ---------------------------------------------------------------------------
def _prepare_inputs(x, block_b):
    n = x.shape[0]
    g = -(-n // block_b)
    n_pad = g * block_b
    if n_pad != n:
        x = jnp.pad(x, ((0, n_pad - n), (0, 0), (0, 0), (0, 0)))
    # NCHW -> per-row lanes (col*Cin + ci); pad lanes 96->128, rows 32->34.
    xh = jnp.transpose(x, (0, 2, 3, 1)).reshape(n_pad, 32, 96)
    xp = jnp.pad(xh, ((0, 0), (1, 1), (0, 32))).astype(jnp.bfloat16)  # (n,34,128)
    # Conv1 windows per kernel row kh: even output rows read padded rows 2*oh+kh,
    # odd output rows read padded rows 2*oh+1+kh.
    evens = jnp.stack([xp[:, kh:kh + 31:2, :] for kh in range(3)], axis=1)
    odds = jnp.stack([xp[:, kh + 1:kh + 32:2, :] for kh in range(3)], axis=1)

    def arrange(w):                                   # (n_pad, 3, 16, 128)
        w = w.reshape(g, block_b, 3, 16, 128)
        w = jnp.transpose(w, (0, 2, 3, 1, 4))         # (g, kh, oh, b, lane)
        return w.reshape(g, 3, 16 * block_b, 128)

    xin = jnp.concatenate([arrange(evens), arrange(odds)], axis=2)
    return xin, n_pad, g                              # (g, 3, 32*block_b, 128)


# ---------------------------------------------------------------------------
# Wrapper (matches Convolutional.forward; input is PyTorch NCHW).
# ---------------------------------------------------------------------------
def convolutional_forward(x, params, block_b=8):
    """x: [N, 3, 32, 32] float32 (NCHW).  Returns [N, num_classes] float32."""
    n = x.shape[0]
    assert x.shape[1:] == (3, 32, 32), x.shape
    assert block_b % 8 == 0, "block_b must be a multiple of 8 (tile alignment)"
    ncls = params["bf"].shape[0]

    xin, n_pad, g = _prepare_inputs(x, block_b)

    out = pl.pallas_call(
        _fused_forward_kernel,
        out_shape=jax.ShapeDtypeStruct((g, block_b, 128), jnp.float32),
        grid=(g,),
        in_specs=[
            pl.BlockSpec((None, 3, 32 * block_b, 128), lambda i: (i, 0, 0, 0)),
            pl.BlockSpec((3, 128, 512), lambda i: (0, 0, 0)),
            pl.BlockSpec((1, 512), lambda i: (0, 0)),
            pl.BlockSpec((3, 512, 512), lambda i: (0, 0, 0)),
            pl.BlockSpec((1, 512), lambda i: (0, 0)),
            pl.BlockSpec((512, 256), lambda i: (0, 0)),
            pl.BlockSpec((1, 128), lambda i: (0, 0)),
        ],
        out_specs=pl.BlockSpec((None, block_b, 128), lambda i: (i, 0, 0)),
        compiler_params=pltpu.CompilerParams(
            dimension_semantics=("parallel",)),
    )(xin, params["t1"], params["b1"], params["t2"], params["b2"],
      params["wall"], params["bfp"])

    return out.reshape(n_pad, 128)[:n, :ncls]


# ---------------------------------------------------------------------------
# Pure-JAX reference (mirrors the PyTorch ops) for correctness checking.
# ---------------------------------------------------------------------------
def _reference(x, w1, b1, w2, b2, wf, bf):
    def conv(x, w, b, stride):
        y = jax.lax.conv_general_dilated(
            x, w, window_strides=(stride, stride),
            padding=((1, 1), (1, 1)),
            dimension_numbers=("NCHW", "OIHW", "NCHW"))
        return jnp.maximum(y + b[None, :, None, None], 0.0)
    h = conv(x, w1, b1, 1)
    h = conv(h, w2, b2, 2)
    h = h.reshape(h.shape[0], -1)
    return h @ wf.T + bf


if __name__ == "__main__":
    key = jax.random.PRNGKey(0)
    ks = jax.random.split(key, 7)

    # Spatial size must be 32x32 so the flatten matches 32*16*16.
    N, Cin, H, W = 10, 3, 32, 32
    num_classes = 10

    x = jax.random.normal(ks[0], (N, Cin, H, W), jnp.float32)

    # PyTorch layouts: conv weight [Cout, Cin, kh, kw], fc weight [out, in].
    w1 = jax.random.normal(ks[1], (16, Cin, 3, 3), jnp.float32) * 0.1
    b1 = jax.random.normal(ks[2], (16,), jnp.float32) * 0.1
    w2 = jax.random.normal(ks[3], (32, 16, 3, 3), jnp.float32) * 0.1
    b2 = jax.random.normal(ks[4], (32,), jnp.float32) * 0.1
    wf = jax.random.normal(ks[5], (num_classes, 32 * 16 * 16), jnp.float32) * 0.01
    bf = jax.random.normal(ks[6], (num_classes,), jnp.float32) * 0.01

    params = prepare_params(w1, b1, w2, b2, wf, bf)
    fwd = jax.jit(convolutional_forward)

    out = jax.block_until_ready(fwd(x, params))
    assert out.shape == (N, num_classes), out.shape

    ref = _reference(x, w1, b1, w2, b2, wf, bf)
    max_err = float(jnp.max(jnp.abs(out - ref)))
    assert jnp.allclose(out, ref, atol=4e-2, rtol=4e-2), max_err

    print("KERNEL_OK")
</pallas_src>

<mosaic_0001>
module attributes {stable_mosaic.version = 11 : i64} {
  func.func @_fused_forward_kernel(%arg0: i32, %arg1: memref<1x3x256x128xbf16, #tpu.memory_space<vmem>>, %arg2: memref<3x128x512xbf16, #tpu.memory_space<vmem>>, %arg3: memref<1x512xf32, #tpu.memory_space<vmem>>, %arg4: memref<3x512x512xbf16, #tpu.memory_space<vmem>>, %arg5: memref<1x512xf32, #tpu.memory_space<vmem>>, %arg6: memref<512x256xbf16, #tpu.memory_space<vmem>>, %arg7: memref<1x128xf32, #tpu.memory_space<vmem>>, %arg8: memref<1x8x128xf32, #tpu.memory_space<vmem>>) attributes {dimension_semantics = [#tpu.dimension_semantics<parallel>], iteration_bounds = array<i64: 2>, scalar_prefetch = 0 : i64, scratch_operands = 0 : i64, tpu.core_type = #tpu.core_type<tc>, window_params = [{transform_indices = @transform_0, window_bounds = array<i64: 1, 3, 256, 128>}, {pipeline_mode = #tpu.pipeline_mode<synchronous>, transform_indices = @transform_1, window_bounds = array<i64: 3, 128, 512>}, {pipeline_mode = #tpu.pipeline_mode<synchronous>, transform_indices = @transform_2, window_bounds = array<i64: 1, 512>}, {pipeline_mode = #tpu.pipeline_mode<synchronous>, transform_indices = @transform_3, window_bounds = array<i64: 3, 512, 512>}, {pipeline_mode = #tpu.pipeline_mode<synchronous>, transform_indices = @transform_4, window_bounds = array<i64: 1, 512>}, {pipeline_mode = #tpu.pipeline_mode<synchronous>, transform_indices = @transform_5, window_bounds = array<i64: 512, 256>}, {pipeline_mode = #tpu.pipeline_mode<synchronous>, transform_indices = @transform_6, window_bounds = array<i64: 1, 128>}, {transform_indices = @transform_7, window_bounds = array<i64: 1, 8, 128>}]} {
    %c0 = arith.constant 0 : index
    %c0_0 = arith.constant 0 : index
    %c0_1 = arith.constant 0 : index
    %c0_2 = arith.constant 0 : index
    %0 = vector.load %arg1[%c0, %c0_0, %c0_1, %c0_2] : memref<1x3x256x128xbf16, #tpu.memory_space<vmem>>, vector<1x1x256x128xbf16>
    %1 = vector.shape_cast %0 : vector<1x1x256x128xbf16> to vector<256x128xbf16>
    %c0_3 = arith.constant 0 : index
    %c0_4 = arith.constant 0 : index
    %c0_5 = arith.constant 0 : index
    %2 = vector.load %arg2[%c0_3, %c0_4, %c0_5] : memref<3x128x512xbf16, #tpu.memory_space<vmem>>, vector<1x128x512xbf16>
    %3 = vector.shape_cast %2 : vector<1x128x512xbf16> to vector<128x512xbf16>
    %cst = arith.constant dense<0.000000e+00> : vector<256x512xf32>
    %4 = tpu.matmul %1, %3, %cst {dimension_numbers = #tpu.dot_dimension_numbers<[1], [0], [0], [1], [0, 0, 1, 1], [], []>} : vector<256x128xbf16>, vector<128x512xbf16>, vector<256x512xf32> -> vector<256x512xf32>
    %c0_6 = arith.constant 0 : index
    %c1 = arith.constant 1 : index
    %c0_7 = arith.constant 0 : index
    %c0_8 = arith.constant 0 : index
    %5 = vector.load %arg1[%c0_6, %c1, %c0_7, %c0_8] : memref<1x3x256x128xbf16, #tpu.memory_space<vmem>>, vector<1x1x256x128xbf16>
    %6 = vector.shape_cast %5 : vector<1x1x256x128xbf16> to vector<256x128xbf16>
    %c1_9 = arith.constant 1 : index
    %c0_10 = arith.constant 0 : index
    %c0_11 = arith.constant 0 : index
    %7 = vector.load %arg2[%c1_9, %c0_10, %c0_11] : memref<3x128x512xbf16, #tpu.memory_space<vmem>>, vector<1x128x512xbf16>
    %8 = vector.shape_cast %7 : vector<1x128x512xbf16> to vector<128x512xbf16>
    %cst_12 = arith.constant dense<0.000000e+00> : vector<256x512xf32>
    %9 = tpu.matmul %6, %8, %cst_12 {dimension_numbers = #tpu.dot_dimension_numbers<[1], [0], [0], [1], [0, 0, 1, 1], [], []>} : vector<256x128xbf16>, vector<128x512xbf16>, vector<256x512xf32> -> vector<256x512xf32>
    %10 = arith.addf %4, %9 : vector<256x512xf32>
    %c0_13 = arith.constant 0 : index
    %c2 = arith.constant 2 : index
    %c0_14 = arith.constant 0 : index
    %c0_15 = arith.constant 0 : index
    %11 = vector.load %arg1[%c0_13, %c2, %c0_14, %c0_15] : memref<1x3x256x128xbf16, #tpu.memory_space<vmem>>, vector<1x1x256x128xbf16>
    %12 = vector.shape_cast %11 : vector<1x1x256x128xbf16> to vector<256x128xbf16>
    %c2_16 = arith.constant 2 : index
    %c0_17 = arith.constant 0 : index
    %c0_18 = arith.constant 0 : index
    %13 = vector.load %arg2[%c2_16, %c0_17, %c0_18] : memref<3x128x512xbf16, #tpu.memory_space<vmem>>, vector<1x128x512xbf16>
    %14 = vector.shape_cast %13 : vector<1x128x512xbf16> to vector<128x512xbf16>
    %cst_19 = arith.constant dense<0.000000e+00> : vector<256x512xf32>
    %15 = tpu.matmul %12, %14, %cst_19 {dimension_numbers = #tpu.dot_dimension_numbers<[1], [0], [0], [1], [0, 0, 1, 1], [], []>} : vector<256x128xbf16>, vector<128x512xbf16>, vector<256x512xf32> -> vector<256x512xf32>
    %16 = arith.addf %10, %15 : vector<256x512xf32>
    %c0_20 = arith.constant 0 : index
    %c0_21 = arith.constant 0 : index
    %17 = vector.load %arg3[%c0_20, %c0_21] : memref<1x512xf32, #tpu.memory_space<vmem>>, vector<1x512xf32>
    %18 = vector.broadcast %17 : vector<1x512xf32> to vector<256x512xf32>
    %19 = arith.addf %16, %18 : vector<256x512xf32>
    %cst_22 = arith.constant 0.000000e+00 : f32
    %20 = vector.broadcast %cst_22 : f32 to vector<256x512xf32>
    %21 = arith.maximumf %19, %20 : vector<256x512xf32>
    %22 = vector.extract_strided_slice %21 {offsets = [0, 0], sizes = [128, 512], strides = [1, 1]} : vector<256x512xf32> to vector<128x512xf32>
    %23 = vector.extract_strided_slice %21 {offsets = [128, 0], sizes = [128, 512], strides = [1, 1]} : vector<256x512xf32> to vector<128x512xf32>
    %24 = arith.truncf %22 : vector<128x512xf32> to vector<128x512xbf16>
    %25 = arith.truncf %23 : vector<128x512xf32> to vector<128x512xbf16>
    %cst_23 = arith.constant 0.000000e+00 : f32
    %26 = vector.broadcast %cst_23 : f32 to vector<8x512xf32>
    %27 = vector.extract_strided_slice %23 {offsets = [0, 0], sizes = [120, 512], strides = [1, 1]} : vector<128x512xf32> to vector<120x512xf32>
    %28 = tpu.concatenate %26, %27 in 0 : vector<8x512xf32>, vector<120x512xf32> -> vector<128x512xf32>
    %29 = arith.truncf %28 : vector<128x512xf32> to vector<128x512xbf16>
    %c0_24 = arith.constant 0 : index
    %c0_25 = arith.constant 0 : index
    %c0_26 = arith.constant 0 : index
    %30 = vector.load %arg4[%c0_24, %c0_25, %c0_26] : memref<3x512x512xbf16, #tpu.memory_space<vmem>>, vector<1x512x512xbf16>
    %31 = vector.shape_cast %30 : vector<1x512x512xbf16> to vector<512x512xbf16>
    %cst_27 = arith.constant dense<0.000000e+00> : vector<128x512xf32>
    %32 = tpu.matmul %29, %31, %cst_27 {dimension_numbers = #tpu.dot_dimension_numbers<[1], [0], [0], [1], [0, 0, 1, 1], [], []>} : vector<128x512xbf16>, vector<512x512xbf16>, vector<128x512xf32> -> vector<128x512xf32>
    %c1_28 = arith.constant 1 : index
    %c0_29 = arith.constant 0 : index
    %c0_30 = arith.constant 0 : index
    %33 = vector.load %arg4[%c1_28, %c0_29, %c0_30] : memref<3x512x512xbf16, #tpu.memory_space<vmem>>, vector<1x512x512xbf16>
    %34 = vector.shape_cast %33 : vector<1x512x512xbf16> to vector<512x512xbf16>
    %cst_31 = arith.constant dense<0.000000e+00> : vector<128x512xf32>
    %35 = tpu.matmul %24, %34, %cst_31 {dimension_numbers = #tpu.dot_dimension_numbers<[1], [0], [0], [1], [0, 0, 1, 1], [], []>} : vector<128x512xbf16>, vector<512x512xbf16>, vector<128x512xf32> -> vector<128x512xf32>
    %36 = arith.addf %32, %35 : vector<128x512xf32>
    %c2_32 = arith.constant 2 : index
    %c0_33 = arith.constant 0 : index
    %c0_34 = arith.constant 0 : index
    %37 = vector.load %arg4[%c2_32, %c0_33, %c0_34] : memref<3x512x512xbf16, #tpu.memory_space<vmem>>, vector<1x512x512xbf16>
    %38 = vector.shape_cast %37 : vector<1x512x512xbf16> to vector<512x512xbf16>
    %cst_35 = arith.constant dense<0.000000e+00> : vector<128x512xf32>
    %39 = tpu.matmul %25, %38, %cst_35 {dimension_numbers = #tpu.dot_dimension_numbers<[1], [0], [0], [1], [0, 0, 1, 1], [], []>} : vector<128x512xbf16>, vector<512x512xbf16>, vector<128x512xf32> -> vector<128x512xf32>
    %40 = arith.addf %36, %39 : vector<128x512xf32>
    %c0_36 = arith.constant 0 : index
    %c0_37 = arith.constant 0 : index
    %41 = vector.load %arg5[%c0_36, %c0_37] : memref<1x512xf32, #tpu.memory_space<vmem>>, vector<1x512xf32>
    %42 = vector.broadcast %41 : vector<1x512xf32> to vector<128x512xf32>
    %43 = arith.addf %40, %42 : vector<128x512xf32>
    %cst_38 = arith.constant 0.000000e+00 : f32
    %44 = vector.broadcast %cst_38 : f32 to vector<128x512xf32>
    %45 = arith.maximumf %43, %44 : vector<128x512xf32>
    %46 = arith.truncf %45 : vector<128x512xf32> to vector<128x512xbf16>
    %c0_39 = arith.constant 0 : index
    %c0_40 = arith.constant 0 : index
    %47 = vector.load %arg6[%c0_39, %c0_40] : memref<512x256xbf16, #tpu.memory_space<vmem>>, vector<512x256xbf16>
    %cst_41 = arith.constant dense<0.000000e+00> : vector<128x256xf32>
    %48 = tpu.matmul %46, %47, %cst_41 {dimension_numbers = #tpu.dot_dimension_numbers<[1], [0], [0], [1], [0, 0, 1, 1], [], []>} : vector<128x512xbf16>, vector<512x256xbf16>, vector<128x256xf32> -> vector<128x256xf32>
    %49 = vector.extract_strided_slice %48 {offsets = [0, 0], sizes = [8, 16], strides = [1, 1]} : vector<128x256xf32> to vector<8x16xf32>
    %50 = vector.extract_strided_slice %48 {offsets = [8, 16], sizes = [8, 16], strides = [1, 1]} : vector<128x256xf32> to vector<8x16xf32>
    %51 = arith.addf %49, %50 : vector<8x16xf32>
    %52 = vector.extract_strided_slice %48 {offsets = [16, 32], sizes = [8, 16], strides = [1, 1]} : vector<128x256xf32> to vector<8x16xf32>
    %53 = arith.addf %51, %52 : vector<8x16xf32>
    %54 = vector.extract_strided_slice %48 {offsets = [24, 48], sizes = [8, 16], strides = [1, 1]} : vector<128x256xf32> to vector<8x16xf32>
    %55 = arith.addf %53, %54 : vector<8x16xf32>
    %56 = vector.extract_strided_slice %48 {offsets = [32, 64], sizes = [8, 16], strides = [1, 1]} : vector<128x256xf32> to vector<8x16xf32>
    %57 = arith.addf %55, %56 : vector<8x16xf32>
    %58 = vector.extract_strided_slice %48 {offsets = [40, 80], sizes = [8, 16], strides = [1, 1]} : vector<128x256xf32> to vector<8x16xf32>
    %59 = arith.addf %57, %58 : vector<8x16xf32>
    %60 = vector.extract_strided_slice %48 {offsets = [48, 96], sizes = [8, 16], strides = [1, 1]} : vector<128x256xf32> to vector<8x16xf32>
    %61 = arith.addf %59, %60 : vector<8x16xf32>
    %62 = vector.extract_strided_slice %48 {offsets = [56, 112], sizes = [8, 16], strides = [1, 1]} : vector<128x256xf32> to vector<8x16xf32>
    %63 = arith.addf %61, %62 : vector<8x16xf32>
    %64 = vector.extract_strided_slice %48 {offsets = [64, 128], sizes = [8, 16], strides = [1, 1]} : vector<128x256xf32> to vector<8x16xf32>
    %65 = arith.addf %63, %64 : vector<8x16xf32>
    %66 = vector.extract_strided_slice %48 {offsets = [72, 144], sizes = [8, 16], strides = [1, 1]} : vector<128x256xf32> to vector<8x16xf32>
    %67 = arith.addf %65, %66 : vector<8x16xf32>
    %68 = vector.extract_strided_slice %48 {offsets = [80, 160], sizes = [8, 16], strides = [1, 1]} : vector<128x256xf32> to vector<8x16xf32>
    %69 = arith.addf %67, %68 : vector<8x16xf32>
    %70 = vector.extract_strided_slice %48 {offsets = [88, 176], sizes = [8, 16], strides = [1, 1]} : vector<128x256xf32> to vector<8x16xf32>
    %71 = arith.addf %69, %70 : vector<8x16xf32>
    %72 = vector.extract_strided_slice %48 {offsets = [96, 192], sizes = [8, 16], strides = [1, 1]} : vector<128x256xf32> to vector<8x16xf32>
    %73 = arith.addf %71, %72 : vector<8x16xf32>
    %74 = vector.extract_strided_slice %48 {offsets = [104, 208], sizes = [8, 16], strides = [1, 1]} : vector<128x256xf32> to vector<8x16xf32>
    %75 = arith.addf %73, %74 : vector<8x16xf32>
    %76 = vector.extract_strided_slice %48 {offsets = [112, 224], sizes = [8, 16], strides = [1, 1]} : vector<128x256xf32> to vector<8x16xf32>
    %77 = arith.addf %75, %76 : vector<8x16xf32>
    %78 = vector.extract_strided_slice %48 {offsets = [120, 240], sizes = [8, 16], strides = [1, 1]} : vector<128x256xf32> to vector<8x16xf32>
    %79 = arith.addf %77, %78 : vector<8x16xf32>
    %cst_42 = arith.constant 0.000000e+00 : f32
    %80 = vector.broadcast %cst_42 : f32 to vector<8x112xf32>
    %81 = tpu.concatenate %79, %80 in 1 : vector<8x16xf32>, vector<8x112xf32> -> vector<8x128xf32>
    %c0_43 = arith.constant 0 : index
    %c0_44 = arith.constant 0 : index
    %82 = vector.load %arg7[%c0_43, %c0_44] : memref<1x128xf32, #tpu.memory_space<vmem>>, vector<1x128xf32>
    %83 = vector.broadcast %82 : vector<1x128xf32> to vector<8x128xf32>
    %84 = arith.addf %81, %83 : vector<8x128xf32>
    %c0_45 = arith.constant 0 : index
    %c0_46 = arith.constant 0 : index
    %c0_47 = arith.constant 0 : index
    %85 = vector.load %arg8[%c0_45, %c0_46, %c0_47] : memref<1x8x128xf32, #tpu.memory_space<vmem>>, vector<1x8x128xf32>
    %86 = vector.shape_cast %85 : vector<1x8x128xf32> to vector<8x128xf32>
    %87 = vector.shape_cast %84 : vector<8x128xf32> to vector<1x8x128xf32>
    tpu.vector_store %arg8[%c0_45, %c0_46, %c0_47], %87 {strides = array<i32>} : memref<1x8x128xf32, #tpu.memory_space<vmem>>, vector<1x8x128xf32>,
    return
  }
  func.func @transform_0(%arg0: i32) -> (i32, i32, i32, i32) {
    %c0_i32 = arith.constant 0 : i32
    %c0_i32_0 = arith.constant 0 : i32
    %c0_i32_1 = arith.constant 0 : i32
    %c0_i32_2 = arith.constant 0 : i32
    return %arg0, %c0_i32, %c0_i32_0, %c0_i32_1 : i32, i32, i32, i32
  }
  func.func @transform_1(%arg0: i32) -> (i32, i32, i32) {
    %c0_i32 = arith.constant 0 : i32
    %c0_i32_0 = arith.constant 0 : i32
    %c0_i32_1 = arith.constant 0 : i32
    %c0_i32_2 = arith.constant 0 : i32
    return %c0_i32, %c0_i32_0, %c0_i32_1 : i32, i32, i32
  }
  func.func @transform_2(%arg0: i32) -> (i32, i32) {
    %c0_i32 = arith.constant 0 : i32
    %c0_i32_0 = arith.constant 0 : i32
    %c0_i32_1 = arith.constant 0 : i32
    return %c0_i32, %c0_i32_0 : i32, i32
  }
  func.func @transform_3(%arg0: i32) -> (i32, i32, i32) {
    %c0_i32 = arith.constant 0 : i32
    %c0_i32_0 = arith.constant 0 : i32
    %c0_i32_1 = arith.constant 0 : i32
    %c0_i32_2 = arith.constant 0 : i32
    return %c0_i32, %c0_i32_0, %c0_i32_1 : i32, i32, i32
  }
  func.func @transform_4(%arg0: i32) -> (i32, i32) {
    %c0_i32 = arith.constant 0 : i32
    %c0_i32_0 = arith.constant 0 : i32
    %c0_i32_1 = arith.constant 0 : i32
    return %c0_i32, %c0_i32_0 : i32, i32
  }
  func.func @transform_5(%arg0: i32) -> (i32, i32) {
    %c0_i32 = arith.constant 0 : i32
    %c0_i32_0 = arith.constant 0 : i32
    %c0_i32_1 = arith.constant 0 : i32
    return %c0_i32, %c0_i32_0 : i32, i32
  }
  func.func @transform_6(%arg0: i32) -> (i32, i32) {
    %c0_i32 = arith.constant 0 : i32
    %c0_i32_0 = arith.constant 0 : i32
    %c0_i32_1 = arith.constant 0 : i32
    return %c0_i32, %c0_i32_0 : i32, i32
  }
  func.func @transform_7(%arg0: i32) -> (i32, i32, i32) {
    %c0_i32 = arith.constant 0 : i32
    %c0_i32_0 = arith.constant 0 : i32
    %c0_i32_1 = arith.constant 0 : i32
    return %arg0, %c0_i32, %c0_i32_0 : i32, i32, i32
  }
}

</mosaic_0001>

<bundles_post_ra>
// kernel: convolutional_forward.1
= control target key start
LH: loop header
LB: loop body
LE: loop exit
PB: predicated region body
PF: predicated region fallthrough
CT: control target
= control target key end

     0   :  { %12 = vsyncpa [#allocation3], 0  ;;  %s17601_s0 = inlined_call_operand.vmem [shape: bf16[2,3,256,128], index: 0, kind: input, shape index: {}]   ;;  %s17602_s1 = inlined_call_operand.vmem [shape: bf16[3,128,512], index: 1, kind: input, shape index: {}]   ;;  %s17603_s2 = inlined_call_operand.vmem [shape: f32[1,512], index: 2, kind: input, shape index: {}]   ;;  %s17604_s3 = inlined_call_operand.vmem [shape: bf16[3,512,512], index: 3, kind: input, shape index: {}]   ;;  %s17605_s4 = inlined_call_operand.vmem [shape: f32[1,512], index: 4, kind: input, shape index: {}]   ;;  %s17606_s5 = inlined_call_operand.vmem [shape: bf16[512,256], index: 5, kind: input, shape index: {}]   ;;  %s17607_s6 = inlined_call_operand.vmem [shape: f32[1,128], index: 6, kind: input, shape index: {}]   ;;  %s17608_s7 = inlined_call_operand.hbm [shape: f32[2,8,128], index: 7, kind: output, shape index: {}]  }
   0x1   :  { %14 = vsyncpa [#allocation3 + $0x1], 0  ;;  %s12073_s24 = smov 0   ;;  %s12075_s25 = smov 0  }
   0x2   :  { %s12077_s26 = smov 0   ;;  %s12079_s27 = smov 0  }
   0x3 LB: > { %s12094_s28 = sadd.s32 4294967295, %s12023_s27   ;;  %s8557_s29 = sadd.s32 4294967294, %s12023_s27   ;;  %s12023_s27 = sphi %s12079_s27, %s18436_s27   ;;  %s12019_s26 = sphi %s12077_s26, %s18435_s26   ;;  %s12015_s25 = sphi %s12075_s25, %s18434_s25   ;;  %s12011_s24 = sphi %s12073_s24, %s18433_s24  }
   0x4   : > { %s12098_s30 = sadd.s32 1, %s12023_s27   ;;  %s179_s8 = sadd.s32 1, %s12019_s26 }
   0x5   : > { %s176_s9 = ssub.s32 %s12023_s27, %s12098_s30  ;;  %p189_p0 = scmp.ne.s32.totalorder %s12019_s26, %s12015_s25 }
   0x6   : > { %p177_p1 = scmp.eq.s32.totalorder %s176_s9, 0  ;;  %p190_p2 = scmp.eq.s32.totalorder %s12094_s28, 1 }
   0x7   : > { %p195_p3 = scmp.ne.s32.totalorder %s12015_s25, %s12011_s24  ;;  %p196_p4 = scmp.eq.s32.totalorder %s8557_s29, 1 }
   0x8   : > { %s12109_s10 = scalar_select %p177_p1, %s12019_s26, %s179_s8  }
   0x9   : > { %p12111_p5 = por %p190_p2, %p189_p0  ;;  %p12115_p6 = por %p196_p4, %p195_p3 }
   0xa   : > { %p8560_p7 = scmp.ge.s32.totalorder %s12023_s27, 1  ;;  %p240_p8 = scmp.lt.s32.totalorder %s12023_s27, 3 }
   0xc   : > { %p241_p9 = pnand %p8560_p7, %p240_p8 }
   0xe   : > { %244 = sbr.rel (%p241_p9) target bundleno = 2887 (0xb47), region = 48 }
  0x13   : > { %v8805_v0 = vld [vmem:[%s17602_s1 + $0x1e0] sm:$0xf]  ;;  %v11413_v1 = vld [vmem:[%s17602_s1 + $0x1ec] sm:$0xf0]  ;;  %v11411_v2 = vld [vmem:[%s17602_s1 + $0x1e4] sm:$0xf] }
  0x14   : > { %v8806_v3 = vor.u32 %v11413_v1, %v8805_v0  ;;  %v8807_v4 = vld [vmem:[%s17602_s1 + $0x1f0] sm:$0xf0]  ;;  %v8813_v5 = vld [vmem:[%s17602_s1 + $0x1e8] sm:$0xf]  ;;  %v11414_v6 = vld [vmem:[%s17602_s1 + $0x1f4] sm:$0xf0] }
  0x15   : > { %v8810_v7 = vor.u32 %v11411_v2, %v8807_v4  ;;  %v8814_v8 = vor.u32 %v11414_v6, %v8813_v5  ;;  %v11412_v9 = vld [vmem:[%s17602_s1 + $0x1ec] sm:$0xf]  ;;  %v8815_v10 = vld [vmem:[%s17602_s1 + $0x1f8] sm:$0xf0]  ;;  %v8789_v11 = vld [vmem:[%s17602_s1 + $0x1c0] sm:$0xf] }
  0x16   : > { %663 = vmatpush.bf16.msra.mxu0 %v8806_v3  ;;  %v8818_v12 = vor.u32 %v11412_v9, %v8815_v10  ;;  %v11409_v13 = vld [vmem:[%s17602_s1 + $0x1cc] sm:$0xf0]  ;;  %v11407_v14 = vld [vmem:[%s17602_s1 + $0x1c4] sm:$0xf]  ;;  %v8791_v15 = vld [vmem:[%s17602_s1 + $0x1d0] sm:$0xf0] }
  0x17   : > { %752 = vmatpush.bf16.msra.mxu1 %v8810_v7  ;;  %841 = vmatpush.bf16.msra.mxu2 %v8814_v8  ;;  %v8790_v16 = vor.u32 %v11409_v13, %v8789_v11  ;;  %v8794_v17 = vor.u32 %v11407_v14, %v8791_v15  ;;  %v8797_v18 = vld [vmem:[%s17602_s1 + $0x1c8] sm:$0xf]  ;;  %v11410_v19 = vld [vmem:[%s17602_s1 + $0x1d4] sm:$0xf0]  ;;  %v11408_v20 = vld [vmem:[%s17602_s1 + $0x1cc] sm:$0xf] }
  0x18   : > { %930 = vmatpush.bf16.msra.mxu3 %v8818_v12  ;;  %v8798_v21 = vor.u32 %v11410_v19, %v8797_v18  ;;  %v8799_v22 = vld [vmem:[%s17602_s1 + $0x1d8] sm:$0xf0]  ;;  %v8773_v23 = vld [vmem:[%s17602_s1 + $0x1a0] sm:$0xf]  ;;  %v11405_v24 = vld [vmem:[%s17602_s1 + $0x1ac] sm:$0xf0] }
  0x19   : > { %v8802_v25 = vor.u32 %v11408_v20, %v8799_v22  ;;  %v11403_v26 = vld [vmem:[%s17602_s1 + $0x1a4] sm:$0xf]  ;;  %v8775_v27 = vld [vmem:[%s17602_s1 + $0x1b0] sm:$0xf0]  ;;  %v8781_v28 = vld [vmem:[%s17602_s1 + $0x1a8] sm:$0xf]  ;;  %v8774_v29 = vor.u32 %v11405_v24, %v8773_v23 }
  0x1a   : > { %664 = vmatpush.bf16.msra.mxu0 %v8790_v16  ;;  %v11406_v30 = vld [vmem:[%s17602_s1 + $0x1b4] sm:$0xf0]  ;;  %v11404_v31 = vld [vmem:[%s17602_s1 + $0x1ac] sm:$0xf]  ;;  %v8783_v32 = vld [vmem:[%s17602_s1 + $0x1b8] sm:$0xf0]  ;;  %v8778_v33 = vor.u32 %v11403_v26, %v8775_v27 }
  0x1b   : > { %753 = vmatpush.bf16.msra.mxu1 %v8794_v17  ;;  %842 = vmatpush.bf16.msra.mxu2 %v8798_v21  ;;  %v8782_v34 = vor.u32 %v11406_v30, %v8781_v28  ;;  %v8757_v35 = vld [vmem:[%s17602_s1 + $0x180] sm:$0xf]  ;;  %v11401_v36 = vld [vmem:[%s17602_s1 + $0x18c] sm:$0xf0]  ;;  %v11399_v37 = vld [vmem:[%s17602_s1 + $0x184] sm:$0xf]  ;;  %v8786_v38 = vor.u32 %v11404_v31, %v8783_v32 }
  0x1c   : > { %931 = vmatpush.bf16.msra.mxu3 %v8802_v25  ;;  %v8759_v39 = vld [vmem:[%s17602_s1 + $0x190] sm:$0xf0]  ;;  %v8765_v40 = vld [vmem:[%s17602_s1 + $0x188] sm:$0xf]  ;;  %v11402_v41 = vld [vmem:[%s17602_s1 + $0x194] sm:$0xf0]  ;;  %v8758_v44 = vor.u32 %v11401_v36, %v8757_v35 }
  0x1d   : > { %v11400_v42 = vld [vmem:[%s17602_s1 + $0x18c] sm:$0xf]  ;;  %v8767_v43 = vld [vmem:[%s17602_s1 + $0x198] sm:$0xf0]  ;;  %v8762_v45 = vor.u32 %v11399_v37, %v8759_v39  ;;  %v8766_v46 = vor.u32 %v11402_v41, %v8765_v40  ;;  %v8741_v47 = vld [vmem:[%s17602_s1 + $0x160] sm:$0xf] }
  0x1e   : > { %665 = vmatpush.bf16.msra.mxu0 %v8774_v29  ;;  %v11397_v48 = vld [vmem:[%s17602_s1 + $0x16c] sm:$0xf0]  ;;  %v11395_v49 = vld [vmem:[%s17602_s1 + $0x164] sm:$0xf]  ;;  %v8770_v50 = vor.u32 %v11400_v42, %v8767_v43  ;;  %v8743_v51 = vld [vmem:[%s17602_s1 + $0x170] sm:$0xf0] }
  0x1f   : > { %754 = vmatpush.bf16.msra.mxu1 %v8778_v33  ;;  %843 = vmatpush.bf16.msra.mxu2 %v8782_v34  ;;  %v8749_v52 = vld [vmem:[%s17602_s1 + $0x168] sm:$0xf]  ;;  %v11398_v53 = vld [vmem:[%s17602_s1 + $0x174] sm:$0xf0]  ;;  %v11396_v54 = vld [vmem:[%s17602_s1 + $0x16c] sm:$0xf]  ;;  %v8742_v56 = vor.u32 %v11397_v48, %v8741_v47  ;;  %v8746_v57 = vor.u32 %v11395_v49, %v8743_v51 }
  0x20   : > { %932 = vmatpush.bf16.msra.mxu3 %v8786_v38  ;;  %v8751_v55 = vld [vmem:[%s17602_s1 + $0x178] sm:$0xf0]  ;;  %v8750_v58 = vor.u32 %v11398_v53, %v8749_v52  ;;  %v8725_v59 = vld [vmem:[%s17602_s1 + $0x140] sm:$0xf]  ;;  %v11393_v60 = vld [vmem:[%s17602_s1 + $0x14c] sm:$0xf0] }
  0x21   : > { %v11391_v61 = vld [vmem:[%s17602_s1 + $0x144] sm:$0xf]  ;;  %v8754_v62 = vor.u32 %v11396_v54, %v8751_v55  ;;  %v8727_v63 = vld [vmem:[%s17602_s1 + $0x150] sm:$0xf0]  ;;  %v8733_v0 = vld [vmem:[%s17602_s1 + $0x148] sm:$0xf]  ;;  %v8726_v4 = vor.u32 %v11393_v60, %v8725_v59 }
  0x22   : > { %666 = vmatpush.bf16.msra.mxu0 %v8758_v44  ;;  %v11394_v1 = vld [vmem:[%s17602_s1 + $0x154] sm:$0xf0]  ;;  %v11392_v2 = vld [vmem:[%s17602_s1 + $0x14c] sm:$0xf]  ;;  %v8735_v3 = vld [vmem:[%s17602_s1 + $0x158] sm:$0xf0]  ;;  %v8730_v6 = vor.u32 %v11391_v61, %v8727_v63 }
  0x23   : > { %755 = vmatpush.bf16.msra.mxu1 %v8762_v45  ;;  %844 = vmatpush.bf16.msra.mxu2 %v8766_v46  ;;  %v8709_v5 = vld [vmem:[%s17602_s1 + $0x120] sm:$0xf]  ;;  %v8734_v7 = vor.u32 %v11394_v1, %v8733_v0  ;;  %v11389_v8 = vld [vmem:[%s17602_s1 + $0x12c] sm:$0xf0]  ;;  %v11387_v9 = vld [vmem:[%s17602_s1 + $0x124] sm:$0xf]  ;;  %v8738_v11 = vor.u32 %v11392_v2, %v8735_v3 }
  0x24   : > { %933 = vmatpush.bf16.msra.mxu3 %v8770_v50  ;;  %v8711_v10 = vld [vmem:[%s17602_s1 + $0x130] sm:$0xf0]  ;;  %v8717_v12 = vld [vmem:[%s17602_s1 + $0x128] sm:$0xf]  ;;  %v11390_v13 = vld [vmem:[%s17602_s1 + $0x134] sm:$0xf0]  ;;  %v8710_v17 = vor.u32 %v11389_v8, %v8709_v5 }
  0x25   : > { %p272_p10 = scmp.lt.s32.totalorder %s12094_s28, 1  ;;  %v11388_v14 = vld [vmem:[%s17602_s1 + $0x12c] sm:$0xf]  ;;  %v8719_v15 = vld [vmem:[%s17602_s1 + $0x138] sm:$0xf0]  ;;  %v8714_v20 = vor.u32 %v11387_v9, %v8711_v10  ;;  %v8718_v21 = vor.u32 %v11390_v13, %v8717_v12  ;;  %s12026_s17 = smov 112  }
  0x26   : > { %667 = vmatpush.bf16.msra.mxu0 %v8742_v56  ;;  %v8693_v16 = vld [vmem:[%s17602_s1 + $0x100] sm:$0xf]  ;;  %v11385_v18 = vld [vmem:[%s17602_s1 + $0x10c] sm:$0xf0]  ;;  %v11383_v19 = vld [vmem:[%s17602_s1 + $0x104] sm:$0xf]  ;;  %v8722_v24 = vor.u32 %v11388_v14, %v8719_v15 }
  0x27   : > { %756 = vmatpush.bf16.msra.mxu1 %v8746_v57  ;;  %845 = vmatpush.bf16.msra.mxu2 %v8750_v58  ;;  %s273_s19 = scalar_select %p272_p10, %s12094_s28, 1  ;;  %v8695_v22 = vld [vmem:[%s17602_s1 + $0x110] sm:$0xf0]  ;;  %v8701_v23 = vld [vmem:[%s17602_s1 + $0x108] sm:$0xf]  ;;  %v8694_v30 = vor.u32 %v11385_v18, %v8693_v16  ;;  %vm8474_vm0 = vcmask 130048  }
  0x28   : > { %934 = vmatpush.bf16.msra.mxu3 %v8754_v62  ;;  %v11386_v25 = vld [vmem:[%s17602_s1 + $0x114] sm:$0xf0]  ;;  %v11384_v26 = vld [vmem:[%s17602_s1 + $0x10c] sm:$0xf]  ;;  %v8703_v27 = vld [vmem:[%s17602_s1 + $0x118] sm:$0xf0]  ;;  %v8698_v33 = vor.u32 %v11383_v19, %v8695_v22 }
  0x29   : > { %s11911_s14 = smul.u32 384, %s273_s19  ;;  %v9005_v28 = vld [vmem:[%s17602_s1 + $0xe8] sm:$0xf]  ;;  %v11366_v29 = vld [vmem:[%s17602_s1 + $0xf4] sm:$0xf0]  ;;  %v8702_v34 = vor.u32 %v11386_v25, %v8701_v23  ;;  %v8706_v35 = vor.u32 %v11384_v26, %v8703_v27  ;;  %s12027_s18 = smov 96  }
  0x2a   : > { %668 = vmatpush.bf16.msra.mxu0 %v8726_v4  ;;  %v11364_v31 = vld [vmem:[%s17602_s1 + $0xec] sm:$0xf]  ;;  %v9007_v32 = vld [vmem:[%s17602_s1 + $0xf8] sm:$0xf0]  ;;  %v9006_v36 = vor.u32 %v11366_v29, %v9005_v28  ;;  %v8997_v37 = vld [vmem:[%s17602_s1 + $0xe0] sm:$0xf] }
  0x2b   : > { %757 = vmatpush.bf16.msra.mxu1 %v8730_v6  ;;  %846 = vmatpush.bf16.msra.mxu2 %v8734_v7  ;;  %s12324_s29 = scalar_lea.vmem %s17601_s0, %s11911_s14  ;;  %v11365_v38 = vld [vmem:[%s17602_s1 + $0xec] sm:$0xf0]  ;;  %v9010_v40 = vor.u32 %v11364_v31, %v9007_v32  ;;  %v11363_v41 = vld [vmem:[%s17602_s1 + $0xe4] sm:$0xf]  ;;  %v8999_v42 = vld [vmem:[%s17602_s1 + $0xf0] sm:$0xf0] }
  0x2c   : > { %935 = vmatpush.bf16.msra.mxu3 %v8738_v11  ;;  %v11367_v39 = vld [vmem:[%s12324_s29 + $0x80] sm:$0xff]  ;;  %v8998_v43 = vor.u32 %v11365_v38, %v8997_v37  ;;  %v9002_v44 = vor.u32 %v11363_v41, %v8999_v42  ;;  %v8989_v45 = vld [vmem:[%s17602_s1 + $0xc8] sm:$0xf]  ;;  %v11362_v46 = vld [vmem:[%s17602_s1 + $0xd4] sm:$0xf0]  ;;  %s12028_s20 = smov 80  }
  0x2d   : > { %v11360_v47 = vld [vmem:[%s17602_s1 + $0xcc] sm:$0xf]  ;;  %v8990_v48 = vor.u32 %v11362_v46, %v8989_v45  ;;  %v8991_v49 = vld [vmem:[%s17602_s1 + $0xd8] sm:$0xf0]  ;;  %v8981_v50 = vld [vmem:[%s17602_s1 + $0xc0] sm:$0xf] }
  0x2e   : > { %669 = vmatpush.bf16.msra.mxu0 %v8710_v17  ;;  %v11361_v51 = vld [vmem:[%s17602_s1 + $0xcc] sm:$0xf0]  ;;  %v8994_v52 = vor.u32 %v11360_v47, %v8991_v49  ;;  %v11359_v54 = vld [vmem:[%s17602_s1 + $0xc4] sm:$0xf]  ;;  %v8983_v55 = vld [vmem:[%s17602_s1 + $0xd0] sm:$0xf0] }
  0x2f   : > { %758 = vmatpush.bf16.msra.mxu1 %v8714_v20  ;;  %847 = vmatpush.bf16.msra.mxu2 %v8718_v21  ;;  %v8982_v53 = vor.u32 %v11361_v51, %v8981_v50  ;;  %v8986_v56 = vor.u32 %v11359_v54, %v8983_v55  ;;  %v11368_v57 = vld [vmem:[%s12324_s29 + $0x88] sm:$0xff]  ;;  %v11369_v58 = vld [vmem:[%s12324_s29 + $0x90] sm:$0xff]  ;;  %v11358_v60 = vld [vmem:[%s17602_s1 + $0xb4] sm:$0xf0]  ;;  %s12029_s21 = smov 64   ;;  %s12030_s22 = smov 48  }
  0x30   : > { %936 = vmatpush.bf16.msra.mxu3 %v8722_v24  ;;  %v8973_v59 = vld [vmem:[%s17602_s1 + $0xa8] sm:$0xf]  ;;  %v11356_v61 = vld [vmem:[%s17602_s1 + $0xac] sm:$0xf]  ;;  %v8975_v63 = vld [vmem:[%s17602_s1 + $0xb8] sm:$0xf0] }
  0x31   : > { %v8974_v62 = vor.u32 %v11358_v60, %v8973_v59  ;;  %v8965_v0 = vld [vmem:[%s17602_s1 + $0xa0] sm:$0xf]  ;;  %v11357_v1 = vld [vmem:[%s17602_s1 + $0xac] sm:$0xf0]  ;;  %v8978_v2 = vor.u32 %v11356_v61, %v8975_v63  ;;  %v11355_v4 = vld [vmem:[%s17602_s1 + $0xa4] sm:$0xf] }
  0x32   : > { %670 = vmatpush.bf16.msra.mxu0 %v8694_v30  ;;  %v8966_v3 = vor.u32 %v11357_v1, %v8965_v0  ;;  %v8967_v5 = vld [vmem:[%s17602_s1 + $0xb0] sm:$0xf0]  ;;  %v11370_v7 = vld [vmem:[%s12324_s29 + $0x98] sm:$0xff]  ;;  %v11371_v8 = vld [vmem:[%s12324_s29 + $0xa0] sm:$0xff]  ;;  %s12031_s23 = smov 32   ;;  %s12032_s19 = smov 16  }
  0x33   : > { %759 = vmatpush.bf16.msra.mxu1 %v8698_v33  ;;  %848 = vmatpush.bf16.msra.mxu2 %v8702_v34  ;;  %v8970_v6 = vor.u32 %v11355_v4, %v8967_v5  ;;  %v8957_v9 = vld [vmem:[%s17602_s1 + $0x88] sm:$0xf]  ;;  %v11354_v10 = vld [vmem:[%s17602_s1 + $0x94] sm:$0xf0]  ;;  %v11352_v11 = vld [vmem:[%s17602_s1 + $0x8c] sm:$0xf] }
  0x34   : > { %937 = vmatpush.bf16.msra.mxu3 %v8706_v35  ;;  %v8958_v12 = vor.u32 %v11354_v10, %v8957_v9  ;;  %v8959_v13 = vld [vmem:[%s17602_s1 + $0x98] sm:$0xf0]  ;;  %v8949_v14 = vld [vmem:[%s17602_s1 + $0x80] sm:$0xf]  ;;  %v11353_v15 = vld [vmem:[%s17602_s1 + $0x8c] sm:$0xf0] }
  0x35   : > { %671 = vmatmul.bf16.vlgmr.msra.gmra.mxu0 %v11367_v39  ;;  %v8962_v16 = vor.u32 %v11352_v11, %v8959_v13  ;;  %v8950_v17 = vor.u32 %v11353_v15, %v8949_v14  ;;  %v11351_v18 = vld [vmem:[%s17602_s1 + $0x84] sm:$0xf]  ;;  %v8951_v19 = vld [vmem:[%s17602_s1 + $0x90] sm:$0xf0]  ;;  %v11372_v21 = vld [vmem:[%s12324_s29 + $0xa8] sm:$0xff]  ;;  %s269_s8 = sand.u32 1, %s12015_s25  }
  0x36   : > { %760 = vmatmul.bf16.vlgmr.msra.gmra.mxu1 %v11367_v39  ;;  %849 = vmatmul.bf16.vlgmr.msra.gmra.mxu2 %v11367_v39  ;;  %v8954_v20 = vor.u32 %v11351_v18, %v8951_v19  ;;  %v11373_v22 = vld [vmem:[%s12324_s29 + $0xb0] sm:$0xff]  ;;  %v8941_v23 = vld [vmem:[%s17602_s1 + $0x68] sm:$0xf]  ;;  %v11350_v24 = vld [vmem:[%s17602_s1 + $0x74] sm:$0xf0]  ;;  %s8561_s9 = sshll.u32 %s269_s8, 3 }
  0x37   : > { %1453 = vmatpush.bf16.msrb.mxu2 %v9006_v36  ;;  %938 = vmatmul.bf16.vlgmr.msra.gmra.mxu3 %v11367_v39  ;;  %v11348_v25 = vld [vmem:[%s17602_s1 + $0x6c] sm:$0xf]  ;;  %v8942_v26 = vor.u32 %v11350_v24, %v8941_v23  ;;  %v8943_v27 = vld [vmem:[%s17602_s1 + $0x78] sm:$0xf0]  ;;  %v8933_v29 = vld [vmem:[%s17602_s1 + $0x60] sm:$0xf] }
  0x38   : > { %1542 = vmatpush.bf16.msrb.mxu3 %v9010_v40  ;;  %1275 = vmatpush.bf16.msrb.mxu0 %v8998_v43  ;;  %v8946_v28 = vor.u32 %v11348_v25, %v8943_v27  ;;  %v11349_v30 = vld [vmem:[%s17602_s1 + $0x6c] sm:$0xf0]  ;;  %v11347_v31 = vld [vmem:[%s17602_s1 + $0x64] sm:$0xf]  ;;  %v8935_v33 = vld [vmem:[%s17602_s1 + $0x70] sm:$0xf0] }
  0x39   : > { %1364 = vmatpush.bf16.msrb.mxu1 %v9002_v44  ;;  %v8934_v32 = vor.u32 %v11349_v30, %v8933_v29  ;;  %v8938_v34 = vor.u32 %v11347_v31, %v8935_v33  ;;  %v11374_v35 = vld [vmem:[%s12324_s29 + $0xb8] sm:$0xff]  ;;  %v11375_v36 = vld [vmem:[%s12324_s29 + $0xc0] sm:$0xff]  ;;  %v8925_v39 = vld [vmem:[%s17602_s1 + $0x48] sm:$0xf]  ;;  %s11316_s13 = sshll.u32 %s12094_s28, 3  ;;  %s8483_s28 = scalar_lea.sflag [#allocation3], %s269_s8 }
  0x3a   : > { %v11346_v40 = vld [vmem:[%s17602_s1 + $0x54] sm:$0xf0]  ;;  %v11344_v41 = vld [vmem:[%s17602_s1 + $0x4c] sm:$0xf]  ;;  %v8927_v43 = vld [vmem:[%s17602_s1 + $0x58] sm:$0xf0]  ;;  %s8493_s16 = scalar_lea.hbm %s17608_s7, %s11316_s13 }
  0x3b   : > { %1454 = vmatpush.bf16.msrb.mxu2 %v8990_v48  ;;  %v8926_v42 = vor.u32 %v11346_v40, %v8925_v39  ;;  %v8930_v45 = vor.u32 %v11344_v41, %v8927_v43  ;;  %v8917_v48 = vld [vmem:[%s17602_s1 + $0x40] sm:$0xf]  ;;  %v11345_v49 = vld [vmem:[%s17602_s1 + $0x4c] sm:$0xf0]  ;;  %v11343_v50 = vld [vmem:[%s17602_s1 + $0x44] sm:$0xf] }
  0x3c   : > { %1543 = vmatpush.bf16.msrb.mxu3 %v8994_v52  ;;  %1276 = vmatpush.bf16.msrb.mxu0 %v8982_v53  ;;  %v8918_v52 = vor.u32 %v11345_v49, %v8917_v48  ;;  %v8919_v53 = vld [vmem:[%s17602_s1 + $0x50] sm:$0xf0]  ;;  %v8909_v5 = vld [vmem:[%s17602_s1 + $0x28] sm:$0xf]  ;;  %v8911_v9 = vld [vmem:[%s17602_s1 + $0x38] sm:$0xf0] }
  0x3d   : > { %1365 = vmatpush.bf16.msrb.mxu1 %v8986_v56  ;;  %v8922_v54 = vor.u32 %v11343_v50, %v8919_v53  ;;  %v11376_v56 = vld [vmem:[%s12324_s29 + $0xc8] sm:$0xff]  ;;  %v11377_v1 = vld [vmem:[%s12324_s29 + $0xd0] sm:$0xff]  ;;  %v8901_v14 = vld [vmem:[%s17602_s1 + $0x20] sm:$0xf] }
  0x3e   : > { %v11341_v15 = vld [vmem:[%s17602_s1 + $0x2c] sm:$0xf0]  ;;  %v8903_v19 = vld [vmem:[%s17602_s1 + $0x30] sm:$0xf0]  ;;  %v11379_v31 = vld [vmem:[%s12324_s29 + $0xe0] sm:$0xff] }
  0x3f   : > { %1455 = vmatpush.bf16.msrb.mxu2 %v8974_v62  ;;  %v8902_v18 = vor.u32 %v11341_v15, %v8901_v14  ;;  %v11336_v39 = vld [vmem:[%s17602_s1 + $0xc] sm:$0xf]  ;;  %v8895_v41 = vld [vmem:[%s17602_s1 + $0x18] sm:$0xf0]  ;;  %v8885_v49 = vld [vmem:[%s17602_s1] sm:$0xf] }
  0x40   : > { %1544 = vmatpush.bf16.msrb.mxu3 %v8978_v2  ;;  %1277 = vmatpush.bf16.msrb.mxu0 %v8966_v3  ;;  %v8898_v43 = vor.u32 %v11336_v39, %v8895_v41  ;;  %v11337_v50 = vld [vmem:[%s17602_s1 + $0xc] sm:$0xf0]  ;;  %v11460_v39 = vld [vmem:[%s17602_s1 + $0x2ec] sm:$0xf]  ;;  %v9263_v41 = vld [vmem:[%s17602_s1 + $0x2f8] sm:$0xf0] }
  0x41   : > { %1366 = vmatpush.bf16.msrb.mxu1 %v8970_v6  ;;  %v11342_v6 = vld [vmem:[%s17602_s1 + $0x34] sm:$0xf0] }
  0x43   : > { %1456 = vmatpush.bf16.msrb.mxu2 %v8958_v12 }
  0x44   : > { %1545 = vmatpush.bf16.msrb.mxu3 %v8962_v16  ;;  %1278 = vmatpush.bf16.msrb.mxu0 %v8950_v17  ;;  %v11339_v16 = vld [vmem:[%s17602_s1 + $0x24] sm:$0xf] }
  0x45   : > { %676 = vmatmul.bf16.gmra.mxu0 %v11368_v57  ;;  %1367 = vmatpush.bf16.msrb.mxu1 %v8954_v20  ;;  %v8906_v20 = vor.u32 %v11339_v16, %v8903_v19  ;;  %v11381_v19 = vld [vmem:[%s12324_s29 + $0xf0] sm:$0xff] }
  0x46   : > { %765 = vmatmul.bf16.gmra.mxu1 %v11368_v57  ;;  %854 = vmatmul.bf16.gmra.mxu2 %v11368_v57 }
  0x47   : > { %943 = vmatmul.bf16.gmra.mxu3 %v11368_v57  ;;  %1457 = vmatpush.bf16.msrb.mxu2 %v8942_v26 }
  0x48   : > { %1546 = vmatpush.bf16.msrb.mxu3 %v8946_v28  ;;  %1279 = vmatpush.bf16.msrb.mxu0 %v8934_v32 }
  0x49   : > { %1368 = vmatpush.bf16.msrb.mxu1 %v8938_v34 }
  0x4b   : > { %1458 = vmatpush.bf16.msrb.mxu2 %v8926_v42 }
  0x4c   : > { %1547 = vmatpush.bf16.msrb.mxu3 %v8930_v45  ;;  %1280 = vmatpush.bf16.msrb.mxu0 %v8918_v52  ;;  %v11335_v52 = vld [vmem:[%s17602_s1 + $0x4] sm:$0xf] }
  0x4d   : > { %1369 = vmatpush.bf16.msrb.mxu1 %v8922_v54  ;;  %v8886_v54 = vor.u32 %v11337_v50, %v8885_v49  ;;  %v9266_v49 = vor.u32 %v11460_v39, %v9263_v41 }
  0x50   : > { %1281 = vmatpush.bf16.msrb.mxu0 %v8902_v18 }
  0x51   : > { %1370 = vmatpush.bf16.msrb.mxu1 %v8906_v20 }
  0x54   : > { %1282 = vmatpush.bf16.msrb.mxu0 %v8886_v54  ;;  %v9253_v54 = vld [vmem:[%s17602_s1 + $0x2e0] sm:$0xf] }
  0x55   : > { %681 = vmatmul.bf16.gmra.mxu0 %v11369_v58 }
  0x56   : > { %770 = vmatmul.bf16.gmra.mxu1 %v11369_v58  ;;  %859 = vmatmul.bf16.gmra.mxu2 %v11369_v58 }
  0x57   : > { %948 = vmatmul.bf16.gmra.mxu3 %v11369_v58 }
  0x65   : > { %686 = vmatmul.bf16.gmra.mxu0 %v11370_v7 }
  0x66   : > { %775 = vmatmul.bf16.gmra.mxu1 %v11370_v7  ;;  %864 = vmatmul.bf16.gmra.mxu2 %v11370_v7 }
  0x67   : > { %953 = vmatmul.bf16.gmra.mxu3 %v11370_v7  ;;  %v11340_v7 = vld [vmem:[%s17602_s1 + $0x2c] sm:$0xf] }
  0x68   : > { %v8914_v11 = vor.u32 %v11340_v7, %v8911_v9 }
  0x6a   : > { %1548 = vmatpush.bf16.msrb.mxu3 %v8914_v11 }
  0x6e   : > { %1549 = vmatpush.bf16.msrb.mxu3 %v8898_v43 }
  0x72   : > { %2220 = vmatpush.bf16.msra.mxu3 %v9266_v49 }
  0x75   : > { %691 = vmatmul.bf16.gmra.mxu0 %v11371_v8 }
  0x76   : > { %780 = vmatmul.bf16.gmra.mxu1 %v11371_v8  ;;  %869 = vmatmul.bf16.gmra.mxu2 %v11371_v8 }
  0x77   : > { %958 = vmatmul.bf16.gmra.mxu3 %v11371_v8  ;;  %v8910_v8 = vor.u32 %v11342_v6, %v8909_v5  ;;  %v11380_v6 = vld [vmem:[%s12324_s29 + $0xe8] sm:$0xff] }
  0x79   : > { %1459 = vmatpush.bf16.msrb.mxu2 %v8910_v8 }
  0x85   : > { %696 = vmatmul.bf16.gmra.mxu0 %v11372_v21 }
  0x86   : > { %785 = vmatmul.bf16.gmra.mxu1 %v11372_v21  ;;  %874 = vmatmul.bf16.gmra.mxu2 %v11372_v21 }
  0x87   : > { %963 = vmatmul.bf16.gmra.mxu3 %v11372_v21 }
  0x95   : > { %701 = vmatmul.bf16.gmra.mxu0 %v11373_v22 }
  0x96   : > { %790 = vmatmul.bf16.gmra.mxu1 %v11373_v22  ;;  %879 = vmatmul.bf16.gmra.mxu2 %v11373_v22 }
  0x97   : > { %968 = vmatmul.bf16.gmra.mxu3 %v11373_v22  ;;  %v11378_v22 = vld [vmem:[%s12324_s29 + $0xd8] sm:$0xff] }
  0xa5   : > { %706 = vmatmul.bf16.gmra.mxu0 %v11374_v35 }
  0xa6   : > { %795 = vmatmul.bf16.gmra.mxu1 %v11374_v35  ;;  %884 = vmatmul.bf16.gmra.mxu2 %v11374_v35 }
  0xa7   : > { %973 = vmatmul.bf16.gmra.mxu3 %v11374_v35  ;;  %v8893_v35 = vld [vmem:[%s17602_s1 + $0x8] sm:$0xf] }
  0xb2   : > { %v12449_v37 = vpop.f32.mrf.mxu0 }
  0xb3   : > { %v12451_v38 = vpop.f32.mrf.mxu1 }
  0xb5   : > { %711 = vmatmul.bf16.gmra.mxu0 %v11375_v36 }
  0xb6   : > { %800 = vmatmul.bf16.gmra.mxu1 %v11375_v36  ;;  %889 = vmatmul.bf16.gmra.mxu2 %v11375_v36 }
  0xb7   : > { %978 = vmatmul.bf16.gmra.mxu3 %v11375_v36  ;;  %v11338_v36 = vld [vmem:[%s17602_s1 + $0x14] sm:$0xf0] }
  0xb8   : > { %v8894_v40 = vor.u32 %v11338_v36, %v8893_v35  ;;  %v9261_v35 = vld [vmem:[%s17602_s1 + $0x2e8] sm:$0xf]  ;;  %v11462_v36 = vld [vmem:[%s17602_s1 + $0x2f4] sm:$0xf0] }
  0xb9   : > { %v12465_v44 = vpop.f32.mrf.mxu2 }
  0xba   : > { %v12467_v46 = vpop.f32.mrf.mxu3  ;;  %v12469_v47 = vpop.f32.mrf.mxu0  ;;  %1460 = vmatpush.bf16.msrb.mxu2 %v8894_v40  ;;  %v9262_v40 = vor.u32 %v11462_v36, %v9261_v35  ;;  %v9255_v35 = vld [vmem:[%s17602_s1 + $0x2f0] sm:$0xf0] }
  0xbb   : > { %v12480_v51 = vpop.f32.mrf.mxu1 }
  0xbe   : > { %2131 = vmatpush.bf16.msra.mxu2 %v9262_v40  ;;  %v11382_v40 = vld [vmem:[%s12324_s29 + $0xf8] sm:$0xff] }
  0xc1   : > { %v12485_v55 = vpop.f32.mrf.mxu2 }
  0xc2   : > { %v12488_v57 = vpop.f32.mrf.mxu3  ;;  %v12490_v58 = vpop.f32.mrf.mxu0 }
  0xc3   : > { %v12492_v59 = vpop.f32.mrf.mxu1 }
  0xc5   : > { %716 = vmatmul.bf16.gmra.mxu0 %v11376_v56 }
  0xc6   : > { %805 = vmatmul.bf16.gmra.mxu1 %v11376_v56  ;;  %894 = vmatmul.bf16.gmra.mxu2 %v11376_v56 }
  0xc7   : > { %983 = vmatmul.bf16.gmra.mxu3 %v11376_v56  ;;  %v8887_v56 = vld [vmem:[%s17602_s1 + $0x10] sm:$0xf0] }
  0xc9   : > { %v12494_v60 = vpop.f32.mrf.mxu2 }
  0xca   : > { %v12496_v61 = vpop.f32.mrf.mxu3  ;;  %v12498_v62 = vpop.f32.mrf.mxu0 }
  0xcb   : > { %v12500_v63 = vpop.f32.mrf.mxu1 }
  0xd1   : > { %v12502_v0 = vpop.f32.mrf.mxu2 }
  0xd2   : > { %v12505_v2 = vpop.f32.mrf.mxu3  ;;  %v12507_v3 = vpop.f32.mrf.mxu0 }
  0xd3   : > { %v12509_v4 = vpop.f32.mrf.mxu1 }
  0xd5   : > { %721 = vmatmul.bf16.gmra.mxu0 %v11377_v1 }
  0xd6   : > { %810 = vmatmul.bf16.gmra.mxu1 %v11377_v1  ;;  %899 = vmatmul.bf16.gmra.mxu2 %v11377_v1 }
  0xd7   : > { %988 = vmatmul.bf16.gmra.mxu3 %v11377_v1  ;;  %v8890_v1 = vor.u32 %v11335_v52, %v8887_v56  ;;  %v11461_v56 = vld [vmem:[%s17602_s1 + $0x2ec] sm:$0xf0] }
  0xd9   : > { %v12523_v10 = vpop.f32.mrf.mxu2  ;;  %1371 = vmatpush.bf16.msrb.mxu1 %v8890_v1  ;;  %v11459_v1 = vld [vmem:[%s17602_s1 + $0x2e4] sm:$0xf] }
  0xda   : > { %v12525_v12 = vpop.f32.mrf.mxu3  ;;  %v12527_v13 = vpop.f32.mrf.mxu0  ;;  %v9258_v36 = vor.u32 %v11459_v1, %v9255_v35  ;;  %v11319_v35 = vld [vmem:[%s12324_s29] sm:$0xff] }
  0xdb   : > { %v12538_v17 = vpop.f32.mrf.mxu1 }
  0xdd   : > { %2042 = vmatpush.bf16.msra.mxu1 %v9258_v36 }
  0xe1   : > { %v12543_v21 = vpop.f32.mrf.mxu2 }
  0xe2   : > { %v12546_v23 = vpop.f32.mrf.mxu3  ;;  %v12548_v24 = vpop.f32.mrf.mxu0 }
  0xe3   : > { %v12550_v25 = vpop.f32.mrf.mxu1 }
  0xe4   : > { %17682 = vst [vmem:[#allocation5_spill] sm:$0xff] %v12550_v25 }
  0xe5   : > { %726 = vmatmul.bf16.gmra.mxu0 %v11378_v22 }
  0xe6   : > { %815 = vmatmul.bf16.gmra.mxu1 %v11378_v22  ;;  %904 = vmatmul.bf16.gmra.mxu2 %v11378_v22 }
  0xe7   : > { %993 = vmatmul.bf16.gmra.mxu3 %v11378_v22 }
  0xe9   : > { %v12552_v26 = vpop.f32.mrf.mxu2 }
  0xea   : > { %17683 = vst [vmem:[#allocation6_spill] sm:$0xff] %v12552_v26  ;;  %v12554_v27 = vpop.f32.mrf.mxu3  ;;  %v12556_v28 = vpop.f32.mrf.mxu0 }
  0xeb   : > { %17684 = vst [vmem:[#allocation7_spill] sm:$0xff] %v12554_v27  ;;  %v12558_v29 = vpop.f32.mrf.mxu1 }
  0xec   : > { %17685 = vst [vmem:[#allocation8_spill] sm:$0xff] %v12556_v28 }
  0xed   : > { %17686 = vst [vmem:[#allocation9_spill] sm:$0xff] %v12558_v29 }
  0xf1   : > { %v12560_v30 = vpop.f32.mrf.mxu2 }
  0xf2   : > { %17687 = vst [vmem:[#allocation10_spill] sm:$0xff] %v12560_v30  ;;  %v12563_v32 = vpop.f32.mrf.mxu3  ;;  %v12565_v33 = vpop.f32.mrf.mxu0 }
  0xf3   : > { %17688 = vst [vmem:[#allocation11_spill] sm:$0xff] %v12563_v32  ;;  %v12567_v34 = vpop.f32.mrf.mxu1 }
  0xf4   : > { %17689 = vst [vmem:[#allocation12_spill] sm:$0xff] %v12565_v33 }
  0xf5   : > { %17690 = vst [vmem:[#allocation13_spill] sm:$0xff] %v12567_v34  ;;  %731 = vmatmul.bf16.gmra.mxu0 %v11379_v31 }
  0xf6   : > { %820 = vmatmul.bf16.gmra.mxu1 %v11379_v31  ;;  %909 = vmatmul.bf16.gmra.mxu2 %v11379_v31 }
  0xf7   : > { %998 = vmatmul.bf16.gmra.mxu3 %v11379_v31 }
  0xf9   : > { %v12581_v42 = vpop.f32.mrf.mxu2 }
  0xfa   : > { %17691 = vst [vmem:[#allocation14_spill] sm:$0xff] %v12581_v42  ;;  %v12583_v45 = vpop.f32.mrf.mxu3  ;;  %v12585_v48 = vpop.f32.mrf.mxu0  ;;  %v11330_v42 = vld [vmem:[%s12324_s29 + $0x58] sm:$0xff] }
  0xfb   : > { %17692 = vst [vmem:[#allocation15_spill] sm:$0xff] %v12583_v45  ;;  %v12596_v53 = vpop.f32.mrf.mxu1 }
  0xfc   : > { %17693 = vst [vmem:[#allocation16_spill] sm:$0xff] %v12585_v48 }
  0xfd   : > { %17694 = vst [vmem:[#allocation17_spill] sm:$0xff] %v12596_v53 }
 0x101   : > { %v12601_v5 = vpop.f32.mrf.mxu2 }
 0x102   : > { %17695 = vst [vmem:[#allocation18_spill] sm:$0xff] %v12601_v5  ;;  %v12604_v7 = vpop.f32.mrf.mxu3  ;;  %v12606_v8 = vpop.f32.mrf.mxu0 }
 0x103   : > { %17696 = vst [vmem:[#allocation19_spill] sm:$0xff] %v12604_v7  ;;  %v12608_v9 = vpop.f32.mrf.mxu1 }
 0x104   : > { %17697 = vst [vmem:[#allocation20_spill] sm:$0xff] %v12606_v8  ;;  %v9167_v8 = vld [vmem:[%s17602_s1 + $0x238] sm:$0xf0] }
 0x105   : > { %17698 = vst [vmem:[#allocation21_spill] sm:$0xff] %v12608_v9  ;;  %736 = vmatmul.bf16.gmra.mxu0 %v11380_v6 }
 0x106   : > { %825 = vmatmul.bf16.gmra.mxu1 %v11380_v6  ;;  %914 = vmatmul.bf16.gmra.mxu2 %v11380_v6 }
 0x107   : > { %1003 = vmatmul.bf16.gmra.mxu3 %v11380_v6 }
 0x109   : > { %v12610_v11 = vpop.f32.mrf.mxu2 }
 0x10a   : > { %17699 = vst [vmem:[#allocation22_spill] sm:$0xff] %v12610_v11  ;;  %v12612_v14 = vpop.f32.mrf.mxu3  ;;  %v12614_v15 = vpop.f32.mrf.mxu0  ;;  %v11436_v11 = vld [vmem:[%s17602_s1 + $0x22c] sm:$0xf] }
 0x10b   : > { %17700 = vst [vmem:[#allocation23_spill] sm:$0xff] %v12612_v14  ;;  %v12616_v16 = vpop.f32.mrf.mxu1  ;;  %v11438_v14 = vld [vmem:[%s17602_s1 + $0x234] sm:$0xf0] }
 0x10c   : > { %17701 = vst [vmem:[#allocation24_spill] sm:$0xff] %v12614_v15 }
 0x10d   : > { %17702 = vst [vmem:[#allocation25_spill] sm:$0xff] %v12616_v16 }
 0x111   : > { %v12618_v18 = vpop.f32.mrf.mxu2 }
 0x112   : > { %17703 = vst [vmem:[#allocation26_spill] sm:$0xff] %v12618_v18  ;;  %v12621_v20 = vpop.f32.mrf.mxu3  ;;  %v12623_v22 = vpop.f32.mrf.mxu0 }
 0x113   : > { %17704 = vst [vmem:[#allocation27_spill] sm:$0xff] %v12621_v20  ;;  %v12625_v31 = vpop.f32.mrf.mxu1 }
 0x114   : > { %17705 = vst [vmem:[#allocation28_spill] sm:$0xff] %v12623_v22 }
 0x115   : > { %17706 = vst [vmem:[#allocation29_spill] sm:$0xff] %v12625_v31  ;;  %741 = vmatmul.bf16.gmra.mxu0 %v11381_v19 }
 0x116   : > { %830 = vmatmul.bf16.gmra.mxu1 %v11381_v19  ;;  %919 = vmatmul.bf16.gmra.mxu2 %v11381_v19 }
 0x117   : > { %1008 = vmatmul.bf16.gmra.mxu3 %v11381_v19  ;;  %v9254_v19 = vor.u32 %v11461_v56, %v9253_v54 }
 0x119   : > { %v12639_v43 = vpop.f32.mrf.mxu2  ;;  %1953 = vmatpush.bf16.msra.mxu0 %v9254_v19 }
 0x11a   : > { %17707 = vst [vmem:[#allocation30_spill] sm:$0xff] %v12639_v43  ;;  %v12641_v50 = vpop.f32.mrf.mxu3  ;;  %v12643_v52 = vpop.f32.mrf.mxu0  ;;  %v11328_v43 = vld [vmem:[%s12324_s29 + $0x48] sm:$0xff] }
 0x11b   : > { %17708 = vst [vmem:[#allocation31_spill] sm:$0xff] %v12641_v50  ;;  %v12654_v6 = vpop.f32.mrf.mxu1 }
 0x11c   : > { %17709 = vst [vmem:[#allocation32_spill] sm:$0xff] %v12643_v52 }
 0x11d   : > { %17710 = vst [vmem:[#allocation33_spill] sm:$0xff] %v12654_v6 }
 0x121   : > { %v12659_v39 = vpop.f32.mrf.mxu2 }
 0x122   : > { %17711 = vst [vmem:[#allocation34_spill] sm:$0xff] %v12659_v39  ;;  %v12662_v41 = vpop.f32.mrf.mxu3  ;;  %v12664_v52 = vpop.f32.mrf.mxu0 }
 0x123   : > { %17712 = vst [vmem:[#allocation35_spill] sm:$0xff] %v12662_v41  ;;  %v12666_v50 = vpop.f32.mrf.mxu1 }
 0x124   : > { %17713 = vst [vmem:[#allocation36_spill] sm:$0xff] %v12664_v52 }
 0x125   : > { %17714 = vst [vmem:[#allocation37_spill] sm:$0xff] %v12666_v50  ;;  %746 = vmatmul.bf16.gmra.mxu0 %v11382_v40 }
 0x126   : > { %835 = vmatmul.bf16.gmra.mxu1 %v11382_v40  ;;  %924 = vmatmul.bf16.gmra.mxu2 %v11382_v40 }
 0x127   : > { %1013 = vmatmul.bf16.gmra.mxu3 %v11382_v40  ;;  %v9245_v40 = vld [vmem:[%s17602_s1 + $0x2c8] sm:$0xf] }
 0x129   : > { %v12668_v49 = vpop.f32.mrf.mxu2 }
 0x12a   : > { %17715 = vst [vmem:[#allocation38_spill] sm:$0xff] %v12668_v49  ;;  %v12670_v54 = vpop.f32.mrf.mxu3  ;;  %v12672_v56 = vpop.f32.mrf.mxu0  ;;  %v9237_v49 = vld [vmem:[%s17602_s1 + $0x2c0] sm:$0xf] }
 0x12b   : > { %17716 = vst [vmem:[#allocation39_spill] sm:$0xff] %v12670_v54  ;;  %v12674_v1 = vpop.f32.mrf.mxu1 }
 0x12c   : > { %17717 = vst [vmem:[#allocation40_spill] sm:$0xff] %v12672_v56 }
 0x12d   : > { %17718 = vst [vmem:[#allocation41_spill] sm:$0xff] %v12674_v1  ;;  %v11458_v1 = vld [vmem:[%s17602_s1 + $0x2d4] sm:$0xf0] }
 0x131   : > { %v12676_v19 = vpop.f32.mrf.mxu2 }
 0x132   : > { %17719 = vst [vmem:[#allocation42_spill] sm:$0xff] %v12676_v19  ;;  %v12679_v36 = vpop.f32.mrf.mxu3  ;;  %v12681_v52 = vpop.f32.mrf.mxu0  ;;  %v9246_v19 = vor.u32 %v11458_v1, %v9245_v40  ;;  %v11457_v1 = vld [vmem:[%s17602_s1 + $0x2cc] sm:$0xf0]  ;;  %v11455_v40 = vld [vmem:[%s17602_s1 + $0x2c4] sm:$0xf] }
 0x133   : > { %17720 = vst [vmem:[#allocation43_spill] sm:$0xff] %v12679_v36  ;;  %v12683_v50 = vpop.f32.mrf.mxu1  ;;  %v11456_v36 = vld [vmem:[%s17602_s1 + $0x2cc] sm:$0xf] }
 0x134   : > { %17721 = vst [vmem:[#allocation44_spill] sm:$0xff] %v12681_v52  ;;  %2132 = vmatpush.bf16.msra.mxu2 %v9246_v19  ;;  %v9239_v19 = vld [vmem:[%s17602_s1 + $0x2d0] sm:$0xf0] }
 0x135   : > { %17722 = vst [vmem:[#allocation45_spill] sm:$0xff] %v12683_v50  ;;  %1283 = vmatmul.bf16.vlgmr.msrb.gmra.mxu0 %v11319_v35  ;;  %v9247_v50 = vld [vmem:[%s17602_s1 + $0x2d8] sm:$0xf0] }
 0x136   : > { %1372 = vmatmul.bf16.vlgmr.msrb.gmra.mxu1 %v11319_v35  ;;  %1461 = vmatmul.bf16.vlgmr.msrb.gmra.mxu2 %v11319_v35 }
 0x137   : > { %1550 = vmatmul.bf16.vlgmr.msrb.gmra.mxu3 %v11319_v35  ;;  %v9250_v35 = vor.u32 %v11456_v36, %v9247_v50  ;;  %v9238_v50 = vor.u32 %v11457_v1, %v9237_v49  ;;  %v9242_v36 = vor.u32 %v11455_v40, %v9239_v19  ;;  %v11321_v19 = vld [vmem:[%s12324_s29 + $0x10] sm:$0xff] }
 0x139   : > { %v12697_v52 = vpop.f32.mrf.mxu2  ;;  %2221 = vmatpush.bf16.msra.mxu3 %v9250_v35  ;;  %1954 = vmatpush.bf16.msra.mxu0 %v9238_v50 }
 0x13a   : > { %17723 = vst [vmem:[#allocation46_spill] sm:$0xff] %v12697_v52  ;;  %v12699_v56 = vpop.f32.mrf.mxu3  ;;  %v12701_v54 = vpop.f32.mrf.mxu0  ;;  %2043 = vmatpush.bf16.msra.mxu1 %v9242_v36 }
 0x13b   : > { %17724 = vst [vmem:[#allocation47_spill] sm:$0xff] %v12699_v56  ;;  %v12712_v52 = vpop.f32.mrf.mxu1  ;;  %v11320_v56 = vld [vmem:[%s12324_s29 + $0x8] sm:$0xff] }
 0x13c   : > { %17725 = vst [vmem:[#allocation48_spill] sm:$0xff] %v12701_v54 }
 0x13d   : > { %17726 = vst [vmem:[#allocation49_spill] sm:$0xff] %v12712_v52 }
 0x141   : > { %v12717_v54 = vpop.f32.mrf.mxu2 }
 0x142   : > { %17727 = vst [vmem:[#allocation50_spill] sm:$0xff] %v12717_v54  ;;  %v12720_v41 = vpop.f32.mrf.mxu3  ;;  %v12722_v39 = vpop.f32.mrf.mxu0 }
 0x143   : > { %17728 = vst [vmem:[#allocation51_spill] sm:$0xff] %v12720_v41  ;;  %v12724_v6 = vpop.f32.mrf.mxu1 }
 0x144   : > { %17729 = vst [vmem:[#allocation52_spill] sm:$0xff] %v12722_v39 }
 0x145   : > { %17730 = vst [vmem:[#allocation53_spill] sm:$0xff] %v12724_v6  ;;  %1288 = vmatmul.bf16.gmra.mxu0 %v11320_v56 }
 0x146   : > { %1377 = vmatmul.bf16.gmra.mxu1 %v11320_v56  ;;  %1466 = vmatmul.bf16.gmra.mxu2 %v11320_v56 }
 0x147   : > { %1555 = vmatmul.bf16.gmra.mxu3 %v11320_v56  ;;  %v9229_v56 = vld [vmem:[%s17602_s1 + $0x2a8] sm:$0xf] }
 0x149   : > { %v12726_v49 = vpop.f32.mrf.mxu2 }
 0x14a   : > { %17731 = vst [vmem:[#allocation54_spill] sm:$0xff] %v12726_v49  ;;  %v12728_v35 = vpop.f32.mrf.mxu3  ;;  %v12730_v1 = vpop.f32.mrf.mxu0  ;;  %v9221_v49 = vld [vmem:[%s17602_s1 + $0x2a0] sm:$0xf] }
 0x14b   : > { %17732 = vst [vmem:[#allocation55_spill] sm:$0xff] %v12728_v35  ;;  %v12732_v40 = vpop.f32.mrf.mxu1 }
 0x14c   : > { %17733 = vst [vmem:[#allocation56_spill] sm:$0xff] %v12730_v1 }
 0x14d   : > { %17734 = vst [vmem:[#allocation57_spill] sm:$0xff] %v12732_v40  ;;  %v11454_v40 = vld [vmem:[%s17602_s1 + $0x2b4] sm:$0xf0] }
 0x151   : > { %v12734_v50 = vpop.f32.mrf.mxu2 }
 0x152   : > { %17735 = vst [vmem:[#allocation58_spill] sm:$0xff] %v12734_v50  ;;  %v12737_v36 = vpop.f32.mrf.mxu3  ;;  %v12739_v39 = vpop.f32.mrf.mxu0  ;;  %v9230_v50 = vor.u32 %v11454_v40, %v9229_v56  ;;  %v11453_v40 = vld [vmem:[%s17602_s1 + $0x2ac] sm:$0xf0]  ;;  %v11451_v56 = vld [vmem:[%s17602_s1 + $0x2a4] sm:$0xf] }
 0x153   : > { %17736 = vst [vmem:[#allocation59_spill] sm:$0xff] %v12737_v36  ;;  %v12741_v6 = vpop.f32.mrf.mxu1  ;;  %v11452_v36 = vld [vmem:[%s17602_s1 + $0x2ac] sm:$0xf] }
 0x154   : > { %17737 = vst [vmem:[#allocation60_spill] sm:$0xff] %v12739_v39  ;;  %2133 = vmatpush.bf16.msra.mxu2 %v9230_v50  ;;  %v9223_v50 = vld [vmem:[%s17602_s1 + $0x2b0] sm:$0xf0] }
 0x155   : > { %17738 = vst [vmem:[#allocation61_spill] sm:$0xff] %v12741_v6  ;;  %1293 = vmatmul.bf16.gmra.mxu0 %v11321_v19  ;;  %v9231_v6 = vld [vmem:[%s17602_s1 + $0x2b8] sm:$0xf0] }
 0x156   : > { %1382 = vmatmul.bf16.gmra.mxu1 %v11321_v19  ;;  %1471 = vmatmul.bf16.gmra.mxu2 %v11321_v19 }
 0x157   : > { %1560 = vmatmul.bf16.gmra.mxu3 %v11321_v19  ;;  %v9234_v19 = vor.u32 %v11452_v36, %v9231_v6  ;;  %v9222_v6 = vor.u32 %v11453_v40, %v9221_v49  ;;  %v9226_v36 = vor.u32 %v11451_v56, %v9223_v50  ;;  %v11323_v50 = vld [vmem:[%s12324_s29 + $0x20] sm:$0xff] }
 0x159   : > { %v12755_v39 = vpop.f32.mrf.mxu2  ;;  %2222 = vmatpush.bf16.msra.mxu3 %v9234_v19  ;;  %1955 = vmatpush.bf16.msra.mxu0 %v9222_v6 }
 0x15a   : > { %17739 = vst [vmem:[#allocation62_spill] sm:$0xff] %v12755_v39  ;;  %v12757_v1 = vpop.f32.mrf.mxu3  ;;  %v12759_v35 = vpop.f32.mrf.mxu0  ;;  %2044 = vmatpush.bf16.msra.mxu1 %v9226_v36 }
 0x15b   : > { %17740 = vst [vmem:[#allocation63_spill] sm:$0xff] %v12757_v1  ;;  %v12770_v39 = vpop.f32.mrf.mxu1  ;;  %v11322_v1 = vld [vmem:[%s12324_s29 + $0x18] sm:$0xff] }
 0x15c   : > { %17741 = vst [vmem:[#allocation64_spill] sm:$0xff] %v12759_v35 }
 0x15d   : > { %17742 = vst [vmem:[#allocation65_spill] sm:$0xff] %v12770_v39 }
 0x161   : > { %v12775_v35 = vpop.f32.mrf.mxu2 }
 0x162   : > { %17743 = vst [vmem:[#allocation66_spill] sm:$0xff] %v12775_v35  ;;  %v12778_v41 = vpop.f32.mrf.mxu3  ;;  %v12780_v54 = vpop.f32.mrf.mxu0 }
 0x163   : > { %17744 = vst [vmem:[#allocation67_spill] sm:$0xff] %v12778_v41  ;;  %v12782_v52 = vpop.f32.mrf.mxu1 }
 0x164   : > { %17745 = vst [vmem:[#allocation68_spill] sm:$0xff] %v12780_v54 }
 0x165   : > { %17746 = vst [vmem:[#allocation69_spill] sm:$0xff] %v12782_v52  ;;  %1298 = vmatmul.bf16.gmra.mxu0 %v11322_v1 }
 0x166   : > { %1387 = vmatmul.bf16.gmra.mxu1 %v11322_v1  ;;  %1476 = vmatmul.bf16.gmra.mxu2 %v11322_v1 }
 0x167   : > { %1565 = vmatmul.bf16.gmra.mxu3 %v11322_v1  ;;  %v9213_v1 = vld [vmem:[%s17602_s1 + $0x288] sm:$0xf] }
 0x169   : > { %v12784_v49 = vpop.f32.mrf.mxu2 }
 0x16a   : > { %17747 = vst [vmem:[#allocation70_spill] sm:$0xff] %v12784_v49  ;;  %v12786_v19 = vpop.f32.mrf.mxu3  ;;  %v12788_v40 = vpop.f32.mrf.mxu0  ;;  %v9205_v49 = vld [vmem:[%s17602_s1 + $0x280] sm:$0xf] }
 0x16b   : > { %17748 = vst [vmem:[#allocation71_spill] sm:$0xff] %v12786_v19  ;;  %v12790_v56 = vpop.f32.mrf.mxu1 }
 0x16c   : > { %17749 = vst [vmem:[#allocation72_spill] sm:$0xff] %v12788_v40 }
 0x16d   : > { %17750 = vst [vmem:[#allocation73_spill] sm:$0xff] %v12790_v56  ;;  %v11450_v56 = vld [vmem:[%s17602_s1 + $0x294] sm:$0xf0] }
 0x171   : > { %v12792_v6 = vpop.f32.mrf.mxu2 }
 0x172   : > { %17751 = vst [vmem:[#allocation74_spill] sm:$0xff] %v12792_v6  ;;  %v12795_v36 = vpop.f32.mrf.mxu3  ;;  %v12797_v54 = vpop.f32.mrf.mxu0  ;;  %v9214_v6 = vor.u32 %v11450_v56, %v9213_v1  ;;  %v11449_v56 = vld [vmem:[%s17602_s1 + $0x28c] sm:$0xf0]  ;;  %v11447_v1 = vld [vmem:[%s17602_s1 + $0x284] sm:$0xf] }
 0x173   : > { %17752 = vst [vmem:[#allocation75_spill] sm:$0xff] %v12795_v36  ;;  %v12799_v52 = vpop.f32.mrf.mxu1  ;;  %v11448_v36 = vld [vmem:[%s17602_s1 + $0x28c] sm:$0xf] }
 0x174   : > { %17753 = vst [vmem:[#allocation76_spill] sm:$0xff] %v12797_v54  ;;  %2134 = vmatpush.bf16.msra.mxu2 %v9214_v6  ;;  %v9207_v6 = vld [vmem:[%s17602_s1 + $0x290] sm:$0xf0] }
 0x175   : > { %17754 = vst [vmem:[#allocation77_spill] sm:$0xff] %v12799_v52  ;;  %1303 = vmatmul.bf16.gmra.mxu0 %v11323_v50  ;;  %v9215_v52 = vld [vmem:[%s17602_s1 + $0x298] sm:$0xf0] }
 0x176   : > { %1392 = vmatmul.bf16.gmra.mxu1 %v11323_v50  ;;  %1481 = vmatmul.bf16.gmra.mxu2 %v11323_v50 }
 0x177   : > { %1570 = vmatmul.bf16.gmra.mxu3 %v11323_v50  ;;  %v9218_v50 = vor.u32 %v11448_v36, %v9215_v52  ;;  %v9206_v52 = vor.u32 %v11449_v56, %v9205_v49  ;;  %v9210_v36 = vor.u32 %v11447_v1, %v9207_v6  ;;  %v11325_v6 = vld [vmem:[%s12324_s29 + $0x30] sm:$0xff] }
 0x179   : > { %v12813_v54 = vpop.f32.mrf.mxu2  ;;  %2223 = vmatpush.bf16.msra.mxu3 %v9218_v50  ;;  %1956 = vmatpush.bf16.msra.mxu0 %v9206_v52 }
 0x17a   : > { %17755 = vst [vmem:[#allocation78_spill] sm:$0xff] %v12813_v54  ;;  %v12815_v40 = vpop.f32.mrf.mxu3  ;;  %v12817_v19 = vpop.f32.mrf.mxu0  ;;  %2045 = vmatpush.bf16.msra.mxu1 %v9210_v36 }
 0x17b   : > { %17756 = vst [vmem:[#allocation79_spill] sm:$0xff] %v12815_v40  ;;  %v12828_v54 = vpop.f32.mrf.mxu1  ;;  %v11324_v40 = vld [vmem:[%s12324_s29 + $0x28] sm:$0xff] }
 0x17c   : > { %17757 = vst [vmem:[#allocation80_spill] sm:$0xff] %v12817_v19 }
 0x17d   : > { %17758 = vst [vmem:[#allocation81_spill] sm:$0xff] %v12828_v54 }
 0x181   : > { %v12833_v19 = vpop.f32.mrf.mxu2 }
 0x182   : > { %17759 = vst [vmem:[#allocation82_spill] sm:$0xff] %v12833_v19  ;;  %v12836_v41 = vpop.f32.mrf.mxu3  ;;  %v12838_v35 = vpop.f32.mrf.mxu0 }
 0x183   : > { %17760 = vst [vmem:[#allocation83_spill] sm:$0xff] %v12836_v41  ;;  %v12840_v39 = vpop.f32.mrf.mxu1 }
 0x184   : > { %17761 = vst [vmem:[#allocation84_spill] sm:$0xff] %v12838_v35 }
 0x185   : > { %17762 = vst [vmem:[#allocation85_spill] sm:$0xff] %v12840_v39  ;;  %1308 = vmatmul.bf16.gmra.mxu0 %v11324_v40 }
 0x186   : > { %1397 = vmatmul.bf16.gmra.mxu1 %v11324_v40  ;;  %1486 = vmatmul.bf16.gmra.mxu2 %v11324_v40 }
 0x187   : > { %1575 = vmatmul.bf16.gmra.mxu3 %v11324_v40  ;;  %v9197_v40 = vld [vmem:[%s17602_s1 + $0x268] sm:$0xf] }
 0x189   : > { %v12842_v49 = vpop.f32.mrf.mxu2 }
 0x18a   : > { %17763 = vst [vmem:[#allocation86_spill] sm:$0xff] %v12842_v49  ;;  %v12844_v50 = vpop.f32.mrf.mxu3  ;;  %v12846_v56 = vpop.f32.mrf.mxu0 }
 0x18b   : > { %17764 = vst [vmem:[#allocation87_spill] sm:$0xff] %v12844_v50  ;;  %v12848_v1 = vpop.f32.mrf.mxu1 }
 0x18c   : > { %17765 = vst [vmem:[#allocation88_spill] sm:$0xff] %v12846_v56 }
 0x18d   : > { %17766 = vst [vmem:[#allocation89_spill] sm:$0xff] %v12848_v1  ;;  %v11446_v1 = vld [vmem:[%s17602_s1 + $0x274] sm:$0xf0] }
 0x191   : > { %v12850_v52 = vpop.f32.mrf.mxu2 }
 0x192   : > { %17767 = vst [vmem:[#allocation90_spill] sm:$0xff] %v12850_v52  ;;  %v12853_v36 = vpop.f32.mrf.mxu3  ;;  %v12855_v35 = vpop.f32.mrf.mxu0  ;;  %v9198_v52 = vor.u32 %v11446_v1, %v9197_v40  ;;  %v9189_v1 = vld [vmem:[%s17602_s1 + $0x260] sm:$0xf]  ;;  %v11445_v40 = vld [vmem:[%s17602_s1 + $0x26c] sm:$0xf0] }
 0x193   : > { %17768 = vst [vmem:[#allocation91_spill] sm:$0xff] %v12853_v36  ;;  %v12857_v39 = vpop.f32.mrf.mxu1  ;;  %v11444_v36 = vld [vmem:[%s17602_s1 + $0x26c] sm:$0xf] }
 0x194   : > { %17769 = vst [vmem:[#allocation92_spill] sm:$0xff] %v12855_v35  ;;  %2135 = vmatpush.bf16.msra.mxu2 %v9198_v52  ;;  %v9191_v52 = vld [vmem:[%s17602_s1 + $0x270] sm:$0xf0] }
 0x195   : > { %17770 = vst [vmem:[#allocation93_spill] sm:$0xff] %v12857_v39  ;;  %1313 = vmatmul.bf16.gmra.mxu0 %v11325_v6  ;;  %v9199_v39 = vld [vmem:[%s17602_s1 + $0x278] sm:$0xf0] }
 0x196   : > { %1402 = vmatmul.bf16.gmra.mxu1 %v11325_v6  ;;  %1491 = vmatmul.bf16.gmra.mxu2 %v11325_v6 }
 0x197   : > { %1580 = vmatmul.bf16.gmra.mxu3 %v11325_v6  ;;  %v9202_v6 = vor.u32 %v11444_v36, %v9199_v39  ;;  %v11443_v39 = vld [vmem:[%s17602_s1 + $0x264] sm:$0xf]  ;;  %v9190_v36 = vor.u32 %v11445_v40, %v9189_v1 }
 0x199   : > { %v12871_v35 = vpop.f32.mrf.mxu2  ;;  %2224 = vmatpush.bf16.msra.mxu3 %v9202_v6  ;;  %1957 = vmatpush.bf16.msra.mxu0 %v9190_v36 }
 0x19a   : > { %17771 = vst [vmem:[#allocation94_spill] sm:$0xff] %v12871_v35  ;;  %v12873_v56 = vpop.f32.mrf.mxu3  ;;  %v12875_v50 = vpop.f32.mrf.mxu0 }
 0x19b   : > { %17772 = vst [vmem:[#allocation95_spill] sm:$0xff] %v12873_v56  ;;  %v12877_v49 = vpop.f32.mrf.mxu1 }
 0x19c   : > { %17773 = vst [vmem:[#allocation96_spill] sm:$0xff] %v12875_v50  ;;  %v9194_v50 = vor.u32 %v11443_v39, %v9191_v52  ;;  %v11327_v52 = vld [vmem:[%s12324_s29 + $0x40] sm:$0xff] }
 0x19d   : > { %17774 = vst [vmem:[#allocation97_spill] sm:$0xff] %v12877_v49  ;;  %v11326_v49 = vld [vmem:[%s12324_s29 + $0x38] sm:$0xff] }
 0x19e   : > { %2046 = vmatpush.bf16.msra.mxu1 %v9194_v50 }
 0x1a1   : > { %v12891_v6 = vpop.f32.mrf.mxu2 }
 0x1a2   : > { %17775 = vst [vmem:[#allocation98_spill] sm:$0xff] %v12891_v6  ;;  %v12894_v56 = vpop.f32.mrf.mxu3  ;;  %v12896_v35 = vpop.f32.mrf.mxu0 }
 0x1a3   : > { %17776 = vst [vmem:[#allocation99_spill] sm:$0xff] %v12894_v56  ;;  %v12898_v41 = vpop.f32.mrf.mxu1 }
 0x1a4   : > { %17777 = vst [vmem:[#allocation100_spill] sm:$0xff] %v12896_v35 }
 0x1a5   : > { %17778 = vst [vmem:[#allocation101_spill] sm:$0xff] %v12898_v41  ;;  %1318 = vmatmul.bf16.gmra.mxu0 %v11326_v49 }
 0x1a6   : > { %1407 = vmatmul.bf16.gmra.mxu1 %v11326_v49  ;;  %1496 = vmatmul.bf16.gmra.mxu2 %v11326_v49 }
 0x1a7   : > { %1585 = vmatmul.bf16.gmra.mxu3 %v11326_v49  ;;  %v9181_v49 = vld [vmem:[%s17602_s1 + $0x248] sm:$0xf] }
 0x1a9   : > { %v12900_v1 = vpop.f32.mrf.mxu2 }
 0x1aa   : > { %17779 = vst [vmem:[#allocation102_spill] sm:$0xff] %v12900_v1  ;;  %v12902_v40 = vpop.f32.mrf.mxu3  ;;  %v12904_v39 = vpop.f32.mrf.mxu0 }
 0x1ab   : > { %17780 = vst [vmem:[#allocation103_spill] sm:$0xff] %v12902_v40  ;;  %v12906_v50 = vpop.f32.mrf.mxu1 }
 0x1ac   : > { %17781 = vst [vmem:[#allocation104_spill] sm:$0xff] %v12904_v39  ;;  %v9183_v39 = vld [vmem:[%s17602_s1 + $0x258] sm:$0xf0] }
 0x1ad   : > { %17782 = vst [vmem:[#allocation105_spill] sm:$0xff] %v12906_v50  ;;  %v11442_v50 = vld [vmem:[%s17602_s1 + $0x254] sm:$0xf0] }
 0x1b1   : > { %v12908_v36 = vpop.f32.mrf.mxu2 }
 0x1b2   : > { %17783 = vst [vmem:[#allocation106_spill] sm:$0xff] %v12908_v36  ;;  %v12911_v56 = vpop.f32.mrf.mxu3  ;;  %v12913_v35 = vpop.f32.mrf.mxu0  ;;  %v9182_v36 = vor.u32 %v11442_v50, %v9181_v49  ;;  %v9173_v50 = vld [vmem:[%s17602_s1 + $0x240] sm:$0xf]  ;;  %v11441_v49 = vld [vmem:[%s17602_s1 + $0x24c] sm:$0xf0] }
 0x1b3   : > { %17784 = vst [vmem:[#allocation107_spill] sm:$0xff] %v12911_v56  ;;  %v12915_v41 = vpop.f32.mrf.mxu1  ;;  %v11440_v56 = vld [vmem:[%s17602_s1 + $0x24c] sm:$0xf] }
 0x1b4   : > { %2136 = vmatpush.bf16.msra.mxu2 %v9182_v36  ;;  %v9175_v36 = vld [vmem:[%s17602_s1 + $0x250] sm:$0xf0] }
 0x1b5   : > { %1323 = vmatmul.bf16.gmra.mxu0 %v11327_v52 }
 0x1b6   : > { %1412 = vmatmul.bf16.gmra.mxu1 %v11327_v52  ;;  %1501 = vmatmul.bf16.gmra.mxu2 %v11327_v52 }
 0x1b7   : > { %1590 = vmatmul.bf16.gmra.mxu3 %v11327_v52  ;;  %v9186_v52 = vor.u32 %v11440_v56, %v9183_v39  ;;  %v11439_v56 = vld [vmem:[%s17602_s1 + $0x244] sm:$0xf]  ;;  %v9174_v39 = vor.u32 %v11441_v49, %v9173_v50 }
 0x1b8   : > { %v9178_v54 = vor.u32 %v11439_v56, %v9175_v36  ;;  %v11329_v36 = vld [vmem:[%s12324_s29 + $0x50] sm:$0xff] }
 0x1b9   : > { %v12929_v40 = vpop.f32.mrf.mxu2  ;;  %2225 = vmatpush.bf16.msra.mxu3 %v9186_v52  ;;  %1958 = vmatpush.bf16.msra.mxu0 %v9174_v39 }
 0x1ba   : > { %v12931_v1 = vpop.f32.mrf.mxu3  ;;  %v12933_v6 = vpop.f32.mrf.mxu0  ;;  %2047 = vmatpush.bf16.msra.mxu1 %v9178_v54 }
 0x1bb   : > { %v12935_v19 = vpop.f32.mrf.mxu1 }
 0x1c1   : > { %v12949_v52 = vpop.f32.mrf.mxu2 }
 0x1c2   : > { %v12952_v31 = vpop.f32.mrf.mxu3  ;;  %v12954_v22 = vpop.f32.mrf.mxu0 }
 0x1c3   : > { %v12956_v20 = vpop.f32.mrf.mxu1 }
 0x1c5   : > { %1328 = vmatmul.bf16.gmra.mxu0 %v11328_v43 }
 0x1c6   : > { %1417 = vmatmul.bf16.gmra.mxu1 %v11328_v43  ;;  %1506 = vmatmul.bf16.gmra.mxu2 %v11328_v43 }
 0x1c7   : > { %1595 = vmatmul.bf16.gmra.mxu3 %v11328_v43  ;;  %v9165_v43 = vld [vmem:[%s17602_s1 + $0x228] sm:$0xf] }
 0x1c8   : > { %v9166_v9 = vor.u32 %v11438_v14, %v9165_v43  ;;  %v9157_v14 = vld [vmem:[%s17602_s1 + $0x220] sm:$0xf]  ;;  %v11437_v43 = vld [vmem:[%s17602_s1 + $0x22c] sm:$0xf0] }
 0x1c9   : > { %v12958_v50 = vpop.f32.mrf.mxu2 }
 0x1ca   : > { %v12960_v49 = vpop.f32.mrf.mxu3  ;;  %v12962_v56 = vpop.f32.mrf.mxu0  ;;  %2137 = vmatpush.bf16.msra.mxu2 %v9166_v9  ;;  %v9159_v9 = vld [vmem:[%s17602_s1 + $0x230] sm:$0xf0] }
 0x1cb   : > { %v12964_v54 = vpop.f32.mrf.mxu1 }
 0x1d1   : > { %v12966_v39 = vpop.f32.mrf.mxu2 }
 0x1d2   : > { %v12969_v18 = vpop.f32.mrf.mxu3  ;;  %v12971_v16 = vpop.f32.mrf.mxu0 }
 0x1d3   : > { %v12973_v15 = vpop.f32.mrf.mxu1 }
 0x1d5   : > { %1333 = vmatmul.bf16.gmra.mxu0 %v11329_v36 }
 0x1d6   : > { %1422 = vmatmul.bf16.gmra.mxu1 %v11329_v36  ;;  %1511 = vmatmul.bf16.gmra.mxu2 %v11329_v36 }
 0x1d7   : > { %1600 = vmatmul.bf16.gmra.mxu3 %v11329_v36  ;;  %v9170_v36 = vor.u32 %v11436_v11, %v9167_v8  ;;  %v11435_v8 = vld [vmem:[%s17602_s1 + $0x224] sm:$0xf]  ;;  %v9158_v11 = vor.u32 %v11437_v43, %v9157_v14 }
 0x1d8   : > { %v9162_v45 = vor.u32 %v11435_v8, %v9159_v9  ;;  %v11331_v9 = vld [vmem:[%s12324_s29 + $0x60] sm:$0xff] }
 0x1d9   : > { %v12987_v7 = vpop.f32.mrf.mxu2  ;;  %2226 = vmatpush.bf16.msra.mxu3 %v9170_v36  ;;  %1959 = vmatpush.bf16.msra.mxu0 %v9158_v11 }
 0x1da   : > { %v12989_v5 = vpop.f32.mrf.mxu3  ;;  %v12991_v53 = vpop.f32.mrf.mxu0  ;;  %2048 = vmatpush.bf16.msra.mxu1 %v9162_v45 }
 0x1db   : > { %v12993_v48 = vpop.f32.mrf.mxu1 }
 0x1e1   : > { %v13007_v36 = vpop.f32.mrf.mxu2 }
 0x1e2   : > { %v13010_v34 = vpop.f32.mrf.mxu3  ;;  %v13012_v33 = vpop.f32.mrf.mxu0 }
 0x1e3   : > { %17785 = vst [vmem:[#allocation108_spill] sm:$0xff] %v13012_v33  ;;  %v13014_v32 = vpop.f32.mrf.mxu1 }
 0x1e4   : > { %17786 = vst [vmem:[#allocation109_spill] sm:$0xff] %v13014_v32 }
 0x1e5   : > { %1338 = vmatmul.bf16.gmra.mxu0 %v11330_v42 }
 0x1e6   : > { %1427 = vmatmul.bf16.gmra.mxu1 %v11330_v42  ;;  %1516 = vmatmul.bf16.gmra.mxu2 %v11330_v42 }
 0x1e7   : > { %1605 = vmatmul.bf16.gmra.mxu3 %v11330_v42  ;;  %v9149_v42 = vld [vmem:[%s17602_s1 + $0x208] sm:$0xf] }
 0x1e9   : > { %v13016_v14 = vpop.f32.mrf.mxu2 }
 0x1ea   : > { %17787 = vst [vmem:[#allocation110_spill] sm:$0xff] %v13016_v14  ;;  %v13018_v43 = vpop.f32.mrf.mxu3  ;;  %v13020_v8 = vpop.f32.mrf.mxu0 }
 0x1eb   : > { %17788 = vst [vmem:[#allocation111_spill] sm:$0xff] %v13018_v43  ;;  %v13022_v45 = vpop.f32.mrf.mxu1 }
 0x1ec   : > { %17789 = vst [vmem:[#allocation112_spill] sm:$0xff] %v13020_v8 }
 0x1ed   : > { %17790 = vst [vmem:[#allocation113_spill] sm:$0xff] %v13022_v45  ;;  %v11434_v45 = vld [vmem:[%s17602_s1 + $0x214] sm:$0xf0] }
 0x1f1   : > { %v13024_v11 = vpop.f32.mrf.mxu2 }
 0x1f2   : > { %17791 = vst [vmem:[#allocation114_spill] sm:$0xff] %v13024_v11  ;;  %v13027_v30 = vpop.f32.mrf.mxu3  ;;  %v13029_v29 = vpop.f32.mrf.mxu0  ;;  %v9150_v11 = vor.u32 %v11434_v45, %v9149_v42  ;;  %v9141_v45 = vld [vmem:[%s17602_s1 + $0x200] sm:$0xf]  ;;  %v11433_v42 = vld [vmem:[%s17602_s1 + $0x20c] sm:$0xf0] }
 0x1f3   : > { %17792 = vst [vmem:[#allocation115_spill] sm:$0xff] %v13027_v30  ;;  %v13031_v28 = vpop.f32.mrf.mxu1  ;;  %v11432_v30 = vld [vmem:[%s17602_s1 + $0x20c] sm:$0xf] }
 0x1f4   : > { %17793 = vst [vmem:[#allocation116_spill] sm:$0xff] %v13029_v29  ;;  %2138 = vmatpush.bf16.msra.mxu2 %v9150_v11  ;;  %v9143_v11 = vld [vmem:[%s17602_s1 + $0x210] sm:$0xf0] }
 0x1f5   : > { %17794 = vst [vmem:[#allocation117_spill] sm:$0xff] %v13031_v28  ;;  %1343 = vmatmul.bf16.gmra.mxu0 %v11331_v9  ;;  %v9151_v28 = vld [vmem:[%s17602_s1 + $0x218] sm:$0xf0] }
 0x1f6   : > { %1432 = vmatmul.bf16.gmra.mxu1 %v11331_v9  ;;  %1521 = vmatmul.bf16.gmra.mxu2 %v11331_v9 }
 0x1f7   : > { %1610 = vmatmul.bf16.gmra.mxu3 %v11331_v9  ;;  %v9154_v9 = vor.u32 %v11432_v30, %v9151_v28  ;;  %v11431_v28 = vld [vmem:[%s17602_s1 + $0x204] sm:$0xf]  ;;  %v9142_v30 = vor.u32 %v11433_v42, %v9141_v45 }
 0x1f9   : > { %v13045_v29 = vpop.f32.mrf.mxu2  ;;  %2227 = vmatpush.bf16.msra.mxu3 %v9154_v9  ;;  %1960 = vmatpush.bf16.msra.mxu0 %v9142_v30 }
 0x1fa   : > { %17795 = vst [vmem:[#allocation118_spill] sm:$0xff] %v13045_v29  ;;  %v13047_v8 = vpop.f32.mrf.mxu3  ;;  %v13049_v43 = vpop.f32.mrf.mxu0 }
 0x1fb   : > { %17796 = vst [vmem:[#allocation119_spill] sm:$0xff] %v13047_v8  ;;  %v13051_v27 = vpop.f32.mrf.mxu1 }
 0x1fc   : > { %17797 = vst [vmem:[#allocation120_spill] sm:$0xff] %v13049_v43  ;;  %v9146_v43 = vor.u32 %v11431_v28, %v9143_v11  ;;  %v11333_v11 = vld [vmem:[%s12324_s29 + $0x70] sm:$0xff] }
 0x1fd   : > { %17798 = vst [vmem:[#allocation121_spill] sm:$0xff] %v13051_v27  ;;  %v11332_v27 = vld [vmem:[%s12324_s29 + $0x68] sm:$0xff] }
 0x1fe   : > { %2049 = vmatpush.bf16.msra.mxu1 %v9146_v43 }
 0x201   : > { %v13065_v9 = vpop.f32.mrf.mxu2 }
 0x202   : > { %17799 = vst [vmem:[#allocation122_spill] sm:$0xff] %v13065_v9  ;;  %v13068_v8 = vpop.f32.mrf.mxu3  ;;  %v13070_v29 = vpop.f32.mrf.mxu0 }
 0x203   : > { %17800 = vst [vmem:[#allocation123_spill] sm:$0xff] %v13068_v8  ;;  %v13072_v14 = vpop.f32.mrf.mxu1 }
 0x204   : > { %17801 = vst [vmem:[#allocation124_spill] sm:$0xff] %v13070_v29 }
 0x205   : > { %17802 = vst [vmem:[#allocation125_spill] sm:$0xff] %v13072_v14  ;;  %1348 = vmatmul.bf16.gmra.mxu0 %v11332_v27 }
 0x206   : > { %1437 = vmatmul.bf16.gmra.mxu1 %v11332_v27  ;;  %1526 = vmatmul.bf16.gmra.mxu2 %v11332_v27 }
 0x207   : > { %1615 = vmatmul.bf16.gmra.mxu3 %v11332_v27  ;;  %v9765_v27 = vld [vmem:[%s17604_s3 + $0x6e0] sm:$0xf] }
 0x209   : > { %v13074_v45 = vpop.f32.mrf.mxu2 }
 0x20a   : > { %17803 = vst [vmem:[#allocation126_spill] sm:$0xff] %v13074_v45  ;;  %v13076_v42 = vpop.f32.mrf.mxu3  ;;  %v13078_v28 = vpop.f32.mrf.mxu0 }
 0x20b   : > { %17804 = vst [vmem:[#allocation127_spill] sm:$0xff] %v13076_v42  ;;  %v13080_v43 = vpop.f32.mrf.mxu1 }
 0x20c   : > { %17805 = vst [vmem:[#allocation128_spill] sm:$0xff] %v13078_v28 }
 0x20d   : > { %17806 = vst [vmem:[#allocation129_spill] sm:$0xff] %v13080_v43  ;;  %v11685_v43 = vld [vmem:[%s17604_s3 + $0x6ec] sm:$0xf0] }
 0x211   : > { %v13082_v30 = vpop.f32.mrf.mxu2 }
 0x212   : > { %17807 = vst [vmem:[#allocation130_spill] sm:$0xff] %v13082_v30  ;;  %v13085_v8 = vpop.f32.mrf.mxu3  ;;  %v13087_v29 = vpop.f32.mrf.mxu0  ;;  %v9766_v30 = vor.u32 %v11685_v43, %v9765_v27  ;;  %v9509_v43 = vld [vmem:[%s17604_s3 + $0x4e0] sm:$0xf]  ;;  %v11621_v27 = vld [vmem:[%s17604_s3 + $0x4ec] sm:$0xf0] }
 0x213   : > { %17808 = vst [vmem:[#allocation131_spill] sm:$0xff] %v13085_v8  ;;  %v13089_v14 = vpop.f32.mrf.mxu1  ;;  %v9893_v8 = vld [vmem:[%s17604_s3 + $0x7e0] sm:$0xf] }
 0x214   : > { %17809 = vst [vmem:[#allocation132_spill] sm:$0xff] %v13087_v29  ;;  %3794 = vmatpush.bf16.msrb.mxu2 %v9766_v30  ;;  %v11653_v30 = vld [vmem:[%s17604_s3 + $0x5ec] sm:$0xf0] }
 0x215   : > { %17810 = vst [vmem:[#allocation133_spill] sm:$0xff] %v13089_v14  ;;  %1353 = vmatmul.bf16.gmra.mxu0 %v11333_v11  ;;  %v11717_v14 = vld [vmem:[%s17604_s3 + $0x7ec] sm:$0xf0] }
 0x216   : > { %1442 = vmatmul.bf16.gmra.mxu1 %v11333_v11  ;;  %1531 = vmatmul.bf16.gmra.mxu2 %v11333_v11 }
 0x217   : > { %1620 = vmatmul.bf16.gmra.mxu3 %v11333_v11  ;;  %v9894_v11 = vor.u32 %v11717_v14, %v9893_v8  ;;  %v9637_v14 = vld [vmem:[%s17604_s3 + $0x5e0] sm:$0xf]  ;;  %v9510_v8 = vor.u32 %v11621_v27, %v9509_v43 }
 0x219   : > { %v13103_v29 = vpop.f32.mrf.mxu2  ;;  %3843 = vmatpush.bf16.msrb.mxu3 %v9894_v11  ;;  %3696 = vmatpush.bf16.msrb.mxu0 %v9510_v8 }
 0x21a   : > { %17811 = vst [vmem:[#allocation134_spill] sm:$0xff] %v13103_v29  ;;  %v13105_v28 = vpop.f32.mrf.mxu3  ;;  %v13107_v42 = vpop.f32.mrf.mxu0 }
 0x21b   : > { %17812 = vst [vmem:[#allocation135_spill] sm:$0xff] %v13105_v28  ;;  %v13109_v45 = vpop.f32.mrf.mxu1 }
 0x21c   : > { %17813 = vst [vmem:[#allocation136_spill] sm:$0xff] %v13107_v42  ;;  %v9638_v42 = vor.u32 %v11653_v30, %v9637_v14  ;;  %v11415_v30 = vld [vmem:[%s12324_s29 + $0x100] sm:$0xff] }
 0x21d   : > { %17814 = vst [vmem:[#allocation137_spill] sm:$0xff] %v13109_v45  ;;  %v11334_v45 = vld [vmem:[%s12324_s29 + $0x78] sm:$0xff] }
 0x21e   : > { %3745 = vmatpush.bf16.msrb.mxu1 %v9638_v42 }
 0x221   : > { %v13123_v11 = vpop.f32.mrf.mxu2 }
 0x222   : > { %17815 = vst [vmem:[#allocation138_spill] sm:$0xff] %v13123_v11  ;;  %v13126_v28 = vpop.f32.mrf.mxu3  ;;  %v13128_v29 = vpop.f32.mrf.mxu0 }
 0x223   : > { %17816 = vst [vmem:[#allocation139_spill] sm:$0xff] %v13126_v28  ;;  %v13130_v9 = vpop.f32.mrf.mxu1 }
 0x224   : > { %17817 = vst [vmem:[#allocation140_spill] sm:$0xff] %v13128_v29 }
 0x225   : > { %17818 = vst [vmem:[#allocation141_spill] sm:$0xff] %v13130_v9  ;;  %1358 = vmatmul.bf16.gmra.mxu0 %v11334_v45 }
 0x226   : > { %1447 = vmatmul.bf16.gmra.mxu1 %v11334_v45  ;;  %1536 = vmatmul.bf16.gmra.mxu2 %v11334_v45 }
 0x227   : > { %1625 = vmatmul.bf16.gmra.mxu3 %v11334_v45  ;;  %v9749_v45 = vld [vmem:[%s17604_s3 + $0x6c0] sm:$0xf] }
 0x229   : > { %v13132_v43 = vpop.f32.mrf.mxu2 }
 0x22a   : > { %17819 = vst [vmem:[#allocation142_spill] sm:$0xff] %v13132_v43  ;;  %v13134_v27 = vpop.f32.mrf.mxu3  ;;  %v13136_v14 = vpop.f32.mrf.mxu0 }
 0x22b   : > { %17820 = vst [vmem:[#allocation143_spill] sm:$0xff] %v13134_v27  ;;  %v13138_v42 = vpop.f32.mrf.mxu1 }
 0x22c   : > { %17821 = vst [vmem:[#allocation144_spill] sm:$0xff] %v13136_v14 }
 0x22d   : > { %17822 = vst [vmem:[#allocation145_spill] sm:$0xff] %v13138_v42  ;;  %v11681_v42 = vld [vmem:[%s17604_s3 + $0x6cc] sm:$0xf0] }
 0x231   : > { %v13140_v8 = vpop.f32.mrf.mxu2 }
 0x232   : > { %17823 = vst [vmem:[#allocation146_spill] sm:$0xff] %v13140_v8  ;;  %v13143_v28 = vpop.f32.mrf.mxu3  ;;  %v13145_v29 = vpop.f32.mrf.mxu0  ;;  %v9750_v8 = vor.u32 %v11681_v42, %v9749_v45  ;;  %v9493_v42 = vld [vmem:[%s17604_s3 + $0x4c0] sm:$0xf]  ;;  %v11617_v45 = vld [vmem:[%s17604_s3 + $0x4cc] sm:$0xf0] }
 0x233   : > { %17824 = vst [vmem:[#allocation147_spill] sm:$0xff] %v13143_v28  ;;  %v13147_v9 = vpop.f32.mrf.mxu1  ;;  %v9877_v28 = vld [vmem:[%s17604_s3 + $0x7c0] sm:$0xf] }
 0x234   : > { %17825 = vst [vmem:[#allocation148_spill] sm:$0xff] %v13145_v29  ;;  %3795 = vmatpush.bf16.msrb.mxu2 %v9750_v8  ;;  %v11649_v8 = vld [vmem:[%s17604_s3 + $0x5cc] sm:$0xf0] }
 0x235   : > { %17826 = vst [vmem:[#allocation149_spill] sm:$0xff] %v13147_v9  ;;  %1961 = vmatmul.bf16.vlgmr.msra.gmra.mxu0 %v11415_v30  ;;  %v11713_v9 = vld [vmem:[%s17604_s3 + $0x7cc] sm:$0xf0] }
 0x236   : > { %2050 = vmatmul.bf16.vlgmr.msra.gmra.mxu1 %v11415_v30  ;;  %2139 = vmatmul.bf16.vlgmr.msra.gmra.mxu2 %v11415_v30 }
 0x237   : > { %2228 = vmatmul.bf16.vlgmr.msra.gmra.mxu3 %v11415_v30  ;;  %v9878_v30 = vor.u32 %v11713_v9, %v9877_v28  ;;  %v9621_v9 = vld [vmem:[%s17604_s3 + $0x5c0] sm:$0xf]  ;;  %v9494_v28 = vor.u32 %v11617_v45, %v9493_v42 }
 0x239   : > { %v13161_v29 = vpop.f32.mrf.mxu2  ;;  %3844 = vmatpush.bf16.msrb.mxu3 %v9878_v30  ;;  %3697 = vmatpush.bf16.msrb.mxu0 %v9494_v28 }
 0x23a   : > { %17827 = vst [vmem:[#allocation150_spill] sm:$0xff] %v13161_v29  ;;  %v13163_v14 = vpop.f32.mrf.mxu3  ;;  %v13165_v27 = vpop.f32.mrf.mxu0 }
 0x23b   : > { %17828 = vst [vmem:[#allocation151_spill] sm:$0xff] %v13163_v14  ;;  %v13167_v43 = vpop.f32.mrf.mxu1 }
 0x23c   : > { %17829 = vst [vmem:[#allocation152_spill] sm:$0xff] %v13165_v27  ;;  %v9622_v27 = vor.u32 %v11649_v8, %v9621_v9  ;;  %v11417_v8 = vld [vmem:[%s12324_s29 + $0x110] sm:$0xff] }
 0x23d   : > { %17830 = vst [vmem:[#allocation153_spill] sm:$0xff] %v13167_v43  ;;  %v11416_v43 = vld [vmem:[%s12324_s29 + $0x108] sm:$0xff] }
 0x23e   : > { %3746 = vmatpush.bf16.msrb.mxu1 %v9622_v27 }
 0x241   : > { %v13181_v30 = vpop.f32.mrf.mxu2 }
 0x242   : > { %17831 = vst [vmem:[#allocation154_spill] sm:$0xff] %v13181_v30  ;;  %v13184_v14 = vpop.f32.mrf.mxu3  ;;  %v13186_v29 = vpop.f32.mrf.mxu0 }
 0x243   : > { %17832 = vst [vmem:[#allocation155_spill] sm:$0xff] %v13184_v14  ;;  %v13188_v11 = vpop.f32.mrf.mxu1 }
 0x244   : > { %17833 = vst [vmem:[#allocation156_spill] sm:$0xff] %v13186_v29 }
 0x245   : > { %17834 = vst [vmem:[#allocation157_spill] sm:$0xff] %v13188_v11  ;;  %1966 = vmatmul.bf16.gmra.mxu0 %v11416_v43 }
 0x246   : > { %2055 = vmatmul.bf16.gmra.mxu1 %v11416_v43  ;;  %2144 = vmatmul.bf16.gmra.mxu2 %v11416_v43 }
 0x247   : > { %2233 = vmatmul.bf16.gmra.mxu3 %v11416_v43  ;;  %v9733_v43 = vld [vmem:[%s17604_s3 + $0x6a0] sm:$0xf] }
 0x249   : > { %v13190_v42 = vpop.f32.mrf.mxu2 }
 0x24a   : > { %17835 = vst [vmem:[#allocation158_spill] sm:$0xff] %v13190_v42  ;;  %v13192_v45 = vpop.f32.mrf.mxu3  ;;  %v13194_v9 = vpop.f32.mrf.mxu0 }
 0x24b   : > { %17836 = vst [vmem:[#allocation159_spill] sm:$0xff] %v13192_v45  ;;  %v13196_v27 = vpop.f32.mrf.mxu1 }
 0x24c   : > { %17837 = vst [vmem:[#allocation160_spill] sm:$0xff] %v13194_v9 }
 0x24d   : > { %17838 = vst [vmem:[#allocation161_spill] sm:$0xff] %v13196_v27  ;;  %v11677_v27 = vld [vmem:[%s17604_s3 + $0x6ac] sm:$0xf0] }
 0x251   : > { %v13198_v28 = vpop.f32.mrf.mxu2 }
 0x252   : > { %17839 = vst [vmem:[#allocation162_spill] sm:$0xff] %v13198_v28  ;;  %v13201_v14 = vpop.f32.mrf.mxu3  ;;  %v13203_v29 = vpop.f32.mrf.mxu0  ;;  %v9734_v28 = vor.u32 %v11677_v27, %v9733_v43  ;;  %v9477_v27 = vld [vmem:[%s17604_s3 + $0x4a0] sm:$0xf]  ;;  %v11613_v43 = vld [vmem:[%s17604_s3 + $0x4ac] sm:$0xf0] }
 0x253   : > { %17840 = vst [vmem:[#allocation163_spill] sm:$0xff] %v13201_v14  ;;  %v13205_v11 = vpop.f32.mrf.mxu1  ;;  %v9861_v14 = vld [vmem:[%s17604_s3 + $0x7a0] sm:$0xf] }
 0x254   : > { %17841 = vst [vmem:[#allocation164_spill] sm:$0xff] %v13203_v29  ;;  %3796 = vmatpush.bf16.msrb.mxu2 %v9734_v28  ;;  %v11645_v28 = vld [vmem:[%s17604_s3 + $0x5ac] sm:$0xf0] }
 0x255   : > { %17842 = vst [vmem:[#allocation165_spill] sm:$0xff] %v13205_v11  ;;  %1971 = vmatmul.bf16.gmra.mxu0 %v11417_v8  ;;  %v11709_v11 = vld [vmem:[%s17604_s3 + $0x7ac] sm:$0xf0] }
 0x256   : > { %2060 = vmatmul.bf16.gmra.mxu1 %v11417_v8  ;;  %2149 = vmatmul.bf16.gmra.mxu2 %v11417_v8 }
 0x257   : > { %2238 = vmatmul.bf16.gmra.mxu3 %v11417_v8  ;;  %v9862_v8 = vor.u32 %v11709_v11, %v9861_v14  ;;  %v9605_v11 = vld [vmem:[%s17604_s3 + $0x5a0] sm:$0xf]  ;;  %v9478_v14 = vor.u32 %v11613_v43, %v9477_v27 }
 0x259   : > { %v13219_v29 = vpop.f32.mrf.mxu2  ;;  %3845 = vmatpush.bf16.msrb.mxu3 %v9862_v8  ;;  %3698 = vmatpush.bf16.msrb.mxu0 %v9478_v14 }
 0x25a   : > { %17843 = vst [vmem:[#allocation166_spill] sm:$0xff] %v13219_v29  ;;  %v13221_v9 = vpop.f32.mrf.mxu3  ;;  %v13223_v45 = vpop.f32.mrf.mxu0 }
 0x25b   : > { %17844 = vst [vmem:[#allocation167_spill] sm:$0xff] %v13221_v9  ;;  %v13225_v42 = vpop.f32.mrf.mxu1 }
 0x25c   : > { %17845 = vst [vmem:[#allocation168_spill] sm:$0xff] %v13223_v45  ;;  %v9606_v45 = vor.u32 %v11645_v28, %v9605_v11  ;;  %v11419_v28 = vld [vmem:[%s12324_s29 + $0x120] sm:$0xff] }
 0x25d   : > { %17846 = vst [vmem:[#allocation169_spill] sm:$0xff] %v13225_v42  ;;  %v11418_v42 = vld [vmem:[%s12324_s29 + $0x118] sm:$0xff] }
 0x25e   : > { %3747 = vmatpush.bf16.msrb.mxu1 %v9606_v45 }
 0x261   : > { %v13239_v8 = vpop.f32.mrf.mxu2 }
 0x262   : > { %17847 = vst [vmem:[#allocation170_spill] sm:$0xff] %v13239_v8  ;;  %v13242_v9 = vpop.f32.mrf.mxu3  ;;  %v13244_v29 = vpop.f32.mrf.mxu0 }
 0x263   : > { %17848 = vst [vmem:[#allocation171_spill] sm:$0xff] %v13242_v9  ;;  %v13246_v30 = vpop.f32.mrf.mxu1 }
 0x264   : > { %17849 = vst [vmem:[#allocation172_spill] sm:$0xff] %v13244_v29 }
 0x265   : > { %17850 = vst [vmem:[#allocation173_spill] sm:$0xff] %v13246_v30  ;;  %1976 = vmatmul.bf16.gmra.mxu0 %v11418_v42 }
 0x266   : > { %2065 = vmatmul.bf16.gmra.mxu1 %v11418_v42  ;;  %2154 = vmatmul.bf16.gmra.mxu2 %v11418_v42 }
 0x267   : > { %2243 = vmatmul.bf16.gmra.mxu3 %v11418_v42  ;;  %v9717_v42 = vld [vmem:[%s17604_s3 + $0x680] sm:$0xf] }
 0x269   : > { %v13248_v27 = vpop.f32.mrf.mxu2 }
 0x26a   : > { %17851 = vst [vmem:[#allocation174_spill] sm:$0xff] %v13248_v27  ;;  %v13250_v43 = vpop.f32.mrf.mxu3  ;;  %v13252_v11 = vpop.f32.mrf.mxu0 }
 0x26b   : > { %17852 = vst [vmem:[#allocation175_spill] sm:$0xff] %v13250_v43  ;;  %v13254_v45 = vpop.f32.mrf.mxu1 }
 0x26c   : > { %17853 = vst [vmem:[#allocation176_spill] sm:$0xff] %v13252_v11 }
 0x26d   : > { %17854 = vst [vmem:[#allocation177_spill] sm:$0xff] %v13254_v45  ;;  %v11673_v45 = vld [vmem:[%s17604_s3 + $0x68c] sm:$0xf0] }
 0x271   : > { %v13256_v14 = vpop.f32.mrf.mxu2 }
 0x272   : > { %17855 = vst [vmem:[#allocation178_spill] sm:$0xff] %v13256_v14  ;;  %v13259_v9 = vpop.f32.mrf.mxu3  ;;  %v13261_v29 = vpop.f32.mrf.mxu0  ;;  %v9718_v14 = vor.u32 %v11673_v45, %v9717_v42  ;;  %v9461_v45 = vld [vmem:[%s17604_s3 + $0x480] sm:$0xf]  ;;  %v11609_v42 = vld [vmem:[%s17604_s3 + $0x48c] sm:$0xf0] }
 0x273   : > { %17856 = vst [vmem:[#allocation179_spill] sm:$0xff] %v13259_v9  ;;  %v13263_v30 = vpop.f32.mrf.mxu1  ;;  %v9845_v9 = vld [vmem:[%s17604_s3 + $0x780] sm:$0xf] }
 0x274   : > { %17857 = vst [vmem:[#allocation180_spill] sm:$0xff] %v13261_v29  ;;  %3797 = vmatpush.bf16.msrb.mxu2 %v9718_v14  ;;  %v11641_v14 = vld [vmem:[%s17604_s3 + $0x58c] sm:$0xf0] }
 0x275   : > { %17858 = vst [vmem:[#allocation181_spill] sm:$0xff] %v13263_v30  ;;  %1981 = vmatmul.bf16.gmra.mxu0 %v11419_v28  ;;  %v11705_v30 = vld [vmem:[%s17604_s3 + $0x78c] sm:$0xf0] }
 0x276   : > { %2070 = vmatmul.bf16.gmra.mxu1 %v11419_v28  ;;  %2159 = vmatmul.bf16.gmra.mxu2 %v11419_v28 }
 0x277   : > { %2248 = vmatmul.bf16.gmra.mxu3 %v11419_v28  ;;  %v9846_v28 = vor.u32 %v11705_v30, %v9845_v9  ;;  %v9589_v30 = vld [vmem:[%s17604_s3 + $0x580] sm:$0xf]  ;;  %v9462_v9 = vor.u32 %v11609_v42, %v9461_v45 }
 0x279   : > { %v13277_v29 = vpop.f32.mrf.mxu2  ;;  %3846 = vmatpush.bf16.msrb.mxu3 %v9846_v28  ;;  %3699 = vmatpush.bf16.msrb.mxu0 %v9462_v9 }
 0x27a   : > { %17859 = vst [vmem:[#allocation182_spill] sm:$0xff] %v13277_v29  ;;  %v13279_v11 = vpop.f32.mrf.mxu3  ;;  %v13281_v43 = vpop.f32.mrf.mxu0 }
 0x27b   : > { %17860 = vst [vmem:[#allocation183_spill] sm:$0xff] %v13279_v11  ;;  %v13283_v27 = vpop.f32.mrf.mxu1 }
 0x27c   : > { %17861 = vst [vmem:[#allocation184_spill] sm:$0xff] %v13281_v43  ;;  %v9590_v43 = vor.u32 %v11641_v14, %v9589_v30  ;;  %v11421_v14 = vld [vmem:[%s12324_s29 + $0x130] sm:$0xff] }
 0x27d   : > { %17862 = vst [vmem:[#allocation185_spill] sm:$0xff] %v13283_v27  ;;  %v11420_v27 = vld [vmem:[%s12324_s29 + $0x128] sm:$0xff] }
 0x27e   : > { %3748 = vmatpush.bf16.msrb.mxu1 %v9590_v43 }
 0x281   : > { %v13297_v28 = vpop.f32.mrf.mxu2 }
 0x282   : > { %17863 = vst [vmem:[#allocation186_spill] sm:$0xff] %v13297_v28  ;;  %v13300_v11 = vpop.f32.mrf.mxu3  ;;  %v13302_v29 = vpop.f32.mrf.mxu0  ;;  %v9445_v28 = vld [vmem:[%s17604_s3 + $0x460] sm:$0xf] }
 0x283   : > { %17864 = vst [vmem:[#allocation187_spill] sm:$0xff] %v13300_v11  ;;  %v13304_v8 = vpop.f32.mrf.mxu1 }
 0x284   : > { %17865 = vst [vmem:[#allocation188_spill] sm:$0xff] %v13302_v29 }
 0x285   : > { %17866 = vst [vmem:[#allocation189_spill] sm:$0xff] %v13304_v8  ;;  %1986 = vmatmul.bf16.gmra.mxu0 %v11420_v27 }
 0x286   : > { %2075 = vmatmul.bf16.gmra.mxu1 %v11420_v27  ;;  %2164 = vmatmul.bf16.gmra.mxu2 %v11420_v27 }
 0x287   : > { %2253 = vmatmul.bf16.gmra.mxu3 %v11420_v27  ;;  %v9701_v27 = vld [vmem:[%s17604_s3 + $0x660] sm:$0xf] }
 0x289   : > { %v13306_v45 = vpop.f32.mrf.mxu2 }
 0x28a   : > { %17867 = vst [vmem:[#allocation190_spill] sm:$0xff] %v13306_v45  ;;  %v13308_v42 = vpop.f32.mrf.mxu3  ;;  %v13310_v30 = vpop.f32.mrf.mxu0 }
 0x28b   : > { %17868 = vst [vmem:[#allocation191_spill] sm:$0xff] %v13308_v42  ;;  %v13312_v43 = vpop.f32.mrf.mxu1 }
 0x28c   : > { %17869 = vst [vmem:[#allocation192_spill] sm:$0xff] %v13310_v30 }
 0x28d   : > { %17870 = vst [vmem:[#allocation193_spill] sm:$0xff] %v13312_v43  ;;  %v11669_v43 = vld [vmem:[%s17604_s3 + $0x66c] sm:$0xf0] }
 0x291   : > { %v13314_v9 = vpop.f32.mrf.mxu2 }
 0x292   : > { %17871 = vst [vmem:[#allocation194_spill] sm:$0xff] %v13314_v9  ;;  %v13317_v11 = vpop.f32.mrf.mxu3  ;;  %v13319_v29 = vpop.f32.mrf.mxu0 }
 0x293   : > { %17872 = vst [vmem:[#allocation195_spill] sm:$0xff] %v13317_v11  ;;  %v13321_v8 = vpop.f32.mrf.mxu1  ;;  %v9829_v11 = vld [vmem:[%s17604_s3 + $0x760] sm:$0xf] }
 0x294   : > { %17873 = vst [vmem:[#allocation196_spill] sm:$0xff] %v13319_v29 }
 0x295   : > { %17874 = vst [vmem:[#allocation197_spill] sm:$0xff] %v13321_v8  ;;  %1991 = vmatmul.bf16.gmra.mxu0 %v11421_v14  ;;  %v9702_v8 = vor.u32 %v11669_v43, %v9701_v27  ;;  %v11605_v43 = vld [vmem:[%s17604_s3 + $0x46c] sm:$0xf0]  ;;  %v9573_v27 = vld [vmem:[%s17604_s3 + $0x560] sm:$0xf] }
 0x296   : > { %2080 = vmatmul.bf16.gmra.mxu1 %v11421_v14  ;;  %2169 = vmatmul.bf16.gmra.mxu2 %v11421_v14 }
 0x297   : > { %2258 = vmatmul.bf16.gmra.mxu3 %v11421_v14  ;;  %v11701_v14 = vld [vmem:[%s17604_s3 + $0x76c] sm:$0xf0]  ;;  %3798 = vmatpush.bf16.msrb.mxu2 %v9702_v8  ;;  %v11422_v8 = vld [vmem:[%s12324_s29 + $0x138] sm:$0xff] }
 0x298   : > { %v9830_v42 = vor.u32 %v11701_v14, %v9829_v11  ;;  %v11637_v11 = vld [vmem:[%s17604_s3 + $0x56c] sm:$0xf0] }
 0x299   : > { %v13332_v29 = vpop.f32.mrf.mxu2 }
 0x29a   : > { %17875 = vst [vmem:[#allocation198_spill] sm:$0xff] %v13332_v29  ;;  %v13337_v9 = vpop.f32.mrf.mxu3  ;;  %v13339_v30 = vpop.f32.mrf.mxu0  ;;  %3847 = vmatpush.bf16.msrb.mxu3 %v9830_v42  ;;  %v9574_v42 = vor.u32 %v11637_v11, %v9573_v27  ;;  %v1285_v11 = vadd.f32 %v12913_v35, %v12449_v37  ;;  %v1463_v35 = vadd.f32 %v12929_v40, %v12465_v44  ;;  %v9813_v44 = vld [vmem:[%s17604_s3 + $0x740] sm:$0xf] }
 0x29b   : > { %17876 = vst [vmem:[#allocation199_spill] sm:$0xff] %v13337_v9  ;;  %v13341_v45 = vpop.f32.mrf.mxu1  ;;  %v9446_v9 = vor.u32 %v11605_v43, %v9445_v28  ;;  %v1376_v40 = vadd.f32 %v12935_v19, %v12480_v51 }
 0x29c   : > { %17877 = vst [vmem:[#allocation200_spill] sm:$0xff] %v13339_v30  ;;  %3749 = vmatpush.bf16.msrb.mxu1 %v9574_v42  ;;  %v1374_v42 = vadd.f32 %v12915_v41, %v12451_v38  ;;  %v1552_v41 = vadd.f32 %v12931_v1, %v12467_v46 }
 0x29d   : > { %17878 = vst [vmem:[#allocation201_spill] sm:$0xff] %v13341_v45  ;;  %3700 = vmatpush.bf16.msrb.mxu0 %v9446_v9  ;;  %v11423_v9 = vld [vmem:[%s12324_s29 + $0x140] sm:$0xff] }
 0x2a1   : > { %v13355_v14 = vpop.f32.mrf.mxu2 }
 0x2a2   : > { %17879 = vst [vmem:[#allocation202_spill] sm:$0xff] %v13355_v14  ;;  %v13358_v45 = vpop.f32.mrf.mxu3  ;;  %v13360_v30 = vpop.f32.mrf.mxu0 }
 0x2a3   : > { %17880 = vst [vmem:[#allocation203_spill] sm:$0xff] %v13358_v45  ;;  %v13362_v29 = vpop.f32.mrf.mxu1 }
 0x2a4   : > { %17881 = vst [vmem:[#allocation204_spill] sm:$0xff] %v13360_v30 }
 0x2a5   : > { %17882 = vst [vmem:[#allocation205_spill] sm:$0xff] %v13362_v29  ;;  %1996 = vmatmul.bf16.gmra.mxu0 %v11422_v8 }
 0x2a6   : > { %2085 = vmatmul.bf16.gmra.mxu1 %v11422_v8  ;;  %2174 = vmatmul.bf16.gmra.mxu2 %v11422_v8 }
 0x2a7   : > { %2263 = vmatmul.bf16.gmra.mxu3 %v11422_v8 }
 0x2a9   : > { %v13364_v28 = vpop.f32.mrf.mxu2 }
 0x2aa   : > { %17883 = vst [vmem:[#allocation206_spill] sm:$0xff] %v13364_v28  ;;  %v13366_v43 = vpop.f32.mrf.mxu3  ;;  %v13368_v14 = vpop.f32.mrf.mxu0 }
 0x2ab   : > { %17884 = vst [vmem:[#allocation207_spill] sm:$0xff] %v13366_v43  ;;  %v13370_v27 = vpop.f32.mrf.mxu1 }
 0x2ac   : > { %17885 = vst [vmem:[#allocation208_spill] sm:$0xff] %v13368_v14  ;;  %v2437_v14 = vld [vmem:[%s17603_s2] sm:$0xf] }
 0x2ad   : > { %17886 = vst [vmem:[#allocation209_spill] sm:$0xff] %v13370_v27  ;;  %v13384_v37 = vperm.slane %v2437_v14, 0  ;;  %v13388_v38 = vperm.slane %v2437_v14, 1  ;;  %v13411_v19 = vperm.slane %v2437_v14, 2 }
 0x2b1   : > { %v13374_v30 = vpop.f32.mrf.mxu2 }
 0x2b2   : > { %17887 = vst [vmem:[#allocation210_spill] sm:$0xff] %v13374_v30  ;;  %v13379_v29 = vpop.f32.mrf.mxu3  ;;  %v1962_v8 = vpop.f32.mrf.mxu0 }
 0x2b3   : > { %17888 = vst [vmem:[#allocation211_spill] sm:$0xff] %v13379_v29  ;;  %v2309_v45 = vadd.f32 %v1962_v8, %v1285_v11  ;;  %v2051_v28 = vpop.f32.mrf.mxu1  ;;  %v1287_v11 = vadd.f32 %v12933_v6, %v12469_v47  ;;  %v11697_v6 = vld [vmem:[%s17604_s3 + $0x74c] sm:$0xf0] }
 0x2b4   : > { %v2310_v43 = vadd.f32 %v2051_v28, %v1374_v42  ;;  %v9685_v28 = vld [vmem:[%s17604_s3 + $0x640] sm:$0xf]  ;;  %v9814_v32 = vor.u32 %v11697_v6, %v9813_v44 }
 0x2b5   : > { %2001 = vmatmul.bf16.gmra.mxu0 %v11423_v9  ;;  %v2447_v29 = vadd.f32 %v13384_v37, %v2309_v45 }
 0x2b6   : > { %2090 = vmatmul.bf16.gmra.mxu1 %v11423_v9  ;;  %2179 = vmatmul.bf16.gmra.mxu2 %v11423_v9  ;;  %v2448_v25 = vadd.f32 %v13388_v38, %v2310_v43 }
 0x2b7   : > { %2268 = vmatmul.bf16.gmra.mxu3 %v11423_v9  ;;  %v11665_v9 = vld [vmem:[%s17604_s3 + $0x64c] sm:$0xf0] }
 0x2b8   : > { %v9686_v47 = vor.u32 %v11665_v9, %v9685_v28  ;;  %3848 = vmatpush.bf16.msrb.mxu3 %v9814_v32  ;;  %v2575_v28 = vmax.f32 %v2447_v29, 0.0  ;;  %v1465_v32 = vadd.f32 %v12949_v52, %v12485_v55  ;;  %v2576_v43 = vmax.f32 %v2448_v25, 0.0  ;;  %v11633_v29 = vld [vmem:[%s17604_s3 + $0x54c] sm:$0xf0]  ;;  %v11424_v25 = vld [vmem:[%s12324_s29 + $0x148] sm:$0xff] }
 0x2b9   : > { %v2140_v8 = vpop.f32.mrf.mxu2  ;;  %v1290_v9 = vadd.f32 %v12954_v22, %v12490_v58 }
 0x2ba   : > { %v2311_v46 = vadd.f32 %v2140_v8, %v1463_v35  ;;  %v2229_v1 = vpop.f32.mrf.mxu3  ;;  %v1964_v42 = vpop.f32.mrf.mxu0  ;;  %3799 = vmatpush.bf16.msrb.mxu2 %v9686_v47  ;;  %v13413_v35 = vperm.slane %v2437_v14, 3 }
 0x2bb   : > { %v2312_v30 = vadd.f32 %v2229_v1, %v1552_v41  ;;  %v2313_v27 = vadd.f32 %v1964_v42, %v1287_v11  ;;  %v2053_v26 = vpop.f32.mrf.mxu1  ;;  %v9429_v41 = vld [vmem:[%s17604_s3 + $0x440] sm:$0xf]  ;;  %v1554_v11 = vadd.f32 %v12952_v31, %v12488_v57 }
 0x2bc   : > { %v2314_v33 = vadd.f32 %v2053_v26, %v1376_v40  ;;  %v11601_v26 = vld [vmem:[%s17604_s3 + $0x44c] sm:$0xf0]  ;;  %v1379_v40 = vadd.f32 %v12956_v20, %v12492_v59  ;;  %v2449_v1 = vadd.f32 %v13411_v19, %v2311_v46 }
 0x2bd   : > { %v2451_v51 = vadd.f32 %v13384_v37, %v2313_v27  ;;  %v9430_v14 = vor.u32 %v11601_v26, %v9429_v41  ;;  %v2450_v57 = vadd.f32 %v13413_v35, %v2312_v30  ;;  %v1468_v30 = vadd.f32 %v12958_v50, %v12494_v60 }
 0x2be   : > { %v2452_v8 = vadd.f32 %v13388_v38, %v2314_v33  ;;  %v9557_v33 = vld [vmem:[%s17604_s3 + $0x540] sm:$0xf]  ;;  %v2577_v59 = vmax.f32 %v2449_v1, 0.0 }
 0x2bf   : > { %v2579_v45 = vmax.f32 %v2451_v51, 0.0  ;;  %v9558_v52 = vor.u32 %v11633_v29, %v9557_v33  ;;  %3701 = vmatpush.bf16.msrb.mxu0 %v9430_v14  ;;  %v2578_v46 = vmax.f32 %v2450_v57, 0.0  ;;  %v1381_v33 = vadd.f32 %v12964_v54, %v12500_v63 }
 0x2c0   : > { %v2580_v27 = vmax.f32 %v2452_v8, 0.0  ;;  %v1470_v63 = vadd.f32 %v12966_v39, %v12502_v0 }
 0x2c1   : > { %v13434_v44 = vpack.c.bf16 %v2579_v45, %v2575_v28  ;;  %v2142_v55 = vpop.f32.mrf.mxu2  ;;  %3750 = vmatpush.bf16.msrb.mxu1 %v9558_v52 }
 0x2c2   : > { %v13440_v42 = vpack.c.bf16 %v2580_v27, %v2576_v43  ;;  %v2315_v47 = vadd.f32 %v2142_v55, %v1465_v32  ;;  %v2231_v6 = vpop.f32.mrf.mxu3  ;;  %v1967_v51 = vpop.f32.mrf.mxu0  ;;  %v1557_v32 = vadd.f32 %v12960_v49, %v12496_v61  ;;  %v1292_v43 = vadd.f32 %v12962_v56, %v12498_v62 }
 0x2c3   : > { %v2316_v31 = vadd.f32 %v2231_v6, %v1554_v11  ;;  %v2317_v58 = vadd.f32 %v1967_v51, %v1290_v9  ;;  %v2056_v22 = vpop.f32.mrf.mxu1  ;;  %v1295_v6 = vadd.f32 %v12971_v16, %v12507_v3 }
 0x2c4   : > { %v2453_v8 = vadd.f32 %v13411_v19, %v2315_v47  ;;  %v2318_v28 = vadd.f32 %v2056_v22, %v1379_v40  ;;  %v1559_v47 = vadd.f32 %v12969_v18, %v12505_v2 }
 0x2c5   : > { %v2454_v45 = vadd.f32 %v13413_v35, %v2316_v31  ;;  %2006 = vmatmul.bf16.gmra.mxu0 %v11424_v25  ;;  %v2455_v55 = vadd.f32 %v13384_v37, %v2317_v58  ;;  %v11425_v31 = vld [vmem:[%s12324_s29 + $0x150] sm:$0xff]  ;;  %v1384_v58 = vadd.f32 %v12973_v15, %v12509_v4 }
 0x2c6   : > { %v2581_v20 = vmax.f32 %v2453_v8, 0.0  ;;  %2095 = vmatmul.bf16.gmra.mxu1 %v11424_v25  ;;  %2184 = vmatmul.bf16.gmra.mxu2 %v11424_v25  ;;  %v2456_v61 = vadd.f32 %v13388_v38, %v2318_v28 }
 0x2c7   : > { %v2582_v41 = vmax.f32 %v2454_v45, 0.0  ;;  %2273 = vmatmul.bf16.gmra.mxu3 %v11424_v25  ;;  %v2583_v52 = vmax.f32 %v2455_v55, 0.0  ;;  %v11693_v55 = vld [vmem:[%s17604_s3 + $0x72c] sm:$0xf0] }
 0x2c8   : > { %v13447_v26 = vpack.c.bf16 %v2581_v20, %v2577_v59  ;;  %v2584_v54 = vmax.f32 %v2456_v61, 0.0 }
 0x2c9   : > { %v13453_v27 = vpack.c.bf16 %v2582_v41, %v2578_v46  ;;  %v2145_v14 = vpop.f32.mrf.mxu2 }
 0x2ca   : > { %v2319_v29 = vadd.f32 %v2145_v14, %v1468_v30  ;;  %v2234_v11 = vpop.f32.mrf.mxu3  ;;  %v1969_v9 = vpop.f32.mrf.mxu0  ;;  %v1473_v30 = vadd.f32 %v12987_v7, %v12523_v10  ;;  %v1297_v14 = vadd.f32 %v12991_v53, %v12527_v13  ;;  %v9797_v10 = vld [vmem:[%s17604_s3 + $0x720] sm:$0xf] }
 0x2cb   : > { %v2320_v60 = vadd.f32 %v2234_v11, %v1557_v32  ;;  %v2321_v50 = vadd.f32 %v1969_v9, %v1292_v43  ;;  %v2058_v25 = vpop.f32.mrf.mxu1  ;;  %v1562_v43 = vadd.f32 %v12989_v5, %v12525_v12  ;;  %v9669_v11 = vld [vmem:[%s17604_s3 + $0x620] sm:$0xf]  ;;  %v11661_v9 = vld [vmem:[%s17604_s3 + $0x62c] sm:$0xf0]  ;;  %v1386_v12 = vadd.f32 %v12993_v48, %v12538_v17 }
 0x2cc   : > { %v2322_v49 = vadd.f32 %v2058_v25, %v1381_v33  ;;  %v2457_v22 = vadd.f32 %v13411_v19, %v2319_v29  ;;  %v9670_v7 = vor.u32 %v11661_v9, %v9669_v11 }
 0x2cd   : > { %v2459_v62 = vadd.f32 %v13384_v37, %v2321_v50  ;;  %v2458_v45 = vadd.f32 %v13413_v35, %v2320_v60 }
 0x2ce   : > { %v2460_v56 = vadd.f32 %v13388_v38, %v2322_v49  ;;  %v2585_v46 = vmax.f32 %v2457_v22, 0.0  ;;  %v9798_v49 = vor.u32 %v11693_v55, %v9797_v10  ;;  %3800 = vmatpush.bf16.msrb.mxu2 %v9670_v7  ;;  %v1564_v22 = vadd.f32 %v13010_v34, %v12546_v23  ;;  %v17892_v10 = vld [vmem:[#allocation6_spill] sm:$0xff]  ;;  %v17895_v7 = vld [vmem:[#allocation111_spill] sm:$0xff] }
 0x2cf   : > { %v2587_v40 = vmax.f32 %v2459_v62, 0.0  ;;  %v2586_v15 = vmax.f32 %v2458_v45, 0.0 }
 0x2d0   : > { %v2588_v1 = vmax.f32 %v2460_v56, 0.0  ;;  %3849 = vmatpush.bf16.msrb.mxu3 %v9798_v49 }
 0x2d1   : > { %v13467_v51 = vpack.c.bf16 %v2587_v40, %v2583_v52  ;;  %v2147_v57 = vpop.f32.mrf.mxu2 }
 0x2d2   : > { %v13473_v8 = vpack.c.bf16 %v2588_v1, %v2584_v54  ;;  %v2323_v0 = vadd.f32 %v2147_v57, %v1470_v63  ;;  %v2236_v39 = vpop.f32.mrf.mxu3  ;;  %v1972_v28 = vpop.f32.mrf.mxu0  ;;  %v9413_v63 = vld [vmem:[%s17604_s3 + $0x420] sm:$0xf]  ;;  %v11597_v54 = vld [vmem:[%s17604_s3 + $0x42c] sm:$0xf0]  ;;  %v1475_v1 = vadd.f32 %v13007_v36, %v12543_v21  ;;  %v11426_v36 = vld [vmem:[%s12324_s29 + $0x158] sm:$0xff] }
 0x2d3   : > { %v2324_v2 = vadd.f32 %v2236_v39, %v1559_v47  ;;  %v2325_v18 = vadd.f32 %v1972_v28, %v1295_v6  ;;  %v2061_v59 = vpop.f32.mrf.mxu1  ;;  %v9414_v57 = vor.u32 %v11597_v54, %v9413_v63 }
 0x2d4   : > { %v2461_v3 = vadd.f32 %v13411_v19, %v2323_v0  ;;  %v2326_v16 = vadd.f32 %v2061_v59, %v1384_v58  ;;  %v11629_v58 = vld [vmem:[%s17604_s3 + $0x52c] sm:$0xf0]  ;;  %v17889_v0 = vld [vmem:[#allocation108_spill] sm:$0xff] }
 0x2d5   : > { %v2462_v20 = vadd.f32 %v13413_v35, %v2324_v2  ;;  %2011 = vmatmul.bf16.gmra.mxu0 %v11425_v31  ;;  %v2463_v60 = vadd.f32 %v13384_v37, %v2325_v18  ;;  %v1300_v39 = vadd.f32 %v17889_v0, %v12548_v24  ;;  %v17890_v2 = vld [vmem:[#allocation5_spill] sm:$0xff] }
 0x2d6   : > { %v2589_v4 = vmax.f32 %v2461_v3, 0.0  ;;  %2100 = vmatmul.bf16.gmra.mxu1 %v11425_v31  ;;  %2189 = vmatmul.bf16.gmra.mxu2 %v11425_v31  ;;  %v2464_v62 = vadd.f32 %v13388_v38, %v2326_v16  ;;  %v17891_v18 = vld [vmem:[#allocation109_spill] sm:$0xff] }
 0x2d7   : > { %v2590_v41 = vmax.f32 %v2462_v20, 0.0  ;;  %2278 = vmatmul.bf16.gmra.mxu3 %v11425_v31  ;;  %v2591_v52 = vmax.f32 %v2463_v60, 0.0  ;;  %v9541_v31 = vld [vmem:[%s17604_s3 + $0x520] sm:$0xf]  ;;  %v1389_v59 = vadd.f32 %v17891_v18, %v17890_v2  ;;  %3702 = vmatpush.bf16.msrb.mxu0 %v9414_v57  ;;  %v17896_v60 = vld [vmem:[#allocation8_spill] sm:$0xff] }
 0x2d8   : > { %v13480_v32 = vpack.c.bf16 %v2589_v4, %v2585_v46  ;;  %v2592_v47 = vmax.f32 %v2464_v62, 0.0  ;;  %v9542_v45 = vor.u32 %v11629_v58, %v9541_v31  ;;  %v17898_v62 = vld [vmem:[#allocation9_spill] sm:$0xff]  ;;  %v17902_v18 = vld [vmem:[#allocation11_spill] sm:$0xff] }
 0x2d9   : > { %v13486_v33 = vpack.c.bf16 %v2590_v41, %v2586_v15  ;;  %v2150_v29 = vpop.f32.mrf.mxu2 }
 0x2da   : > { %v2327_v5 = vadd.f32 %v2150_v29, %v1473_v30  ;;  %v2239_v13 = vpop.f32.mrf.mxu3  ;;  %v1974_v53 = vpop.f32.mrf.mxu0  ;;  %3751 = vmatpush.bf16.msrb.mxu1 %v9542_v45 }
 0x2db   : > { %v2328_v50 = vadd.f32 %v2239_v13, %v1562_v43  ;;  %v2329_v25 = vadd.f32 %v1974_v53, %v1297_v14  ;;  %v2063_v61 = vpop.f32.mrf.mxu1  ;;  %v17894_v53 = vld [vmem:[#allocation7_spill] sm:$0xff] }
 0x2dc   : > { %v2330_v56 = vadd.f32 %v2063_v61, %v1386_v12  ;;  %v2465_v3 = vadd.f32 %v13411_v19, %v2327_v5  ;;  %v17893_v12 = vld [vmem:[#allocation110_spill] sm:$0xff]  ;;  %v1567_v55 = vadd.f32 %v17895_v7, %v17894_v53 }
 0x2dd   : > { %v2467_v17 = vadd.f32 %v13384_v37, %v2329_v25  ;;  %v2466_v23 = vadd.f32 %v13413_v35, %v2328_v50  ;;  %v1478_v5 = vadd.f32 %v17893_v12, %v17892_v10  ;;  %v17897_v50 = vld [vmem:[#allocation112_spill] sm:$0xff] }
 0x2de   : > { %v2468_v48 = vadd.f32 %v13388_v38, %v2330_v56  ;;  %v2593_v14 = vmax.f32 %v2465_v3, 0.0  ;;  %v1302_v25 = vadd.f32 %v17897_v50, %v17896_v60  ;;  %v17899_v56 = vld [vmem:[#allocation113_spill] sm:$0xff] }
 0x2df   : > { %v2595_v40 = vmax.f32 %v2467_v17, 0.0  ;;  %v2594_v11 = vmax.f32 %v2466_v23, 0.0  ;;  %v1391_v17 = vadd.f32 %v17899_v56, %v17898_v62  ;;  %v17908_v56 = vld [vmem:[#allocation14_spill] sm:$0xff] }
 0x2e0   : > { %v2596_v6 = vmax.f32 %v2468_v48, 0.0 }
 0x2e1   : > { %v13524_v28 = vpack.c.bf16 %v2595_v40, %v2591_v52  ;;  %v2152_v21 = vpop.f32.mrf.mxu2 }
 0x2e2   : > { %v13530_v16 = vpack.c.bf16 %v2596_v6, %v2592_v47  ;;  %v2331_v20 = vadd.f32 %v2152_v21, %v1475_v1  ;;  %v2241_v46 = vpop.f32.mrf.mxu3  ;;  %v1977_v4 = vpop.f32.mrf.mxu0  ;;  %v17901_v21 = vld [vmem:[#allocation114_spill] sm:$0xff] }
 0x2e3   : > { %v2332_v34 = vadd.f32 %v2241_v46, %v1564_v22  ;;  %v2333_v24 = vadd.f32 %v1977_v4, %v1300_v39  ;;  %v2066_v15 = vpop.f32.mrf.mxu1  ;;  %v17900_v39 = vld [vmem:[#allocation10_spill] sm:$0xff]  ;;  %v17905_v46 = vld [vmem:[#allocation116_spill] sm:$0xff] }
 0x2e4   : > { %v2469_v41 = vadd.f32 %v13411_v19, %v2331_v20  ;;  %v2334_v30 = vadd.f32 %v2066_v15, %v1389_v59  ;;  %v17903_v59 = vld [vmem:[#allocation115_spill] sm:$0xff]  ;;  %v17904_v20 = vld [vmem:[#allocation12_spill] sm:$0xff]  ;;  %v17906_v15 = vld [vmem:[#allocation13_spill] sm:$0xff] }
 0x2e5   : > { %v2470_v43 = vadd.f32 %v13413_v35, %v2332_v34  ;;  %2016 = vmatmul.bf16.gmra.mxu0 %v11426_v36  ;;  %v2471_v63 = vadd.f32 %v13384_v37, %v2333_v24  ;;  %v1569_v3 = vadd.f32 %v17903_v59, %v17902_v18  ;;  %v1305_v4 = vadd.f32 %v17905_v46, %v17904_v20  ;;  %v11427_v24 = vld [vmem:[%s12324_s29 + $0x160] sm:$0xff] }
 0x2e6   : > { %v2597_v29 = vmax.f32 %v2469_v41, 0.0  ;;  %2105 = vmatmul.bf16.gmra.mxu1 %v11426_v36  ;;  %2194 = vmatmul.bf16.gmra.mxu2 %v11426_v36  ;;  %v2472_v6 = vadd.f32 %v13388_v38, %v2334_v30  ;;  %v17907_v41 = vld [vmem:[#allocation117_spill] sm:$0xff] }
 0x2e7   : > { %v2598_v9 = vmax.f32 %v2470_v43, 0.0  ;;  %2283 = vmatmul.bf16.gmra.mxu3 %v11426_v36  ;;  %v2599_v22 = vmax.f32 %v2471_v63, 0.0  ;;  %v1480_v36 = vadd.f32 %v17901_v21, %v17900_v39  ;;  %v1394_v30 = vadd.f32 %v17907_v41, %v17906_v15  ;;  %v17911_v63 = vld [vmem:[#allocation119_spill] sm:$0xff]  ;;  %v17914_v39 = vld [vmem:[#allocation17_spill] sm:$0xff] }
 0x2e8   : > { %v13537_v13 = vpack.c.bf16 %v2597_v29, %v2593_v14  ;;  %v2600_v45 = vmax.f32 %v2472_v6, 0.0  ;;  %v17915_v21 = vld [vmem:[#allocation121_spill] sm:$0xff] }
 0x2e9   : > { %v13543_v61 = vpack.c.bf16 %v2598_v9, %v2594_v11  ;;  %v2155_v49 = vpop.f32.mrf.mxu2 }
 0x2ea   : > { %v2335_v48 = vadd.f32 %v2155_v49, %v1478_v5  ;;  %v2244_v52 = vpop.f32.mrf.mxu3  ;;  %v1979_v40 = vpop.f32.mrf.mxu0 }
 0x2eb   : > { %v2336_v54 = vadd.f32 %v2244_v52, %v1567_v55  ;;  %v2337_v1 = vadd.f32 %v1979_v40, %v1302_v25  ;;  %v2068_v47 = vpop.f32.mrf.mxu1  ;;  %v17910_v40 = vld [vmem:[#allocation15_spill] sm:$0xff] }
 0x2ec   : > { %v2338_v57 = vadd.f32 %v2068_v47, %v1391_v17  ;;  %v2473_v43 = vadd.f32 %v13411_v19, %v2335_v48  ;;  %v17909_v17 = vld [vmem:[#allocation118_spill] sm:$0xff]  ;;  %v17913_v47 = vld [vmem:[#allocation120_spill] sm:$0xff] }
 0x2ed   : > { %v2475_v31 = vadd.f32 %v13384_v37, %v2337_v1  ;;  %v2474_v10 = vadd.f32 %v13413_v35, %v2336_v54  ;;  %v1483_v48 = vadd.f32 %v17909_v17, %v17908_v56  ;;  %v1572_v54 = vadd.f32 %v17911_v63, %v17910_v40  ;;  %v17912_v1 = vld [vmem:[#allocation16_spill] sm:$0xff] }
 0x2ee   : > { %v2476_v58 = vadd.f32 %v13388_v38, %v2338_v57  ;;  %v2601_v50 = vmax.f32 %v2473_v43, 0.0  ;;  %v1307_v6 = vadd.f32 %v17913_v47, %v17912_v1  ;;  %v17920_v17 = vld [vmem:[#allocation20_spill] sm:$0xff] }
 0x2ef   : > { %v2603_v0 = vmax.f32 %v2475_v31, 0.0  ;;  %v2602_v49 = vmax.f32 %v2474_v10, 0.0  ;;  %v11593_v10 = vld [vmem:[%s17604_s3 + $0x40c] sm:$0xf0]  ;;  %v11428_v1 = vld [vmem:[%s12324_s29 + $0x168] sm:$0xff] }
 0x2f0   : > { %v2604_v2 = vmax.f32 %v2476_v58, 0.0  ;;  %v9653_v58 = vld [vmem:[%s17604_s3 + $0x600] sm:$0xf] }
 0x2f1   : > { %v13557_v23 = vpack.c.bf16 %v2603_v0, %v2599_v22  ;;  %v2157_v34 = vpop.f32.mrf.mxu2  ;;  %v11657_v22 = vld [vmem:[%s17604_s3 + $0x60c] sm:$0xf0]  ;;  %v9781_v0 = vld [vmem:[%s17604_s3 + $0x700] sm:$0xf] }
 0x2f2   : > { %v13563_v14 = vpack.c.bf16 %v2604_v2, %v2600_v45  ;;  %v2339_v29 = vadd.f32 %v2157_v34, %v1480_v36  ;;  %v2246_v11 = vpop.f32.mrf.mxu3  ;;  %v1982_v9 = vpop.f32.mrf.mxu0  ;;  %v1396_v36 = vadd.f32 %v17915_v21, %v17914_v39  ;;  %v9654_v59 = vor.u32 %v11657_v22, %v9653_v58 }
 0x2f3   : > { %v2340_v12 = vadd.f32 %v2246_v11, %v1569_v3  ;;  %v2341_v5 = vadd.f32 %v1982_v9, %v1305_v4  ;;  %v2071_v53 = vpop.f32.mrf.mxu1  ;;  %v11689_v3 = vld [vmem:[%s17604_s3 + $0x70c] sm:$0xf0]  ;;  %v9397_v9 = vld [vmem:[%s17604_s3 + $0x400] sm:$0xf] }
 0x2f4   : > { %v2477_v7 = vadd.f32 %v13411_v19, %v2339_v29  ;;  %v2342_v55 = vadd.f32 %v2071_v53, %v1394_v30  ;;  %3801 = vmatpush.bf16.msrb.mxu2 %v9654_v59 }
 0x2f5   : > { %v2478_v60 = vadd.f32 %v13413_v35, %v2340_v12  ;;  %2021 = vmatmul.bf16.gmra.mxu0 %v11427_v24  ;;  %v2479_v20 = vadd.f32 %v13384_v37, %v2341_v5  ;;  %v17916_v12 = vld [vmem:[#allocation18_spill] sm:$0xff] }
 0x2f6   : > { %v2605_v25 = vmax.f32 %v2477_v7, 0.0  ;;  %2110 = vmatmul.bf16.gmra.mxu1 %v11427_v24  ;;  %2199 = vmatmul.bf16.gmra.mxu2 %v11427_v24  ;;  %v2480_v15 = vadd.f32 %v13388_v38, %v2342_v55  ;;  %v17917_v5 = vld [vmem:[#allocation122_spill] sm:$0xff] }
 0x2f7   : > { %v2606_v62 = vmax.f32 %v2478_v60, 0.0  ;;  %2288 = vmatmul.bf16.gmra.mxu3 %v11427_v24  ;;  %v9782_v24 = vor.u32 %v11689_v3, %v9781_v0  ;;  %v2607_v29 = vmax.f32 %v2479_v20, 0.0  ;;  %v1485_v53 = vadd.f32 %v17917_v5, %v17916_v12  ;;  %v17928_v12 = vld [vmem:[#allocation24_spill] sm:$0xff] }
 0x2f8   : > { %v13570_v52 = vpack.c.bf16 %v2605_v25, %v2601_v50  ;;  %v2608_v7 = vmax.f32 %v2480_v15, 0.0  ;;  %v9398_v60 = vor.u32 %v11593_v10, %v9397_v9  ;;  %v9525_v50 = vld [vmem:[%s17604_s3 + $0x500] sm:$0xf]  ;;  %v11625_v25 = vld [vmem:[%s17604_s3 + $0x50c] sm:$0xf0]  ;;  %v17929_v5 = vld [vmem:[#allocation128_spill] sm:$0xff] }
 0x2f9   : > { %v13576_v57 = vpack.c.bf16 %v2606_v62, %v2602_v49  ;;  %v2160_v31 = vpop.f32.mrf.mxu2  ;;  %3850 = vmatpush.bf16.msrb.mxu3 %v9782_v24  ;;  %v17918_v49 = vld [vmem:[#allocation19_spill] sm:$0xff]  ;;  %v9526_v47 = vor.u32 %v11625_v25, %v9525_v50  ;;  %v17931_v50 = vld [vmem:[#allocation129_spill] sm:$0xff] }
 0x2fa   : > { %v2343_v45 = vadd.f32 %v2160_v31, %v1483_v48  ;;  %v2249_v2 = vpop.f32.mrf.mxu3  ;;  %v1984_v18 = vpop.f32.mrf.mxu0  ;;  %v17919_v62 = vld [vmem:[#allocation123_spill] sm:$0xff]  ;;  %v17921_v48 = vld [vmem:[#allocation124_spill] sm:$0xff]  ;;  %v17923_v31 = vld [vmem:[#allocation125_spill] sm:$0xff]  ;;  %3703 = vmatpush.bf16.msrb.mxu0 %v9398_v60 }
 0x2fb   : > { %v2344_v46 = vadd.f32 %v2249_v2, %v1572_v54  ;;  %v2345_v4 = vadd.f32 %v1984_v18, %v1307_v6  ;;  %v2073_v34 = vpop.f32.mrf.mxu1  ;;  %v1574_v56 = vadd.f32 %v17919_v62, %v17918_v49  ;;  %v1310_v40 = vadd.f32 %v17921_v48, %v17920_v17  ;;  %v17922_v6 = vld [vmem:[#allocation21_spill] sm:$0xff]  ;;  %3752 = vmatpush.bf16.msrb.mxu1 %v9526_v47  ;;  %v17927_v9 = vld [vmem:[#allocation127_spill] sm:$0xff] }
 0x2fc   : > { %v2346_v41 = vadd.f32 %v2073_v34, %v1396_v36  ;;  %v1399_v58 = vadd.f32 %v17923_v31, %v17922_v6  ;;  %v2481_v22 = vadd.f32 %v13411_v19, %v2343_v45  ;;  %v17930_v60 = vld [vmem:[#allocation25_spill] sm:$0xff] }
 0x2fd   : > { %v2483_v30 = vadd.f32 %v13384_v37, %v2345_v4  ;;  %v2482_v2 = vadd.f32 %v13413_v35, %v2344_v46  ;;  %v1401_v25 = vadd.f32 %v17931_v50, %v17930_v60 }
 0x2fe   : > { %v2484_v43 = vadd.f32 %v13388_v38, %v2346_v41  ;;  %v2609_v24 = vmax.f32 %v2481_v22, 0.0 }
 0x2ff   : > { %v2611_v11 = vmax.f32 %v2483_v30, 0.0  ;;  %v2610_v15 = vmax.f32 %v2482_v2, 0.0  ;;  %v17924_v30 = vld [vmem:[#allocation22_spill] sm:$0xff] }
 0x300   : > { %v2612_v55 = vmax.f32 %v2484_v43, 0.0  ;;  %v17925_v43 = vld [vmem:[#allocation126_spill] sm:$0xff] }
 0x301   : > { %v13614_v63 = vpack.c.bf16 %v2611_v11, %v2607_v29  ;;  %v2162_v54 = vpop.f32.mrf.mxu2  ;;  %v1488_v46 = vadd.f32 %v17925_v43, %v17924_v30  ;;  %v17926_v11 = vld [vmem:[#allocation23_spill] sm:$0xff]  ;;  %v17938_v30 = vld [vmem:[#allocation29_spill] sm:$0xff] }
 0x302   : > { %v13620_v0 = vpack.c.bf16 %v2612_v55, %v2608_v7  ;;  %v2347_v39 = vadd.f32 %v2162_v54, %v1485_v53  ;;  %v2251_v21 = vpop.f32.mrf.mxu3  ;;  %v1987_v36 = vpop.f32.mrf.mxu0  ;;  %v1577_v10 = vadd.f32 %v17927_v9, %v17926_v11  ;;  %v1312_v53 = vadd.f32 %v17929_v5, %v17928_v12  ;;  %v17939_v43 = vld [vmem:[#allocation133_spill] sm:$0xff] }
 0x303   : > { %v2348_v18 = vadd.f32 %v2251_v21, %v1574_v56  ;;  %v2349_v59 = vadd.f32 %v1987_v36, %v1310_v40  ;;  %v2076_v3 = vpop.f32.mrf.mxu1  ;;  %v17933_v21 = vld [vmem:[#allocation130_spill] sm:$0xff] }
 0x304   : > { %v2485_v20 = vadd.f32 %v13411_v19, %v2347_v39  ;;  %v2350_v4 = vadd.f32 %v2076_v3, %v1399_v58  ;;  %v17932_v39 = vld [vmem:[#allocation26_spill] sm:$0xff]  ;;  %v17934_v3 = vld [vmem:[#allocation27_spill] sm:$0xff] }
 0x305   : > { %v2486_v34 = vadd.f32 %v13413_v35, %v2348_v18  ;;  %2026 = vmatmul.bf16.gmra.mxu0 %v11428_v1  ;;  %v2487_v17 = vadd.f32 %v13384_v37, %v2349_v59  ;;  %v1490_v36 = vadd.f32 %v17933_v21, %v17932_v39  ;;  %v17935_v59 = vld [vmem:[#allocation131_spill] sm:$0xff]  ;;  %v17944_v39 = vld [vmem:[#allocation32_spill] sm:$0xff] }
 0x306   : > { %v2613_v45 = vmax.f32 %v2485_v20, 0.0  ;;  %2115 = vmatmul.bf16.gmra.mxu1 %v11428_v1  ;;  %2204 = vmatmul.bf16.gmra.mxu2 %v11428_v1  ;;  %v1579_v20 = vadd.f32 %v17935_v59, %v17934_v3  ;;  %v17945_v21 = vld [vmem:[#allocation136_spill] sm:$0xff]  ;;  %v17946_v3 = vld [vmem:[#allocation33_spill] sm:$0xff] }
 0x307   : > { %v2614_v41 = vmax.f32 %v2486_v34, 0.0  ;;  %2293 = vmatmul.bf16.gmra.mxu3 %v11428_v1  ;;  %v2488_v1 = vadd.f32 %v13388_v38, %v2350_v4  ;;  %v2615_v58 = vmax.f32 %v2487_v17, 0.0  ;;  %v17936_v34 = vld [vmem:[#allocation28_spill] sm:$0xff]  ;;  %v17947_v59 = vld [vmem:[#allocation137_spill] sm:$0xff] }
 0x308   : > { %v13627_v29 = vpack.c.bf16 %v2613_v45, %v2609_v24  ;;  %v17937_v24 = vld [vmem:[#allocation132_spill] sm:$0xff] }
 0x309   : > { %v13633_v7 = vpack.c.bf16 %v2614_v41, %v2610_v15  ;;  %v2165_v55 = vpop.f32.mrf.mxu2  ;;  %v2616_v2 = vmax.f32 %v2488_v1, 0.0  ;;  %v1315_v45 = vadd.f32 %v17937_v24, %v17936_v34  ;;  %v11429_v41 = vld [vmem:[%s12324_s29 + $0x170] sm:$0xff]  ;;  %v17940_v1 = vld [vmem:[#allocation30_spill] sm:$0xff] }
 0x30a   : > { %v2351_v49 = vadd.f32 %v2165_v55, %v1488_v46  ;;  %v2254_v62 = vpop.f32.mrf.mxu3  ;;  %v1989_v56 = vpop.f32.mrf.mxu0  ;;  %v1404_v46 = vadd.f32 %v17939_v43, %v17938_v30  ;;  %v11715_v30 = vld [vmem:[%s17604_s3 + $0x7e4] sm:$0xf] }
 0x30b   : > { %v2352_v48 = vadd.f32 %v2254_v62, %v1577_v10  ;;  %v2353_v40 = vadd.f32 %v1989_v56, %v1312_v53  ;;  %v2078_v54 = vpop.f32.mrf.mxu1 }
 0x30c   : > { %v2354_v47 = vadd.f32 %v2078_v54, %v1401_v25  ;;  %v2489_v11 = vadd.f32 %v13411_v19, %v2351_v49 }
 0x30d   : > { %v2491_v6 = vadd.f32 %v13384_v37, %v2353_v40  ;;  %v2490_v53 = vadd.f32 %v13413_v35, %v2352_v48 }
 0x30e   : > { %v2492_v31 = vadd.f32 %v13388_v38, %v2354_v47  ;;  %v2617_v17 = vmax.f32 %v2489_v11, 0.0  ;;  %v17941_v47 = vld [vmem:[#allocation134_spill] sm:$0xff] }
 0x30f   : > { %v2619_v22 = vmax.f32 %v2491_v6, 0.0  ;;  %v2618_v49 = vmax.f32 %v2490_v53, 0.0  ;;  %v1493_v6 = vadd.f32 %v17941_v47, %v17940_v1 }
 0x310   : > { %v2620_v18 = vmax.f32 %v2492_v31, 0.0  ;;  %v17942_v31 = vld [vmem:[#allocation31_spill] sm:$0xff] }
 0x311   : > { %v13647_v15 = vpack.c.bf16 %v2619_v22, %v2615_v58  ;;  %v2167_v4 = vpop.f32.mrf.mxu2  ;;  %v17943_v58 = vld [vmem:[#allocation135_spill] sm:$0xff] }
 0x312   : > { %v13653_v9 = vpack.c.bf16 %v2620_v18, %v2616_v2  ;;  %v2355_v10 = vadd.f32 %v2167_v4, %v1490_v36  ;;  %v2256_v12 = vpop.f32.mrf.mxu3  ;;  %v1992_v5 = vpop.f32.mrf.mxu0  ;;  %v1582_v22 = vadd.f32 %v17943_v58, %v17942_v31  ;;  %v1317_v36 = vadd.f32 %v17945_v21, %v17944_v39  ;;  %v11683_v4 = vld [vmem:[%s17604_s3 + $0x6e4] sm:$0xf]  ;;  %v17953_v39 = vld [vmem:[#allocation140_spill] sm:$0xff] }
 0x313   : > { %v2356_v55 = vadd.f32 %v2256_v12, %v1579_v20  ;;  %v2357_v60 = vadd.f32 %v1992_v5, %v1315_v45  ;;  %v2081_v50 = vpop.f32.mrf.mxu1  ;;  %v1406_v20 = vadd.f32 %v17947_v59, %v17946_v3  ;;  %v9895_v5 = vld [vmem:[%s17604_s3 + $0x7f0] sm:$0xf0]  ;;  %v17950_v31 = vld [vmem:[#allocation35_spill] sm:$0xff] }
 0x314   : > { %v2493_v25 = vadd.f32 %v13411_v19, %v2355_v10  ;;  %v2358_v62 = vadd.f32 %v2081_v50, %v1404_v46  ;;  %v9898_v50 = vor.u32 %v11715_v30, %v9895_v5  ;;  %v17951_v58 = vld [vmem:[#allocation139_spill] sm:$0xff]  ;;  %v9639_v5 = vld [vmem:[%s17604_s3 + $0x5f0] sm:$0xf0] }
 0x315   : > { %v2494_v56 = vadd.f32 %v13413_v35, %v2356_v55  ;;  %2031 = vmatmul.bf16.gmra.mxu0 %v11429_v41  ;;  %v2495_v43 = vadd.f32 %v13384_v37, %v2357_v60 }
 0x316   : > { %v2621_v40 = vmax.f32 %v2493_v25, 0.0  ;;  %2120 = vmatmul.bf16.gmra.mxu1 %v11429_v41  ;;  %2209 = vmatmul.bf16.gmra.mxu2 %v11429_v41  ;;  %v2496_v53 = vadd.f32 %v13388_v38, %v2358_v62  ;;  %v17952_v62 = vld [vmem:[#allocation36_spill] sm:$0xff] }
 0x317   : > { %v2622_v54 = vmax.f32 %v2494_v56, 0.0  ;;  %2298 = vmatmul.bf16.gmra.mxu3 %v11429_v41  ;;  %v9767_v41 = vld [vmem:[%s17604_s3 + $0x6f0] sm:$0xf0]  ;;  %v2623_v60 = vmax.f32 %v2495_v43, 0.0  ;;  %v1320_v21 = vadd.f32 %v17953_v39, %v17952_v62  ;;  %v17959_v62 = vld [vmem:[#allocation143_spill] sm:$0xff] }
 0x318   : > { %v13660_v48 = vpack.c.bf16 %v2621_v40, %v2617_v17  ;;  %v9770_v12 = vor.u32 %v11683_v4, %v9767_v41  ;;  %4039 = vmatpush.bf16.msra.mxu3 %v9898_v50  ;;  %v17948_v40 = vld [vmem:[#allocation34_spill] sm:$0xff]  ;;  %v2624_v1 = vmax.f32 %v2496_v53, 0.0  ;;  %v11651_v4 = vld [vmem:[%s17604_s3 + $0x5e4] sm:$0xf] }
 0x319   : > { %v13666_v2 = vpack.c.bf16 %v2622_v54, %v2618_v49  ;;  %v2170_v18 = vpop.f32.mrf.mxu2  ;;  %v17949_v49 = vld [vmem:[#allocation138_spill] sm:$0xff] }
 0x31a   : > { %v2359_v34 = vadd.f32 %v2170_v18, %v1493_v6  ;;  %v2259_v24 = vpop.f32.mrf.mxu3  ;;  %v1994_v45 = vpop.f32.mrf.mxu0  ;;  %3990 = vmatpush.bf16.msra.mxu2 %v9770_v12  ;;  %v1495_v54 = vadd.f32 %v17949_v49, %v17948_v40  ;;  %v11430_v6 = vld [vmem:[%s12324_s29 + $0x178] sm:$0xff]  ;;  %v17955_v18 = vld [vmem:[#allocation141_spill] sm:$0xff]  ;;  %s11981_s29 = scalar_lea.hbm %s17608_s7, 16 }
 0x31b   : > { %v2360_v46 = vadd.f32 %v2259_v24, %v1582_v22  ;;  %v2361_v11 = vadd.f32 %v1994_v45, %v1317_v36  ;;  %v2083_v10 = vpop.f32.mrf.mxu1  ;;  %v1584_v22 = vadd.f32 %v17951_v58, %v17950_v31  ;;  %v17954_v36 = vld [vmem:[#allocation37_spill] sm:$0xff]  ;;  %v11619_v24 = vld [vmem:[%s17604_s3 + $0x4e4] sm:$0xf] }
 0x31c   : > { %v2362_v55 = vadd.f32 %v2083_v10, %v1406_v20  ;;  %v1409_v3 = vadd.f32 %v17955_v18, %v17954_v36  ;;  %v9511_v45 = vld [vmem:[%s17604_s3 + $0x4f0] sm:$0xf0]  ;;  %v2497_v41 = vadd.f32 %v13411_v19, %v2359_v34  ;;  %v17961_v36 = vld [vmem:[#allocation144_spill] sm:$0xff] }
 0x31d   : > { %v2499_v25 = vadd.f32 %v13384_v37, %v2361_v11  ;;  %v9514_v12 = vor.u32 %v11619_v24, %v9511_v45  ;;  %v2498_v53 = vadd.f32 %v13413_v35, %v2360_v46  ;;  %v17956_v46 = vld [vmem:[#allocation38_spill] sm:$0xff]  ;;  %v17962_v24 = vld [vmem:[#allocation41_spill] sm:$0xff] }
 0x31e   : > { %v2500_v56 = vadd.f32 %v13388_v38, %v2362_v55  ;;  %v2625_v40 = vmax.f32 %v2497_v41, 0.0  ;;  %v17963_v45 = vld [vmem:[#allocation145_spill] sm:$0xff] }
 0x31f   : > { %v2627_v17 = vmax.f32 %v2499_v25, 0.0  ;;  %3892 = vmatpush.bf16.msra.mxu0 %v9514_v12  ;;  %v11711_v12 = vld [vmem:[%s17604_s3 + $0x7c4] sm:$0xf] }
 0x320   : > { %v2628_v47 = vmax.f32 %v2500_v56, 0.0  ;;  %v9642_v56 = vor.u32 %v11651_v4, %v9639_v5  ;;  %v1411_v4 = vadd.f32 %v17963_v45, %v17962_v24  ;;  %v17970_v45 = vld [vmem:[#allocation45_spill] sm:$0xff] }
 0x321   : > { %v13695_v59 = vpack.c.bf16 %v2627_v17, %v2623_v60  ;;  %v2172_v20 = vpop.f32.mrf.mxu2 }
 0x322   : > { %v13707_v30 = vpack.c.bf16 %v2628_v47, %v2624_v1  ;;  %v2363_v43 = vadd.f32 %v2172_v20, %v1495_v54  ;;  %v2261_v11 = vpop.f32.mrf.mxu3  ;;  %v1997_v10 = vpop.f32.mrf.mxu0  ;;  %3941 = vmatpush.bf16.msra.mxu1 %v9642_v56  ;;  %v2626_v54 = vmax.f32 %v2498_v53, 0.0  ;;  %v17957_v47 = vld [vmem:[#allocation142_spill] sm:$0xff] }
 0x323   : > { %v2364_v55 = vadd.f32 %v2261_v11, %v1584_v22  ;;  %v2365_v50 = vadd.f32 %v1997_v10, %v1320_v21  ;;  %v2086_v25 = vpop.f32.mrf.mxu1  ;;  %v1498_v31 = vadd.f32 %v17957_v47, %v17956_v46  ;;  %v17958_v22 = vld [vmem:[#allocation39_spill] sm:$0xff]  ;;  %v17960_v21 = vld [vmem:[#allocation40_spill] sm:$0xff]  ;;  %v9751_v10 = vld [vmem:[%s17604_s3 + $0x6d0] sm:$0xf0] }
 0x324   : > { %v2501_v60 = vadd.f32 %v13411_v19, %v2363_v43  ;;  %v2366_v17 = vadd.f32 %v2086_v25, %v1409_v3  ;;  %v1587_v39 = vadd.f32 %v17959_v62, %v17958_v22  ;;  %v1322_v18 = vadd.f32 %v17961_v36, %v17960_v21  ;;  %v11679_v11 = vld [vmem:[%s17604_s3 + $0x6c4] sm:$0xf]  ;;  %v17964_v47 = vld [vmem:[#allocation42_spill] sm:$0xff] }
 0x325   : > { %v2502_v34 = vadd.f32 %v13413_v35, %v2364_v55  ;;  %2036 = vmatmul.bf16.gmra.mxu0 %v11430_v6  ;;  %v2503_v5 = vadd.f32 %v13384_v37, %v2365_v50  ;;  %v9754_v56 = vor.u32 %v11679_v11, %v9751_v10  ;;  %v17966_v21 = vld [vmem:[#allocation43_spill] sm:$0xff] }
 0x326   : > { %v2629_v49 = vmax.f32 %v2501_v60, 0.0  ;;  %2125 = vmatmul.bf16.gmra.mxu1 %v11430_v6  ;;  %2214 = vmatmul.bf16.gmra.mxu2 %v11430_v6  ;;  %v9879_v60 = vld [vmem:[%s17604_s3 + $0x7d0] sm:$0xf0]  ;;  %v17967_v36 = vld [vmem:[#allocation147_spill] sm:$0xff] }
 0x327   : > { %v2630_v1 = vmax.f32 %v2502_v34, 0.0  ;;  %2303 = vmatmul.bf16.gmra.mxu3 %v11430_v6  ;;  %v2504_v34 = vadd.f32 %v13388_v38, %v2366_v17  ;;  %3991 = vmatpush.bf16.msra.mxu2 %v9754_v56  ;;  %v2631_v46 = vmax.f32 %v2503_v5, 0.0  ;;  %v17969_v17 = vld [vmem:[#allocation148_spill] sm:$0xff]  ;;  %v11615_v10 = vld [vmem:[%s17604_s3 + $0x4c4] sm:$0xf] }
 0x328   : > { %v13717_v58 = vpack.c.bf16 %v2629_v49, %v2625_v40  ;;  %v9882_v49 = vor.u32 %v11711_v12, %v9879_v60  ;;  %v9495_v12 = vld [vmem:[%s17604_s3 + $0x4d0] sm:$0xf0]  ;;  %v11647_v5 = vld [vmem:[%s17604_s3 + $0x5c4] sm:$0xf] }
 0x329   : > { %v13723_v3 = vpack.c.bf16 %v2630_v1, %v2626_v54  ;;  %v2175_v20 = vpop.f32.mrf.mxu2  ;;  %v2632_v62 = vmax.f32 %v2504_v34, 0.0 }
 0x32a   : > { %v2367_v41 = vadd.f32 %v2175_v20, %v1498_v31  ;;  %v2264_v43 = vpop.f32.mrf.mxu3  ;;  %v1999_v6 = vpop.f32.mrf.mxu0  ;;  %4040 = vmatpush.bf16.msra.mxu3 %v9882_v49  ;;  %v17965_v31 = vld [vmem:[#allocation146_spill] sm:$0xff]  ;;  %v17968_v20 = vld [vmem:[#allocation44_spill] sm:$0xff]  ;;  %v9623_v49 = vld [vmem:[%s17604_s3 + $0x5d0] sm:$0xf0] }
 0x32b   : > { %v2368_v53 = vadd.f32 %v2264_v43, %v1587_v39  ;;  %v2369_v55 = vadd.f32 %v1999_v6, %v1322_v18  ;;  %v2088_v25 = vpop.f32.mrf.mxu1  ;;  %v1500_v22 = vadd.f32 %v17965_v31, %v17964_v47  ;;  %v1589_v18 = vadd.f32 %v17967_v36, %v17966_v21  ;;  %v17972_v36 = vld [vmem:[#allocation46_spill] sm:$0xff] }
 0x32c   : > { %v2370_v40 = vadd.f32 %v2088_v25, %v1411_v4  ;;  %v1325_v24 = vadd.f32 %v17969_v17, %v17968_v20  ;;  %v17971_v4 = vld [vmem:[#allocation149_spill] sm:$0xff]  ;;  %v9626_v47 = vor.u32 %v11647_v5, %v9623_v49 }
 0x32d   : > { %v2507_v54 = vadd.f32 %v13384_v37, %v2369_v55  ;;  %v1414_v43 = vadd.f32 %v17971_v4, %v17970_v45  ;;  %v2505_v55 = vadd.f32 %v13411_v19, %v2367_v41  ;;  %v17975_v45 = vld [vmem:[#allocation151_spill] sm:$0xff] }
 0x32e   : > { %v2508_v1 = vadd.f32 %v13388_v38, %v2370_v40  ;;  %v9498_v40 = vor.u32 %v11615_v10, %v9495_v12  ;;  %3942 = vmatpush.bf16.msra.mxu1 %v9626_v47 }
 0x32f   : > { %v2635_v50 = vmax.f32 %v2507_v54, 0.0  ;;  %v2506_v54 = vadd.f32 %v13413_v35, %v2368_v53 }
 0x330   : > { %v2636_v39 = vmax.f32 %v2508_v1, 0.0  ;;  %3893 = vmatpush.bf16.msra.mxu0 %v9498_v40 }
 0x331   : > { %v13751_v6 = vpack.c.bf16 %v2635_v50, %v2631_v46  ;;  %v2177_v11 = vpop.f32.mrf.mxu2  ;;  %v2634_v53 = vmax.f32 %v2506_v54, 0.0  ;;  %v11675_v54 = vld [vmem:[%s17604_s3 + $0x6a4] sm:$0xf] }
 0x332   : > { %v13763_v25 = vpack.c.bf16 %v2636_v39, %v2632_v62  ;;  %v2371_v56 = vadd.f32 %v2177_v11, %v1500_v22  ;;  %v2266_v60 = vpop.f32.mrf.mxu3  ;;  %v2002_v34 = vpop.f32.mrf.mxu0  ;;  %v2633_v22 = vmax.f32 %v2505_v55, 0.0  ;;  %v17977_v11 = vld [vmem:[#allocation152_spill] sm:$0xff]  ;;  %v17979_v55 = vld [vmem:[#allocation49_spill] sm:$0xff] }
 0x333   : > { %v2372_v1 = vadd.f32 %v2266_v60, %v1589_v18  ;;  %v2373_v46 = vadd.f32 %v2002_v34, %v1325_v24  ;;  %v2091_v50 = vpop.f32.mrf.mxu1  ;;  %v17973_v18 = vld [vmem:[#allocation150_spill] sm:$0xff]  ;;  %v17974_v24 = vld [vmem:[#allocation47_spill] sm:$0xff] }
 0x334   : > { %v2509_v31 = vadd.f32 %v13411_v19, %v2371_v56  ;;  %v2374_v21 = vadd.f32 %v2091_v50, %v1414_v43  ;;  %v1503_v20 = vadd.f32 %v17973_v18, %v17972_v36  ;;  %v1592_v4 = vadd.f32 %v17975_v45, %v17974_v24  ;;  %v17976_v43 = vld [vmem:[#allocation48_spill] sm:$0xff]  ;;  %v17980_v56 = vld [vmem:[#allocation153_spill] sm:$0xff]  ;;  %v11707_v50 = vld [vmem:[%s17604_s3 + $0x7a4] sm:$0xf] }
 0x335   : > { %v2510_v41 = vadd.f32 %v13413_v35, %v2372_v1  ;;  %3704 = vmatmul.bf16.vlgmr.msrb.gmra.mxu0 %v13434_v44  ;;  %v1327_v10 = vadd.f32 %v17977_v11, %v17976_v43  ;;  %v1416_v60 = vadd.f32 %v17980_v56, %v17979_v55  ;;  %v9735_v1 = vld [vmem:[%s17604_s3 + $0x6b0] sm:$0xf0]  ;;  %v13797_v47 = vadd.f32 %v13384_v37, %v2373_v46  ;;  %v17984_v43 = vld [vmem:[#allocation154_spill] sm:$0xff]  ;;  %v17985_v55 = vld [vmem:[#allocation51_spill] sm:$0xff] }
 0x336   : > { %v2637_v62 = vmax.f32 %v2509_v31, 0.0  ;;  %3753 = vmatmul.bf16.vlgmr.msrb.gmra.mxu1 %v13440_v42  ;;  %3802 = vmatmul.bf16.vlgmr.msrb.gmra.mxu2 %v13447_v26 }
 0x337   : > { %v2638_v39 = vmax.f32 %v2510_v41, 0.0  ;;  %3851 = vmatmul.bf16.vlgmr.msrb.gmra.mxu3 %v13453_v27  ;;  %17981 = vst [vmem:[#allocation5_spill] sm:$0xff] %v13797_v47  ;;  %v17609_v46 = vmax.f32 %v13797_v47, 0.0 }
 0x338   : > { %v13777_v17 = vpack.c.bf16 %v2637_v62, %v2633_v22  ;;  %v9738_v62 = vor.u32 %v11675_v54, %v9735_v1  ;;  %v17989_v54 = vld [vmem:[#allocation53_spill] sm:$0xff] }
 0x339   : > { %v13783_v12 = vpack.c.bf16 %v2638_v39, %v2634_v53  ;;  %v2180_v5 = vpop.f32.mrf.mxu2  ;;  %v9863_v53 = vld [vmem:[%s17604_s3 + $0x7b0] sm:$0xf0]  ;;  %v13803_v39 = vadd.f32 %v13388_v38, %v2374_v21  ;;  %v17986_v21 = vld [vmem:[#allocation155_spill] sm:$0xff] }
 0x33a   : > { %v2375_v34 = vadd.f32 %v2180_v5, %v1503_v20  ;;  %v2269_v40 = vpop.f32.mrf.mxu3  ;;  %v2004_v49 = vpop.f32.mrf.mxu0  ;;  %v9866_v18 = vor.u32 %v11707_v50, %v9863_v53  ;;  %3992 = vmatpush.bf16.msra.mxu2 %v9738_v62  ;;  %v1594_v56 = vadd.f32 %v17986_v21, %v17985_v55  ;;  %v17990_v1 = vld [vmem:[#allocation157_spill] sm:$0xff]  ;;  %v11611_v62 = vld [vmem:[%s17604_s3 + $0x4a4] sm:$0xf] }
 0x33b   : > { %17978 = vst [vmem:[#allocation108_spill] sm:$0xff] %v13783_v12  ;;  %v2376_v31 = vadd.f32 %v2269_v40, %v1592_v4  ;;  %v2377_v41 = vadd.f32 %v2004_v49, %v1327_v10  ;;  %v2093_v22 = vpop.f32.mrf.mxu1  ;;  %v17983_v4 = vld [vmem:[#allocation50_spill] sm:$0xff]  ;;  %v17611_v10 = vmax.f32 %v13803_v39, 0.0  ;;  %v17988_v40 = vld [vmem:[#allocation156_spill] sm:$0xff]  ;;  %v1419_v50 = vadd.f32 %v17990_v1, %v17989_v54  ;;  %v9479_v53 = vld [vmem:[%s17604_s3 + $0x4b0] sm:$0xf0] }
 0x33c   : > { %17982 = vst [vmem:[#allocation109_spill] sm:$0xff] %v13803_v39  ;;  %v2378_v36 = vadd.f32 %v2093_v22, %v1416_v60  ;;  %4041 = vmatpush.bf16.msra.mxu3 %v9866_v18  ;;  %v1505_v11 = vadd.f32 %v17984_v43, %v17983_v4  ;;  %v17987_v60 = vld [vmem:[#allocation52_spill] sm:$0xff]  ;;  %v13831_v18 = vadd.f32 %v13411_v19, %v2375_v34  ;;  %v9607_v21 = vld [vmem:[%s17604_s3 + $0x5b0] sm:$0xf0] }
 0x33d   : > { %v2515_v20 = vadd.f32 %v13384_v37, %v2377_v41  ;;  %v1330_v49 = vadd.f32 %v17988_v40, %v17987_v60  ;;  %v9482_v55 = vor.u32 %v11611_v62, %v9479_v53  ;;  %v13841_v60 = vadd.f32 %v13413_v35, %v2376_v31 }
 0x33e   : > { %v2516_v24 = vadd.f32 %v13388_v38, %v2378_v36  ;;  %v11643_v36 = vld [vmem:[%s17604_s3 + $0x5a4] sm:$0xf]  ;;  %17992 = vst [vmem:[#allocation110_spill] sm:$0xff] %v13831_v18  ;;  %v17613_v62 = vmax.f32 %v13831_v18, 0.0 }
 0x33f   : > { %v2643_v45 = vmax.f32 %v2515_v20, 0.0  ;;  %17994 = vst [vmem:[#allocation111_spill] sm:$0xff] %v13841_v60  ;;  %v9610_v34 = vor.u32 %v11643_v36, %v9607_v21  ;;  %3894 = vmatpush.bf16.msra.mxu0 %v9482_v55  ;;  %v17995_v36 = vld [vmem:[#allocation54_spill] sm:$0xff]  ;;  %v17998_v55 = vld [vmem:[#allocation55_spill] sm:$0xff] }
 0x340   : > { %v2644_v5 = vmax.f32 %v2516_v24, 0.0 }
 0x341   : > { %v13819_v41 = vpack.c.bf16 %v2643_v45, %v17609_v46  ;;  %v2182_v22 = vpop.f32.mrf.mxu2  ;;  %3943 = vmatpush.bf16.msra.mxu1 %v9610_v34 }
 0x342   : > { %v13835_v20 = vpack.c.bf16 %v2644_v5, %v17611_v10  ;;  %v2379_v24 = vadd.f32 %v2182_v22, %v1505_v11  ;;  %v2271_v4 = vpop.f32.mrf.mxu3  ;;  %v2007_v43 = vpop.f32.mrf.mxu0  ;;  %v18004_v10 = vld [vmem:[#allocation57_spill] sm:$0xff] }
 0x343   : > { %17991 = vst [vmem:[#allocation6_spill] sm:$0xff] %v13819_v41  ;;  %v2380_v40 = vadd.f32 %v2271_v4, %v1594_v56  ;;  %v2381_v54 = vadd.f32 %v2007_v43, %v1330_v49  ;;  %v2096_v1 = vpop.f32.mrf.mxu1  ;;  %v17615_v56 = vmax.f32 %v13841_v60, 0.0 }
 0x344   : > { %17993 = vst [vmem:[#allocation7_spill] sm:$0xff] %v13835_v20  ;;  %v2517_v46 = vadd.f32 %v13411_v19, %v2379_v24  ;;  %v2382_v41 = vadd.f32 %v2096_v1, %v1419_v50  ;;  %v17996_v24 = vld [vmem:[#allocation158_spill] sm:$0xff] }
 0x345   : > { %v2518_v11 = vadd.f32 %v13413_v35, %v2380_v40  ;;  %v2519_v22 = vadd.f32 %v13384_v37, %v2381_v54  ;;  %3709 = vmatmul.bf16.gmra.mxu0 %v13467_v51  ;;  %v1508_v4 = vadd.f32 %v17996_v24, %v17995_v36  ;;  %v18000_v40 = vld [vmem:[#allocation56_spill] sm:$0xff]  ;;  %v18005_v36 = vld [vmem:[#allocation161_spill] sm:$0xff] }
 0x346   : > { %v2645_v53 = vmax.f32 %v2517_v46, 0.0  ;;  %v2520_v31 = vadd.f32 %v13388_v38, %v2382_v41  ;;  %3758 = vmatmul.bf16.gmra.mxu1 %v13473_v8  ;;  %3807 = vmatmul.bf16.gmra.mxu2 %v13480_v32  ;;  %v17999_v41 = vld [vmem:[#allocation159_spill] sm:$0xff]  ;;  %v18001_v54 = vld [vmem:[#allocation160_spill] sm:$0xff]  ;;  %v1421_v24 = vadd.f32 %v18005_v36, %v18004_v10 }
 0x347   : > { %v2646_v49 = vmax.f32 %v2518_v11, 0.0  ;;  %v2647_v50 = vmax.f32 %v2519_v22, 0.0  ;;  %3856 = vmatmul.bf16.gmra.mxu3 %v13486_v33  ;;  %v1597_v21 = vadd.f32 %v17999_v41, %v17998_v55  ;;  %v1332_v1 = vadd.f32 %v18001_v54, %v18000_v40  ;;  %v11671_v55 = vld [vmem:[%s17604_s3 + $0x684] sm:$0xf]  ;;  %v9719_v41 = vld [vmem:[%s17604_s3 + $0x690] sm:$0xf0] }
 0x348   : > { %v13857_v43 = vpack.c.bf16 %v2645_v53, %v17613_v62  ;;  %v2648_v46 = vmax.f32 %v2520_v31, 0.0 }
 0x349   : > { %v13865_v34 = vpack.c.bf16 %v2646_v49, %v17615_v56  ;;  %v13867_v11 = vpack.c.bf16 %v2647_v50, %v2643_v45  ;;  %v2185_v22 = vpop.f32.mrf.mxu2  ;;  %v11703_v45 = vld [vmem:[%s17604_s3 + $0x784] sm:$0xf] }
 0x34a   : > { %17997 = vst [vmem:[#allocation8_spill] sm:$0xff] %v13857_v43  ;;  %v13871_v20 = vpack.c.bf16 %v2648_v46, %v2644_v5  ;;  %v2383_v62 = vadd.f32 %v2185_v22, %v1508_v4  ;;  %v2274_v31 = vpop.f32.mrf.mxu3  ;;  %v2009_v43 = vpop.f32.mrf.mxu0  ;;  %v9722_v5 = vor.u32 %v11671_v55, %v9719_v41  ;;  %v9847_v4 = vld [vmem:[%s17604_s3 + $0x790] sm:$0xf0] }
 0x34b   : > { %18002 = vst [vmem:[#allocation112_spill] sm:$0xff] %v13865_v34  ;;  %v2384_v40 = vadd.f32 %v2274_v31, %v1597_v21  ;;  %v2385_v54 = vadd.f32 %v2009_v43, %v1332_v1  ;;  %v2098_v10 = vpop.f32.mrf.mxu1  ;;  %v9850_v56 = vor.u32 %v11703_v45, %v9847_v4  ;;  %v18007_v1 = vld [vmem:[#allocation58_spill] sm:$0xff] }
 0x34c   : > { %18003 = vst [vmem:[#allocation9_spill] sm:$0xff] %v13867_v11  ;;  %v2521_v22 = vadd.f32 %v13411_v19, %v2383_v62  ;;  %v2386_v36 = vadd.f32 %v2098_v10, %v1421_v24  ;;  %3993 = vmatpush.bf16.msra.mxu2 %v9722_v5  ;;  %v18008_v31 = vld [vmem:[#allocation162_spill] sm:$0xff]  ;;  %v18010_v62 = vld [vmem:[#allocation59_spill] sm:$0xff]  ;;  %v18012_v10 = vld [vmem:[#allocation60_spill] sm:$0xff] }
 0x34d   : > { %18006 = vst [vmem:[#allocation113_spill] sm:$0xff] %v13871_v20  ;;  %v2522_v34 = vadd.f32 %v13413_v35, %v2384_v40  ;;  %v2523_v20 = vadd.f32 %v13384_v37, %v2385_v54  ;;  %4042 = vmatpush.bf16.msra.mxu3 %v9850_v56  ;;  %v1510_v55 = vadd.f32 %v18008_v31, %v18007_v1  ;;  %v18011_v24 = vld [vmem:[#allocation163_spill] sm:$0xff]  ;;  %v18013_v40 = vld [vmem:[#allocation164_spill] sm:$0xff]  ;;  %v18016_v56 = vld [vmem:[#allocation61_spill] sm:$0xff] }
 0x34e   : > { %v2649_v11 = vmax.f32 %v2521_v22, 0.0  ;;  %v2524_v60 = vadd.f32 %v13388_v38, %v2386_v36  ;;  %v1599_v45 = vadd.f32 %v18011_v24, %v18010_v62  ;;  %v1335_v4 = vadd.f32 %v18013_v40, %v18012_v10  ;;  %v9591_v24 = vld [vmem:[%s17604_s3 + $0x590] sm:$0xf0] }
 0x34f   : > { %v2650_v43 = vmax.f32 %v2522_v34, 0.0  ;;  %v2651_v21 = vmax.f32 %v2523_v20, 0.0  ;;  %v11607_v20 = vld [vmem:[%s17604_s3 + $0x484] sm:$0xf]  ;;  %v18017_v34 = vld [vmem:[#allocation165_spill] sm:$0xff] }
 0x350   : > { %v13891_v41 = vpack.c.bf16 %v2649_v11, %v2645_v53  ;;  %v2652_v18 = vmax.f32 %v2524_v60, 0.0  ;;  %v9463_v53 = vld [vmem:[%s17604_s3 + $0x490] sm:$0xf0]  ;;  %v11639_v60 = vld [vmem:[%s17604_s3 + $0x584] sm:$0xf]  ;;  %v1424_v36 = vadd.f32 %v18017_v34, %v18016_v56 }
 0x351   : > { %v13897_v54 = vpack.c.bf16 %v2650_v43, %v2646_v49  ;;  %v13899_v5 = vpack.c.bf16 %v2651_v21, %v2647_v50  ;;  %v2187_v22 = vpop.f32.mrf.mxu2  ;;  %v9466_v62 = vor.u32 %v11607_v20, %v9463_v53  ;;  %v18020_v20 = vld [vmem:[#allocation166_spill] sm:$0xff] }
 0x352   : > { %18009 = vst [vmem:[#allocation10_spill] sm:$0xff] %v13891_v41  ;;  %v13912_v49 = vpack.c.bf16 %v2652_v18, %v2648_v46  ;;  %v2387_v50 = vadd.f32 %v2187_v22, %v1510_v55  ;;  %v2276_v1 = vpop.f32.mrf.mxu3  ;;  %v2012_v31 = vpop.f32.mrf.mxu0 }
 0x353   : > { %18014 = vst [vmem:[#allocation114_spill] sm:$0xff] %v13897_v54  ;;  %v2388_v10 = vadd.f32 %v2276_v1, %v1599_v45  ;;  %v2389_v40 = vadd.f32 %v2012_v31, %v1335_v4  ;;  %v9594_v54 = vor.u32 %v11639_v60, %v9591_v24  ;;  %3895 = vmatpush.bf16.msra.mxu0 %v9466_v62  ;;  %v18025_v1 = vld [vmem:[#allocation168_spill] sm:$0xff] }
 0x354   : > { %18015 = vst [vmem:[#allocation11_spill] sm:$0xff] %v13899_v5  ;;  %v2101_v5 = vpop.f32.mrf.mxu1  ;;  %v2525_v41 = vadd.f32 %v13411_v19, %v2387_v50  ;;  %v18023_v50 = vld [vmem:[#allocation167_spill] sm:$0xff] }
 0x355   : > { %18018 = vst [vmem:[#allocation115_spill] sm:$0xff] %v13912_v49  ;;  %v2390_v39 = vadd.f32 %v2101_v5, %v1424_v36  ;;  %v2526_v56 = vadd.f32 %v13413_v35, %v2388_v10  ;;  %v2527_v46 = vadd.f32 %v13384_v37, %v2389_v40  ;;  %3714 = vmatmul.bf16.gmra.mxu0 %v13524_v28  ;;  %v18019_v5 = vld [vmem:[#allocation62_spill] sm:$0xff]  ;;  %v18022_v36 = vld [vmem:[#allocation63_spill] sm:$0xff]  ;;  %v18028_v10 = vld [vmem:[#allocation65_spill] sm:$0xff] }
 0x356   : > { %3944 = vmatpush.bf16.msra.mxu1 %v9594_v54  ;;  %v2653_v55 = vmax.f32 %v2525_v41, 0.0  ;;  %3812 = vmatmul.bf16.gmra.mxu2 %v13537_v13  ;;  %v1513_v53 = vadd.f32 %v18020_v20, %v18019_v5  ;;  %v1602_v54 = vadd.f32 %v18023_v50, %v18022_v36  ;;  %v18024_v41 = vld [vmem:[#allocation64_spill] sm:$0xff]  ;;  %v18029_v40 = vld [vmem:[#allocation169_spill] sm:$0xff] }
 0x357   : > { %v2528_v22 = vadd.f32 %v13388_v38, %v2390_v39  ;;  %3763 = vmatmul.bf16.gmra.mxu1 %v13530_v16  ;;  %v2654_v45 = vmax.f32 %v2526_v56, 0.0  ;;  %v2655_v4 = vmax.f32 %v2527_v46, 0.0  ;;  %3861 = vmatmul.bf16.gmra.mxu3 %v13543_v61  ;;  %v1337_v39 = vadd.f32 %v18025_v1, %v18024_v41 }
 0x358   : > { %v13927_v60 = vpack.c.bf16 %v2653_v55, %v2649_v11  ;;  %v1426_v56 = vadd.f32 %v18029_v40, %v18028_v10 }
 0x359   : > { %v2656_v34 = vmax.f32 %v2528_v22, 0.0  ;;  %v13933_v31 = vpack.c.bf16 %v2654_v45, %v2650_v43  ;;  %v13935_v62 = vpack.c.bf16 %v2655_v4, %v2651_v21  ;;  %v2190_v24 = vpop.f32.mrf.mxu2  ;;  %v11667_v22 = vld [vmem:[%s17604_s3 + $0x664] sm:$0xf]  ;;  %v9703_v43 = vld [vmem:[%s17604_s3 + $0x670] sm:$0xf0] }
 0x35a   : > { %18021 = vst [vmem:[#allocation12_spill] sm:$0xff] %v13927_v60  ;;  %v2391_v5 = vadd.f32 %v2190_v24, %v1513_v53  ;;  %v2279_v11 = vpop.f32.mrf.mxu3  ;;  %v2014_v20 = vpop.f32.mrf.mxu0  ;;  %v11699_v21 = vld [vmem:[%s17604_s3 + $0x764] sm:$0xf]  ;;  %v9831_v53 = vld [vmem:[%s17604_s3 + $0x770] sm:$0xf0] }
 0x35b   : > { %18026 = vst [vmem:[#allocation116_spill] sm:$0xff] %v13933_v31  ;;  %v13939_v46 = vpack.c.bf16 %v2656_v34, %v2652_v18  ;;  %v2392_v36 = vadd.f32 %v2279_v11, %v1602_v54  ;;  %v2393_v50 = vadd.f32 %v2014_v20, %v1337_v39  ;;  %v9706_v18 = vor.u32 %v11667_v22, %v9703_v43  ;;  %v18031_v11 = vld [vmem:[#allocation66_spill] sm:$0xff] }
 0x35c   : > { %18027 = vst [vmem:[#allocation13_spill] sm:$0xff] %v13935_v62  ;;  %v2103_v41 = vpop.f32.mrf.mxu1  ;;  %v2529_v1 = vadd.f32 %v13411_v19, %v2391_v5  ;;  %v9834_v10 = vor.u32 %v11699_v21, %v9831_v53  ;;  %v18032_v20 = vld [vmem:[#allocation170_spill] sm:$0xff]  ;;  %v18034_v5 = vld [vmem:[#allocation67_spill] sm:$0xff] }
 0x35d   : > { %18030 = vst [vmem:[#allocation117_spill] sm:$0xff] %v13939_v46  ;;  %v2394_v24 = vadd.f32 %v2103_v41, %v1426_v56  ;;  %v2530_v40 = vadd.f32 %v13413_v35, %v2392_v36  ;;  %v2531_v31 = vadd.f32 %v13384_v37, %v2393_v50  ;;  %3994 = vmatpush.bf16.msra.mxu2 %v9706_v18  ;;  %v18035_v56 = vld [vmem:[#allocation171_spill] sm:$0xff]  ;;  %v18036_v41 = vld [vmem:[#allocation68_spill] sm:$0xff] }
 0x35e   : > { %v2657_v60 = vmax.f32 %v2529_v1, 0.0  ;;  %4043 = vmatpush.bf16.msra.mxu3 %v9834_v10  ;;  %v1515_v22 = vadd.f32 %v18032_v20, %v18031_v11  ;;  %v1604_v21 = vadd.f32 %v18035_v56, %v18034_v5  ;;  %v18037_v36 = vld [vmem:[#allocation172_spill] sm:$0xff]  ;;  %v18041_v10 = vld [vmem:[#allocation173_spill] sm:$0xff] }
 0x35f   : > { %v2532_v49 = vadd.f32 %v13388_v38, %v2394_v24  ;;  %v2658_v54 = vmax.f32 %v2530_v40, 0.0  ;;  %v2659_v39 = vmax.f32 %v2531_v31, 0.0  ;;  %v1340_v53 = vadd.f32 %v18037_v36, %v18036_v41  ;;  %v11603_v31 = vld [vmem:[%s17604_s3 + $0x464] sm:$0xf]  ;;  %v18040_v24 = vld [vmem:[#allocation69_spill] sm:$0xff] }
 0x360   : > { %v13959_v43 = vpack.c.bf16 %v2657_v60, %v2653_v55  ;;  %v9447_v55 = vld [vmem:[%s17604_s3 + $0x470] sm:$0xf0]  ;;  %v1429_v40 = vadd.f32 %v18041_v10, %v18040_v24 }
 0x361   : > { %v2660_v46 = vmax.f32 %v2532_v49, 0.0  ;;  %v13965_v50 = vpack.c.bf16 %v2658_v54, %v2654_v45  ;;  %v13967_v18 = vpack.c.bf16 %v2659_v39, %v2655_v4  ;;  %v2192_v1 = vpop.f32.mrf.mxu2  ;;  %v11635_v49 = vld [vmem:[%s17604_s3 + $0x564] sm:$0xf]  ;;  %v9450_v5 = vor.u32 %v11603_v31, %v9447_v55  ;;  %v9575_v56 = vld [vmem:[%s17604_s3 + $0x570] sm:$0xf0]  ;;  %v18044_v31 = vld [vmem:[#allocation174_spill] sm:$0xff] }
 0x362   : > { %18033 = vst [vmem:[#allocation14_spill] sm:$0xff] %v13959_v43  ;;  %v2395_v4 = vadd.f32 %v2192_v1, %v1515_v22  ;;  %v2281_v11 = vpop.f32.mrf.mxu3  ;;  %v2017_v20 = vpop.f32.mrf.mxu0 }
 0x363   : > { %18038 = vst [vmem:[#allocation118_spill] sm:$0xff] %v13965_v50  ;;  %v13980_v45 = vpack.c.bf16 %v2660_v46, %v2656_v34  ;;  %v2396_v41 = vadd.f32 %v2281_v11, %v1604_v21  ;;  %v2397_v36 = vadd.f32 %v2017_v20, %v1340_v53  ;;  %v9578_v50 = vor.u32 %v11635_v49, %v9575_v56  ;;  %v18049_v11 = vld [vmem:[#allocation176_spill] sm:$0xff] }
 0x364   : > { %18039 = vst [vmem:[#allocation15_spill] sm:$0xff] %v13967_v18  ;;  %v2106_v18 = vpop.f32.mrf.mxu1  ;;  %v2533_v43 = vadd.f32 %v13411_v19, %v2395_v4  ;;  %3896 = vmatpush.bf16.msra.mxu0 %v9450_v5  ;;  %v18047_v4 = vld [vmem:[#allocation175_spill] sm:$0xff] }
 0x365   : > { %18042 = vst [vmem:[#allocation119_spill] sm:$0xff] %v13980_v45  ;;  %v2398_v62 = vadd.f32 %v2106_v18, %v1429_v40  ;;  %v2534_v24 = vadd.f32 %v13413_v35, %v2396_v41  ;;  %v2535_v34 = vadd.f32 %v13384_v37, %v2397_v36  ;;  %3719 = vmatmul.bf16.gmra.mxu0 %v13557_v23  ;;  %v18043_v18 = vld [vmem:[#allocation70_spill] sm:$0xff]  ;;  %v18046_v40 = vld [vmem:[#allocation71_spill] sm:$0xff]  ;;  %v18052_v41 = vld [vmem:[#allocation73_spill] sm:$0xff] }
 0x366   : > { %3945 = vmatpush.bf16.msra.mxu1 %v9578_v50  ;;  %v2661_v22 = vmax.f32 %v2533_v43, 0.0  ;;  %3817 = vmatmul.bf16.gmra.mxu2 %v13570_v52  ;;  %v1518_v55 = vadd.f32 %v18044_v31, %v18043_v18  ;;  %v1607_v50 = vadd.f32 %v18047_v4, %v18046_v40  ;;  %v18048_v43 = vld [vmem:[#allocation72_spill] sm:$0xff]  ;;  %v18053_v36 = vld [vmem:[#allocation177_spill] sm:$0xff] }
 0x367   : > { %v2536_v1 = vadd.f32 %v13388_v38, %v2398_v62  ;;  %3768 = vmatmul.bf16.gmra.mxu1 %v13563_v14  ;;  %v2662_v21 = vmax.f32 %v2534_v24, 0.0  ;;  %v2663_v53 = vmax.f32 %v2535_v34, 0.0  ;;  %3866 = vmatmul.bf16.gmra.mxu3 %v13576_v57  ;;  %v1342_v62 = vadd.f32 %v18049_v11, %v18048_v43 }
 0x368   : > { %v13995_v49 = vpack.c.bf16 %v2661_v22, %v2657_v60  ;;  %v1431_v24 = vadd.f32 %v18053_v36, %v18052_v41 }
 0x369   : > { %v2664_v10 = vmax.f32 %v2536_v1, 0.0  ;;  %v14001_v20 = vpack.c.bf16 %v2662_v21, %v2658_v54  ;;  %v14003_v5 = vpack.c.bf16 %v2663_v53, %v2659_v39  ;;  %v2195_v56 = vpop.f32.mrf.mxu2  ;;  %v11663_v1 = vld [vmem:[%s17604_s3 + $0x644] sm:$0xf]  ;;  %v9687_v54 = vld [vmem:[%s17604_s3 + $0x650] sm:$0xf0] }
 0x36a   : > { %18045 = vst [vmem:[#allocation16_spill] sm:$0xff] %v13995_v49  ;;  %v2399_v18 = vadd.f32 %v2195_v56, %v1518_v55  ;;  %v2284_v60 = vpop.f32.mrf.mxu3  ;;  %v2019_v31 = vpop.f32.mrf.mxu0  ;;  %v11695_v39 = vld [vmem:[%s17604_s3 + $0x744] sm:$0xf]  ;;  %v9815_v55 = vld [vmem:[%s17604_s3 + $0x750] sm:$0xf0] }
 0x36b   : > { %18050 = vst [vmem:[#allocation120_spill] sm:$0xff] %v14001_v20  ;;  %v14007_v34 = vpack.c.bf16 %v2664_v10, %v2660_v46  ;;  %v2400_v40 = vadd.f32 %v2284_v60, %v1607_v50  ;;  %v2401_v4 = vadd.f32 %v2019_v31, %v1342_v62  ;;  %v9690_v46 = vor.u32 %v11663_v1, %v9687_v54  ;;  %v18055_v60 = vld [vmem:[#allocation74_spill] sm:$0xff] }
 0x36c   : > { %18051 = vst [vmem:[#allocation17_spill] sm:$0xff] %v14003_v5  ;;  %v2108_v43 = vpop.f32.mrf.mxu1  ;;  %v2537_v11 = vadd.f32 %v13411_v19, %v2399_v18  ;;  %v9818_v41 = vor.u32 %v11695_v39, %v9815_v55  ;;  %v18056_v31 = vld [vmem:[#allocation178_spill] sm:$0xff]  ;;  %v18058_v18 = vld [vmem:[#allocation75_spill] sm:$0xff] }
 0x36d   : > { %18054 = vst [vmem:[#allocation121_spill] sm:$0xff] %v14007_v34  ;;  %v2402_v56 = vadd.f32 %v2108_v43, %v1431_v24  ;;  %v2538_v36 = vadd.f32 %v13413_v35, %v2400_v40  ;;  %v2539_v20 = vadd.f32 %v13384_v37, %v2401_v4  ;;  %3995 = vmatpush.bf16.msra.mxu2 %v9690_v46  ;;  %v18059_v24 = vld [vmem:[#allocation179_spill] sm:$0xff]  ;;  %v18060_v43 = vld [vmem:[#allocation76_spill] sm:$0xff] }
 0x36e   : > { %v2665_v49 = vmax.f32 %v2537_v11, 0.0  ;;  %4044 = vmatpush.bf16.msra.mxu3 %v9818_v41  ;;  %v1520_v1 = vadd.f32 %v18056_v31, %v18055_v60  ;;  %v1609_v39 = vadd.f32 %v18059_v24, %v18058_v18  ;;  %v18061_v40 = vld [vmem:[#allocation180_spill] sm:$0xff]  ;;  %v18065_v41 = vld [vmem:[#allocation181_spill] sm:$0xff] }
 0x36f   : > { %v2540_v45 = vadd.f32 %v13388_v38, %v2402_v56  ;;  %v2666_v50 = vmax.f32 %v2538_v36, 0.0  ;;  %v2667_v62 = vmax.f32 %v2539_v20, 0.0  ;;  %v1345_v55 = vadd.f32 %v18061_v40, %v18060_v43  ;;  %v11599_v20 = vld [vmem:[%s17604_s3 + $0x444] sm:$0xf]  ;;  %v18064_v56 = vld [vmem:[#allocation77_spill] sm:$0xff] }
 0x370   : > { %v14027_v54 = vpack.c.bf16 %v2665_v49, %v2661_v22  ;;  %v9431_v22 = vld [vmem:[%s17604_s3 + $0x450] sm:$0xf0]  ;;  %v1434_v36 = vadd.f32 %v18065_v41, %v18064_v56 }
 0x371   : > { %v2668_v34 = vmax.f32 %v2540_v45, 0.0  ;;  %v14033_v4 = vpack.c.bf16 %v2666_v50, %v2662_v21  ;;  %v14035_v46 = vpack.c.bf16 %v2667_v62, %v2663_v53  ;;  %v2197_v11 = vpop.f32.mrf.mxu2  ;;  %v11631_v45 = vld [vmem:[%s17604_s3 + $0x544] sm:$0xf]  ;;  %v9434_v18 = vor.u32 %v11599_v20, %v9431_v22  ;;  %v9559_v24 = vld [vmem:[%s17604_s3 + $0x550] sm:$0xf0]  ;;  %v18068_v20 = vld [vmem:[#allocation182_spill] sm:$0xff] }
 0x372   : > { %18057 = vst [vmem:[#allocation18_spill] sm:$0xff] %v14027_v54  ;;  %v2403_v53 = vadd.f32 %v2197_v11, %v1520_v1  ;;  %v2286_v60 = vpop.f32.mrf.mxu3  ;;  %v2022_v31 = vpop.f32.mrf.mxu0 }
 0x373   : > { %18062 = vst [vmem:[#allocation122_spill] sm:$0xff] %v14033_v4  ;;  %v14048_v21 = vpack.c.bf16 %v2668_v34, %v2664_v10  ;;  %v2404_v43 = vadd.f32 %v2286_v60, %v1609_v39  ;;  %v2405_v40 = vadd.f32 %v2022_v31, %v1345_v55  ;;  %v9562_v4 = vor.u32 %v11631_v45, %v9559_v24  ;;  %v18073_v60 = vld [vmem:[#allocation184_spill] sm:$0xff] }
 0x374   : > { %18063 = vst [vmem:[#allocation19_spill] sm:$0xff] %v14035_v46  ;;  %v2111_v46 = vpop.f32.mrf.mxu1  ;;  %v2541_v54 = vadd.f32 %v13411_v19, %v2403_v53  ;;  %3897 = vmatpush.bf16.msra.mxu0 %v9434_v18  ;;  %v18071_v53 = vld [vmem:[#allocation183_spill] sm:$0xff] }
 0x375   : > { %18066 = vst [vmem:[#allocation123_spill] sm:$0xff] %v14048_v21  ;;  %v2406_v5 = vadd.f32 %v2111_v46, %v1434_v36  ;;  %v2542_v56 = vadd.f32 %v13413_v35, %v2404_v43  ;;  %v2543_v10 = vadd.f32 %v13384_v37, %v2405_v40  ;;  %3724 = vmatmul.bf16.gmra.mxu0 %v13614_v63  ;;  %v18067_v46 = vld [vmem:[#allocation78_spill] sm:$0xff]  ;;  %v18070_v36 = vld [vmem:[#allocation79_spill] sm:$0xff]  ;;  %v18076_v43 = vld [vmem:[#allocation81_spill] sm:$0xff] }
 0x376   : > { %3946 = vmatpush.bf16.msra.mxu1 %v9562_v4  ;;  %v2669_v1 = vmax.f32 %v2541_v54, 0.0  ;;  %3822 = vmatmul.bf16.gmra.mxu2 %v13627_v29  ;;  %v1523_v22 = vadd.f32 %v18068_v20, %v18067_v46  ;;  %v1612_v4 = vadd.f32 %v18071_v53, %v18070_v36  ;;  %v18072_v54 = vld [vmem:[#allocation80_spill] sm:$0xff]  ;;  %v18077_v40 = vld [vmem:[#allocation185_spill] sm:$0xff] }
 0x377   : > { %v2544_v11 = vadd.f32 %v13388_v38, %v2406_v5  ;;  %3773 = vmatmul.bf16.gmra.mxu1 %v13620_v0  ;;  %v2670_v39 = vmax.f32 %v2542_v56, 0.0  ;;  %v2671_v55 = vmax.f32 %v2543_v10, 0.0  ;;  %3871 = vmatmul.bf16.gmra.mxu3 %v13633_v7  ;;  %v1347_v5 = vadd.f32 %v18073_v60, %v18072_v54 }
 0x378   : > { %v14063_v45 = vpack.c.bf16 %v2669_v1, %v2665_v49  ;;  %v1436_v56 = vadd.f32 %v18077_v40, %v18076_v43 }
 0x379   : > { %v2672_v41 = vmax.f32 %v2544_v11, 0.0  ;;  %v14069_v31 = vpack.c.bf16 %v2670_v39, %v2666_v50  ;;  %v14071_v18 = vpack.c.bf16 %v2671_v55, %v2667_v62  ;;  %v2200_v24 = vpop.f32.mrf.mxu2  ;;  %v11659_v11 = vld [vmem:[%s17604_s3 + $0x624] sm:$0xf]  ;;  %v9671_v50 = vld [vmem:[%s17604_s3 + $0x630] sm:$0xf0] }
 0x37a   : > { %18069 = vst [vmem:[#allocation20_spill] sm:$0xff] %v14063_v45  ;;  %v2407_v46 = vadd.f32 %v2200_v24, %v1523_v22  ;;  %v2289_v49 = vpop.f32.mrf.mxu3  ;;  %v2024_v20 = vpop.f32.mrf.mxu0  ;;  %v11691_v62 = vld [vmem:[%s17604_s3 + $0x724] sm:$0xf]  ;;  %v9799_v22 = vld [vmem:[%s17604_s3 + $0x730] sm:$0xf0] }
 0x37b   : > { %18074 = vst [vmem:[#allocation124_spill] sm:$0xff] %v14069_v31  ;;  %v14075_v10 = vpack.c.bf16 %v2672_v41, %v2668_v34  ;;  %v2408_v36 = vadd.f32 %v2289_v49, %v1612_v4  ;;  %v2409_v53 = vadd.f32 %v2024_v20, %v1347_v5  ;;  %v9674_v34 = vor.u32 %v11659_v11, %v9671_v50  ;;  %v18079_v49 = vld [vmem:[#allocation82_spill] sm:$0xff] }
 0x37c   : > { %18075 = vst [vmem:[#allocation21_spill] sm:$0xff] %v14071_v18  ;;  %v2113_v54 = vpop.f32.mrf.mxu1  ;;  %v2545_v60 = vadd.f32 %v13411_v19, %v2407_v46  ;;  %v9802_v43 = vor.u32 %v11691_v62, %v9799_v22  ;;  %v18080_v20 = vld [vmem:[#allocation186_spill] sm:$0xff]  ;;  %v18082_v46 = vld [vmem:[#allocation83_spill] sm:$0xff] }
 0x37d   : > { %18078 = vst [vmem:[#allocation125_spill] sm:$0xff] %v14075_v10  ;;  %v2410_v24 = vadd.f32 %v2113_v54, %v1436_v56  ;;  %v2546_v40 = vadd.f32 %v13413_v35, %v2408_v36  ;;  %v2547_v31 = vadd.f32 %v13384_v37, %v2409_v53  ;;  %3996 = vmatpush.bf16.msra.mxu2 %v9674_v34  ;;  %v18083_v56 = vld [vmem:[#allocation187_spill] sm:$0xff]  ;;  %v18084_v54 = vld [vmem:[#allocation84_spill] sm:$0xff] }
 0x37e   : > { %v2673_v45 = vmax.f32 %v2545_v60, 0.0  ;;  %4045 = vmatpush.bf16.msra.mxu3 %v9802_v43  ;;  %v1525_v11 = vadd.f32 %v18080_v20, %v18079_v49  ;;  %v1614_v62 = vadd.f32 %v18083_v56, %v18082_v46  ;;  %v18085_v36 = vld [vmem:[#allocation188_spill] sm:$0xff]  ;;  %v18089_v43 = vld [vmem:[#allocation189_spill] sm:$0xff] }
 0x37f   : > { %v2548_v21 = vadd.f32 %v13388_v38, %v2410_v24  ;;  %v2674_v4 = vmax.f32 %v2546_v40, 0.0  ;;  %v2675_v5 = vmax.f32 %v2547_v31, 0.0  ;;  %v1350_v22 = vadd.f32 %v18085_v36, %v18084_v54  ;;  %v11595_v31 = vld [vmem:[%s17604_s3 + $0x424] sm:$0xf]  ;;  %v18088_v24 = vld [vmem:[#allocation85_spill] sm:$0xff] }
 0x380   : > { %v14095_v50 = vpack.c.bf16 %v2673_v45, %v2669_v1  ;;  %v9415_v1 = vld [vmem:[%s17604_s3 + $0x430] sm:$0xf0]  ;;  %v1439_v40 = vadd.f32 %v18089_v43, %v18088_v24 }
 0x381   : > { %v2676_v10 = vmax.f32 %v2548_v21, 0.0  ;;  %v14101_v53 = vpack.c.bf16 %v2674_v4, %v2670_v39  ;;  %v14103_v34 = vpack.c.bf16 %v2675_v5, %v2671_v55  ;;  %v2202_v60 = vpop.f32.mrf.mxu2  ;;  %v11627_v21 = vld [vmem:[%s17604_s3 + $0x524] sm:$0xf]  ;;  %v9418_v46 = vor.u32 %v11595_v31, %v9415_v1  ;;  %v9543_v56 = vld [vmem:[%s17604_s3 + $0x530] sm:$0xf0]  ;;  %v18092_v31 = vld [vmem:[#allocation190_spill] sm:$0xff] }
 0x382   : > { %18081 = vst [vmem:[#allocation22_spill] sm:$0xff] %v14095_v50  ;;  %v2411_v55 = vadd.f32 %v2202_v60, %v1525_v11  ;;  %v2291_v49 = vpop.f32.mrf.mxu3  ;;  %v2027_v20 = vpop.f32.mrf.mxu0 }
 0x383   : > { %18086 = vst [vmem:[#allocation126_spill] sm:$0xff] %v14101_v53  ;;  %v14116_v39 = vpack.c.bf16 %v2676_v10, %v2672_v41  ;;  %v2412_v54 = vadd.f32 %v2291_v49, %v1614_v62  ;;  %v2413_v36 = vadd.f32 %v2027_v20, %v1350_v22  ;;  %v9546_v53 = vor.u32 %v11627_v21, %v9543_v56  ;;  %v18097_v49 = vld [vmem:[#allocation192_spill] sm:$0xff] }
 0x384   : > { %18087 = vst [vmem:[#allocation23_spill] sm:$0xff] %v14103_v34  ;;  %v2116_v34 = vpop.f32.mrf.mxu1  ;;  %v2549_v50 = vadd.f32 %v13411_v19, %v2411_v55  ;;  %3898 = vmatpush.bf16.msra.mxu0 %v9418_v46  ;;  %v18095_v55 = vld [vmem:[#allocation191_spill] sm:$0xff] }
 0x385   : > { %18090 = vst [vmem:[#allocation127_spill] sm:$0xff] %v14116_v39  ;;  %v2414_v18 = vadd.f32 %v2116_v34, %v1439_v40  ;;  %v2550_v24 = vadd.f32 %v13413_v35, %v2412_v54  ;;  %v2551_v41 = vadd.f32 %v13384_v37, %v2413_v36  ;;  %3729 = vmatmul.bf16.gmra.mxu0 %v13647_v15  ;;  %v18091_v34 = vld [vmem:[#allocation86_spill] sm:$0xff]  ;;  %v18094_v40 = vld [vmem:[#allocation87_spill] sm:$0xff]  ;;  %v18100_v54 = vld [vmem:[#allocation89_spill] sm:$0xff] }
 0x386   : > { %3947 = vmatpush.bf16.msra.mxu1 %v9546_v53  ;;  %v2677_v11 = vmax.f32 %v2549_v50, 0.0  ;;  %3827 = vmatmul.bf16.gmra.mxu2 %v13660_v48  ;;  %v1528_v1 = vadd.f32 %v18092_v31, %v18091_v34  ;;  %v1617_v53 = vadd.f32 %v18095_v55, %v18094_v40  ;;  %v18096_v50 = vld [vmem:[#allocation88_spill] sm:$0xff]  ;;  %v18101_v36 = vld [vmem:[#allocation193_spill] sm:$0xff] }
 0x387   : > { %v2552_v60 = vadd.f32 %v13388_v38, %v2414_v18  ;;  %3778 = vmatmul.bf16.gmra.mxu1 %v13653_v9  ;;  %v2678_v62 = vmax.f32 %v2550_v24, 0.0  ;;  %v2679_v22 = vmax.f32 %v2551_v41, 0.0  ;;  %3876 = vmatmul.bf16.gmra.mxu3 %v13666_v2  ;;  %v1352_v18 = vadd.f32 %v18097_v49, %v18096_v50 }
 0x388   : > { %v14131_v21 = vpack.c.bf16 %v2677_v11, %v2673_v45  ;;  %v1441_v24 = vadd.f32 %v18101_v36, %v18100_v54 }
 0x389   : > { %v2680_v43 = vmax.f32 %v2552_v60, 0.0  ;;  %v14137_v20 = vpack.c.bf16 %v2678_v62, %v2674_v4  ;;  %v14139_v46 = vpack.c.bf16 %v2679_v22, %v2675_v5  ;;  %v2205_v56 = vpop.f32.mrf.mxu2  ;;  %v11655_v60 = vld [vmem:[%s17604_s3 + $0x604] sm:$0xf]  ;;  %v9655_v4 = vld [vmem:[%s17604_s3 + $0x610] sm:$0xf0] }
 0x38a   : > { %18093 = vst [vmem:[#allocation24_spill] sm:$0xff] %v14131_v21  ;;  %v2415_v34 = vadd.f32 %v2205_v56, %v1528_v1  ;;  %v2294_v45 = vpop.f32.mrf.mxu3  ;;  %v2029_v31 = vpop.f32.mrf.mxu0  ;;  %v11687_v5 = vld [vmem:[%s17604_s3 + $0x704] sm:$0xf]  ;;  %v9783_v1 = vld [vmem:[%s17604_s3 + $0x710] sm:$0xf0] }
 0x38b   : > { %18098 = vst [vmem:[#allocation128_spill] sm:$0xff] %v14137_v20  ;;  %v14143_v41 = vpack.c.bf16 %v2680_v43, %v2676_v10  ;;  %v2416_v40 = vadd.f32 %v2294_v45, %v1617_v53  ;;  %v2417_v55 = vadd.f32 %v2029_v31, %v1352_v18  ;;  %v9658_v10 = vor.u32 %v11655_v60, %v9655_v4  ;;  %v18103_v45 = vld [vmem:[#allocation90_spill] sm:$0xff] }
 0x38c   : > { %18099 = vst [vmem:[#allocation25_spill] sm:$0xff] %v14139_v46  ;;  %v2118_v50 = vpop.f32.mrf.mxu1  ;;  %v2553_v49 = vadd.f32 %v13411_v19, %v2415_v34  ;;  %v9786_v54 = vor.u32 %v11687_v5, %v9783_v1  ;;  %v18104_v31 = vld [vmem:[#allocation194_spill] sm:$0xff]  ;;  %v18106_v34 = vld [vmem:[#allocation91_spill] sm:$0xff] }
 0x38d   : > { %18102 = vst [vmem:[#allocation129_spill] sm:$0xff] %v14143_v41  ;;  %v2418_v56 = vadd.f32 %v2118_v50, %v1441_v24  ;;  %v2554_v36 = vadd.f32 %v13413_v35, %v2416_v40  ;;  %v2555_v20 = vadd.f32 %v13384_v37, %v2417_v55  ;;  %3997 = vmatpush.bf16.msra.mxu2 %v9658_v10  ;;  %v18107_v24 = vld [vmem:[#allocation195_spill] sm:$0xff]  ;;  %v18108_v50 = vld [vmem:[#allocation92_spill] sm:$0xff] }
 0x38e   : > { %v2681_v21 = vmax.f32 %v2553_v49, 0.0  ;;  %4046 = vmatpush.bf16.msra.mxu3 %v9786_v54  ;;  %v1530_v60 = vadd.f32 %v18104_v31, %v18103_v45  ;;  %v1619_v5 = vadd.f32 %v18107_v24, %v18106_v34  ;;  %v18109_v40 = vld [vmem:[#allocation196_spill] sm:$0xff]  ;;  %v18113_v54 = vld [vmem:[#allocation197_spill] sm:$0xff] }
 0x38f   : > { %v2556_v39 = vadd.f32 %v13388_v38, %v2418_v56  ;;  %v2682_v53 = vmax.f32 %v2554_v36, 0.0  ;;  %v2683_v18 = vmax.f32 %v2555_v20, 0.0  ;;  %v1355_v1 = vadd.f32 %v18109_v40, %v18108_v50  ;;  %v11591_v20 = vld [vmem:[%s17604_s3 + $0x404] sm:$0xf]  ;;  %v18112_v56 = vld [vmem:[#allocation93_spill] sm:$0xff] }
 0x390   : > { %v14163_v4 = vpack.c.bf16 %v2681_v21, %v2677_v11  ;;  %v9399_v11 = vld [vmem:[%s17604_s3 + $0x410] sm:$0xf0]  ;;  %v1444_v36 = vadd.f32 %v18113_v54, %v18112_v56 }
 0x391   : > { %v2684_v41 = vmax.f32 %v2556_v39, 0.0  ;;  %v14169_v55 = vpack.c.bf16 %v2682_v53, %v2678_v62  ;;  %v14171_v10 = vpack.c.bf16 %v2683_v18, %v2679_v22  ;;  %v2207_v49 = vpop.f32.mrf.mxu2  ;;  %v11623_v39 = vld [vmem:[%s17604_s3 + $0x504] sm:$0xf]  ;;  %v9402_v34 = vor.u32 %v11591_v20, %v9399_v11  ;;  %v9527_v24 = vld [vmem:[%s17604_s3 + $0x510] sm:$0xf0]  ;;  %v18116_v20 = vld [vmem:[#allocation198_spill] sm:$0xff] }
 0x392   : > { %18105 = vst [vmem:[#allocation26_spill] sm:$0xff] %v14163_v4  ;;  %v2419_v22 = vadd.f32 %v2207_v49, %v1530_v60  ;;  %v2296_v45 = vpop.f32.mrf.mxu3  ;;  %v2032_v31 = vpop.f32.mrf.mxu0 }
 0x393   : > { %18110 = vst [vmem:[#allocation130_spill] sm:$0xff] %v14169_v55  ;;  %v14184_v62 = vpack.c.bf16 %v2684_v41, %v2680_v43  ;;  %v2420_v50 = vadd.f32 %v2296_v45, %v1619_v5  ;;  %v2421_v40 = vadd.f32 %v2032_v31, %v1355_v1  ;;  %v9530_v55 = vor.u32 %v11623_v39, %v9527_v24  ;;  %v18121_v45 = vld [vmem:[#allocation200_spill] sm:$0xff] }
 0x394   : > { %18111 = vst [vmem:[#allocation27_spill] sm:$0xff] %v14171_v10  ;;  %v2121_v10 = vpop.f32.mrf.mxu1  ;;  %v2557_v4 = vadd.f32 %v13411_v19, %v2419_v22  ;;  %3899 = vmatpush.bf16.msra.mxu0 %v9402_v34  ;;  %v18119_v22 = vld [vmem:[#allocation199_spill] sm:$0xff] }
 0x395   : > { %18114 = vst [vmem:[#allocation131_spill] sm:$0xff] %v14184_v62  ;;  %v2422_v46 = vadd.f32 %v2121_v10, %v1444_v36  ;;  %v2558_v56 = vadd.f32 %v13413_v35, %v2420_v50  ;;  %v2559_v43 = vadd.f32 %v13384_v37, %v2421_v40  ;;  %3734 = vmatmul.bf16.gmra.mxu0 %v13695_v59  ;;  %v18115_v10 = vld [vmem:[#allocation94_spill] sm:$0xff]  ;;  %v18118_v36 = vld [vmem:[#allocation95_spill] sm:$0xff]  ;;  %v9773_v50 = vld [vmem:[%s17604_s3 + $0x6e8] sm:$0xf] }
 0x396   : > { %3948 = vmatpush.bf16.msra.mxu1 %v9530_v55  ;;  %v2685_v60 = vmax.f32 %v2557_v4, 0.0  ;;  %3832 = vmatmul.bf16.gmra.mxu2 %v13717_v58  ;;  %v1533_v11 = vadd.f32 %v18116_v20, %v18115_v10  ;;  %v1622_v55 = vadd.f32 %v18119_v22, %v18118_v36  ;;  %v18120_v4 = vld [vmem:[#allocation96_spill] sm:$0xff]  ;;  %v11718_v22 = vld [vmem:[%s17604_s3 + $0x7f4] sm:$0xf0] }
 0x397   : > { %v2560_v49 = vadd.f32 %v13388_v38, %v2422_v46  ;;  %3783 = vmatmul.bf16.gmra.mxu1 %v13707_v30  ;;  %v2686_v5 = vmax.f32 %v2558_v56, 0.0  ;;  %v2687_v1 = vmax.f32 %v2559_v43, 0.0  ;;  %3881 = vmatmul.bf16.gmra.mxu3 %v13723_v3  ;;  %v1357_v46 = vadd.f32 %v18121_v45, %v18120_v4  ;;  %v9901_v40 = vld [vmem:[%s17604_s3 + $0x7e8] sm:$0xf]  ;;  %v18124_v56 = vld [vmem:[#allocation97_spill] sm:$0xff] }
 0x398   : > { %v14199_v39 = vpack.c.bf16 %v2685_v60, %v2681_v21  ;;  %v11686_v21 = vld [vmem:[%s17604_s3 + $0x6f4] sm:$0xf0]  ;;  %v18125_v43 = vld [vmem:[#allocation201_spill] sm:$0xff] }
 0x399   : > { %v2688_v54 = vmax.f32 %v2560_v49, 0.0  ;;  %v14205_v31 = vpack.c.bf16 %v2686_v5, %v2682_v53  ;;  %v14207_v34 = vpack.c.bf16 %v2687_v1, %v2683_v18  ;;  %v2210_v24 = vpop.f32.mrf.mxu2  ;;  %v1446_v49 = vadd.f32 %v18125_v43, %v18124_v56 }
 0x39a   : > { %18117 = vst [vmem:[#allocation28_spill] sm:$0xff] %v14199_v39  ;;  %v2423_v18 = vadd.f32 %v2210_v24, %v1533_v11  ;;  %v2299_v10 = vpop.f32.mrf.mxu3  ;;  %v2034_v20 = vpop.f32.mrf.mxu0  ;;  %v9774_v36 = vor.u32 %v11686_v21, %v9773_v50  ;;  %v9902_v39 = vor.u32 %v11718_v22, %v9901_v40  ;;  %v11622_v11 = vld [vmem:[%s17604_s3 + $0x4f4] sm:$0xf0]  ;;  %v9645_v24 = vld [vmem:[%s17604_s3 + $0x5e8] sm:$0xf] }
 0x39b   : > { %18122 = vst [vmem:[#allocation132_spill] sm:$0xff] %v14205_v31  ;;  %v14220_v53 = vpack.c.bf16 %v2688_v54, %v2684_v41  ;;  %v2424_v4 = vadd.f32 %v2299_v10, %v1622_v55  ;;  %v2425_v45 = vadd.f32 %v2034_v20, %v1357_v46  ;;  %v9517_v41 = vld [vmem:[%s17604_s3 + $0x4e8] sm:$0xf]  ;;  %v18128_v10 = vld [vmem:[#allocation202_spill] sm:$0xff] }
 0x39c   : > { %18123 = vst [vmem:[#allocation29_spill] sm:$0xff] %v14207_v34  ;;  %v2123_v31 = vpop.f32.mrf.mxu1  ;;  %v2561_v62 = vadd.f32 %v13411_v19, %v2423_v18  ;;  %4186 = vmatpush.bf16.msrb.mxu2 %v9774_v36  ;;  %4235 = vmatpush.bf16.msrb.mxu3 %v9902_v39  ;;  %v9518_v50 = vor.u32 %v11622_v11, %v9517_v41  ;;  %v18127_v18 = vld [vmem:[#allocation98_spill] sm:$0xff]  ;;  %v18130_v39 = vld [vmem:[#allocation99_spill] sm:$0xff]  ;;  %v18132_v41 = vld [vmem:[#allocation100_spill] sm:$0xff] }
 0x39d   : > { %18126 = vst [vmem:[#allocation133_spill] sm:$0xff] %v14220_v53  ;;  %v2426_v34 = vadd.f32 %v2123_v31, %v1446_v49  ;;  %v2562_v55 = vadd.f32 %v13413_v35, %v2424_v4  ;;  %v2563_v46 = vadd.f32 %v13384_v37, %v2425_v45  ;;  %v11654_v31 = vld [vmem:[%s17604_s3 + $0x5f4] sm:$0xf0]  ;;  %v1535_v20 = vadd.f32 %v18128_v10, %v18127_v18  ;;  %v18131_v4 = vld [vmem:[#allocation203_spill] sm:$0xff]  ;;  %v18133_v11 = vld [vmem:[#allocation204_spill] sm:$0xff] }
 0x39e   : > { %v2689_v21 = vmax.f32 %v2561_v62, 0.0  ;;  %v9646_v56 = vor.u32 %v11654_v31, %v9645_v24  ;;  %4088 = vmatpush.bf16.msrb.mxu0 %v9518_v50  ;;  %v1624_v45 = vadd.f32 %v18131_v4, %v18130_v39  ;;  %v1360_v53 = vadd.f32 %v18133_v11, %v18132_v41 }
 0x39f   : > { %v2564_v40 = vadd.f32 %v13388_v38, %v2426_v34  ;;  %v2690_v43 = vmax.f32 %v2562_v55, 0.0  ;;  %v2691_v49 = vmax.f32 %v2563_v46, 0.0  ;;  %v18136_v55 = vld [vmem:[#allocation101_spill] sm:$0xff] }
 0x3a0   : > { %v14243_v36 = vpack.c.bf16 %v2689_v21, %v2685_v60  ;;  %4137 = vmatpush.bf16.msrb.mxu1 %v9646_v56  ;;  %v18137_v46 = vld [vmem:[#allocation205_spill] sm:$0xff] }
 0x3a1   : > { %v2692_v22 = vmax.f32 %v2564_v40, 0.0  ;;  %v14249_v62 = vpack.c.bf16 %v2690_v43, %v2686_v5  ;;  %v14251_v34 = vpack.c.bf16 %v2691_v49, %v2687_v1  ;;  %v2212_v24 = vpop.f32.mrf.mxu2  ;;  %v1449_v50 = vadd.f32 %v18137_v46, %v18136_v55  ;;  %v11682_v55 = vld [vmem:[%s17604_s3 + $0x6d4] sm:$0xf0]  ;;  %v18141_v46 = vld [vmem:[#allocation103_spill] sm:$0xff] }
 0x3a2   : > { %18129 = vst [vmem:[#allocation30_spill] sm:$0xff] %v14243_v36  ;;  %v2427_v60 = vadd.f32 %v2212_v24, %v1535_v20  ;;  %v2301_v18 = vpop.f32.mrf.mxu3  ;;  %v2037_v40 = vpop.f32.mrf.mxu0  ;;  %v18140_v20 = vld [vmem:[#allocation206_spill] sm:$0xff] }
 0x3a3   : > { %18134 = vst [vmem:[#allocation134_spill] sm:$0xff] %v14249_v62  ;;  %v14255_v31 = vpack.c.bf16 %v2692_v22, %v2688_v54  ;;  %v2428_v56 = vadd.f32 %v2301_v18, %v1624_v45  ;;  %v2429_v10 = vadd.f32 %v2037_v40, %v1360_v53  ;;  %v18139_v54 = vld [vmem:[#allocation102_spill] sm:$0xff] }
 0x3a4   : > { %18135 = vst [vmem:[#allocation31_spill] sm:$0xff] %v14251_v34  ;;  %v2126_v36 = vpop.f32.mrf.mxu1  ;;  %v2565_v39 = vadd.f32 %v13411_v19, %v2427_v60  ;;  %v1538_v53 = vadd.f32 %v18140_v20, %v18139_v54 }
 0x3a5   : > { %18138 = vst [vmem:[#allocation135_spill] sm:$0xff] %v14255_v31  ;;  %v2430_v4 = vadd.f32 %v2126_v36, %v1449_v50  ;;  %v2566_v5 = vadd.f32 %v13413_v35, %v2428_v56  ;;  %v2567_v1 = vadd.f32 %v13384_v37, %v2429_v10  ;;  %3739 = vmatmul.bf16.gmra.mxu0 %v13751_v6  ;;  %v9757_v36 = vld [vmem:[%s17604_s3 + $0x6c8] sm:$0xf]  ;;  %v18142_v50 = vld [vmem:[#allocation207_spill] sm:$0xff] }
 0x3a6   : > { %v2693_v41 = vmax.f32 %v2565_v39, 0.0  ;;  %3837 = vmatmul.bf16.gmra.mxu2 %v13777_v17  ;;  %v1627_v60 = vadd.f32 %v18142_v50, %v18141_v46  ;;  %v9758_v56 = vor.u32 %v11682_v55, %v9757_v36  ;;  %v9885_v10 = vld [vmem:[%s17604_s3 + $0x7c8] sm:$0xf]  ;;  %v11714_v39 = vld [vmem:[%s17604_s3 + $0x7d4] sm:$0xf0]  ;;  %v18147_v50 = vld [vmem:[#allocation105_spill] sm:$0xff] }
 0x3a7   : > { %v2568_v11 = vadd.f32 %v13388_v38, %v2430_v4  ;;  %3788 = vmatmul.bf16.gmra.mxu1 %v13763_v25  ;;  %v2694_v45 = vmax.f32 %v2566_v5, 0.0  ;;  %v2695_v24 = vmax.f32 %v2567_v1, 0.0  ;;  %3886 = vmatmul.bf16.gmra.mxu3 %v13783_v12  ;;  %v18144_v4 = vld [vmem:[#allocation104_spill] sm:$0xff] }
 0x3a8   : > { %v14275_v18 = vpack.c.bf16 %v2693_v41, %v2689_v21  ;;  %v18145_v5 = vld [vmem:[#allocation208_spill] sm:$0xff]  ;;  %v9886_v21 = vor.u32 %v11714_v39, %v9885_v10  ;;  %4187 = vmatpush.bf16.msrb.mxu2 %v9758_v56 }
 0x3a9   : > { %v2696_v40 = vmax.f32 %v2568_v11, 0.0  ;;  %v1362_v1 = vadd.f32 %v18145_v5, %v18144_v4  ;;  %v14285_v54 = vpack.c.bf16 %v2694_v45, %v2690_v43  ;;  %v14287_v20 = vpack.c.bf16 %v2695_v24, %v2691_v49  ;;  %v2215_v46 = vpop.f32.mrf.mxu2  ;;  %v18148_v11 = vld [vmem:[#allocation209_spill] sm:$0xff]  ;;  %v9501_v49 = vld [vmem:[%s17604_s3 + $0x4c8] sm:$0xf] }
 0x3aa   : > { %18143 = vst [vmem:[#allocation32_spill] sm:$0xff] %v14275_v18  ;;  %v1451_v36 = vadd.f32 %v18148_v11, %v18147_v50  ;;  %v2431_v18 = vadd.f32 %v2215_v46, %v1538_v53  ;;  %v2304_v31 = vpop.f32.mrf.mxu3  ;;  %v2039_v34 = vpop.f32.mrf.mxu0  ;;  %4236 = vmatpush.bf16.msrb.mxu3 %v9886_v21  ;;  %v9629_v53 = vld [vmem:[%s17604_s3 + $0x5c8] sm:$0xf]  ;;  %v18150_v46 = vld [vmem:[#allocation210_spill] sm:$0xff] }
 0x3ab   : > { %18146 = vst [vmem:[#allocation136_spill] sm:$0xff] %v14285_v54  ;;  %v14291_v55 = vpack.c.bf16 %v2696_v40, %v2692_v22  ;;  %v2432_v62 = vadd.f32 %v2304_v31, %v1627_v60  ;;  %v2433_v47 = vadd.f32 %v2039_v34, %v1362_v1  ;;  %v11618_v22 = vld [vmem:[%s17604_s3 + $0x4d4] sm:$0xf0] }
 0x3ac   : > { %v2128_v12 = vpop.f32.mrf.mxu1  ;;  %v2569_v43 = vadd.f32 %v13411_v19, %v2431_v18  ;;  %v9502_v60 = vor.u32 %v11618_v22, %v9501_v49  ;;  %v18149_v1 = vld [vmem:[#allocation106_spill] sm:$0xff] }
 0x3ad   : > { %v2434_v4 = vadd.f32 %v2128_v12, %v1451_v36  ;;  %v2570_v31 = vadd.f32 %v13413_v35, %v2432_v62  ;;  %v2571_v34 = vadd.f32 %v13384_v37, %v2433_v47  ;;  %v11650_v12 = vld [vmem:[%s17604_s3 + $0x5d4] sm:$0xf0]  ;;  %v1540_v21 = vadd.f32 %v18150_v46, %v18149_v1  ;;  %v18151_v37 = vld [vmem:[#allocation107_spill] sm:$0xff] }
 0x3ae   : > { %v2697_v18 = vmax.f32 %v2569_v43, 0.0  ;;  %v9630_v10 = vor.u32 %v11650_v12, %v9629_v53  ;;  %4089 = vmatpush.bf16.msrb.mxu0 %v9502_v60  ;;  %v18152_v47 = vld [vmem:[#allocation211_spill] sm:$0xff] }
 0x3af   : > { %v2572_v56 = vadd.f32 %v13388_v38, %v2434_v4  ;;  %v2698_v39 = vmax.f32 %v2570_v31, 0.0  ;;  %v2699_v5 = vmax.f32 %v2571_v34, 0.0  ;;  %v1629_v11 = vadd.f32 %v18152_v47, %v18151_v37 }
 0x3b0   : > { %v14311_v50 = vpack.c.bf16 %v2697_v18, %v2693_v41  ;;  %4138 = vmatpush.bf16.msrb.mxu1 %v9630_v10  ;;  %v9869_v10 = vld [vmem:[%s17604_s3 + $0x7a8] sm:$0xf] }
 0x3b1   : > { %v2700_v62 = vmax.f32 %v2572_v56, 0.0  ;;  %v14315_v36 = vpack.c.bf16 %v2698_v39, %v2694_v45  ;;  %v14317_v49 = vpack.c.bf16 %v2699_v5, %v2695_v24  ;;  %v2217_v43 = vpop.f32.mrf.mxu2  ;;  %v9741_v24 = vld [vmem:[%s17604_s3 + $0x6a8] sm:$0xf]  ;;  %v11710_v5 = vld [vmem:[%s17604_s3 + $0x7b4] sm:$0xf0] }
 0x3b2   : > { %v2435_v4 = vadd.f32 %v2217_v43, %v1540_v21  ;;  %v2306_v22 = vpop.f32.mrf.mxu3  ;;  %v3705_v53 = vpop.f32.mrf.mxu0  ;;  %v9870_v21 = vor.u32 %v11710_v5, %v9869_v10  ;;  %v11674_v10 = vld [vmem:[%s17604_s3 + $0x694] sm:$0xf0]  ;;  %v9853_v5 = vld [vmem:[%s17604_s3 + $0x788] sm:$0xf] }
 0x3b3   : > { %18153 = vst [vmem:[#allocation33_spill] sm:$0xff] %v14317_v49  ;;  %v14319_v38 = vpack.c.bf16 %v2700_v62, %v2696_v40  ;;  %v2436_v31 = vadd.f32 %v2306_v22, %v1629_v11  ;;  %v9613_v22 = vld [vmem:[%s17604_s3 + $0x5a8] sm:$0xf] }
 0x3b4   : > { %v3754_v34 = vpop.f32.mrf.mxu1  ;;  %v2573_v41 = vadd.f32 %v13411_v19, %v2435_v4  ;;  %v11678_v19 = vld [vmem:[%s17604_s3 + $0x6b4] sm:$0xf0]  ;;  %4237 = vmatpush.bf16.msrb.mxu3 %v9870_v21  ;;  %v9485_v4 = vld [vmem:[%s17604_s3 + $0x4a8] sm:$0xf] }
 0x3b5   : > { %18154 = vst [vmem:[#allocation137_spill] sm:$0xff] %v14319_v38  ;;  %v3755_v60 = vadd.f32 %v3754_v34, %v3705_v53  ;;  %v2574_v12 = vadd.f32 %v13413_v35, %v2436_v31  ;;  %3900 = vmatmul.bf16.vlgmr.msra.gmra.mxu0 %v13434_v44  ;;  %v9742_v35 = vor.u32 %v11678_v19, %v9741_v24  ;;  %v11646_v31 = vld [vmem:[%s17604_s3 + $0x5b4] sm:$0xf0]  ;;  %v11620_v38 = vld [vmem:[%s17604_s3 + $0x4ec] sm:$0xf] }
 0x3b6   : > { %v2701_v56 = vmax.f32 %v2573_v41, 0.0  ;;  %3998 = vmatmul.bf16.vlgmr.msra.gmra.mxu2 %v13447_v26  ;;  %v9614_v34 = vor.u32 %v11646_v31, %v9613_v22  ;;  %v11706_v21 = vld [vmem:[%s17604_s3 + $0x794] sm:$0xf0] }
 0x3b7   : > { %3949 = vmatmul.bf16.vlgmr.msra.gmra.mxu1 %v13440_v42  ;;  %v2702_v45 = vmax.f32 %v2574_v12, 0.0  ;;  %4047 = vmatmul.bf16.vlgmr.msra.gmra.mxu3 %v13453_v27  ;;  %v11610_v31 = vld [vmem:[%s17604_s3 + $0x494] sm:$0xf0] }
 0x3b8   : > { %v14333_v40 = vpack.c.bf16 %v2701_v56, %v2697_v18  ;;  %4188 = vmatpush.bf16.msrb.mxu2 %v9742_v35  ;;  %4139 = vmatpush.bf16.msrb.mxu1 %v9614_v34  ;;  %v9725_v35 = vld [vmem:[%s17604_s3 + $0x688] sm:$0xf] }
 0x3b9   : > { %v14341_v1 = vpack.c.bf16 %v2702_v45, %v2698_v39  ;;  %v3803_v46 = vpop.f32.mrf.mxu2  ;;  %v11614_v39 = vld [vmem:[%s17604_s3 + $0x4b4] sm:$0xf0]  ;;  %v9597_v34 = vld [vmem:[%s17604_s3 + $0x588] sm:$0xf] }
 0x3ba   : > { %18155 = vst [vmem:[#allocation34_spill] sm:$0xff] %v14333_v40  ;;  %v3804_v62 = vadd.f32 %v3803_v46, %v3755_v60  ;;  %v3852_v37 = vpop.f32.mrf.mxu3  ;;  %v3707_v47 = vpop.f32.mrf.mxu0  ;;  %v9486_v53 = vor.u32 %v11614_v39, %v9485_v4  ;;  %v9726_v46 = vor.u32 %v11674_v10, %v9725_v35 }
 0x3bb   : > { %18156 = vst [vmem:[#allocation138_spill] sm:$0xff] %v14341_v1  ;;  %v9405_v1 = vld [vmem:[%s17604_s3 + $0x408] sm:$0xf] }
 0x3bc   : > { %v3756_v11 = vpop.f32.mrf.mxu1  ;;  %v14343_v18 = vadd.f32 %v3852_v37, %v3804_v62  ;;  %4090 = vmatpush.bf16.msrb.mxu0 %v9486_v53  ;;  %v9854_v37 = vor.u32 %v11706_v21, %v9853_v5  ;;  %4189 = vmatpush.bf16.msrb.mxu2 %v9726_v46  ;;  %v9469_v53 = vld [vmem:[%s17604_s3 + $0x488] sm:$0xf] }
 0x3bd   : > { %v3757_v43 = vadd.f32 %v3756_v11, %v3707_v47  ;;  %v9709_v21 = vld [vmem:[%s17604_s3 + $0x668] sm:$0xf] }
 0x3be   : > { %4238 = vmatpush.bf16.msrb.mxu3 %v9854_v37  ;;  %v9837_v37 = vld [vmem:[%s17604_s3 + $0x768] sm:$0xf] }
 0x3c1   : > { %v3805_v41 = vpop.f32.mrf.mxu2 }
 0x3c2   : > { %v3806_v60 = vadd.f32 %v3805_v41, %v3757_v43  ;;  %v3854_v12 = vpop.f32.mrf.mxu3  ;;  %v3710_v56 = vpop.f32.mrf.mxu0  ;;  %v9470_v41 = vor.u32 %v11610_v31, %v9469_v53 }
 0x3c4   : > { %v3759_v45 = vpop.f32.mrf.mxu1  ;;  %v14357_v24 = vadd.f32 %v3854_v12, %v3806_v60  ;;  %v11642_v60 = vld [vmem:[%s17604_s3 + $0x594] sm:$0xf0]  ;;  %4091 = vmatpush.bf16.msrb.mxu0 %v9470_v41 }
 0x3c5   : > { %v3760_v19 = vadd.f32 %v3759_v45, %v3710_v56  ;;  %3905 = vmatmul.bf16.gmra.mxu0 %v13467_v51  ;;  %v9598_v12 = vor.u32 %v11642_v60, %v9597_v34 }
 0x3c6   : > { %4003 = vmatmul.bf16.gmra.mxu2 %v13480_v32 }
 0x3c7   : > { %3954 = vmatmul.bf16.gmra.mxu1 %v13473_v8  ;;  %4052 = vmatmul.bf16.gmra.mxu3 %v13486_v33 }
 0x3c8   : > { %4140 = vmatpush.bf16.msrb.mxu1 %v9598_v12  ;;  %v9453_v12 = vld [vmem:[%s17604_s3 + $0x468] sm:$0xf] }
 0x3c9   : > { %v3808_v62 = vpop.f32.mrf.mxu2 }
 0x3ca   : > { %v3809_v47 = vadd.f32 %v3808_v62, %v3760_v19  ;;  %v3857_v11 = vpop.f32.mrf.mxu3  ;;  %v3712_v43 = vpop.f32.mrf.mxu0  ;;  %v11670_v62 = vld [vmem:[%s17604_s3 + $0x674] sm:$0xf0] }
 0x3cc   : > { %v3761_v4 = vpop.f32.mrf.mxu1  ;;  %v14375_v39 = vadd.f32 %v3857_v11, %v3809_v47  ;;  %v9710_v47 = vor.u32 %v11670_v62, %v9709_v21  ;;  %v11702_v11 = vld [vmem:[%s17604_s3 + $0x774] sm:$0xf0] }
 0x3cd   : > { %v3762_v22 = vadd.f32 %v3761_v4, %v3712_v43  ;;  %v9838_v4 = vor.u32 %v11702_v11, %v9837_v37 }
 0x3ce   : > { %4190 = vmatpush.bf16.msrb.mxu2 %v9710_v47 }
 0x3cf   : > { %4239 = vmatpush.bf16.msrb.mxu3 %v9838_v4  ;;  %v9693_v4 = vld [vmem:[%s17604_s3 + $0x648] sm:$0xf] }
 0x3d1   : > { %v3810_v56 = vpop.f32.mrf.mxu2 }
 0x3d2   : > { %v3811_v45 = vadd.f32 %v3810_v56, %v3762_v22  ;;  %v3859_v19 = vpop.f32.mrf.mxu3  ;;  %v3715_v35 = vpop.f32.mrf.mxu0  ;;  %v11606_v56 = vld [vmem:[%s17604_s3 + $0x474] sm:$0xf0] }
 0x3d4   : > { %v3764_v10 = vpop.f32.mrf.mxu1  ;;  %v14389_v5 = vadd.f32 %v3859_v19, %v3811_v45  ;;  %v9581_v45 = vld [vmem:[%s17604_s3 + $0x568] sm:$0xf]  ;;  %v9454_v19 = vor.u32 %v11606_v56, %v9453_v12 }
 0x3d5   : > { %v3765_v46 = vadd.f32 %v3764_v10, %v3715_v35  ;;  %3910 = vmatmul.bf16.gmra.mxu0 %v13524_v28  ;;  %v11638_v35 = vld [vmem:[%s17604_s3 + $0x574] sm:$0xf0] }
 0x3d6   : > { %4008 = vmatmul.bf16.gmra.mxu2 %v13537_v13  ;;  %v9582_v10 = vor.u32 %v11638_v35, %v9581_v45  ;;  %4092 = vmatpush.bf16.msrb.mxu0 %v9454_v19 }
 0x3d7   : > { %3959 = vmatmul.bf16.gmra.mxu1 %v13530_v16  ;;  %4057 = vmatmul.bf16.gmra.mxu3 %v13543_v61 }
 0x3d8   : > { %4141 = vmatpush.bf16.msrb.mxu1 %v9582_v10 }
 0x3d9   : > { %v3813_v43 = vpop.f32.mrf.mxu2 }
 0x3da   : > { %v3814_v22 = vadd.f32 %v3813_v43, %v3765_v46  ;;  %v3862_v53 = vpop.f32.mrf.mxu3  ;;  %v3717_v31 = vpop.f32.mrf.mxu0 }
 0x3dc   : > { %v3766_v34 = vpop.f32.mrf.mxu1  ;;  %v14407_v41 = vadd.f32 %v3862_v53, %v3814_v22  ;;  %v11666_v22 = vld [vmem:[%s17604_s3 + $0x654] sm:$0xf0]  ;;  %v9821_v53 = vld [vmem:[%s17604_s3 + $0x748] sm:$0xf] }
 0x3dd   : > { %v3767_v60 = vadd.f32 %v3766_v34, %v3717_v31  ;;  %v9694_v31 = vor.u32 %v11666_v22, %v9693_v4  ;;  %v11698_v34 = vld [vmem:[%s17604_s3 + $0x754] sm:$0xf0] }
 0x3de   : > { %v9822_v12 = vor.u32 %v11698_v34, %v9821_v53 }
 0x3df   : > { %4191 = vmatpush.bf16.msrb.mxu2 %v9694_v31 }
 0x3e0   : > { %4240 = vmatpush.bf16.msrb.mxu3 %v9822_v12 }
 0x3e1   : > { %v3815_v46 = vpop.f32.mrf.mxu2 }
 0x3e2   : > { %v3816_v21 = vadd.f32 %v3815_v46, %v3767_v60  ;;  %v3864_v62 = vpop.f32.mrf.mxu3  ;;  %v3720_v37 = vpop.f32.mrf.mxu0 }
 0x3e4   : > { %v3769_v47 = vpop.f32.mrf.mxu1  ;;  %v14421_v11 = vadd.f32 %v3864_v62, %v3816_v21  ;;  %v9437_v21 = vld [vmem:[%s17604_s3 + $0x448] sm:$0xf]  ;;  %v11602_v62 = vld [vmem:[%s17604_s3 + $0x454] sm:$0xf0] }
 0x3e5   : > { %v3770_v43 = vadd.f32 %v3769_v47, %v3720_v37  ;;  %3915 = vmatmul.bf16.gmra.mxu0 %v13557_v23  ;;  %v9565_v37 = vld [vmem:[%s17604_s3 + $0x548] sm:$0xf]  ;;  %v9438_v47 = vor.u32 %v11602_v62, %v9437_v21  ;;  %v11694_v21 = vld [vmem:[%s17604_s3 + $0x734] sm:$0xf0] }
 0x3e6   : > { %4013 = vmatmul.bf16.gmra.mxu2 %v13570_v52 }
 0x3e7   : > { %3964 = vmatmul.bf16.gmra.mxu1 %v13563_v14  ;;  %4062 = vmatmul.bf16.gmra.mxu3 %v13576_v57 }
 0x3e8   : > { %4093 = vmatpush.bf16.msrb.mxu0 %v9438_v47 }
 0x3e9   : > { %v3818_v60 = vpop.f32.mrf.mxu2 }
 0x3ea   : > { %v3819_v56 = vadd.f32 %v3818_v60, %v3770_v43  ;;  %v3867_v45 = vpop.f32.mrf.mxu3  ;;  %v3722_v19 = vpop.f32.mrf.mxu0  ;;  %v11634_v43 = vld [vmem:[%s17604_s3 + $0x554] sm:$0xf0] }
 0x3eb   : > { %v9566_v4 = vor.u32 %v11634_v43, %v9565_v37 }
 0x3ec   : > { %v3771_v35 = vpop.f32.mrf.mxu1  ;;  %v14439_v10 = vadd.f32 %v3867_v45, %v3819_v56  ;;  %v9677_v45 = vld [vmem:[%s17604_s3 + $0x628] sm:$0xf] }
 0x3ed   : > { %v3772_v46 = vadd.f32 %v3771_v35, %v3722_v19  ;;  %4142 = vmatpush.bf16.msrb.mxu1 %v9566_v4  ;;  %v11662_v19 = vld [vmem:[%s17604_s3 + $0x634] sm:$0xf0]  ;;  %v9805_v35 = vld [vmem:[%s17604_s3 + $0x728] sm:$0xf] }
 0x3ee   : > { %v9806_v37 = vor.u32 %v11694_v21, %v9805_v35 }
 0x3f0   : > { %4241 = vmatpush.bf16.msrb.mxu3 %v9806_v37 }
 0x3f1   : > { %v3820_v22 = vpop.f32.mrf.mxu2 }
 0x3f2   : > { %v3821_v53 = vadd.f32 %v3820_v22, %v3772_v46  ;;  %v3869_v31 = vpop.f32.mrf.mxu3  ;;  %v3725_v34 = vpop.f32.mrf.mxu0  ;;  %v9678_v46 = vor.u32 %v11662_v19, %v9677_v45  ;;  %v11630_v19 = vld [vmem:[%s17604_s3 + $0x534] sm:$0xf0] }
 0x3f4   : > { %v3774_v60 = vpop.f32.mrf.mxu1  ;;  %v14453_v12 = vadd.f32 %v3869_v31, %v3821_v53  ;;  %4192 = vmatpush.bf16.msrb.mxu2 %v9678_v46 }
 0x3f5   : > { %v3775_v56 = vadd.f32 %v3774_v60, %v3725_v34  ;;  %3920 = vmatmul.bf16.gmra.mxu0 %v13614_v63  ;;  %v9421_v34 = vld [vmem:[%s17604_s3 + $0x428] sm:$0xf]  ;;  %v11598_v60 = vld [vmem:[%s17604_s3 + $0x434] sm:$0xf0] }
 0x3f6   : > { %4018 = vmatmul.bf16.gmra.mxu2 %v13627_v29  ;;  %v9422_v45 = vor.u32 %v11598_v60, %v9421_v34  ;;  %v9789_v34 = vld [vmem:[%s17604_s3 + $0x708] sm:$0xf] }
 0x3f7   : > { %3969 = vmatmul.bf16.gmra.mxu1 %v13620_v0  ;;  %4067 = vmatmul.bf16.gmra.mxu3 %v13633_v7 }
 0x3f8   : > { %4094 = vmatpush.bf16.msrb.mxu0 %v9422_v45 }
 0x3f9   : > { %v3823_v62 = vpop.f32.mrf.mxu2 }
 0x3fa   : > { %v3824_v47 = vadd.f32 %v3823_v62, %v3775_v56  ;;  %v3872_v43 = vpop.f32.mrf.mxu3  ;;  %v3727_v4 = vpop.f32.mrf.mxu0  ;;  %v9549_v56 = vld [vmem:[%s17604_s3 + $0x528] sm:$0xf] }
 0x3fb   : > { %v9550_v35 = vor.u32 %v11630_v19, %v9549_v56  ;;  %v11690_v56 = vld [vmem:[%s17604_s3 + $0x714] sm:$0xf0] }
 0x3fc   : > { %v3776_v22 = vpop.f32.mrf.mxu1  ;;  %v14471_v53 = vadd.f32 %v3872_v43, %v3824_v47  ;;  %v9790_v19 = vor.u32 %v11690_v56, %v9789_v34  ;;  %v11626_v34 = vld [vmem:[%s17604_s3 + $0x514] sm:$0xf0] }
 0x3fd   : > { %v3777_v31 = vadd.f32 %v3776_v22, %v3727_v4  ;;  %4143 = vmatpush.bf16.msrb.mxu1 %v9550_v35  ;;  %v9661_v22 = vld [vmem:[%s17604_s3 + $0x608] sm:$0xf] }
 0x3fe   : > { %4242 = vmatpush.bf16.msrb.mxu3 %v9790_v19 }
 0x401   : > { %v3825_v46 = vpop.f32.mrf.mxu2 }
 0x402   : > { %v3826_v21 = vadd.f32 %v3825_v46, %v3777_v31  ;;  %v3874_v62 = vpop.f32.mrf.mxu3  ;;  %v3730_v37 = vpop.f32.mrf.mxu0  ;;  %v11658_v31 = vld [vmem:[%s17604_s3 + $0x614] sm:$0xf0] }
 0x403   : > { %v9662_v60 = vor.u32 %v11658_v31, %v9661_v22  ;;  %v11594_v22 = vld [vmem:[%s17604_s3 + $0x414] sm:$0xf0] }
 0x404   : > { %v3779_v47 = vpop.f32.mrf.mxu1  ;;  %v14485_v43 = vadd.f32 %v3874_v62, %v3826_v21  ;;  %v9406_v31 = vor.u32 %v11594_v22, %v9405_v1  ;;  %v11684_v1 = vld [vmem:[%s17604_s3 + $0x6ec] sm:$0xf] }
 0x405   : > { %v3780_v4 = vadd.f32 %v3779_v47, %v3730_v37  ;;  %3925 = vmatmul.bf16.gmra.mxu0 %v13647_v15  ;;  %4193 = vmatpush.bf16.msrb.mxu2 %v9662_v60  ;;  %v11716_v22 = vld [vmem:[%s17604_s3 + $0x7ec] sm:$0xf] }
 0x406   : > { %4023 = vmatmul.bf16.gmra.mxu2 %v13660_v48  ;;  %4095 = vmatpush.bf16.msrb.mxu0 %v9406_v31  ;;  %v9903_v31 = vld [vmem:[%s17604_s3 + $0x7f8] sm:$0xf0] }
 0x407   : > { %3974 = vmatmul.bf16.gmra.mxu1 %v13653_v9  ;;  %4072 = vmatmul.bf16.gmra.mxu3 %v13666_v2 }
 0x409   : > { %v3828_v45 = vpop.f32.mrf.mxu2 }
 0x40a   : > { %v3829_v35 = vadd.f32 %v3828_v45, %v3780_v4  ;;  %v3877_v46 = vpop.f32.mrf.mxu3  ;;  %v3732_v21 = vpop.f32.mrf.mxu0  ;;  %v9533_v4 = vld [vmem:[%s17604_s3 + $0x508] sm:$0xf] }
 0x40b   : > { %v9534_v60 = vor.u32 %v11626_v34, %v9533_v4 }
 0x40c   : > { %v3781_v62 = vpop.f32.mrf.mxu1  ;;  %v14503_v37 = vadd.f32 %v3877_v46, %v3829_v35 }
 0x40d   : > { %v3782_v47 = vadd.f32 %v3781_v62, %v3732_v21  ;;  %4144 = vmatpush.bf16.msrb.mxu1 %v9534_v60  ;;  %v9906_v60 = vor.u32 %v11716_v22, %v9903_v31  ;;  %v9647_v22 = vld [vmem:[%s17604_s3 + $0x5f8] sm:$0xf0] }
 0x40f   : > { %4431 = vmatpush.bf16.msra.mxu3 %v9906_v60 }
 0x411   : > { %v3830_v56 = vpop.f32.mrf.mxu2 }
 0x412   : > { %v3831_v45 = vadd.f32 %v3830_v56, %v3782_v47  ;;  %v3879_v19 = vpop.f32.mrf.mxu3  ;;  %v3735_v35 = vpop.f32.mrf.mxu0  ;;  %v9775_v47 = vld [vmem:[%s17604_s3 + $0x6f8] sm:$0xf0] }
 0x413   : > { %v9778_v4 = vor.u32 %v11684_v1, %v9775_v47  ;;  %v9519_v1 = vld [vmem:[%s17604_s3 + $0x4f8] sm:$0xf0] }
 0x414   : > { %v3784_v46 = vpop.f32.mrf.mxu1  ;;  %v14517_v21 = vadd.f32 %v3879_v19, %v3831_v45  ;;  %v9522_v47 = vor.u32 %v11620_v38, %v9519_v1  ;;  %v18158_v38 = vld [vmem:[#allocation108_spill] sm:$0xff] }
 0x415   : > { %v3785_v62 = vadd.f32 %v3784_v46, %v3735_v35  ;;  %3930 = vmatmul.bf16.gmra.mxu0 %v13695_v59  ;;  %4382 = vmatpush.bf16.msra.mxu2 %v9778_v4  ;;  %v11680_v1 = vld [vmem:[%s17604_s3 + $0x6cc] sm:$0xf] }
 0x416   : > { %4028 = vmatmul.bf16.gmra.mxu2 %v13717_v58  ;;  %4284 = vmatpush.bf16.msra.mxu0 %v9522_v47 }
 0x417   : > { %3979 = vmatmul.bf16.gmra.mxu1 %v13707_v30  ;;  %4077 = vmatmul.bf16.gmra.mxu3 %v13723_v3 }
 0x419   : > { %v3833_v34 = vpop.f32.mrf.mxu2 }
 0x41a   : > { %v3834_v56 = vadd.f32 %v3833_v34, %v3785_v62  ;;  %v3882_v45 = vpop.f32.mrf.mxu3  ;;  %v3737_v19 = vpop.f32.mrf.mxu0  ;;  %v11652_v62 = vld [vmem:[%s17604_s3 + $0x5ec] sm:$0xf] }
 0x41b   : > { %v9650_v4 = vor.u32 %v11652_v62, %v9647_v22  ;;  %v11712_v62 = vld [vmem:[%s17604_s3 + $0x7cc] sm:$0xf]  ;;  %v9887_v22 = vld [vmem:[%s17604_s3 + $0x7d8] sm:$0xf0] }
 0x41c   : > { %v3786_v35 = vpop.f32.mrf.mxu1  ;;  %v14535_v46 = vadd.f32 %v3882_v45, %v3834_v56 }
 0x41d   : > { %v3787_v40 = vadd.f32 %v3786_v35, %v3737_v19  ;;  %4333 = vmatpush.bf16.msra.mxu1 %v9650_v4 }
 0x421   : > { %v3835_v31 = vpop.f32.mrf.mxu2 }
 0x422   : > { %v3836_v34 = vadd.f32 %v3835_v31, %v3787_v40  ;;  %v3884_v60 = vpop.f32.mrf.mxu3  ;;  %v3740_v56 = vpop.f32.mrf.mxu0  ;;  %v9759_v40 = vld [vmem:[%s17604_s3 + $0x6d8] sm:$0xf0]  ;;  %v9890_v31 = vor.u32 %v11712_v62, %v9887_v22 }
 0x423   : > { %v9762_v47 = vor.u32 %v11680_v1, %v9759_v40  ;;  %v9503_v1 = vld [vmem:[%s17604_s3 + $0x4d8] sm:$0xf0] }
 0x424   : > { %v3789_v45 = vpop.f32.mrf.mxu1  ;;  %v14549_v19 = vadd.f32 %v3884_v60, %v3836_v34  ;;  %4432 = vmatpush.bf16.msra.mxu3 %v9890_v31  ;;  %v9631_v62 = vld [vmem:[%s17604_s3 + $0x5d8] sm:$0xf0] }
 0x425   : > { %v3790_v35 = vadd.f32 %v3789_v45, %v3740_v56  ;;  %3935 = vmatmul.bf16.gmra.mxu0 %v13751_v6  ;;  %4383 = vmatpush.bf16.msra.mxu2 %v9762_v47 }
 0x426   : > { %18157 = vst [vmem:[#allocation35_spill] sm:$0xff] %v14549_v19  ;;  %4033 = vmatmul.bf16.gmra.mxu2 %v13777_v17  ;;  %v11616_v19 = vld [vmem:[%s17604_s3 + $0x4cc] sm:$0xf] }
 0x427   : > { %3984 = vmatmul.bf16.gmra.mxu1 %v13763_v25  ;;  %4082 = vmatmul.bf16.gmra.mxu3 %v18158_v38  ;;  %v9506_v40 = vor.u32 %v11616_v19, %v9503_v1  ;;  %v11676_v19 = vld [vmem:[%s17604_s3 + $0x6ac] sm:$0xf] }
 0x428   : > { %v11708_v1 = vld [vmem:[%s17604_s3 + $0x7ac] sm:$0xf] }
 0x429   : > { %v3838_v4 = vpop.f32.mrf.mxu2  ;;  %4285 = vmatpush.bf16.msra.mxu0 %v9506_v40  ;;  %v9871_v40 = vld [vmem:[%s17604_s3 + $0x7b8] sm:$0xf0] }
 0x42a   : > { %v3839_v34 = vadd.f32 %v3838_v4, %v3790_v35  ;;  %v3887_v60 = vpop.f32.mrf.mxu3  ;;  %v3742_v56 = vpop.f32.mrf.mxu0  ;;  %v11648_v35 = vld [vmem:[%s17604_s3 + $0x5cc] sm:$0xf] }
 0x42b   : > { %v9634_v47 = vor.u32 %v11648_v35, %v9631_v62 }
 0x42c   : > { %v3791_v45 = vpop.f32.mrf.mxu1  ;;  %v14567_v49 = vadd.f32 %v3887_v60, %v3839_v34 }
 0x42d   : > { %v3792_v54 = vadd.f32 %v3791_v45, %v3742_v56  ;;  %4334 = vmatpush.bf16.msra.mxu1 %v9634_v47  ;;  %v9874_v47 = vor.u32 %v11708_v1, %v9871_v40  ;;  %v9615_v1 = vld [vmem:[%s17604_s3 + $0x5b8] sm:$0xf0] }
 0x42e   : > { %18159 = vst [vmem:[#allocation139_spill] sm:$0xff] %v14567_v49  ;;  %v11612_v49 = vld [vmem:[%s17604_s3 + $0x4ac] sm:$0xf] }
 0x42f   : > { %4433 = vmatpush.bf16.msra.mxu3 %v9874_v47 }
 0x431   : > { %v3840_v22 = vpop.f32.mrf.mxu2 }
 0x432   : > { %v3841_v4 = vadd.f32 %v3840_v22, %v3792_v54  ;;  %v3889_v31 = vpop.f32.mrf.mxu3  ;;  %v3901_v34 = vpop.f32.mrf.mxu0  ;;  %v9743_v54 = vld [vmem:[%s17604_s3 + $0x6b8] sm:$0xf0] }
 0x433   : > { %v9746_v35 = vor.u32 %v11676_v19, %v9743_v54  ;;  %v9487_v19 = vld [vmem:[%s17604_s3 + $0x4b8] sm:$0xf0] }
 0x434   : > { %v3950_v60 = vpop.f32.mrf.mxu1  ;;  %v14581_v56 = vadd.f32 %v3889_v31, %v3841_v4  ;;  %v9490_v54 = vor.u32 %v11612_v49, %v9487_v19  ;;  %v11672_v49 = vld [vmem:[%s17604_s3 + $0x68c] sm:$0xf] }
 0x435   : > { %v3951_v45 = vadd.f32 %v3950_v60, %v3901_v34  ;;  %4096 = vmatmul.bf16.vlgmr.msrb.gmra.mxu0 %v13434_v44  ;;  %4384 = vmatpush.bf16.msra.mxu2 %v9746_v35  ;;  %v11704_v19 = vld [vmem:[%s17604_s3 + $0x78c] sm:$0xf] }
 0x436   : > { %18160 = vst [vmem:[#allocation36_spill] sm:$0xff] %v14581_v56  ;;  %4194 = vmatmul.bf16.vlgmr.msrb.gmra.mxu2 %v13447_v26  ;;  %4286 = vmatpush.bf16.msra.mxu0 %v9490_v54  ;;  %v9855_v54 = vld [vmem:[%s17604_s3 + $0x798] sm:$0xf0] }
 0x437   : > { %4145 = vmatmul.bf16.vlgmr.msrb.gmra.mxu1 %v13440_v42  ;;  %4243 = vmatmul.bf16.vlgmr.msrb.gmra.mxu3 %v13453_v27 }
 0x439   : > { %v3999_v62 = vpop.f32.mrf.mxu2 }
 0x43a   : > { %v4000_v22 = vadd.f32 %v3999_v62, %v3951_v45  ;;  %v4048_v4 = vpop.f32.mrf.mxu3  ;;  %v3903_v31 = vpop.f32.mrf.mxu0  ;;  %v11644_v45 = vld [vmem:[%s17604_s3 + $0x5ac] sm:$0xf] }
 0x43b   : > { %v9618_v35 = vor.u32 %v11644_v45, %v9615_v1 }
 0x43c   : > { %v3952_v34 = vpop.f32.mrf.mxu1  ;;  %v14599_v60 = vadd.f32 %v4048_v4, %v4000_v22 }
 0x43d   : > { %v3953_v56 = vadd.f32 %v3952_v34, %v3903_v31  ;;  %4335 = vmatpush.bf16.msra.mxu1 %v9618_v35  ;;  %v9858_v35 = vor.u32 %v11704_v19, %v9855_v54  ;;  %v9599_v19 = vld [vmem:[%s17604_s3 + $0x598] sm:$0xf0] }
 0x43e   : > { %18161 = vst [vmem:[#allocation140_spill] sm:$0xff] %v14599_v60  ;;  %v11608_v60 = vld [vmem:[%s17604_s3 + $0x48c] sm:$0xf] }
 0x43f   : > { %4434 = vmatpush.bf16.msra.mxu3 %v9858_v35 }
 0x441   : > { %v4001_v40 = vpop.f32.mrf.mxu2 }
 0x442   : > { %v4002_v62 = vadd.f32 %v4001_v40, %v3953_v56  ;;  %v4050_v47 = vpop.f32.mrf.mxu3  ;;  %v3906_v22 = vpop.f32.mrf.mxu0  ;;  %v9727_v56 = vld [vmem:[%s17604_s3 + $0x698] sm:$0xf0] }
 0x443   : > { %v9730_v45 = vor.u32 %v11672_v49, %v9727_v56  ;;  %v9471_v49 = vld [vmem:[%s17604_s3 + $0x498] sm:$0xf0] }
 0x444   : > { %v3955_v4 = vpop.f32.mrf.mxu1  ;;  %v14613_v31 = vadd.f32 %v4050_v47, %v4002_v62  ;;  %v9474_v56 = vor.u32 %v11608_v60, %v9471_v49  ;;  %v11668_v60 = vld [vmem:[%s17604_s3 + $0x66c] sm:$0xf] }
 0x445   : > { %v3956_v34 = vadd.f32 %v3955_v4, %v3906_v22  ;;  %4101 = vmatmul.bf16.gmra.mxu0 %v13467_v51  ;;  %4385 = vmatpush.bf16.msra.mxu2 %v9730_v45  ;;  %v11700_v49 = vld [vmem:[%s17604_s3 + $0x76c] sm:$0xf] }
 0x446   : > { %18162 = vst [vmem:[#allocation37_spill] sm:$0xff] %v14613_v31  ;;  %4199 = vmatmul.bf16.gmra.mxu2 %v13480_v32  ;;  %4287 = vmatpush.bf16.msra.mxu0 %v9474_v56  ;;  %v9839_v56 = vld [vmem:[%s17604_s3 + $0x778] sm:$0xf0] }
 0x447   : > { %4150 = vmatmul.bf16.gmra.mxu1 %v13473_v8  ;;  %4248 = vmatmul.bf16.gmra.mxu3 %v13486_v33 }
 0x449   : > { %v4004_v1 = vpop.f32.mrf.mxu2 }
 0x44a   : > { %v4005_v40 = vadd.f32 %v4004_v1, %v3956_v34  ;;  %v4053_v62 = vpop.f32.mrf.mxu3  ;;  %v3908_v47 = vpop.f32.mrf.mxu0  ;;  %v11640_v34 = vld [vmem:[%s17604_s3 + $0x58c] sm:$0xf] }
 0x44b   : > { %v9602_v45 = vor.u32 %v11640_v34, %v9599_v19 }
 0x44c   : > { %v3957_v22 = vpop.f32.mrf.mxu1  ;;  %v14631_v4 = vadd.f32 %v4053_v62, %v4005_v40 }
 0x44d   : > { %v3958_v31 = vadd.f32 %v3957_v22, %v3908_v47  ;;  %4336 = vmatpush.bf16.msra.mxu1 %v9602_v45  ;;  %v9842_v45 = vor.u32 %v11700_v49, %v9839_v56  ;;  %v9583_v49 = vld [vmem:[%s17604_s3 + $0x578] sm:$0xf0] }
 0x44e   : > { %18163 = vst [vmem:[#allocation141_spill] sm:$0xff] %v14631_v4  ;;  %v11604_v4 = vld [vmem:[%s17604_s3 + $0x46c] sm:$0xf] }
 0x44f   : > { %4435 = vmatpush.bf16.msra.mxu3 %v9842_v45 }
 0x451   : > { %v4006_v54 = vpop.f32.mrf.mxu2 }
 0x452   : > { %v4007_v1 = vadd.f32 %v4006_v54, %v3958_v31  ;;  %v4055_v35 = vpop.f32.mrf.mxu3  ;;  %v3911_v40 = vpop.f32.mrf.mxu0  ;;  %v9711_v31 = vld [vmem:[%s17604_s3 + $0x678] sm:$0xf0] }
 0x453   : > { %v9714_v34 = vor.u32 %v11668_v60, %v9711_v31  ;;  %v9455_v60 = vld [vmem:[%s17604_s3 + $0x478] sm:$0xf0] }
 0x454   : > { %v3960_v62 = vpop.f32.mrf.mxu1  ;;  %v14645_v47 = vadd.f32 %v4055_v35, %v4007_v1  ;;  %v9458_v31 = vor.u32 %v11604_v4, %v9455_v60  ;;  %v11664_v4 = vld [vmem:[%s17604_s3 + $0x64c] sm:$0xf] }
 0x455   : > { %v3961_v22 = vadd.f32 %v3960_v62, %v3911_v40  ;;  %4106 = vmatmul.bf16.gmra.mxu0 %v13524_v28  ;;  %4386 = vmatpush.bf16.msra.mxu2 %v9714_v34  ;;  %v11696_v60 = vld [vmem:[%s17604_s3 + $0x74c] sm:$0xf] }
 0x456   : > { %18164 = vst [vmem:[#allocation38_spill] sm:$0xff] %v14645_v47  ;;  %4204 = vmatmul.bf16.gmra.mxu2 %v13537_v13  ;;  %4288 = vmatpush.bf16.msra.mxu0 %v9458_v31  ;;  %v9823_v31 = vld [vmem:[%s17604_s3 + $0x758] sm:$0xf0] }
 0x457   : > { %4155 = vmatmul.bf16.gmra.mxu1 %v13530_v16  ;;  %4253 = vmatmul.bf16.gmra.mxu3 %v13543_v61 }
 0x459   : > { %v4009_v19 = vpop.f32.mrf.mxu2 }
 0x45a   : > { %v4010_v54 = vadd.f32 %v4009_v19, %v3961_v22  ;;  %v4058_v1 = vpop.f32.mrf.mxu3  ;;  %v3913_v35 = vpop.f32.mrf.mxu0  ;;  %v11636_v22 = vld [vmem:[%s17604_s3 + $0x56c] sm:$0xf] }
 0x45b   : > { %v9586_v34 = vor.u32 %v11636_v22, %v9583_v49 }
 0x45c   : > { %v3962_v40 = vpop.f32.mrf.mxu1  ;;  %v14663_v62 = vadd.f32 %v4058_v1, %v4010_v54 }
 0x45d   : > { %v3963_v47 = vadd.f32 %v3962_v40, %v3913_v35  ;;  %4337 = vmatpush.bf16.msra.mxu1 %v9586_v34  ;;  %v9826_v34 = vor.u32 %v11696_v60, %v9823_v31  ;;  %v9567_v60 = vld [vmem:[%s17604_s3 + $0x558] sm:$0xf0] }
 0x45e   : > { %18165 = vst [vmem:[#allocation142_spill] sm:$0xff] %v14663_v62  ;;  %v11600_v62 = vld [vmem:[%s17604_s3 + $0x44c] sm:$0xf] }
 0x45f   : > { %4436 = vmatpush.bf16.msra.mxu3 %v9826_v34 }
 0x461   : > { %v4011_v56 = vpop.f32.mrf.mxu2 }
 0x462   : > { %v4012_v19 = vadd.f32 %v4011_v56, %v3963_v47  ;;  %v4060_v45 = vpop.f32.mrf.mxu3  ;;  %v3916_v54 = vpop.f32.mrf.mxu0  ;;  %v9695_v47 = vld [vmem:[%s17604_s3 + $0x658] sm:$0xf0] }
 0x463   : > { %v9698_v22 = vor.u32 %v11664_v4, %v9695_v47  ;;  %v9439_v4 = vld [vmem:[%s17604_s3 + $0x458] sm:$0xf0] }
 0x464   : > { %v3965_v1 = vpop.f32.mrf.mxu1  ;;  %v14677_v35 = vadd.f32 %v4060_v45, %v4012_v19  ;;  %v9442_v47 = vor.u32 %v11600_v62, %v9439_v4  ;;  %v11660_v62 = vld [vmem:[%s17604_s3 + $0x62c] sm:$0xf] }
 0x465   : > { %v3966_v40 = vadd.f32 %v3965_v1, %v3916_v54  ;;  %4111 = vmatmul.bf16.gmra.mxu0 %v13557_v23  ;;  %4387 = vmatpush.bf16.msra.mxu2 %v9698_v22  ;;  %v11692_v4 = vld [vmem:[%s17604_s3 + $0x72c] sm:$0xf] }
 0x466   : > { %18166 = vst [vmem:[#allocation39_spill] sm:$0xff] %v14677_v35  ;;  %4209 = vmatmul.bf16.gmra.mxu2 %v13570_v52  ;;  %4289 = vmatpush.bf16.msra.mxu0 %v9442_v47  ;;  %v9807_v47 = vld [vmem:[%s17604_s3 + $0x738] sm:$0xf0] }
 0x467   : > { %4160 = vmatmul.bf16.gmra.mxu1 %v13563_v14  ;;  %4258 = vmatmul.bf16.gmra.mxu3 %v13576_v57 }
 0x469   : > { %v4014_v49 = vpop.f32.mrf.mxu2 }
 0x46a   : > { %v4015_v56 = vadd.f32 %v4014_v49, %v3966_v40  ;;  %v4063_v19 = vpop.f32.mrf.mxu3  ;;  %v3918_v45 = vpop.f32.mrf.mxu0  ;;  %v11632_v40 = vld [vmem:[%s17604_s3 + $0x54c] sm:$0xf] }
 0x46b   : > { %v9570_v22 = vor.u32 %v11632_v40, %v9567_v60 }
 0x46c   : > { %v3967_v54 = vpop.f32.mrf.mxu1  ;;  %v14695_v1 = vadd.f32 %v4063_v19, %v4015_v56 }
 0x46d   : > { %v3968_v35 = vadd.f32 %v3967_v54, %v3918_v45  ;;  %4338 = vmatpush.bf16.msra.mxu1 %v9570_v22  ;;  %v9810_v22 = vor.u32 %v11692_v4, %v9807_v47  ;;  %v9551_v4 = vld [vmem:[%s17604_s3 + $0x538] sm:$0xf0] }
 0x46e   : > { %18167 = vst [vmem:[#allocation143_spill] sm:$0xff] %v14695_v1  ;;  %v11596_v1 = vld [vmem:[%s17604_s3 + $0x42c] sm:$0xf] }
 0x46f   : > { %4437 = vmatpush.bf16.msra.mxu3 %v9810_v22 }
 0x471   : > { %v4016_v31 = vpop.f32.mrf.mxu2 }
 0x472   : > { %v4017_v49 = vadd.f32 %v4016_v31, %v3968_v35  ;;  %v4065_v34 = vpop.f32.mrf.mxu3  ;;  %v3921_v56 = vpop.f32.mrf.mxu0  ;;  %v9679_v35 = vld [vmem:[%s17604_s3 + $0x638] sm:$0xf0] }
 0x473   : > { %v9682_v40 = vor.u32 %v11660_v62, %v9679_v35  ;;  %v9423_v62 = vld [vmem:[%s17604_s3 + $0x438] sm:$0xf0] }
 0x474   : > { %v3970_v19 = vpop.f32.mrf.mxu1  ;;  %v14709_v45 = vadd.f32 %v4065_v34, %v4017_v49  ;;  %v9426_v35 = vor.u32 %v11596_v1, %v9423_v62  ;;  %v11656_v1 = vld [vmem:[%s17604_s3 + $0x60c] sm:$0xf] }
 0x475   : > { %v3971_v54 = vadd.f32 %v3970_v19, %v3921_v56  ;;  %4116 = vmatmul.bf16.gmra.mxu0 %v13614_v63  ;;  %4388 = vmatpush.bf16.msra.mxu2 %v9682_v40  ;;  %v11688_v62 = vld [vmem:[%s17604_s3 + $0x70c] sm:$0xf] }
 0x476   : > { %18168 = vst [vmem:[#allocation40_spill] sm:$0xff] %v14709_v45  ;;  %4214 = vmatmul.bf16.gmra.mxu2 %v13627_v29  ;;  %4290 = vmatpush.bf16.msra.mxu0 %v9426_v35  ;;  %v9791_v35 = vld [vmem:[%s17604_s3 + $0x718] sm:$0xf0] }
 0x477   : > { %4165 = vmatmul.bf16.gmra.mxu1 %v13620_v0  ;;  %4263 = vmatmul.bf16.gmra.mxu3 %v13633_v7 }
 0x479   : > { %v4019_v60 = vpop.f32.mrf.mxu2 }
 0x47a   : > { %v4020_v31 = vadd.f32 %v4019_v60, %v3971_v54  ;;  %v4068_v49 = vpop.f32.mrf.mxu3  ;;  %v3923_v34 = vpop.f32.mrf.mxu0  ;;  %v11628_v54 = vld [vmem:[%s17604_s3 + $0x52c] sm:$0xf] }
 0x47b   : > { %v9554_v40 = vor.u32 %v11628_v54, %v9551_v4 }
 0x47c   : > { %v3972_v56 = vpop.f32.mrf.mxu1  ;;  %v14727_v19 = vadd.f32 %v4068_v49, %v4020_v31 }
 0x47d   : > { %v3973_v45 = vadd.f32 %v3972_v56, %v3923_v34  ;;  %4339 = vmatpush.bf16.msra.mxu1 %v9554_v40  ;;  %v9794_v40 = vor.u32 %v11688_v62, %v9791_v35  ;;  %v9535_v62 = vld [vmem:[%s17604_s3 + $0x518] sm:$0xf0] }
 0x47e   : > { %18169 = vst [vmem:[#allocation144_spill] sm:$0xff] %v14727_v19  ;;  %v11592_v19 = vld [vmem:[%s17604_s3 + $0x40c] sm:$0xf] }
 0x47f   : > { %4438 = vmatpush.bf16.msra.mxu3 %v9794_v40 }
 0x481   : > { %v4021_v47 = vpop.f32.mrf.mxu2 }
 0x482   : > { %v4022_v60 = vadd.f32 %v4021_v47, %v3973_v45  ;;  %v4070_v22 = vpop.f32.mrf.mxu3  ;;  %v3926_v31 = vpop.f32.mrf.mxu0  ;;  %v9663_v45 = vld [vmem:[%s17604_s3 + $0x618] sm:$0xf0] }
 0x483   : > { %v9666_v54 = vor.u32 %v11656_v1, %v9663_v45  ;;  %v9407_v1 = vld [vmem:[%s17604_s3 + $0x418] sm:$0xf0] }
 0x484   : > { %v3975_v49 = vpop.f32.mrf.mxu1  ;;  %v14741_v34 = vadd.f32 %v4070_v22, %v4022_v60  ;;  %v9410_v45 = vor.u32 %v11592_v19, %v9407_v1  ;;  %v10277_v19 = vld [vmem:[%s17604_s3 + $0x2e0] sm:$0xf] }
 0x485   : > { %v3976_v56 = vadd.f32 %v3975_v49, %v3926_v31  ;;  %4121 = vmatmul.bf16.gmra.mxu0 %v13647_v15  ;;  %4389 = vmatpush.bf16.msra.mxu2 %v9666_v54  ;;  %v10405_v1 = vld [vmem:[%s17604_s3 + $0x3e0] sm:$0xf] }
 0x486   : > { %18170 = vst [vmem:[#allocation41_spill] sm:$0xff] %v14741_v34  ;;  %4219 = vmatmul.bf16.gmra.mxu2 %v13660_v48  ;;  %4291 = vmatpush.bf16.msra.mxu0 %v9410_v45  ;;  %v11589_v45 = vld [vmem:[%s17604_s3 + $0x3ec] sm:$0xf0] }
 0x487   : > { %4170 = vmatmul.bf16.gmra.mxu1 %v13653_v9  ;;  %4268 = vmatmul.bf16.gmra.mxu3 %v13666_v2 }
 0x489   : > { %v4024_v4 = vpop.f32.mrf.mxu2 }
 0x48a   : > { %v4025_v47 = vadd.f32 %v4024_v4, %v3976_v56  ;;  %v4073_v60 = vpop.f32.mrf.mxu3  ;;  %v3928_v22 = vpop.f32.mrf.mxu0  ;;  %v11624_v56 = vld [vmem:[%s17604_s3 + $0x50c] sm:$0xf] }
 0x48b   : > { %v9538_v54 = vor.u32 %v11624_v56, %v9535_v62 }
 0x48c   : > { %v3977_v31 = vpop.f32.mrf.mxu1  ;;  %v14759_v49 = vadd.f32 %v4073_v60, %v4025_v47 }
 0x48d   : > { %v3978_v34 = vadd.f32 %v3977_v31, %v3928_v22  ;;  %4340 = vmatpush.bf16.msra.mxu1 %v9538_v54  ;;  %v10406_v54 = vor.u32 %v11589_v45, %v10405_v1  ;;  %v11525_v1 = vld [vmem:[%s17604_s3 + $0x1ec] sm:$0xf0] }
 0x48e   : > { %18171 = vst [vmem:[#allocation145_spill] sm:$0xff] %v14759_v49  ;;  %v10021_v49 = vld [vmem:[%s17604_s3 + $0xe0] sm:$0xf] }
 0x48f   : > { %5267 = vmatpush.bf16.msrb.mxu3 %v10406_v54 }
 0x491   : > { %v4026_v35 = vpop.f32.mrf.mxu2 }
 0x492   : > { %v4027_v4 = vadd.f32 %v4026_v35, %v3978_v34  ;;  %v4075_v40 = vpop.f32.mrf.mxu3  ;;  %v3931_v47 = vpop.f32.mrf.mxu0  ;;  %v11557_v34 = vld [vmem:[%s17604_s3 + $0x2ec] sm:$0xf0] }
 0x493   : > { %v10278_v56 = vor.u32 %v11557_v34, %v10277_v19  ;;  %v11493_v19 = vld [vmem:[%s17604_s3 + $0xec] sm:$0xf0] }
 0x494   : > { %v3980_v60 = vpop.f32.mrf.mxu1  ;;  %v14773_v22 = vadd.f32 %v4075_v40, %v4027_v4  ;;  %v10022_v34 = vor.u32 %v11493_v19, %v10021_v49  ;;  %v10261_v49 = vld [vmem:[%s17604_s3 + $0x2c0] sm:$0xf] }
 0x495   : > { %v3981_v31 = vadd.f32 %v3980_v60, %v3931_v47  ;;  %4126 = vmatmul.bf16.gmra.mxu0 %v13695_v59  ;;  %5218 = vmatpush.bf16.msrb.mxu2 %v10278_v56  ;;  %v10389_v19 = vld [vmem:[%s17604_s3 + $0x3c0] sm:$0xf] }
 0x496   : > { %18172 = vst [vmem:[#allocation42_spill] sm:$0xff] %v14773_v22  ;;  %4224 = vmatmul.bf16.gmra.mxu2 %v13717_v58  ;;  %5120 = vmatpush.bf16.msrb.mxu0 %v10022_v34  ;;  %v11585_v34 = vld [vmem:[%s17604_s3 + $0x3cc] sm:$0xf0] }
 0x497   : > { %4175 = vmatmul.bf16.gmra.mxu1 %v13707_v30  ;;  %4273 = vmatmul.bf16.gmra.mxu3 %v13723_v3 }
 0x499   : > { %v4029_v62 = vpop.f32.mrf.mxu2 }
 0x49a   : > { %v4030_v35 = vadd.f32 %v4029_v62, %v3981_v31  ;;  %v4078_v4 = vpop.f32.mrf.mxu3  ;;  %v3933_v40 = vpop.f32.mrf.mxu0  ;;  %v10149_v31 = vld [vmem:[%s17604_s3 + $0x1e0] sm:$0xf] }
 0x49b   : > { %v10150_v56 = vor.u32 %v11525_v1, %v10149_v31 }
 0x49c   : > { %v3982_v47 = vpop.f32.mrf.mxu1  ;;  %v14791_v60 = vadd.f32 %v4078_v4, %v4030_v35 }
 0x49d   : > { %v3983_v22 = vadd.f32 %v3982_v47, %v3933_v40  ;;  %5169 = vmatpush.bf16.msrb.mxu1 %v10150_v56  ;;  %v10390_v56 = vor.u32 %v11585_v34, %v10389_v19  ;;  %v11521_v19 = vld [vmem:[%s17604_s3 + $0x1cc] sm:$0xf0] }
 0x49e   : > { %18173 = vst [vmem:[#allocation146_spill] sm:$0xff] %v14791_v60  ;;  %v10005_v60 = vld [vmem:[%s17604_s3 + $0xc0] sm:$0xf] }
 0x49f   : > { %5268 = vmatpush.bf16.msrb.mxu3 %v10390_v56 }
 0x4a1   : > { %v4031_v45 = vpop.f32.mrf.mxu2 }
 0x4a2   : > { %v4032_v62 = vadd.f32 %v4031_v45, %v3983_v22  ;;  %v4080_v54 = vpop.f32.mrf.mxu3  ;;  %v3936_v35 = vpop.f32.mrf.mxu0  ;;  %v11553_v22 = vld [vmem:[%s17604_s3 + $0x2cc] sm:$0xf0] }
 0x4a3   : > { %v10262_v31 = vor.u32 %v11553_v22, %v10261_v49  ;;  %v11489_v49 = vld [vmem:[%s17604_s3 + $0xcc] sm:$0xf0] }
 0x4a4   : > { %v3985_v4 = vpop.f32.mrf.mxu1  ;;  %v14805_v40 = vadd.f32 %v4080_v54, %v4032_v62  ;;  %v10006_v22 = vor.u32 %v11489_v49, %v10005_v60  ;;  %v10245_v60 = vld [vmem:[%s17604_s3 + $0x2a0] sm:$0xf] }
 0x4a5   : > { %v3986_v47 = vadd.f32 %v3985_v4, %v3936_v35  ;;  %4131 = vmatmul.bf16.gmra.mxu0 %v13751_v6  ;;  %5219 = vmatpush.bf16.msrb.mxu2 %v10262_v31  ;;  %v10373_v49 = vld [vmem:[%s17604_s3 + $0x3a0] sm:$0xf] }
 0x4a6   : > { %18174 = vst [vmem:[#allocation43_spill] sm:$0xff] %v14805_v40  ;;  %4229 = vmatmul.bf16.gmra.mxu2 %v13777_v17  ;;  %5121 = vmatpush.bf16.msrb.mxu0 %v10006_v22 }
 0x4a7   : > { %4180 = vmatmul.bf16.gmra.mxu1 %v13763_v25  ;;  %4278 = vmatmul.bf16.gmra.mxu3 %v18158_v38 }
 0x4a9   : > { %v4034_v1 = vpop.f32.mrf.mxu2 }
 0x4aa   : > { %v4035_v45 = vadd.f32 %v4034_v1, %v3986_v47  ;;  %v4083_v62 = vpop.f32.mrf.mxu3  ;;  %v3938_v54 = vpop.f32.mrf.mxu0  ;;  %v10133_v47 = vld [vmem:[%s17604_s3 + $0x1c0] sm:$0xf] }
 0x4ab   : > { %v10134_v31 = vor.u32 %v11521_v19, %v10133_v47 }
 0x4ac   : > { %v3987_v35 = vpop.f32.mrf.mxu1  ;;  %v14823_v4 = vadd.f32 %v4083_v62, %v4035_v45 }
 0x4ad   : > { %v3988_v40 = vadd.f32 %v3987_v35, %v3938_v54  ;;  %5170 = vmatpush.bf16.msrb.mxu1 %v10134_v31 }
 0x4b1   : > { %v4036_v34 = vpop.f32.mrf.mxu2 }
 0x4b2   : > { %v4037_v1 = vadd.f32 %v4036_v34, %v3988_v40  ;;  %v4085_v56 = vpop.f32.mrf.mxu3  ;;  %v4097_v45 = vpop.f32.mrf.mxu0  ;;  %v11549_v40 = vld [vmem:[%s17604_s3 + $0x2ac] sm:$0xf0] }
 0x4b3   : > { %v10246_v47 = vor.u32 %v11549_v40, %v10245_v60  ;;  %v11517_v60 = vld [vmem:[%s17604_s3 + $0x1ac] sm:$0xf0] }
 0x4b4   : > { %v4146_v62 = vpop.f32.mrf.mxu1  ;;  %v14837_v54 = vadd.f32 %v4085_v56, %v4037_v1  ;;  %v9989_v56 = vld [vmem:[%s17604_s3 + $0xa0] sm:$0xf] }
 0x4b5   : > { %v4147_v35 = vadd.f32 %v4146_v62, %v4097_v45  ;;  %4292 = vmatmul.bf16.vlgmr.msra.gmra.mxu0 %v13434_v44  ;;  %v11581_v44 = vld [vmem:[%s17604_s3 + $0x3ac] sm:$0xf0]  ;;  %5220 = vmatpush.bf16.msrb.mxu2 %v10246_v47  ;;  %v10117_v62 = vld [vmem:[%s17604_s3 + $0x1a0] sm:$0xf] }
 0x4b6   : > { %4390 = vmatmul.bf16.vlgmr.msra.gmra.mxu2 %v13447_v26  ;;  %v10374_v26 = vor.u32 %v11581_v44, %v10373_v49  ;;  %v11485_v45 = vld [vmem:[%s17604_s3 + $0xac] sm:$0xf0]  ;;  %v10118_v40 = vor.u32 %v11517_v60, %v10117_v62 }
 0x4b7   : > { %4341 = vmatmul.bf16.vlgmr.msra.gmra.mxu1 %v13440_v42  ;;  %4439 = vmatmul.bf16.vlgmr.msra.gmra.mxu3 %v13453_v27 }
 0x4b8   : > { %5269 = vmatpush.bf16.msrb.mxu3 %v10374_v26  ;;  %5171 = vmatpush.bf16.msrb.mxu1 %v10118_v40 }
 0x4b9   : > { %v4195_v42 = vpop.f32.mrf.mxu2 }
 0x4ba   : > { %v4196_v27 = vadd.f32 %v4195_v42, %v4147_v35  ;;  %v4244_v22 = vpop.f32.mrf.mxu3  ;;  %v4099_v19 = vpop.f32.mrf.mxu0  ;;  %v9990_v35 = vor.u32 %v11485_v45, %v9989_v56 }
 0x4bc   : > { %v4148_v31 = vpop.f32.mrf.mxu1  ;;  %v14855_v34 = vadd.f32 %v4244_v22, %v4196_v27  ;;  %5122 = vmatpush.bf16.msrb.mxu0 %v9990_v35 }
 0x4bd   : > { %v4149_v1 = vadd.f32 %v4148_v31, %v4099_v19  ;;  %v10229_v19 = vld [vmem:[%s17604_s3 + $0x280] sm:$0xf]  ;;  %v11545_v31 = vld [vmem:[%s17604_s3 + $0x28c] sm:$0xf0] }
 0x4be   : > { %v10230_v56 = vor.u32 %v11545_v31, %v10229_v19 }
 0x4c0   : > { %5221 = vmatpush.bf16.msrb.mxu2 %v10230_v56 }
 0x4c1   : > { %v4197_v49 = vpop.f32.mrf.mxu2 }
 0x4c2   : > { %v4198_v47 = vadd.f32 %v4197_v49, %v4149_v1  ;;  %v4246_v44 = vpop.f32.mrf.mxu3  ;;  %v4102_v42 = vpop.f32.mrf.mxu0  ;;  %v10357_v1 = vld [vmem:[%s17604_s3 + $0x380] sm:$0xf] }
 0x4c3   : > { %v9973_v49 = vld [vmem:[%s17604_s3 + $0x80] sm:$0xf] }
 0x4c4   : > { %v4151_v26 = vpop.f32.mrf.mxu1  ;;  %v14869_v27 = vadd.f32 %v4246_v44, %v4198_v47  ;;  %v11481_v47 = vld [vmem:[%s17604_s3 + $0x8c] sm:$0xf0]  ;;  %v10101_v44 = vld [vmem:[%s17604_s3 + $0x180] sm:$0xf] }
 0x4c5   : > { %v4152_v22 = vadd.f32 %v4151_v26, %v4102_v42  ;;  %4297 = vmatmul.bf16.gmra.mxu0 %v13467_v51  ;;  %v11577_v51 = vld [vmem:[%s17604_s3 + $0x38c] sm:$0xf0]  ;;  %v9974_v42 = vor.u32 %v11481_v47, %v9973_v49 }
 0x4c6   : > { %4395 = vmatmul.bf16.gmra.mxu2 %v13480_v32  ;;  %v10358_v32 = vor.u32 %v11577_v51, %v10357_v1  ;;  %v11513_v26 = vld [vmem:[%s17604_s3 + $0x18c] sm:$0xf0] }
 0x4c7   : > { %4346 = vmatmul.bf16.gmra.mxu1 %v13473_v8  ;;  %4444 = vmatmul.bf16.gmra.mxu3 %v13486_v33 }
 0x4c8   : > { %5270 = vmatpush.bf16.msrb.mxu3 %v10358_v32  ;;  %5123 = vmatpush.bf16.msrb.mxu0 %v9974_v42 }
 0x4c9   : > { %v4200_v8 = vpop.f32.mrf.mxu2 }
 0x4ca   : > { %v4201_v33 = vadd.f32 %v4200_v8, %v4152_v22  ;;  %v4249_v45 = vpop.f32.mrf.mxu3  ;;  %v4104_v62 = vpop.f32.mrf.mxu0  ;;  %v10102_v22 = vor.u32 %v11513_v26, %v10101_v44  ;;  %v9957_v26 = vld [vmem:[%s17604_s3 + $0x60] sm:$0xf] }
 0x4cc   : > { %v4153_v35 = vpop.f32.mrf.mxu1  ;;  %v14887_v60 = vadd.f32 %v4249_v45, %v4201_v33  ;;  %5172 = vmatpush.bf16.msrb.mxu1 %v10102_v22  ;;  %v10213_v33 = vld [vmem:[%s17604_s3 + $0x260] sm:$0xf]  ;;  %v11541_v45 = vld [vmem:[%s17604_s3 + $0x26c] sm:$0xf0] }
 0x4cd   : > { %v4154_v40 = vadd.f32 %v4153_v35, %v4104_v62  ;;  %v10341_v62 = vld [vmem:[%s17604_s3 + $0x360] sm:$0xf]  ;;  %v10214_v35 = vor.u32 %v11541_v45, %v10213_v33  ;;  %v11477_v22 = vld [vmem:[%s17604_s3 + $0x6c] sm:$0xf0] }
 0x4ce   : > { %18175 = vst [vmem:[#allocation147_spill] sm:$0xff] %v14887_v60  ;;  %v10029_v60 = vld [vmem:[%s17604_s3 + $0xe8] sm:$0xf] }
 0x4cf   : > { %5222 = vmatpush.bf16.msrb.mxu2 %v10214_v35 }
 0x4d1   : > { %v4202_v19 = vpop.f32.mrf.mxu2 }
 0x4d2   : > { %v4203_v31 = vadd.f32 %v4202_v19, %v4154_v40  ;;  %v4251_v1 = vpop.f32.mrf.mxu3  ;;  %v4107_v56 = vpop.f32.mrf.mxu0  ;;  %v10085_v19 = vld [vmem:[%s17604_s3 + $0x160] sm:$0xf] }
 0x4d4   : > { %v4156_v51 = vpop.f32.mrf.mxu1  ;;  %v14901_v8 = vadd.f32 %v4251_v1, %v4203_v31  ;;  %v9958_v31 = vor.u32 %v11477_v22, %v9957_v26  ;;  %v11509_v1 = vld [vmem:[%s17604_s3 + $0x16c] sm:$0xf0] }
 0x4d5   : > { %v4157_v32 = vadd.f32 %v4156_v51, %v4107_v56  ;;  %4302 = vmatmul.bf16.gmra.mxu0 %v13524_v28  ;;  %v11573_v28 = vld [vmem:[%s17604_s3 + $0x36c] sm:$0xf0]  ;;  %v10086_v56 = vor.u32 %v11509_v1, %v10085_v19  ;;  %v9941_v19 = vld [vmem:[%s17604_s3 + $0x40] sm:$0xf] }
 0x4d6   : > { %18176 = vst [vmem:[#allocation44_spill] sm:$0xff] %v14901_v8  ;;  %4400 = vmatmul.bf16.gmra.mxu2 %v13537_v13  ;;  %v10342_v13 = vor.u32 %v11573_v28, %v10341_v62  ;;  %5124 = vmatpush.bf16.msrb.mxu0 %v9958_v31  ;;  %v11473_v31 = vld [vmem:[%s17604_s3 + $0x4c] sm:$0xf0]  ;;  %v10069_v1 = vld [vmem:[%s17604_s3 + $0x140] sm:$0xf] }
 0x4d7   : > { %4351 = vmatmul.bf16.gmra.mxu1 %v13530_v16  ;;  %4449 = vmatmul.bf16.gmra.mxu3 %v13543_v61 }
 0x4d8   : > { %5271 = vmatpush.bf16.msrb.mxu3 %v10342_v13  ;;  %5173 = vmatpush.bf16.msrb.mxu1 %v10086_v56  ;;  %v11537_v13 = vld [vmem:[%s17604_s3 + $0x24c] sm:$0xf0]  ;;  %v9942_v56 = vor.u32 %v11473_v31, %v9941_v19  ;;  %v9925_v19 = vld [vmem:[%s17604_s3 + $0x20] sm:$0xf] }
 0x4d9   : > { %v4205_v16 = vpop.f32.mrf.mxu2  ;;  %v11469_v31 = vld [vmem:[%s17604_s3 + $0x2c] sm:$0xf0] }
 0x4da   : > { %v4206_v61 = vadd.f32 %v4205_v16, %v4157_v32  ;;  %v4254_v40 = vpop.f32.mrf.mxu3  ;;  %v4109_v49 = vpop.f32.mrf.mxu0  ;;  %v10197_v16 = vld [vmem:[%s17604_s3 + $0x240] sm:$0xf]  ;;  %5125 = vmatpush.bf16.msrb.mxu0 %v9942_v56  ;;  %v9926_v56 = vor.u32 %v11469_v31, %v9925_v19 }
 0x4db   : > { %v10037_v19 = vld [vmem:[%s17604_s3 + $0x100] sm:$0xf] }
 0x4dc   : > { %v4158_v47 = vpop.f32.mrf.mxu1  ;;  %v14919_v44 = vadd.f32 %v4254_v40, %v4206_v61  ;;  %v10325_v61 = vld [vmem:[%s17604_s3 + $0x340] sm:$0xf]  ;;  %v10198_v40 = vor.u32 %v11537_v13, %v10197_v16 }
 0x4dd   : > { %v4159_v42 = vadd.f32 %v4158_v47, %v4109_v49 }
 0x4de   : > { %18177 = vst [vmem:[#allocation148_spill] sm:$0xff] %v14919_v44  ;;  %5223 = vmatpush.bf16.msrb.mxu2 %v10198_v40  ;;  %v10181_v40 = vld [vmem:[%s17604_s3 + $0x220] sm:$0xf]  ;;  %5126 = vmatpush.bf16.msrb.mxu0 %v9926_v56 }
 0x4e1   : > { %v4207_v51 = vpop.f32.mrf.mxu2 }
 0x4e2   : > { %v4208_v32 = vadd.f32 %v4207_v51, %v4159_v42  ;;  %v4256_v33 = vpop.f32.mrf.mxu3  ;;  %v4112_v45 = vpop.f32.mrf.mxu0  ;;  %v11505_v51 = vld [vmem:[%s17604_s3 + $0x14c] sm:$0xf0] }
 0x4e4   : > { %v4161_v62 = vpop.f32.mrf.mxu1  ;;  %v14933_v35 = vadd.f32 %v4256_v33, %v4208_v32  ;;  %v10070_v32 = vor.u32 %v11505_v51, %v10069_v1  ;;  %v10053_v1 = vld [vmem:[%s17604_s3 + $0x120] sm:$0xf]  ;;  %v11501_v51 = vld [vmem:[%s17604_s3 + $0x12c] sm:$0xf0] }
 0x4e5   : > { %v4162_v28 = vadd.f32 %v4161_v62, %v4112_v45  ;;  %4307 = vmatmul.bf16.gmra.mxu0 %v13557_v23  ;;  %v11569_v23 = vld [vmem:[%s17604_s3 + $0x34c] sm:$0xf0] }
 0x4e6   : > { %18178 = vst [vmem:[#allocation45_spill] sm:$0xff] %v14933_v35  ;;  %4405 = vmatmul.bf16.gmra.mxu2 %v13570_v52  ;;  %v10326_v52 = vor.u32 %v11569_v23, %v10325_v61  ;;  %5174 = vmatpush.bf16.msrb.mxu1 %v10070_v32  ;;  %v11533_v23 = vld [vmem:[%s17604_s3 + $0x22c] sm:$0xf0]  ;;  %v10054_v32 = vor.u32 %v11501_v51, %v10053_v1 }
 0x4e7   : > { %4356 = vmatmul.bf16.gmra.mxu1 %v13563_v14  ;;  %4454 = vmatmul.bf16.gmra.mxu3 %v13576_v57  ;;  %v11497_v1 = vld [vmem:[%s17604_s3 + $0x10c] sm:$0xf0] }
 0x4e8   : > { %5272 = vmatpush.bf16.msrb.mxu3 %v10326_v52  ;;  %v10182_v52 = vor.u32 %v11533_v23, %v10181_v40  ;;  %v10165_v23 = vld [vmem:[%s17604_s3 + $0x200] sm:$0xf]  ;;  %v10038_v56 = vor.u32 %v11497_v1, %v10037_v19  ;;  %v18230_v35 = vld [vmem:[#allocation133_spill] sm:$0xff] }
 0x4e9   : > { %v4210_v14 = vpop.f32.mrf.mxu2 }
 0x4ea   : > { %v4211_v57 = vadd.f32 %v4210_v14, %v4162_v28  ;;  %v4259_v49 = vpop.f32.mrf.mxu3  ;;  %v4114_v47 = vpop.f32.mrf.mxu0  ;;  %v10309_v14 = vld [vmem:[%s17604_s3 + $0x320] sm:$0xf]  ;;  %5224 = vmatpush.bf16.msrb.mxu2 %v10182_v52  ;;  %5175 = vmatpush.bf16.msrb.mxu1 %v10054_v32 }
 0x4eb   : > { %v10293_v52 = vld [vmem:[%s17604_s3 + $0x300] sm:$0xf] }
 0x4ec   : > { %v4163_v42 = vpop.f32.mrf.mxu1  ;;  %v14951_v26 = vadd.f32 %v4259_v49, %v4211_v57 }
 0x4ed   : > { %v4164_v22 = vadd.f32 %v4163_v42, %v4114_v47 }
 0x4ee   : > { %18179 = vst [vmem:[#allocation149_spill] sm:$0xff] %v14951_v26  ;;  %5176 = vmatpush.bf16.msrb.mxu1 %v10038_v56  ;;  %v11463_v26 = vld [vmem:[%s17604_s3 + $0x4] sm:$0xf] }
 0x4f1   : > { %v4212_v33 = vpop.f32.mrf.mxu2 }
 0x4f2   : > { %v4213_v45 = vadd.f32 %v4212_v33, %v4164_v22  ;;  %v4261_v62 = vpop.f32.mrf.mxu3  ;;  %v4117_v28 = vpop.f32.mrf.mxu0 }
 0x4f4   : > { %v4166_v16 = vpop.f32.mrf.mxu1  ;;  %v14965_v13 = vadd.f32 %v4261_v62, %v4213_v45 }
 0x4f5   : > { %v4167_v61 = vadd.f32 %v4166_v16, %v4117_v28  ;;  %4312 = vmatmul.bf16.gmra.mxu0 %v13614_v63  ;;  %v11565_v63 = vld [vmem:[%s17604_s3 + $0x32c] sm:$0xf0] }
 0x4f6   : > { %18180 = vst [vmem:[#allocation46_spill] sm:$0xff] %v14965_v13  ;;  %4410 = vmatmul.bf16.gmra.mxu2 %v13627_v29  ;;  %v10310_v29 = vor.u32 %v11565_v63, %v10309_v14  ;;  %v11529_v14 = vld [vmem:[%s17604_s3 + $0x20c] sm:$0xf0] }
 0x4f7   : > { %4361 = vmatmul.bf16.gmra.mxu1 %v13620_v0  ;;  %4459 = vmatmul.bf16.gmra.mxu3 %v13633_v7  ;;  %v10166_v63 = vor.u32 %v11529_v14, %v10165_v23  ;;  %v10279_v23 = vld [vmem:[%s17604_s3 + $0x2f0] sm:$0xf0]  ;;  %v11587_v14 = vld [vmem:[%s17604_s3 + $0x3e4] sm:$0xf] }
 0x4f8   : > { %5273 = vmatpush.bf16.msrb.mxu3 %v10310_v29 }
 0x4f9   : > { %v4215_v0 = vpop.f32.mrf.mxu2  ;;  %5225 = vmatpush.bf16.msrb.mxu2 %v10166_v63 }
 0x4fa   : > { %v4216_v7 = vadd.f32 %v4215_v0, %v4167_v61  ;;  %v4264_v57 = vpop.f32.mrf.mxu3  ;;  %v4119_v49 = vpop.f32.mrf.mxu0 }
 0x4fc   : > { %v4168_v47 = vpop.f32.mrf.mxu1  ;;  %v14983_v42 = vadd.f32 %v4264_v57, %v4216_v7 }
 0x4fd   : > { %v4169_v22 = vadd.f32 %v4168_v47, %v4119_v49  ;;  %v9909_v47 = vld [vmem:[%s17604_s3] sm:$0xf] }
 0x4fe   : > { %18181 = vst [vmem:[#allocation150_spill] sm:$0xff] %v14983_v42 }
 0x501   : > { %v4217_v33 = vpop.f32.mrf.mxu2 }
 0x502   : > { %v4218_v45 = vadd.f32 %v4217_v33, %v4169_v22  ;;  %v4266_v62 = vpop.f32.mrf.mxu3  ;;  %v4122_v28 = vpop.f32.mrf.mxu0  ;;  %v11465_v22 = vld [vmem:[%s17604_s3 + $0xc] sm:$0xf0] }
 0x503   : > { %v9910_v31 = vor.u32 %v11465_v22, %v9909_v47  ;;  %v10151_v47 = vld [vmem:[%s17604_s3 + $0x1f0] sm:$0xf0] }
 0x504   : > { %v4171_v16 = vpop.f32.mrf.mxu1  ;;  %v14997_v61 = vadd.f32 %v4266_v62, %v4218_v45 }
 0x505   : > { %v4172_v40 = vadd.f32 %v4171_v16, %v4122_v28  ;;  %4317 = vmatmul.bf16.gmra.mxu0 %v13647_v15  ;;  %v11561_v15 = vld [vmem:[%s17604_s3 + $0x30c] sm:$0xf0] }
 0x506   : > { %18182 = vst [vmem:[#allocation47_spill] sm:$0xff] %v14997_v61  ;;  %4415 = vmatmul.bf16.gmra.mxu2 %v13660_v48  ;;  %v10294_v48 = vor.u32 %v11561_v15, %v10293_v52  ;;  %5127 = vmatpush.bf16.msrb.mxu0 %v9910_v31  ;;  %v18224_v61 = vld [vmem:[#allocation129_spill] sm:$0xff] }
 0x507   : > { %4366 = vmatmul.bf16.gmra.mxu1 %v13653_v9  ;;  %4464 = vmatmul.bf16.gmra.mxu3 %v13666_v2 }
 0x508   : > { %5274 = vmatpush.bf16.msrb.mxu3 %v10294_v48 }
 0x509   : > { %v4220_v9 = vpop.f32.mrf.mxu2 }
 0x50a   : > { %v4221_v2 = vadd.f32 %v4220_v9, %v4172_v40  ;;  %v4269_v0 = vpop.f32.mrf.mxu3  ;;  %v4124_v29 = vpop.f32.mrf.mxu0  ;;  %v11555_v40 = vld [vmem:[%s17604_s3 + $0x2e4] sm:$0xf] }
 0x50b   : > { %v10282_v52 = vor.u32 %v11555_v40, %v10279_v23 }
 0x50c   : > { %v4173_v7 = vpop.f32.mrf.mxu1  ;;  %v15015_v57 = vadd.f32 %v4269_v0, %v4221_v2  ;;  %v11491_v0 = vld [vmem:[%s17604_s3 + $0xe4] sm:$0xf] }
 0x50d   : > { %v4174_v49 = vadd.f32 %v4173_v7, %v4124_v29  ;;  %5414 = vmatpush.bf16.msra.mxu2 %v10282_v52  ;;  %v10023_v29 = vld [vmem:[%s17604_s3 + $0xf0] sm:$0xf0]  ;;  %v11523_v7 = vld [vmem:[%s17604_s3 + $0x1e4] sm:$0xf] }
 0x50e   : > { %18183 = vst [vmem:[#allocation151_spill] sm:$0xff] %v15015_v57  ;;  %v10154_v22 = vor.u32 %v11523_v7, %v10151_v47  ;;  %v12025_v47 = vmov 0.0   ;;  %v11467_v57 = vld [vmem:[%s17604_s3 + $0x24] sm:$0xf] }
 0x510   : > { %5365 = vmatpush.bf16.msra.mxu1 %v10154_v22  ;;  %v18188_v22 = vld [vmem:[#allocation5_spill] sm:$0xff] }
 0x511   : > { %v4222_v51 = vpop.f32.mrf.mxu2 }
 0x512   : > { %v4223_v32 = vadd.f32 %v4222_v51, %v4174_v49  ;;  %v4271_v33 = vpop.f32.mrf.mxu3  ;;  %v4127_v45 = vpop.f32.mrf.mxu0  ;;  %v10026_v49 = vor.u32 %v11491_v0, %v10023_v29 }
 0x514   : > { %v4176_v62 = vpop.f32.mrf.mxu1  ;;  %v15029_v28 = vadd.f32 %v4271_v33, %v4223_v32  ;;  %5316 = vmatpush.bf16.msra.mxu0 %v10026_v49 }
 0x515   : > { %v4177_v16 = vadd.f32 %v4176_v62, %v4127_v45  ;;  %4322 = vmatmul.bf16.gmra.mxu0 %v13695_v59  ;;  %v10407_v59 = vld [vmem:[%s17604_s3 + $0x3f0] sm:$0xf0]  ;;  %v11551_v45 = vld [vmem:[%s17604_s3 + $0x2c4] sm:$0xf] }
 0x516   : > { %18184 = vst [vmem:[#allocation48_spill] sm:$0xff] %v15029_v28  ;;  %4420 = vmatmul.bf16.gmra.mxu2 %v13717_v58  ;;  %v10410_v58 = vor.u32 %v11587_v14, %v10407_v59  ;;  %v10263_v62 = vld [vmem:[%s17604_s3 + $0x2d0] sm:$0xf0] }
 0x517   : > { %4371 = vmatmul.bf16.gmra.mxu1 %v13707_v30  ;;  %4469 = vmatmul.bf16.gmra.mxu3 %v13723_v3  ;;  %v10266_v40 = vor.u32 %v11551_v45, %v10263_v62  ;;  %v18192_v45 = vld [vmem:[#allocation110_spill] sm:$0xff] }
 0x518   : > { %5463 = vmatpush.bf16.msra.mxu3 %v10410_v58  ;;  %v11487_v58 = vld [vmem:[%s17604_s3 + $0xc4] sm:$0xf]  ;;  %v18193_v62 = vmax.f32 %v18192_v45, 0.0 }
 0x519   : > { %v4225_v30 = vpop.f32.mrf.mxu2  ;;  %5415 = vmatpush.bf16.msra.mxu2 %v10266_v40 }
 0x51a   : > { %v4226_v3 = vadd.f32 %v4225_v30, %v4177_v16  ;;  %v4274_v63 = vpop.f32.mrf.mxu3  ;;  %v4129_v15 = vpop.f32.mrf.mxu0  ;;  %v11583_v16 = vld [vmem:[%s17604_s3 + $0x3c4] sm:$0xf] }
 0x51c   : > { %v4178_v9 = vpop.f32.mrf.mxu1  ;;  %v15047_v48 = vadd.f32 %v4274_v63, %v4226_v3  ;;  %v10007_v3 = vld [vmem:[%s17604_s3 + $0xd0] sm:$0xf0]  ;;  %v11519_v63 = vld [vmem:[%s17604_s3 + $0x1c4] sm:$0xf] }
 0x51d   : > { %v4179_v2 = vadd.f32 %v4178_v9, %v4129_v15  ;;  %v10010_v15 = vor.u32 %v11487_v58, %v10007_v3  ;;  %v10135_v9 = vld [vmem:[%s17604_s3 + $0x1d0] sm:$0xf0] }
 0x51e   : > { %18185 = vst [vmem:[#allocation152_spill] sm:$0xff] %v15047_v48  ;;  %v10375_v58 = vld [vmem:[%s17604_s3 + $0x3b0] sm:$0xf0] }
 0x51f   : > { %5317 = vmatpush.bf16.msra.mxu0 %v10010_v15 }
 0x521   : > { %v4227_v19 = vpop.f32.mrf.mxu2 }
 0x522   : > { %v4228_v31 = vadd.f32 %v4227_v19, %v4179_v2  ;;  %v4276_v1 = vpop.f32.mrf.mxu3  ;;  %v4132_v56 = vpop.f32.mrf.mxu0  ;;  %v10138_v2 = vor.u32 %v11519_v63, %v10135_v9  ;;  %v18189_v19 = vmax.f32 %v18188_v22, 0.0  ;;  %v11515_v22 = vld [vmem:[%s17604_s3 + $0x1a4] sm:$0xf] }
 0x524   : > { %v4181_v51 = vpop.f32.mrf.mxu1  ;;  %v15061_v32 = vadd.f32 %v4276_v1, %v4228_v31  ;;  %5366 = vmatpush.bf16.msra.mxu1 %v10138_v2  ;;  %v15095_v31 = vpack.c.bf16 %v18189_v19, %v12025_v47 }
 0x525   : > { %v4182_v33 = vadd.f32 %v4181_v51, %v4132_v56  ;;  %4327 = vmatmul.bf16.gmra.mxu0 %v13751_v6  ;;  %v10391_v6 = vld [vmem:[%s17604_s3 + $0x3d0] sm:$0xf0] }
 0x526   : > { %18186 = vst [vmem:[#allocation49_spill] sm:$0xff] %v15061_v32  ;;  %4425 = vmatmul.bf16.gmra.mxu2 %v13777_v17  ;;  %v10394_v17 = vor.u32 %v11583_v16, %v10391_v6  ;;  %v18190_v56 = vld [vmem:[#allocation109_spill] sm:$0xff]  ;;  %v15103_v16 = vpack.c.bf16 %v18193_v62, %v12025_v47 }
 0x527   : > { %4376 = vmatmul.bf16.gmra.mxu1 %v13763_v25  ;;  %4474 = vmatmul.bf16.gmra.mxu3 %v18158_v38  ;;  %v18191_v51 = vmax.f32 %v18190_v56, 0.0  ;;  %v18218_v32 = vld [vmem:[#allocation125_spill] sm:$0xff] }
 0x528   : > { %5464 = vmatpush.bf16.msra.mxu3 %v10394_v17 }
 0x529   : > { %v4230_v25 = vpop.f32.mrf.mxu2 }
 0x52a   : > { %v4231_v38 = vadd.f32 %v4230_v25, %v4182_v33  ;;  %v4279_v23 = vpop.f32.mrf.mxu3  ;;  %v4134_v14 = vpop.f32.mrf.mxu0  ;;  %v15099_v33 = vpack.c.bf16 %v18191_v51, %v12025_v47  ;;  %v18195_v25 = vld [vmem:[#allocation111_spill] sm:$0xff] }
 0x52b   : > { %v18196_v17 = vmax.f32 %v18195_v25, 0.0 }
 0x52c   : > { %v4183_v52 = vpop.f32.mrf.mxu1  ;;  %v15079_v59 = vadd.f32 %v4279_v23, %v4231_v38  ;;  %v11547_v23 = vld [vmem:[%s17604_s3 + $0x2a4] sm:$0xf] }
 0x52d   : > { %v4184_v30 = vadd.f32 %v4183_v52, %v4134_v14  ;;  %v15109_v38 = vpack.c.bf16 %v18196_v17, %v12025_v47  ;;  %v10247_v14 = vld [vmem:[%s17604_s3 + $0x2b0] sm:$0xf0]  ;;  %v11579_v52 = vld [vmem:[%s17604_s3 + $0x3a4] sm:$0xf] }
 0x52e   : > { %18187 = vst [vmem:[#allocation153_spill] sm:$0xff] %v15079_v59  ;;  %v10378_v63 = vor.u32 %v11579_v52, %v10375_v58  ;;  %v9991_v47 = vld [vmem:[%s17604_s3 + $0xb0] sm:$0xf0]  ;;  %v18202_v58 = vld [vmem:[#allocation114_spill] sm:$0xff]  ;;  %v11471_v59 = vld [vmem:[%s17604_s3 + $0x44] sm:$0xf] }
 0x52f   : > { %v18200_v52 = vld [vmem:[#allocation113_spill] sm:$0xff] }
 0x530   : > { %5465 = vmatpush.bf16.msra.mxu3 %v10378_v63  ;;  %v10231_v63 = vld [vmem:[%s17604_s3 + $0x290] sm:$0xf0] }
 0x531   : > { %v4232_v0 = vpop.f32.mrf.mxu2 }
 0x532   : > { %v4233_v29 = vadd.f32 %v4232_v0, %v4184_v30  ;;  %v4281_v7 = vpop.f32.mrf.mxu3  ;;  %v4293_v49 = vpop.f32.mrf.mxu0  ;;  %v10250_v30 = vor.u32 %v11547_v23, %v10247_v14  ;;  %v18199_v14 = vld [vmem:[#allocation9_spill] sm:$0xff] }
 0x534   : > { %v4342_v1 = vpop.f32.mrf.mxu1  ;;  %v15105_v40 = vadd.f32 %v4281_v7, %v4233_v29  ;;  %5416 = vmatpush.bf16.msra.mxu2 %v10250_v30  ;;  %v18201_v30 = vld [vmem:[#allocation10_spill] sm:$0xff] }
 0x535   : > { %v4343_v6 = vadd.f32 %v4342_v1, %v4293_v49  ;;  %5128 = vmatmul.bf16.vlgmr.msrb.gmra.mxu0 %v15095_v31  ;;  %v11483_v49 = vld [vmem:[%s17604_s3 + $0xa4] sm:$0xf]  ;;  %v10119_v1 = vld [vmem:[%s17604_s3 + $0x1b0] sm:$0xf0] }
 0x536   : > { %18194 = vst [vmem:[#allocation50_spill] sm:$0xff] %v15105_v40  ;;  %5226 = vmatmul.bf16.vlgmr.msrb.gmra.mxu2 %v15103_v16  ;;  %v9994_v19 = vor.u32 %v11483_v49, %v9991_v47  ;;  %v10122_v56 = vor.u32 %v11515_v22, %v10119_v1 }
 0x537   : > { %5177 = vmatmul.bf16.vlgmr.msrb.gmra.mxu1 %v15099_v33  ;;  %5275 = vmatmul.bf16.vlgmr.msrb.gmra.mxu3 %v15109_v38 }
 0x538   : > { %5318 = vmatpush.bf16.msra.mxu0 %v9994_v19  ;;  %5367 = vmatpush.bf16.msra.mxu1 %v10122_v56 }
 0x539   : > { %v4391_v3 = vpop.f32.mrf.mxu2 }
 0x53a   : > { %v4392_v15 = vadd.f32 %v4391_v3, %v4343_v6  ;;  %v4440_v9 = vpop.f32.mrf.mxu3  ;;  %v4295_v2 = vpop.f32.mrf.mxu0  ;;  %v11543_v3 = vld [vmem:[%s17604_s3 + $0x284] sm:$0xf] }
 0x53c   : > { %v4344_v0 = vpop.f32.mrf.mxu1  ;;  %v15127_v29 = vadd.f32 %v4440_v9, %v4392_v15  ;;  %v11575_v15 = vld [vmem:[%s17604_s3 + $0x384] sm:$0xf]  ;;  %v10234_v9 = vor.u32 %v11543_v3, %v10231_v63 }
 0x53d   : > { %v4345_v7 = vadd.f32 %v4344_v0, %v4295_v2  ;;  %v10359_v2 = vld [vmem:[%s17604_s3 + $0x390] sm:$0xf0] }
 0x53e   : > { %18197 = vst [vmem:[#allocation154_spill] sm:$0xff] %v15127_v29  ;;  %5417 = vmatpush.bf16.msra.mxu2 %v10234_v9 }
 0x541   : > { %v4393_v51 = vpop.f32.mrf.mxu2 }
 0x542   : > { %v4394_v45 = vadd.f32 %v4393_v51, %v4345_v7  ;;  %v4442_v62 = vpop.f32.mrf.mxu3  ;;  %v4298_v6 = vpop.f32.mrf.mxu0  ;;  %v10362_v7 = vor.u32 %v11575_v15, %v10359_v2  ;;  %v11479_v51 = vld [vmem:[%s17604_s3 + $0x84] sm:$0xf] }
 0x544   : > { %v4347_v25 = vpop.f32.mrf.mxu1  ;;  %v15141_v17 = vadd.f32 %v4442_v62, %v4394_v45  ;;  %5466 = vmatpush.bf16.msra.mxu3 %v10362_v7  ;;  %v9975_v45 = vld [vmem:[%s17604_s3 + $0x90] sm:$0xf0]  ;;  %v11511_v62 = vld [vmem:[%s17604_s3 + $0x184] sm:$0xf] }
 0x545   : > { %v4348_v23 = vadd.f32 %v4347_v25, %v4298_v6  ;;  %5133 = vmatmul.bf16.gmra.mxu0 %v18199_v14  ;;  %v9978_v6 = vor.u32 %v11479_v51, %v9975_v45  ;;  %v10103_v25 = vld [vmem:[%s17604_s3 + $0x190] sm:$0xf0]  ;;  %v11539_v51 = vld [vmem:[%s17604_s3 + $0x264] sm:$0xf] }
 0x546   : > { %18198 = vst [vmem:[#allocation51_spill] sm:$0xff] %v15141_v17  ;;  %5231 = vmatmul.bf16.gmra.mxu2 %v18201_v30  ;;  %v11571_v45 = vld [vmem:[%s17604_s3 + $0x364] sm:$0xf]  ;;  %v18212_v17 = vld [vmem:[#allocation121_spill] sm:$0xff] }
 0x547   : > { %5182 = vmatmul.bf16.gmra.mxu1 %v18200_v52  ;;  %5280 = vmatmul.bf16.gmra.mxu3 %v18202_v58 }
 0x548   : > { %5319 = vmatpush.bf16.msra.mxu0 %v9978_v6  ;;  %v10343_v6 = vld [vmem:[%s17604_s3 + $0x370] sm:$0xf0] }
 0x549   : > { %v4396_v0 = vpop.f32.mrf.mxu2 }
 0x54a   : > { %v4397_v49 = vadd.f32 %v4396_v0, %v4348_v23  ;;  %v4445_v47 = vpop.f32.mrf.mxu3  ;;  %v4300_v22 = vpop.f32.mrf.mxu0  ;;  %v10106_v23 = vor.u32 %v11511_v62, %v10103_v25 }
 0x54c   : > { %v4349_v19 = vpop.f32.mrf.mxu1  ;;  %v15159_v1 = vadd.f32 %v4445_v47, %v4397_v49  ;;  %5368 = vmatpush.bf16.msra.mxu1 %v10106_v23  ;;  %v18205_v49 = vld [vmem:[#allocation13_spill] sm:$0xff]  ;;  %v10346_v23 = vor.u32 %v11571_v45, %v10343_v6 }
 0x54d   : > { %v4350_v56 = vadd.f32 %v4349_v19, %v4300_v22  ;;  %v18206_v47 = vld [vmem:[#allocation117_spill] sm:$0xff]  ;;  %v18207_v22 = vld [vmem:[#allocation14_spill] sm:$0xff] }
 0x54e   : > { %18203 = vst [vmem:[#allocation155_spill] sm:$0xff] %v15159_v1  ;;  %v18208_v19 = vld [vmem:[#allocation118_spill] sm:$0xff]  ;;  %5467 = vmatpush.bf16.msra.mxu3 %v10346_v23  ;;  %v11475_v1 = vld [vmem:[%s17604_s3 + $0x64] sm:$0xf]  ;;  %v10087_v45 = vld [vmem:[%s17604_s3 + $0x170] sm:$0xf0] }
 0x551   : > { %v4398_v3 = vpop.f32.mrf.mxu2 }
 0x552   : > { %v4399_v63 = vadd.f32 %v4398_v3, %v4350_v56  ;;  %v4447_v15 = vpop.f32.mrf.mxu3  ;;  %v4303_v9 = vpop.f32.mrf.mxu0  ;;  %v10215_v56 = vld [vmem:[%s17604_s3 + $0x270] sm:$0xf0] }
 0x553   : > { %v10218_v62 = vor.u32 %v11539_v51, %v10215_v56  ;;  %v9959_v51 = vld [vmem:[%s17604_s3 + $0x70] sm:$0xf0] }
 0x554   : > { %v4352_v2 = vpop.f32.mrf.mxu1  ;;  %v15173_v0 = vadd.f32 %v4447_v15, %v4399_v63  ;;  %v9962_v56 = vor.u32 %v11475_v1, %v9959_v51  ;;  %v18213_v1 = vld [vmem:[#allocation18_spill] sm:$0xff] }
 0x555   : > { %v4353_v7 = vadd.f32 %v4352_v2, %v4303_v9  ;;  %5138 = vmatmul.bf16.gmra.mxu0 %v18205_v49  ;;  %5418 = vmatpush.bf16.msra.mxu2 %v10218_v62  ;;  %v18214_v51 = vld [vmem:[#allocation122_spill] sm:$0xff] }
 0x556   : > { %18204 = vst [vmem:[#allocation52_spill] sm:$0xff] %v15173_v0  ;;  %5236 = vmatmul.bf16.gmra.mxu2 %v18207_v22  ;;  %5320 = vmatpush.bf16.msra.mxu0 %v9962_v56  ;;  %v11567_v56 = vld [vmem:[%s17604_s3 + $0x344] sm:$0xf] }
 0x557   : > { %5187 = vmatmul.bf16.gmra.mxu1 %v18206_v47  ;;  %5285 = vmatmul.bf16.gmra.mxu3 %v18208_v19 }
 0x559   : > { %v4401_v25 = vpop.f32.mrf.mxu2 }
 0x55a   : > { %v4402_v3 = vadd.f32 %v4401_v25, %v4353_v7  ;;  %v4450_v63 = vpop.f32.mrf.mxu3  ;;  %v4305_v15 = vpop.f32.mrf.mxu0  ;;  %v11507_v7 = vld [vmem:[%s17604_s3 + $0x164] sm:$0xf] }
 0x55b   : > { %v10090_v62 = vor.u32 %v11507_v7, %v10087_v45  ;;  %v11535_v7 = vld [vmem:[%s17604_s3 + $0x244] sm:$0xf] }
 0x55c   : > { %v4354_v9 = vpop.f32.mrf.mxu1  ;;  %v15191_v2 = vadd.f32 %v4450_v63, %v4402_v3 }
 0x55d   : > { %v4355_v0 = vadd.f32 %v4354_v9, %v4305_v15  ;;  %5369 = vmatpush.bf16.msra.mxu1 %v10090_v62  ;;  %v10327_v62 = vld [vmem:[%s17604_s3 + $0x350] sm:$0xf0] }
 0x55e   : > { %18209 = vst [vmem:[#allocation156_spill] sm:$0xff] %v15191_v2  ;;  %v18211_v2 = vld [vmem:[#allocation17_spill] sm:$0xff] }
 0x561   : > { %v4403_v6 = vpop.f32.mrf.mxu2 }
 0x562   : > { %v4404_v25 = vadd.f32 %v4403_v6, %v4355_v0  ;;  %v4452_v23 = vpop.f32.mrf.mxu3  ;;  %v4308_v3 = vpop.f32.mrf.mxu0  ;;  %v10199_v0 = vld [vmem:[%s17604_s3 + $0x250] sm:$0xf0] }
 0x563   : > { %v10202_v45 = vor.u32 %v11535_v7, %v10199_v0  ;;  %v9943_v7 = vld [vmem:[%s17604_s3 + $0x50] sm:$0xf0] }
 0x564   : > { %v4357_v63 = vpop.f32.mrf.mxu1  ;;  %v15205_v15 = vadd.f32 %v4452_v23, %v4404_v25  ;;  %v10330_v25 = vor.u32 %v11567_v56, %v10327_v62  ;;  %v9946_v0 = vor.u32 %v11471_v59, %v9943_v7  ;;  %v10071_v56 = vld [vmem:[%s17604_s3 + $0x150] sm:$0xf0]  ;;  %v18219_v59 = vld [vmem:[#allocation22_spill] sm:$0xff] }
 0x565   : > { %v4358_v9 = vadd.f32 %v4357_v63, %v4308_v3  ;;  %5143 = vmatmul.bf16.gmra.mxu0 %v18211_v2  ;;  %5419 = vmatpush.bf16.msra.mxu2 %v10202_v45  ;;  %v18220_v7 = vld [vmem:[#allocation126_spill] sm:$0xff] }
 0x566   : > { %18210 = vst [vmem:[#allocation53_spill] sm:$0xff] %v15205_v15  ;;  %5241 = vmatmul.bf16.gmra.mxu2 %v18213_v1  ;;  %5468 = vmatpush.bf16.msra.mxu3 %v10330_v25 }
 0x567   : > { %5192 = vmatmul.bf16.gmra.mxu1 %v18212_v17  ;;  %5290 = vmatmul.bf16.gmra.mxu3 %v18214_v51 }
 0x568   : > { %5321 = vmatpush.bf16.msra.mxu0 %v9946_v0  ;;  %v11563_v0 = vld [vmem:[%s17604_s3 + $0x324] sm:$0xf] }
 0x569   : > { %v4406_v6 = vpop.f32.mrf.mxu2 }
 0x56a   : > { %v4407_v23 = vadd.f32 %v4406_v6, %v4358_v9  ;;  %v4455_v3 = vpop.f32.mrf.mxu3  ;;  %v4310_v63 = vpop.f32.mrf.mxu0  ;;  %v11503_v9 = vld [vmem:[%s17604_s3 + $0x144] sm:$0xf] }
 0x56b   : > { %v10074_v45 = vor.u32 %v11503_v9, %v10071_v56  ;;  %v11531_v9 = vld [vmem:[%s17604_s3 + $0x224] sm:$0xf] }
 0x56c   : > { %v4359_v15 = vpop.f32.mrf.mxu1  ;;  %v15223_v29 = vadd.f32 %v4455_v3, %v4407_v23 }
 0x56d   : > { %v4360_v40 = vadd.f32 %v4359_v15, %v4310_v63  ;;  %5370 = vmatpush.bf16.msra.mxu1 %v10074_v45  ;;  %v10311_v45 = vld [vmem:[%s17604_s3 + $0x330] sm:$0xf0] }
 0x56e   : > { %18215 = vst [vmem:[#allocation157_spill] sm:$0xff] %v15223_v29  ;;  %v18217_v29 = vld [vmem:[#allocation21_spill] sm:$0xff] }
 0x571   : > { %v4408_v15 = vpop.f32.mrf.mxu2 }
 0x572   : > { %v4409_v62 = vadd.f32 %v4408_v15, %v4360_v40  ;;  %v4457_v6 = vpop.f32.mrf.mxu3  ;;  %v4313_v25 = vpop.f32.mrf.mxu0  ;;  %v10183_v40 = vld [vmem:[%s17604_s3 + $0x230] sm:$0xf0] }
 0x573   : > { %v10186_v56 = vor.u32 %v11531_v9, %v10183_v40  ;;  %v9927_v9 = vld [vmem:[%s17604_s3 + $0x30] sm:$0xf0] }
 0x574   : > { %v4362_v23 = vpop.f32.mrf.mxu1  ;;  %v15237_v3 = vadd.f32 %v4457_v6, %v4409_v62  ;;  %v10314_v62 = vor.u32 %v11563_v0, %v10311_v45  ;;  %v9930_v40 = vor.u32 %v11467_v57, %v9927_v9  ;;  %v10055_v0 = vld [vmem:[%s17604_s3 + $0x130] sm:$0xf0]  ;;  %v18225_v57 = vld [vmem:[#allocation26_spill] sm:$0xff] }
 0x575   : > { %v4363_v63 = vadd.f32 %v4362_v23, %v4313_v25  ;;  %5148 = vmatmul.bf16.gmra.mxu0 %v18217_v29  ;;  %5420 = vmatpush.bf16.msra.mxu2 %v10186_v56  ;;  %v18226_v9 = vld [vmem:[#allocation130_spill] sm:$0xff] }
 0x576   : > { %18216 = vst [vmem:[#allocation54_spill] sm:$0xff] %v15237_v3  ;;  %5246 = vmatmul.bf16.gmra.mxu2 %v18219_v59  ;;  %5469 = vmatpush.bf16.msra.mxu3 %v10314_v62 }
 0x577   : > { %5197 = vmatmul.bf16.gmra.mxu1 %v18218_v32  ;;  %5295 = vmatmul.bf16.gmra.mxu3 %v18220_v7 }
 0x578   : > { %5322 = vmatpush.bf16.msra.mxu0 %v9930_v40  ;;  %v11559_v40 = vld [vmem:[%s17604_s3 + $0x304] sm:$0xf] }
 0x579   : > { %v4411_v15 = vpop.f32.mrf.mxu2 }
 0x57a   : > { %v4412_v6 = vadd.f32 %v4411_v15, %v4363_v63  ;;  %v4460_v25 = vpop.f32.mrf.mxu3  ;;  %v4315_v23 = vpop.f32.mrf.mxu0  ;;  %v11499_v63 = vld [vmem:[%s17604_s3 + $0x124] sm:$0xf] }
 0x57b   : > { %v10058_v56 = vor.u32 %v11499_v63, %v10055_v0  ;;  %v11527_v63 = vld [vmem:[%s17604_s3 + $0x204] sm:$0xf] }
 0x57c   : > { %v4364_v3 = vpop.f32.mrf.mxu1  ;;  %v15255_v48 = vadd.f32 %v4460_v25, %v4412_v6 }
 0x57d   : > { %v4365_v28 = vadd.f32 %v4364_v3, %v4315_v23  ;;  %5371 = vmatpush.bf16.msra.mxu1 %v10058_v56  ;;  %v10295_v56 = vld [vmem:[%s17604_s3 + $0x310] sm:$0xf0] }
 0x57e   : > { %18221 = vst [vmem:[#allocation158_spill] sm:$0xff] %v15255_v48  ;;  %v18223_v48 = vld [vmem:[#allocation25_spill] sm:$0xff] }
 0x581   : > { %v4413_v3 = vpop.f32.mrf.mxu2 }
 0x582   : > { %v4414_v45 = vadd.f32 %v4413_v3, %v4365_v28  ;;  %v4462_v15 = vpop.f32.mrf.mxu3  ;;  %v4318_v62 = vpop.f32.mrf.mxu0  ;;  %v10167_v28 = vld [vmem:[%s17604_s3 + $0x210] sm:$0xf0] }
 0x583   : > { %v10170_v0 = vor.u32 %v11527_v63, %v10167_v28  ;;  %v9911_v63 = vld [vmem:[%s17604_s3 + $0x10] sm:$0xf0] }
 0x584   : > { %v4367_v6 = vpop.f32.mrf.mxu1  ;;  %v15269_v25 = vadd.f32 %v4462_v15, %v4414_v45  ;;  %v10298_v45 = vor.u32 %v11559_v40, %v10295_v56  ;;  %v9914_v28 = vor.u32 %v11463_v26, %v9911_v63  ;;  %v10039_v40 = vld [vmem:[%s17604_s3 + $0x110] sm:$0xf0]  ;;  %v18231_v26 = vld [vmem:[#allocation30_spill] sm:$0xff] }
 0x585   : > { %v4368_v23 = vadd.f32 %v4367_v6, %v4318_v62  ;;  %5153 = vmatmul.bf16.gmra.mxu0 %v18223_v48  ;;  %5421 = vmatpush.bf16.msra.mxu2 %v10170_v0  ;;  %v18232_v63 = vld [vmem:[#allocation134_spill] sm:$0xff] }
 0x586   : > { %18222 = vst [vmem:[#allocation55_spill] sm:$0xff] %v15269_v25  ;;  %5251 = vmatmul.bf16.gmra.mxu2 %v18225_v57  ;;  %5470 = vmatpush.bf16.msra.mxu3 %v10298_v45 }
 0x587   : > { %5202 = vmatmul.bf16.gmra.mxu1 %v18224_v61  ;;  %5300 = vmatmul.bf16.gmra.mxu3 %v18226_v9 }
 0x588   : > { %5323 = vmatpush.bf16.msra.mxu0 %v9914_v28  ;;  %v10413_v28 = vld [vmem:[%s17604_s3 + $0x3e8] sm:$0xf] }
 0x589   : > { %v4416_v3 = vpop.f32.mrf.mxu2 }
 0x58a   : > { %v4417_v15 = vadd.f32 %v4416_v3, %v4368_v23  ;;  %v4465_v62 = vpop.f32.mrf.mxu3  ;;  %v4320_v6 = vpop.f32.mrf.mxu0  ;;  %v11495_v23 = vld [vmem:[%s17604_s3 + $0x104] sm:$0xf] }
 0x58b   : > { %v10042_v0 = vor.u32 %v11495_v23, %v10039_v40  ;;  %v10285_v23 = vld [vmem:[%s17604_s3 + $0x2e8] sm:$0xf] }
 0x58c   : > { %v4369_v25 = vpop.f32.mrf.mxu1  ;;  %v15287_v42 = vadd.f32 %v4465_v62, %v4417_v15 }
 0x58d   : > { %v4370_v13 = vadd.f32 %v4369_v25, %v4320_v6  ;;  %5372 = vmatpush.bf16.msra.mxu1 %v10042_v0  ;;  %v11590_v0 = vld [vmem:[%s17604_s3 + $0x3f4] sm:$0xf0] }
 0x58e   : > { %18227 = vst [vmem:[#allocation159_spill] sm:$0xff] %v15287_v42  ;;  %v18229_v42 = vld [vmem:[#allocation29_spill] sm:$0xff] }
 0x591   : > { %v4418_v25 = vpop.f32.mrf.mxu2 }
 0x592   : > { %v4419_v56 = vadd.f32 %v4418_v25, %v4370_v13  ;;  %v4467_v3 = vpop.f32.mrf.mxu3  ;;  %v4323_v45 = vpop.f32.mrf.mxu0  ;;  %v11558_v13 = vld [vmem:[%s17604_s3 + $0x2f4] sm:$0xf0] }
 0x593   : > { %v10286_v40 = vor.u32 %v11558_v13, %v10285_v23  ;;  %v11494_v23 = vld [vmem:[%s17604_s3 + $0xf4] sm:$0xf0] }
 0x594   : > { %v4372_v15 = vpop.f32.mrf.mxu1  ;;  %v15301_v62 = vadd.f32 %v4467_v3, %v4419_v56  ;;  %v10414_v56 = vor.u32 %v11590_v0, %v10413_v28  ;;  %v10030_v13 = vor.u32 %v11494_v23, %v10029_v60  ;;  %v11526_v28 = vld [vmem:[%s17604_s3 + $0x1f4] sm:$0xf0]  ;;  %v10269_v60 = vld [vmem:[%s17604_s3 + $0x2c8] sm:$0xf] }
 0x595   : > { %v4373_v6 = vadd.f32 %v4372_v15, %v4323_v45  ;;  %5158 = vmatmul.bf16.gmra.mxu0 %v18229_v42  ;;  %5610 = vmatpush.bf16.msrb.mxu2 %v10286_v40  ;;  %v10397_v23 = vld [vmem:[%s17604_s3 + $0x3c8] sm:$0xf] }
 0x596   : > { %18228 = vst [vmem:[#allocation56_spill] sm:$0xff] %v15301_v62  ;;  %5256 = vmatmul.bf16.gmra.mxu2 %v18231_v26  ;;  %5659 = vmatpush.bf16.msrb.mxu3 %v10414_v56 }
 0x597   : > { %5207 = vmatmul.bf16.gmra.mxu1 %v18230_v35  ;;  %5305 = vmatmul.bf16.gmra.mxu3 %v18232_v63 }
 0x598   : > { %5512 = vmatpush.bf16.msrb.mxu0 %v10030_v13  ;;  %v11586_v13 = vld [vmem:[%s17604_s3 + $0x3d4] sm:$0xf0] }
 0x599   : > { %v4421_v25 = vpop.f32.mrf.mxu2 }
 0x59a   : > { %v4422_v3 = vadd.f32 %v4421_v25, %v4373_v6  ;;  %v4470_v45 = vpop.f32.mrf.mxu3  ;;  %v4325_v15 = vpop.f32.mrf.mxu0  ;;  %v10157_v6 = vld [vmem:[%s17604_s3 + $0x1e8] sm:$0xf] }
 0x59b   : > { %v10158_v40 = vor.u32 %v11526_v28, %v10157_v6 }
 0x59c   : > { %v4374_v62 = vpop.f32.mrf.mxu1  ;;  %v15319_v44 = vadd.f32 %v4470_v45, %v4422_v3 }
 0x59d   : > { %v4375_v8 = vadd.f32 %v4374_v62, %v4325_v15  ;;  %5561 = vmatpush.bf16.msrb.mxu1 %v10158_v40  ;;  %v10398_v40 = vor.u32 %v11586_v13, %v10397_v23  ;;  %v11522_v23 = vld [vmem:[%s17604_s3 + $0x1d4] sm:$0xf0] }
 0x59e   : > { %18233 = vst [vmem:[#allocation160_spill] sm:$0xff] %v15319_v44  ;;  %v10013_v44 = vld [vmem:[%s17604_s3 + $0xc8] sm:$0xf] }
 0x59f   : > { %5660 = vmatpush.bf16.msrb.mxu3 %v10398_v40 }
 0x5a1   : > { %v4423_v62 = vpop.f32.mrf.mxu2 }
 0x5a2   : > { %v4424_v0 = vadd.f32 %v4423_v62, %v4375_v8  ;;  %v4472_v25 = vpop.f32.mrf.mxu3  ;;  %v4328_v56 = vpop.f32.mrf.mxu0  ;;  %v11554_v8 = vld [vmem:[%s17604_s3 + $0x2d4] sm:$0xf0] }
 0x5a3   : > { %v10270_v6 = vor.u32 %v11554_v8, %v10269_v60  ;;  %v11490_v60 = vld [vmem:[%s17604_s3 + $0xd4] sm:$0xf0] }
 0x5a4   : > { %v4377_v3 = vpop.f32.mrf.mxu1  ;;  %v15333_v45 = vadd.f32 %v4472_v25, %v4424_v0  ;;  %v10014_v8 = vor.u32 %v11490_v60, %v10013_v44  ;;  %v10253_v44 = vld [vmem:[%s17604_s3 + $0x2a8] sm:$0xf] }
 0x5a5   : > { %v4378_v15 = vadd.f32 %v4377_v3, %v4328_v56  ;;  %5163 = vmatmul.bf16.gmra.mxu0 %v14287_v20  ;;  %5611 = vmatpush.bf16.msrb.mxu2 %v10270_v6 }
 0x5a6   : > { %18234 = vst [vmem:[#allocation57_spill] sm:$0xff] %v15333_v45  ;;  %5261 = vmatmul.bf16.gmra.mxu2 %v14311_v50  ;;  %5513 = vmatpush.bf16.msrb.mxu0 %v10014_v8 }
 0x5a7   : > { %5212 = vmatmul.bf16.gmra.mxu1 %v14291_v55  ;;  %5310 = vmatmul.bf16.gmra.mxu3 %v14315_v36 }
 0x5a9   : > { %v4426_v28 = vpop.f32.mrf.mxu2 }
 0x5aa   : > { %v4427_v62 = vadd.f32 %v4426_v28, %v4378_v15  ;;  %v4475_v0 = vpop.f32.mrf.mxu3  ;;  %v4330_v25 = vpop.f32.mrf.mxu0  ;;  %v10141_v15 = vld [vmem:[%s17604_s3 + $0x1c8] sm:$0xf] }
 0x5ab   : > { %v10142_v6 = vor.u32 %v11522_v23, %v10141_v15  ;;  %v11582_v15 = vld [vmem:[%s17604_s3 + $0x3b4] sm:$0xf0] }
 0x5ac   : > { %v4379_v56 = vpop.f32.mrf.mxu1  ;;  %v15351_v3 = vadd.f32 %v4475_v0, %v4427_v62 }
 0x5ad   : > { %v4380_v45 = vadd.f32 %v4379_v56, %v4330_v25  ;;  %5562 = vmatpush.bf16.msrb.mxu1 %v10142_v6 }
 0x5ae   : > { %18235 = vst [vmem:[#allocation161_spill] sm:$0xff] %v15351_v3 }
 0x5b1   : > { %v4428_v13 = vpop.f32.mrf.mxu2 }
 0x5b2   : > { %v4429_v28 = vadd.f32 %v4428_v13, %v4380_v45  ;;  %v4477_v40 = vpop.f32.mrf.mxu3  ;;  %v5129_v62 = vpop.f32.mrf.mxu0  ;;  %v10381_v45 = vld [vmem:[%s17604_s3 + $0x3a8] sm:$0xf] }
 0x5b3   : > { %v5130_v0 = vadd.f32 %v5129_v62, %v14343_v18  ;;  %v11550_v18 = vld [vmem:[%s17604_s3 + $0x2b4] sm:$0xf0]  ;;  %v10382_v23 = vor.u32 %v11582_v15, %v10381_v45 }
 0x5b4   : > { %v5178_v25 = vpop.f32.mrf.mxu1  ;;  %v15366_v56 = vadd.f32 %v4477_v40, %v4429_v28  ;;  %v10254_v60 = vor.u32 %v11550_v18, %v10253_v44  ;;  %v11486_v44 = vld [vmem:[%s17604_s3 + $0xb4] sm:$0xf0] }
 0x5b5   : > { %v5179_v3 = vadd.f32 %v5178_v25, %v5130_v0  ;;  %5324 = vmatmul.bf16.vlgmr.msra.gmra.mxu0 %v15095_v31  ;;  %5661 = vmatpush.bf16.msrb.mxu3 %v10382_v23  ;;  %v9997_v25 = vld [vmem:[%s17604_s3 + $0xa8] sm:$0xf] }
 0x5b6   : > { %18236 = vst [vmem:[#allocation58_spill] sm:$0xff] %v15366_v56  ;;  %5422 = vmatmul.bf16.vlgmr.msra.gmra.mxu2 %v15103_v16  ;;  %v9998_v45 = vor.u32 %v11486_v44, %v9997_v25  ;;  %v11578_v44 = vld [vmem:[%s17604_s3 + $0x394] sm:$0xf0] }
 0x5b7   : > { %5373 = vmatmul.bf16.vlgmr.msra.gmra.mxu1 %v15099_v33  ;;  %5471 = vmatmul.bf16.vlgmr.msra.gmra.mxu3 %v15109_v38 }
 0x5b8   : > { %5612 = vmatpush.bf16.msrb.mxu2 %v10254_v60  ;;  %5514 = vmatpush.bf16.msrb.mxu0 %v9998_v45 }
 0x5b9   : > { %v5227_v8 = vpop.f32.mrf.mxu2 }
 0x5ba   : > { %v5228_v6 = vadd.f32 %v5227_v8, %v5179_v3  ;;  %v5276_v13 = vpop.f32.mrf.mxu3  ;;  %v5131_v28 = vpop.f32.mrf.mxu0  ;;  %v10125_v3 = vld [vmem:[%s17604_s3 + $0x1a8] sm:$0xf] }
 0x5bb   : > { %v5132_v40 = vadd.f32 %v5131_v28, %v14357_v24  ;;  %v11518_v24 = vld [vmem:[%s17604_s3 + $0x1b4] sm:$0xf0] }
 0x5bc   : > { %v5180_v62 = vpop.f32.mrf.mxu1  ;;  %v15385_v0 = vadd.f32 %v5276_v13, %v5228_v6  ;;  %v10126_v60 = vor.u32 %v11518_v24, %v10125_v3 }
 0x5bd   : > { %v5181_v18 = vadd.f32 %v5180_v62, %v5132_v40  ;;  %v10237_v40 = vld [vmem:[%s17604_s3 + $0x288] sm:$0xf] }
 0x5be   : > { %18237 = vst [vmem:[#allocation162_spill] sm:$0xff] %v15385_v0  ;;  %5563 = vmatpush.bf16.msrb.mxu1 %v10126_v60  ;;  %v10365_v62 = vld [vmem:[%s17604_s3 + $0x388] sm:$0xf] }
 0x5c1   : > { %v5229_v15 = vpop.f32.mrf.mxu2 }
 0x5c2   : > { %v5230_v8 = vadd.f32 %v5229_v15, %v5181_v18  ;;  %v5278_v23 = vpop.f32.mrf.mxu3  ;;  %v5134_v6 = vpop.f32.mrf.mxu0  ;;  %v10366_v18 = vor.u32 %v11578_v44, %v10365_v62 }
 0x5c3   : > { %v5135_v13 = vadd.f32 %v5134_v6, %v14375_v39  ;;  %v11546_v39 = vld [vmem:[%s17604_s3 + $0x294] sm:$0xf0]  ;;  %v9981_v6 = vld [vmem:[%s17604_s3 + $0x88] sm:$0xf] }
 0x5c4   : > { %v5183_v28 = vpop.f32.mrf.mxu1  ;;  %v15400_v0 = vadd.f32 %v5278_v23, %v5230_v8  ;;  %v10238_v25 = vor.u32 %v11546_v39, %v10237_v40  ;;  %5662 = vmatpush.bf16.msrb.mxu3 %v10366_v18 }
 0x5c5   : > { %v5184_v56 = vadd.f32 %v5183_v28, %v5135_v13  ;;  %5329 = vmatmul.bf16.gmra.mxu0 %v18199_v14  ;;  %v11482_v13 = vld [vmem:[%s17604_s3 + $0x94] sm:$0xf0] }
 0x5c6   : > { %5427 = vmatmul.bf16.gmra.mxu2 %v18201_v30  ;;  %v9982_v40 = vor.u32 %v11482_v13, %v9981_v6  ;;  %v11574_v13 = vld [vmem:[%s17604_s3 + $0x374] sm:$0xf0] }
 0x5c7   : > { %5378 = vmatmul.bf16.gmra.mxu1 %v18200_v52  ;;  %5476 = vmatmul.bf16.gmra.mxu3 %v18202_v58 }
 0x5c8   : > { %5613 = vmatpush.bf16.msrb.mxu2 %v10238_v25  ;;  %5515 = vmatpush.bf16.msrb.mxu0 %v9982_v40 }
 0x5c9   : > { %v5232_v3 = vpop.f32.mrf.mxu2 }
 0x5ca   : > { %v5233_v45 = vadd.f32 %v5232_v3, %v5184_v56  ;;  %v5281_v24 = vpop.f32.mrf.mxu3  ;;  %v5136_v60 = vpop.f32.mrf.mxu0  ;;  %v10109_v56 = vld [vmem:[%s17604_s3 + $0x188] sm:$0xf] }
 0x5cb   : > { %v5137_v15 = vadd.f32 %v5136_v60, %v14389_v5  ;;  %v11514_v5 = vld [vmem:[%s17604_s3 + $0x194] sm:$0xf0] }
 0x5cc   : > { %v5185_v8 = vpop.f32.mrf.mxu1  ;;  %v15419_v23 = vadd.f32 %v5281_v24, %v5233_v45  ;;  %v10110_v39 = vor.u32 %v11514_v5, %v10109_v56 }
 0x5cd   : > { %v5186_v28 = vadd.f32 %v5185_v8, %v5137_v15  ;;  %v10221_v15 = vld [vmem:[%s17604_s3 + $0x268] sm:$0xf] }
 0x5ce   : > { %5564 = vmatpush.bf16.msrb.mxu1 %v10110_v39  ;;  %v10349_v8 = vld [vmem:[%s17604_s3 + $0x368] sm:$0xf] }
 0x5d1   : > { %v5234_v62 = vpop.f32.mrf.mxu2 }
 0x5d2   : > { %v5235_v25 = vadd.f32 %v5234_v62, %v5186_v28  ;;  %v5283_v44 = vpop.f32.mrf.mxu3  ;;  %v5139_v3 = vpop.f32.mrf.mxu0  ;;  %v10350_v28 = vor.u32 %v11574_v13, %v10349_v8 }
 0x5d3   : > { %v5140_v18 = vadd.f32 %v5139_v3, %v14407_v41  ;;  %v11542_v41 = vld [vmem:[%s17604_s3 + $0x274] sm:$0xf0]  ;;  %v9965_v3 = vld [vmem:[%s17604_s3 + $0x68] sm:$0xf] }
 0x5d4   : > { %v5188_v45 = vpop.f32.mrf.mxu1  ;;  %v15434_v24 = vadd.f32 %v5283_v44, %v5235_v25  ;;  %v10222_v6 = vor.u32 %v11542_v41, %v10221_v15  ;;  %5663 = vmatpush.bf16.msrb.mxu3 %v10350_v28 }
 0x5d5   : > { %v5189_v60 = vadd.f32 %v5188_v45, %v5140_v18  ;;  %5334 = vmatmul.bf16.gmra.mxu0 %v18205_v49  ;;  %v11478_v18 = vld [vmem:[%s17604_s3 + $0x74] sm:$0xf0]  ;;  %v10093_v45 = vld [vmem:[%s17604_s3 + $0x168] sm:$0xf] }
 0x5d6   : > { %5432 = vmatmul.bf16.gmra.mxu2 %v18207_v22  ;;  %v9966_v15 = vor.u32 %v11478_v18, %v9965_v3  ;;  %v11570_v18 = vld [vmem:[%s17604_s3 + $0x354] sm:$0xf0] }
 0x5d7   : > { %5383 = vmatmul.bf16.gmra.mxu1 %v18206_v47  ;;  %5481 = vmatmul.bf16.gmra.mxu3 %v18208_v19 }
 0x5d8   : > { %5614 = vmatpush.bf16.msrb.mxu2 %v10222_v6  ;;  %5516 = vmatpush.bf16.msrb.mxu0 %v9966_v15 }
 0x5d9   : > { %v5237_v56 = vpop.f32.mrf.mxu2 }
 0x5da   : > { %v5238_v40 = vadd.f32 %v5237_v56, %v5189_v60  ;;  %v5286_v5 = vpop.f32.mrf.mxu3  ;;  %v5141_v39 = vpop.f32.mrf.mxu0 }
 0x5db   : > { %v5142_v62 = vadd.f32 %v5141_v39, %v14421_v11  ;;  %v11510_v11 = vld [vmem:[%s17604_s3 + $0x174] sm:$0xf0] }
 0x5dc   : > { %v5190_v25 = vpop.f32.mrf.mxu1  ;;  %v15453_v44 = vadd.f32 %v5286_v5, %v5238_v40  ;;  %v10094_v41 = vor.u32 %v11510_v11, %v10093_v45 }
 0x5dd   : > { %v5191_v60 = vadd.f32 %v5190_v25, %v5142_v62  ;;  %v10205_v62 = vld [vmem:[%s17604_s3 + $0x248] sm:$0xf] }
 0x5de   : > { %5565 = vmatpush.bf16.msrb.mxu1 %v10094_v41  ;;  %v10333_v25 = vld [vmem:[%s17604_s3 + $0x348] sm:$0xf] }
 0x5e1   : > { %v5239_v8 = vpop.f32.mrf.mxu2 }
 0x5e2   : > { %v5240_v6 = vadd.f32 %v5239_v8, %v5191_v60  ;;  %v5288_v13 = vpop.f32.mrf.mxu3  ;;  %v5144_v56 = vpop.f32.mrf.mxu0  ;;  %v10334_v60 = vor.u32 %v11570_v18, %v10333_v25 }
 0x5e3   : > { %v5145_v28 = vadd.f32 %v5144_v56, %v14439_v10  ;;  %v11538_v10 = vld [vmem:[%s17604_s3 + $0x254] sm:$0xf0]  ;;  %v9949_v56 = vld [vmem:[%s17604_s3 + $0x48] sm:$0xf] }
 0x5e4   : > { %v5193_v40 = vpop.f32.mrf.mxu1  ;;  %v15468_v5 = vadd.f32 %v5288_v13, %v5240_v6  ;;  %v10206_v3 = vor.u32 %v11538_v10, %v10205_v62  ;;  %5664 = vmatpush.bf16.msrb.mxu3 %v10334_v60 }
 0x5e5   : > { %v5194_v39 = vadd.f32 %v5193_v40, %v5145_v28  ;;  %5339 = vmatmul.bf16.gmra.mxu0 %v18211_v2  ;;  %v11474_v28 = vld [vmem:[%s17604_s3 + $0x54] sm:$0xf0]  ;;  %v10077_v40 = vld [vmem:[%s17604_s3 + $0x148] sm:$0xf] }
 0x5e6   : > { %5437 = vmatmul.bf16.gmra.mxu2 %v18213_v1  ;;  %v9950_v62 = vor.u32 %v11474_v28, %v9949_v56  ;;  %v11566_v28 = vld [vmem:[%s17604_s3 + $0x334] sm:$0xf0] }
 0x5e7   : > { %5388 = vmatmul.bf16.gmra.mxu1 %v18212_v17  ;;  %5486 = vmatmul.bf16.gmra.mxu3 %v18214_v51 }
 0x5e8   : > { %5615 = vmatpush.bf16.msrb.mxu2 %v10206_v3  ;;  %5517 = vmatpush.bf16.msrb.mxu0 %v9950_v62 }
 0x5e9   : > { %v5242_v45 = vpop.f32.mrf.mxu2 }
 0x5ea   : > { %v5243_v15 = vadd.f32 %v5242_v45, %v5194_v39  ;;  %v5291_v11 = vpop.f32.mrf.mxu3  ;;  %v5146_v41 = vpop.f32.mrf.mxu0 }
 0x5eb   : > { %v5147_v8 = vadd.f32 %v5146_v41, %v14453_v12  ;;  %v11506_v12 = vld [vmem:[%s17604_s3 + $0x154] sm:$0xf0] }
 0x5ec   : > { %v5195_v6 = vpop.f32.mrf.mxu1  ;;  %v15487_v13 = vadd.f32 %v5291_v11, %v5243_v15  ;;  %v10078_v10 = vor.u32 %v11506_v12, %v10077_v40 }
 0x5ed   : > { %v5196_v39 = vadd.f32 %v5195_v6, %v5147_v8  ;;  %v10189_v8 = vld [vmem:[%s17604_s3 + $0x228] sm:$0xf] }
 0x5ee   : > { %5566 = vmatpush.bf16.msrb.mxu1 %v10078_v10  ;;  %v10317_v6 = vld [vmem:[%s17604_s3 + $0x328] sm:$0xf] }
 0x5f1   : > { %v5244_v25 = vpop.f32.mrf.mxu2 }
 0x5f2   : > { %v5245_v3 = vadd.f32 %v5244_v25, %v5196_v39  ;;  %v5293_v18 = vpop.f32.mrf.mxu3  ;;  %v5149_v45 = vpop.f32.mrf.mxu0  ;;  %v10318_v39 = vor.u32 %v11566_v28, %v10317_v6 }
 0x5f3   : > { %v5150_v60 = vadd.f32 %v5149_v45, %v14471_v53  ;;  %v11534_v53 = vld [vmem:[%s17604_s3 + $0x234] sm:$0xf0]  ;;  %v9933_v45 = vld [vmem:[%s17604_s3 + $0x28] sm:$0xf] }
 0x5f4   : > { %v5198_v15 = vpop.f32.mrf.mxu1  ;;  %v15502_v11 = vadd.f32 %v5293_v18, %v5245_v3  ;;  %v10190_v56 = vor.u32 %v11534_v53, %v10189_v8  ;;  %5665 = vmatpush.bf16.msrb.mxu3 %v10318_v39 }
 0x5f5   : > { %v5199_v41 = vadd.f32 %v5198_v15, %v5150_v60  ;;  %5344 = vmatmul.bf16.gmra.mxu0 %v18217_v29  ;;  %v11470_v60 = vld [vmem:[%s17604_s3 + $0x34] sm:$0xf0]  ;;  %v10061_v15 = vld [vmem:[%s17604_s3 + $0x128] sm:$0xf] }
 0x5f6   : > { %5442 = vmatmul.bf16.gmra.mxu2 %v18219_v59  ;;  %v9934_v8 = vor.u32 %v11470_v60, %v9933_v45  ;;  %v11562_v60 = vld [vmem:[%s17604_s3 + $0x314] sm:$0xf0] }
 0x5f7   : > { %5393 = vmatmul.bf16.gmra.mxu1 %v18218_v32  ;;  %5491 = vmatmul.bf16.gmra.mxu3 %v18220_v7 }
 0x5f8   : > { %5616 = vmatpush.bf16.msrb.mxu2 %v10190_v56  ;;  %5518 = vmatpush.bf16.msrb.mxu0 %v9934_v8 }
 0x5f9   : > { %v5247_v40 = vpop.f32.mrf.mxu2 }
 0x5fa   : > { %v5248_v62 = vadd.f32 %v5247_v40, %v5199_v41  ;;  %v5296_v12 = vpop.f32.mrf.mxu3  ;;  %v5151_v10 = vpop.f32.mrf.mxu0 }
 0x5fb   : > { %v5152_v25 = vadd.f32 %v5151_v10, %v14485_v43  ;;  %v11502_v43 = vld [vmem:[%s17604_s3 + $0x134] sm:$0xf0] }
 0x5fc   : > { %v5200_v3 = vpop.f32.mrf.mxu1  ;;  %v15521_v18 = vadd.f32 %v5296_v12, %v5248_v62  ;;  %v10062_v53 = vor.u32 %v11502_v43, %v10061_v15 }
 0x5fd   : > { %v5201_v41 = vadd.f32 %v5200_v3, %v5152_v25  ;;  %v10173_v25 = vld [vmem:[%s17604_s3 + $0x208] sm:$0xf] }
 0x5fe   : > { %5567 = vmatpush.bf16.msrb.mxu1 %v10062_v53  ;;  %v10301_v3 = vld [vmem:[%s17604_s3 + $0x308] sm:$0xf] }
 0x601   : > { %v5249_v6 = vpop.f32.mrf.mxu2 }
 0x602   : > { %v5250_v56 = vadd.f32 %v5249_v6, %v5201_v41  ;;  %v5298_v28 = vpop.f32.mrf.mxu3  ;;  %v5154_v40 = vpop.f32.mrf.mxu0  ;;  %v10302_v41 = vor.u32 %v11562_v60, %v10301_v3 }
 0x603   : > { %v5155_v39 = vadd.f32 %v5154_v40, %v14503_v37  ;;  %v11530_v37 = vld [vmem:[%s17604_s3 + $0x214] sm:$0xf0]  ;;  %v9917_v40 = vld [vmem:[%s17604_s3 + $0x8] sm:$0xf] }
 0x604   : > { %v5203_v62 = vpop.f32.mrf.mxu1  ;;  %v15536_v12 = vadd.f32 %v5298_v28, %v5250_v56  ;;  %v10174_v45 = vor.u32 %v11530_v37, %v10173_v25  ;;  %5666 = vmatpush.bf16.msrb.mxu3 %v10302_v41 }
 0x605   : > { %v5204_v10 = vadd.f32 %v5203_v62, %v5155_v39  ;;  %5349 = vmatmul.bf16.gmra.mxu0 %v18223_v48  ;;  %v11466_v39 = vld [vmem:[%s17604_s3 + $0x14] sm:$0xf0]  ;;  %v10045_v62 = vld [vmem:[%s17604_s3 + $0x108] sm:$0xf] }
 0x606   : > { %5447 = vmatmul.bf16.gmra.mxu2 %v18225_v57  ;;  %v9918_v25 = vor.u32 %v11466_v39, %v9917_v40  ;;  %v10415_v39 = vld [vmem:[%s17604_s3 + $0x3f8] sm:$0xf0] }
 0x607   : > { %5398 = vmatmul.bf16.gmra.mxu1 %v18224_v61  ;;  %5496 = vmatmul.bf16.gmra.mxu3 %v18226_v9 }
 0x608   : > { %5617 = vmatpush.bf16.msrb.mxu2 %v10174_v45  ;;  %5519 = vmatpush.bf16.msrb.mxu0 %v9918_v25 }
 0x609   : > { %v5252_v15 = vpop.f32.mrf.mxu2 }
 0x60a   : > { %v5253_v8 = vadd.f32 %v5252_v15, %v5204_v10  ;;  %v5301_v43 = vpop.f32.mrf.mxu3  ;;  %v5156_v53 = vpop.f32.mrf.mxu0 }
 0x60b   : > { %v5157_v6 = vadd.f32 %v5156_v53, %v14517_v21  ;;  %v11498_v21 = vld [vmem:[%s17604_s3 + $0x114] sm:$0xf0] }
 0x60c   : > { %v5205_v56 = vpop.f32.mrf.mxu1  ;;  %v15555_v28 = vadd.f32 %v5301_v43, %v5253_v8  ;;  %v10046_v37 = vor.u32 %v11498_v21, %v10045_v62 }
 0x60d   : > { %v5206_v10 = vadd.f32 %v5205_v56, %v5157_v6  ;;  %v11556_v6 = vld [vmem:[%s17604_s3 + $0x2ec] sm:$0xf] }
 0x60e   : > { %5568 = vmatpush.bf16.msrb.mxu1 %v10046_v37  ;;  %v11588_v56 = vld [vmem:[%s17604_s3 + $0x3ec] sm:$0xf] }
 0x611   : > { %v5254_v3 = vpop.f32.mrf.mxu2 }
 0x612   : > { %v5255_v45 = vadd.f32 %v5254_v3, %v5206_v10  ;;  %v5303_v60 = vpop.f32.mrf.mxu3  ;;  %v5159_v15 = vpop.f32.mrf.mxu0  ;;  %v10418_v10 = vor.u32 %v11588_v56, %v10415_v39  ;;  %v18239_v3 = vld [vmem:[#allocation35_spill] sm:$0xff]  ;;  %v10159_v56 = vld [vmem:[%s17604_s3 + $0x1f8] sm:$0xf0] }
 0x613   : > { %v5160_v41 = vadd.f32 %v5159_v15, %v14535_v46  ;;  %v10287_v46 = vld [vmem:[%s17604_s3 + $0x2f8] sm:$0xf0] }
 0x614   : > { %v5208_v8 = vpop.f32.mrf.mxu1  ;;  %v15570_v43 = vadd.f32 %v5303_v60, %v5255_v45  ;;  %v10290_v40 = vor.u32 %v11556_v6, %v10287_v46  ;;  %5855 = vmatpush.bf16.msra.mxu3 %v10418_v10 }
 0x615   : > { %v5209_v53 = vadd.f32 %v5208_v8, %v5160_v41  ;;  %5354 = vmatmul.bf16.gmra.mxu0 %v18229_v42  ;;  %v11492_v41 = vld [vmem:[%s17604_s3 + $0xec] sm:$0xf]  ;;  %v10031_v8 = vld [vmem:[%s17604_s3 + $0xf8] sm:$0xf0] }
 0x616   : > { %18238 = vst [vmem:[#allocation59_spill] sm:$0xff] %v15570_v43  ;;  %5452 = vmatmul.bf16.gmra.mxu2 %v18231_v26  ;;  %v10034_v46 = vor.u32 %v11492_v41, %v10031_v8  ;;  %v11584_v41 = vld [vmem:[%s17604_s3 + $0x3cc] sm:$0xf] }
 0x617   : > { %5403 = vmatmul.bf16.gmra.mxu1 %v18230_v35  ;;  %5501 = vmatmul.bf16.gmra.mxu3 %v18232_v63 }
 0x618   : > { %5806 = vmatpush.bf16.msra.mxu2 %v10290_v40  ;;  %5708 = vmatpush.bf16.msra.mxu0 %v10034_v46 }
 0x619   : > { %v5257_v62 = vpop.f32.mrf.mxu2 }
 0x61a   : > { %v5258_v25 = vadd.f32 %v5257_v62, %v5209_v53  ;;  %v5306_v21 = vpop.f32.mrf.mxu3  ;;  %v5161_v37 = vpop.f32.mrf.mxu0  ;;  %v11524_v53 = vld [vmem:[%s17604_s3 + $0x1ec] sm:$0xf] }
 0x61b   : > { %v5162_v45 = vadd.f32 %v5161_v37, %v18239_v3  ;;  %v10162_v40 = vor.u32 %v11524_v53, %v10159_v56  ;;  %v10399_v53 = vld [vmem:[%s17604_s3 + $0x3d8] sm:$0xf0] }
 0x61c   : > { %v5210_v60 = vpop.f32.mrf.mxu1  ;;  %v15589_v15 = vadd.f32 %v5306_v21, %v5258_v25  ;;  %v18241_v21 = vld [vmem:[#allocation139_spill] sm:$0xff]  ;;  %v10402_v46 = vor.u32 %v11584_v41, %v10399_v53  ;;  %v10143_v41 = vld [vmem:[%s17604_s3 + $0x1d8] sm:$0xf0] }
 0x61d   : > { %v5211_v6 = vadd.f32 %v5210_v60, %v5162_v45  ;;  %5757 = vmatpush.bf16.msra.mxu1 %v10162_v40  ;;  %v11552_v45 = vld [vmem:[%s17604_s3 + $0x2cc] sm:$0xf]  ;;  %v10271_v60 = vld [vmem:[%s17604_s3 + $0x2d8] sm:$0xf0] }
 0x61e   : > { %18240 = vst [vmem:[#allocation163_spill] sm:$0xff] %v15589_v15  ;;  %v10274_v8 = vor.u32 %v11552_v45, %v10271_v60  ;;  %5856 = vmatpush.bf16.msra.mxu3 %v10402_v46 }
 0x620   : > { %5807 = vmatpush.bf16.msra.mxu2 %v10274_v8 }
 0x621   : > { %v5259_v39 = vpop.f32.mrf.mxu2 }
 0x622   : > { %v5260_v62 = vadd.f32 %v5259_v39, %v5211_v6  ;;  %v5308_v10 = vpop.f32.mrf.mxu3  ;;  %v5164_v25 = vpop.f32.mrf.mxu0 }
 0x623   : > { %v5165_v37 = vadd.f32 %v5164_v25, %v18241_v21 }
 0x624   : > { %v5213_v3 = vpop.f32.mrf.mxu1  ;;  %v15604_v15 = vadd.f32 %v5308_v10, %v5260_v62  ;;  %v18243_v62 = vld [vmem:[#allocation36_spill] sm:$0xff] }
 0x625   : > { %v5214_v43 = vadd.f32 %v5213_v3, %v5165_v37  ;;  %5359 = vmatmul.bf16.gmra.mxu0 %v14287_v20  ;;  %v11488_v37 = vld [vmem:[%s17604_s3 + $0xcc] sm:$0xf]  ;;  %v10015_v3 = vld [vmem:[%s17604_s3 + $0xd8] sm:$0xf0] }
 0x626   : > { %18242 = vst [vmem:[#allocation60_spill] sm:$0xff] %v15604_v15  ;;  %5457 = vmatmul.bf16.gmra.mxu2 %v14311_v50  ;;  %v10018_v60 = vor.u32 %v11488_v37, %v10015_v3  ;;  %v11580_v37 = vld [vmem:[%s17604_s3 + $0x3ac] sm:$0xf] }
 0x627   : > { %5408 = vmatmul.bf16.gmra.mxu1 %v14291_v55  ;;  %5506 = vmatmul.bf16.gmra.mxu3 %v14315_v36 }
 0x628   : > { %5709 = vmatpush.bf16.msra.mxu0 %v10018_v60 }
 0x629   : > { %v5262_v6 = vpop.f32.mrf.mxu2 }
 0x62a   : > { %v5263_v56 = vadd.f32 %v5262_v6, %v5214_v43  ;;  %v5311_v40 = vpop.f32.mrf.mxu3  ;;  %v5166_v39 = vpop.f32.mrf.mxu0  ;;  %v11520_v43 = vld [vmem:[%s17604_s3 + $0x1cc] sm:$0xf] }
 0x62b   : > { %v5167_v10 = vadd.f32 %v5166_v39, %v18243_v62  ;;  %v10146_v8 = vor.u32 %v11520_v43, %v10143_v41  ;;  %v10383_v43 = vld [vmem:[%s17604_s3 + $0x3b8] sm:$0xf0] }
 0x62c   : > { %v5215_v25 = vpop.f32.mrf.mxu1  ;;  %v15623_v21 = vadd.f32 %v5311_v40, %v5263_v56  ;;  %v18245_v40 = vld [vmem:[#allocation140_spill] sm:$0xff]  ;;  %v10386_v60 = vor.u32 %v11580_v37, %v10383_v43  ;;  %v10127_v37 = vld [vmem:[%s17604_s3 + $0x1b8] sm:$0xf0] }
 0x62d   : > { %v5216_v45 = vadd.f32 %v5215_v25, %v5167_v10  ;;  %5758 = vmatpush.bf16.msra.mxu1 %v10146_v8  ;;  %v11548_v10 = vld [vmem:[%s17604_s3 + $0x2ac] sm:$0xf]  ;;  %v10255_v25 = vld [vmem:[%s17604_s3 + $0x2b8] sm:$0xf0] }
 0x62e   : > { %18244 = vst [vmem:[#allocation164_spill] sm:$0xff] %v15623_v21  ;;  %v10258_v3 = vor.u32 %v11548_v10, %v10255_v25  ;;  %5857 = vmatpush.bf16.msra.mxu3 %v10386_v60 }
 0x630   : > { %5808 = vmatpush.bf16.msra.mxu2 %v10258_v3 }
 0x631   : > { %v5264_v53 = vpop.f32.mrf.mxu2 }
 0x632   : > { %v5265_v6 = vadd.f32 %v5264_v53, %v5216_v45  ;;  %v5313_v46 = vpop.f32.mrf.mxu3  ;;  %v5325_v56 = vpop.f32.mrf.mxu0 }
 0x633   : > { %v5326_v39 = vadd.f32 %v5325_v56, %v18245_v40 }
 0x634   : > { %v5374_v62 = vpop.f32.mrf.mxu1  ;;  %v15638_v21 = vadd.f32 %v5313_v46, %v5265_v6  ;;  %v18247_v6 = vld [vmem:[#allocation37_spill] sm:$0xff] }
 0x635   : > { %v5375_v15 = vadd.f32 %v5374_v62, %v5326_v39  ;;  %5520 = vmatmul.bf16.vlgmr.msrb.gmra.mxu0 %v15095_v31  ;;  %v11484_v39 = vld [vmem:[%s17604_s3 + $0xac] sm:$0xf]  ;;  %v9999_v62 = vld [vmem:[%s17604_s3 + $0xb8] sm:$0xf0] }
 0x636   : > { %18246 = vst [vmem:[#allocation61_spill] sm:$0xff] %v15638_v21  ;;  %5618 = vmatmul.bf16.vlgmr.msrb.gmra.mxu2 %v15103_v16  ;;  %v10002_v25 = vor.u32 %v11484_v39, %v9999_v62  ;;  %v11576_v39 = vld [vmem:[%s17604_s3 + $0x38c] sm:$0xf] }
 0x637   : > { %5569 = vmatmul.bf16.vlgmr.msrb.gmra.mxu1 %v15099_v33  ;;  %5667 = vmatmul.bf16.vlgmr.msrb.gmra.mxu3 %v15109_v38 }
 0x638   : > { %5710 = vmatpush.bf16.msra.mxu0 %v10002_v25 }
 0x639   : > { %v5423_v45 = vpop.f32.mrf.mxu2 }
 0x63a   : > { %v5424_v41 = vadd.f32 %v5423_v45, %v5375_v15  ;;  %v5472_v8 = vpop.f32.mrf.mxu3  ;;  %v5327_v53 = vpop.f32.mrf.mxu0  ;;  %v11516_v15 = vld [vmem:[%s17604_s3 + $0x1ac] sm:$0xf] }
 0x63b   : > { %v5328_v46 = vadd.f32 %v5327_v53, %v18247_v6  ;;  %v10130_v3 = vor.u32 %v11516_v15, %v10127_v37  ;;  %v10367_v15 = vld [vmem:[%s17604_s3 + $0x398] sm:$0xf0] }
 0x63c   : > { %v5376_v56 = vpop.f32.mrf.mxu1  ;;  %v15657_v40 = vadd.f32 %v5472_v8, %v5424_v41  ;;  %v18249_v8 = vld [vmem:[#allocation141_spill] sm:$0xff]  ;;  %v10370_v25 = vor.u32 %v11576_v39, %v10367_v15  ;;  %v10111_v39 = vld [vmem:[%s17604_s3 + $0x198] sm:$0xf0] }
 0x63d   : > { %v5377_v10 = vadd.f32 %v5376_v56, %v5328_v46  ;;  %5759 = vmatpush.bf16.msra.mxu1 %v10130_v3  ;;  %v11544_v46 = vld [vmem:[%s17604_s3 + $0x28c] sm:$0xf]  ;;  %v10239_v56 = vld [vmem:[%s17604_s3 + $0x298] sm:$0xf0] }
 0x63e   : > { %18248 = vst [vmem:[#allocation165_spill] sm:$0xff] %v15657_v40  ;;  %v10242_v62 = vor.u32 %v11544_v46, %v10239_v56  ;;  %5858 = vmatpush.bf16.msra.mxu3 %v10370_v25 }
 0x640   : > { %5809 = vmatpush.bf16.msra.mxu2 %v10242_v62 }
 0x641   : > { %v5425_v43 = vpop.f32.mrf.mxu2 }
 0x642   : > { %v5426_v45 = vadd.f32 %v5425_v43, %v5377_v10  ;;  %v5474_v60 = vpop.f32.mrf.mxu3  ;;  %v5330_v41 = vpop.f32.mrf.mxu0 }
 0x643   : > { %v5331_v53 = vadd.f32 %v5330_v41, %v18249_v8 }
 0x644   : > { %v5379_v6 = vpop.f32.mrf.mxu1  ;;  %v15672_v40 = vadd.f32 %v5474_v60, %v5426_v45  ;;  %v18251_v45 = vld [vmem:[#allocation38_spill] sm:$0xff] }
 0x645   : > { %v5380_v21 = vadd.f32 %v5379_v6, %v5331_v53  ;;  %5525 = vmatmul.bf16.gmra.mxu0 %v18199_v14  ;;  %v11480_v53 = vld [vmem:[%s17604_s3 + $0x8c] sm:$0xf]  ;;  %v9983_v6 = vld [vmem:[%s17604_s3 + $0x98] sm:$0xf0] }
 0x646   : > { %18250 = vst [vmem:[#allocation62_spill] sm:$0xff] %v15672_v40  ;;  %5623 = vmatmul.bf16.gmra.mxu2 %v18201_v30  ;;  %v9986_v56 = vor.u32 %v11480_v53, %v9983_v6  ;;  %v11572_v53 = vld [vmem:[%s17604_s3 + $0x36c] sm:$0xf] }
 0x647   : > { %5574 = vmatmul.bf16.gmra.mxu1 %v18200_v52  ;;  %5672 = vmatmul.bf16.gmra.mxu3 %v18202_v58 }
 0x648   : > { %5711 = vmatpush.bf16.msra.mxu0 %v9986_v56 }
 0x649   : > { %v5428_v10 = vpop.f32.mrf.mxu2 }
 0x64a   : > { %v5429_v37 = vadd.f32 %v5428_v10, %v5380_v21  ;;  %v5477_v3 = vpop.f32.mrf.mxu3  ;;  %v5332_v43 = vpop.f32.mrf.mxu0  ;;  %v11512_v21 = vld [vmem:[%s17604_s3 + $0x18c] sm:$0xf] }
 0x64b   : > { %v5333_v60 = vadd.f32 %v5332_v43, %v18251_v45  ;;  %v10114_v62 = vor.u32 %v11512_v21, %v10111_v39  ;;  %v10351_v21 = vld [vmem:[%s17604_s3 + $0x378] sm:$0xf0] }
 0x64c   : > { %v5381_v41 = vpop.f32.mrf.mxu1  ;;  %v15691_v8 = vadd.f32 %v5477_v3, %v5429_v37  ;;  %v18253_v3 = vld [vmem:[#allocation142_spill] sm:$0xff]  ;;  %v10354_v56 = vor.u32 %v11572_v53, %v10351_v21 }
 0x64d   : > { %v5382_v46 = vadd.f32 %v5381_v41, %v5333_v60  ;;  %5760 = vmatpush.bf16.msra.mxu1 %v10114_v62  ;;  %v11540_v60 = vld [vmem:[%s17604_s3 + $0x26c] sm:$0xf]  ;;  %v10223_v41 = vld [vmem:[%s17604_s3 + $0x278] sm:$0xf0] }
 0x64e   : > { %18252 = vst [vmem:[#allocation166_spill] sm:$0xff] %v15691_v8  ;;  %v10226_v6 = vor.u32 %v11540_v60, %v10223_v41  ;;  %5859 = vmatpush.bf16.msra.mxu3 %v10354_v56  ;;  %v10095_v53 = vld [vmem:[%s17604_s3 + $0x178] sm:$0xf0] }
 0x650   : > { %5810 = vmatpush.bf16.msra.mxu2 %v10226_v6 }
 0x651   : > { %v5430_v15 = vpop.f32.mrf.mxu2 }
 0x652   : > { %v5431_v10 = vadd.f32 %v5430_v15, %v5382_v46  ;;  %v5479_v25 = vpop.f32.mrf.mxu3  ;;  %v5335_v37 = vpop.f32.mrf.mxu0 }
 0x653   : > { %v5336_v43 = vadd.f32 %v5335_v37, %v18253_v3 }
 0x654   : > { %v5384_v45 = vpop.f32.mrf.mxu1  ;;  %v15706_v8 = vadd.f32 %v5479_v25, %v5431_v10  ;;  %v18255_v10 = vld [vmem:[#allocation39_spill] sm:$0xff] }
 0x655   : > { %v5385_v40 = vadd.f32 %v5384_v45, %v5336_v43  ;;  %5530 = vmatmul.bf16.gmra.mxu0 %v18205_v49  ;;  %v11476_v43 = vld [vmem:[%s17604_s3 + $0x6c] sm:$0xf]  ;;  %v9967_v45 = vld [vmem:[%s17604_s3 + $0x78] sm:$0xf0] }
 0x656   : > { %18254 = vst [vmem:[#allocation63_spill] sm:$0xff] %v15706_v8  ;;  %5628 = vmatmul.bf16.gmra.mxu2 %v18207_v22  ;;  %v9970_v41 = vor.u32 %v11476_v43, %v9967_v45  ;;  %v11568_v43 = vld [vmem:[%s17604_s3 + $0x34c] sm:$0xf] }
 0x657   : > { %5579 = vmatmul.bf16.gmra.mxu1 %v18206_v47  ;;  %5677 = vmatmul.bf16.gmra.mxu3 %v18208_v19 }
 0x658   : > { %5712 = vmatpush.bf16.msra.mxu0 %v9970_v41 }
 0x659   : > { %v5433_v46 = vpop.f32.mrf.mxu2 }
 0x65a   : > { %v5434_v39 = vadd.f32 %v5433_v46, %v5385_v40  ;;  %v5482_v62 = vpop.f32.mrf.mxu3  ;;  %v5337_v15 = vpop.f32.mrf.mxu0  ;;  %v11508_v40 = vld [vmem:[%s17604_s3 + $0x16c] sm:$0xf] }
 0x65b   : > { %v5338_v25 = vadd.f32 %v5337_v15, %v18255_v10  ;;  %v10098_v6 = vor.u32 %v11508_v40, %v10095_v53  ;;  %v10335_v40 = vld [vmem:[%s17604_s3 + $0x358] sm:$0xf0] }
 0x65c   : > { %v5386_v37 = vpop.f32.mrf.mxu1  ;;  %v15725_v3 = vadd.f32 %v5482_v62, %v5434_v39  ;;  %v18257_v62 = vld [vmem:[#allocation143_spill] sm:$0xff]  ;;  %v10338_v41 = vor.u32 %v11568_v43, %v10335_v40  ;;  %v10079_v43 = vld [vmem:[%s17604_s3 + $0x158] sm:$0xf0] }
 0x65d   : > { %v5387_v60 = vadd.f32 %v5386_v37, %v5338_v25  ;;  %5761 = vmatpush.bf16.msra.mxu1 %v10098_v6  ;;  %v11536_v25 = vld [vmem:[%s17604_s3 + $0x24c] sm:$0xf]  ;;  %v10207_v37 = vld [vmem:[%s17604_s3 + $0x258] sm:$0xf0] }
 0x65e   : > { %18256 = vst [vmem:[#allocation167_spill] sm:$0xff] %v15725_v3  ;;  %v10210_v45 = vor.u32 %v11536_v25, %v10207_v37  ;;  %5860 = vmatpush.bf16.msra.mxu3 %v10338_v41 }
 0x660   : > { %5811 = vmatpush.bf16.msra.mxu2 %v10210_v45 }
 0x661   : > { %v5435_v21 = vpop.f32.mrf.mxu2 }
 0x662   : > { %v5436_v46 = vadd.f32 %v5435_v21, %v5387_v60  ;;  %v5484_v56 = vpop.f32.mrf.mxu3  ;;  %v5340_v39 = vpop.f32.mrf.mxu0 }
 0x663   : > { %v5341_v15 = vadd.f32 %v5340_v39, %v18257_v62 }
 0x664   : > { %v5389_v10 = vpop.f32.mrf.mxu1  ;;  %v15740_v3 = vadd.f32 %v5484_v56, %v5436_v46  ;;  %v18259_v46 = vld [vmem:[#allocation40_spill] sm:$0xff] }
 0x665   : > { %v5390_v8 = vadd.f32 %v5389_v10, %v5341_v15  ;;  %5535 = vmatmul.bf16.gmra.mxu0 %v18211_v2  ;;  %v11472_v15 = vld [vmem:[%s17604_s3 + $0x4c] sm:$0xf]  ;;  %v9951_v10 = vld [vmem:[%s17604_s3 + $0x58] sm:$0xf0] }
 0x666   : > { %18258 = vst [vmem:[#allocation64_spill] sm:$0xff] %v15740_v3  ;;  %5633 = vmatmul.bf16.gmra.mxu2 %v18213_v1  ;;  %v9954_v37 = vor.u32 %v11472_v15, %v9951_v10  ;;  %v11564_v15 = vld [vmem:[%s17604_s3 + $0x32c] sm:$0xf] }
 0x667   : > { %5584 = vmatmul.bf16.gmra.mxu1 %v18212_v17  ;;  %5682 = vmatmul.bf16.gmra.mxu3 %v18214_v51 }
 0x668   : > { %5713 = vmatpush.bf16.msra.mxu0 %v9954_v37 }
 0x669   : > { %v5438_v60 = vpop.f32.mrf.mxu2 }
 0x66a   : > { %v5439_v53 = vadd.f32 %v5438_v60, %v5390_v8  ;;  %v5487_v6 = vpop.f32.mrf.mxu3  ;;  %v5342_v21 = vpop.f32.mrf.mxu0  ;;  %v11504_v8 = vld [vmem:[%s17604_s3 + $0x14c] sm:$0xf] }
 0x66b   : > { %v5343_v56 = vadd.f32 %v5342_v21, %v18259_v46  ;;  %v10082_v45 = vor.u32 %v11504_v8, %v10079_v43  ;;  %v10319_v8 = vld [vmem:[%s17604_s3 + $0x338] sm:$0xf0] }
 0x66c   : > { %v5391_v39 = vpop.f32.mrf.mxu1  ;;  %v15759_v62 = vadd.f32 %v5487_v6, %v5439_v53  ;;  %v18261_v6 = vld [vmem:[#allocation144_spill] sm:$0xff]  ;;  %v10322_v37 = vor.u32 %v11564_v15, %v10319_v8  ;;  %v10063_v15 = vld [vmem:[%s17604_s3 + $0x138] sm:$0xf0] }
 0x66d   : > { %v5392_v25 = vadd.f32 %v5391_v39, %v5343_v56  ;;  %5762 = vmatpush.bf16.msra.mxu1 %v10082_v45  ;;  %v11532_v56 = vld [vmem:[%s17604_s3 + $0x22c] sm:$0xf]  ;;  %v10191_v39 = vld [vmem:[%s17604_s3 + $0x238] sm:$0xf0] }
 0x66e   : > { %18260 = vst [vmem:[#allocation168_spill] sm:$0xff] %v15759_v62  ;;  %v10194_v10 = vor.u32 %v11532_v56, %v10191_v39  ;;  %5861 = vmatpush.bf16.msra.mxu3 %v10322_v37 }
 0x670   : > { %5812 = vmatpush.bf16.msra.mxu2 %v10194_v10 }
 0x671   : > { %v5440_v40 = vpop.f32.mrf.mxu2 }
 0x672   : > { %v5441_v60 = vadd.f32 %v5440_v40, %v5392_v25  ;;  %v5489_v41 = vpop.f32.mrf.mxu3  ;;  %v5345_v53 = vpop.f32.mrf.mxu0 }
 0x673   : > { %v5346_v21 = vadd.f32 %v5345_v53, %v18261_v6 }
 0x674   : > { %v5394_v46 = vpop.f32.mrf.mxu1  ;;  %v15774_v62 = vadd.f32 %v5489_v41, %v5441_v60  ;;  %v18263_v60 = vld [vmem:[#allocation41_spill] sm:$0xff] }
 0x675   : > { %v5395_v3 = vadd.f32 %v5394_v46, %v5346_v21  ;;  %5540 = vmatmul.bf16.gmra.mxu0 %v18217_v29  ;;  %v11468_v21 = vld [vmem:[%s17604_s3 + $0x2c] sm:$0xf]  ;;  %v9935_v46 = vld [vmem:[%s17604_s3 + $0x38] sm:$0xf0] }
 0x676   : > { %18262 = vst [vmem:[#allocation65_spill] sm:$0xff] %v15774_v62  ;;  %5638 = vmatmul.bf16.gmra.mxu2 %v18219_v59  ;;  %v9938_v39 = vor.u32 %v11468_v21, %v9935_v46  ;;  %v11560_v21 = vld [vmem:[%s17604_s3 + $0x30c] sm:$0xf] }
 0x677   : > { %5589 = vmatmul.bf16.gmra.mxu1 %v18218_v32  ;;  %5687 = vmatmul.bf16.gmra.mxu3 %v18220_v7 }
 0x678   : > { %5714 = vmatpush.bf16.msra.mxu0 %v9938_v39 }
 0x679   : > { %v5443_v25 = vpop.f32.mrf.mxu2 }
 0x67a   : > { %v5444_v43 = vadd.f32 %v5443_v25, %v5395_v3  ;;  %v5492_v45 = vpop.f32.mrf.mxu3  ;;  %v5347_v40 = vpop.f32.mrf.mxu0  ;;  %v11500_v3 = vld [vmem:[%s17604_s3 + $0x12c] sm:$0xf] }
 0x67b   : > { %v5348_v41 = vadd.f32 %v5347_v40, %v18263_v60  ;;  %v10066_v10 = vor.u32 %v11500_v3, %v10063_v15  ;;  %v10303_v3 = vld [vmem:[%s17604_s3 + $0x318] sm:$0xf0] }
 0x67c   : > { %v5396_v53 = vpop.f32.mrf.mxu1  ;;  %v15793_v6 = vadd.f32 %v5492_v45, %v5444_v43  ;;  %v18265_v45 = vld [vmem:[#allocation145_spill] sm:$0xff]  ;;  %v10306_v39 = vor.u32 %v11560_v21, %v10303_v3  ;;  %v10047_v21 = vld [vmem:[%s17604_s3 + $0x118] sm:$0xf0] }
 0x67d   : > { %v5397_v56 = vadd.f32 %v5396_v53, %v5348_v41  ;;  %5763 = vmatpush.bf16.msra.mxu1 %v10066_v10  ;;  %v11528_v41 = vld [vmem:[%s17604_s3 + $0x20c] sm:$0xf]  ;;  %v10175_v53 = vld [vmem:[%s17604_s3 + $0x218] sm:$0xf0] }
 0x67e   : > { %18264 = vst [vmem:[#allocation169_spill] sm:$0xff] %v15793_v6  ;;  %v10178_v46 = vor.u32 %v11528_v41, %v10175_v53  ;;  %5862 = vmatpush.bf16.msra.mxu3 %v10306_v39 }
 0x680   : > { %5813 = vmatpush.bf16.msra.mxu2 %v10178_v46 }
 0x681   : > { %v5445_v8 = vpop.f32.mrf.mxu2 }
 0x682   : > { %v5446_v25 = vadd.f32 %v5445_v8, %v5397_v56  ;;  %v5494_v37 = vpop.f32.mrf.mxu3  ;;  %v5350_v43 = vpop.f32.mrf.mxu0 }
 0x683   : > { %v5351_v40 = vadd.f32 %v5350_v43, %v18265_v45 }
 0x684   : > { %v5399_v60 = vpop.f32.mrf.mxu1  ;;  %v15808_v6 = vadd.f32 %v5494_v37, %v5446_v25  ;;  %v18267_v25 = vld [vmem:[#allocation42_spill] sm:$0xff] }
 0x685   : > { %v5400_v62 = vadd.f32 %v5399_v60, %v5351_v40  ;;  %5545 = vmatmul.bf16.gmra.mxu0 %v18223_v48  ;;  %v11464_v40 = vld [vmem:[%s17604_s3 + $0xc] sm:$0xf]  ;;  %v9919_v60 = vld [vmem:[%s17604_s3 + $0x18] sm:$0xf0] }
 0x686   : > { %18266 = vst [vmem:[#allocation66_spill] sm:$0xff] %v15808_v6  ;;  %5643 = vmatmul.bf16.gmra.mxu2 %v18225_v57  ;;  %v9922_v53 = vor.u32 %v11464_v40, %v9919_v60  ;;  %v11045_v40 = vld [vmem:[%s17604_s3 + $0xbe0] sm:$0xf] }
 0x687   : > { %5594 = vmatmul.bf16.gmra.mxu1 %v18224_v61  ;;  %5692 = vmatmul.bf16.gmra.mxu3 %v18226_v9 }
 0x688   : > { %5715 = vmatpush.bf16.msra.mxu0 %v9922_v53 }
 0x689   : > { %v5448_v56 = vpop.f32.mrf.mxu2 }
 0x68a   : > { %v5449_v15 = vadd.f32 %v5448_v56, %v5400_v62  ;;  %v5497_v10 = vpop.f32.mrf.mxu3  ;;  %v5352_v8 = vpop.f32.mrf.mxu0  ;;  %v11496_v62 = vld [vmem:[%s17604_s3 + $0x10c] sm:$0xf] }
 0x68b   : > { %v5353_v37 = vadd.f32 %v5352_v8, %v18267_v25  ;;  %v10050_v46 = vor.u32 %v11496_v62, %v10047_v21  ;;  %v11845_v62 = vld [vmem:[%s17604_s3 + $0xbec] sm:$0xf0] }
 0x68c   : > { %v5401_v43 = vpop.f32.mrf.mxu1  ;;  %v15827_v45 = vadd.f32 %v5497_v10, %v5449_v15  ;;  %v18269_v10 = vld [vmem:[#allocation146_spill] sm:$0xff]  ;;  %v11046_v53 = vor.u32 %v11845_v62, %v11045_v40  ;;  %v11781_v40 = vld [vmem:[%s17604_s3 + $0x9ec] sm:$0xf0] }
 0x68d   : > { %v5402_v41 = vadd.f32 %v5401_v43, %v5353_v37  ;;  %5764 = vmatpush.bf16.msra.mxu1 %v10050_v46  ;;  %v10917_v37 = vld [vmem:[%s17604_s3 + $0xae0] sm:$0xf]  ;;  %v11813_v43 = vld [vmem:[%s17604_s3 + $0xaec] sm:$0xf0] }
 0x68e   : > { %18268 = vst [vmem:[#allocation170_spill] sm:$0xff] %v15827_v45  ;;  %v10918_v60 = vor.u32 %v11813_v43, %v10917_v37  ;;  %6820 = vmatpush.bf16.msrb.mxu3 %v11046_v53 }
 0x690   : > { %6771 = vmatpush.bf16.msrb.mxu2 %v10918_v60 }
 0x691   : > { %v5450_v3 = vpop.f32.mrf.mxu2 }
 0x692   : > { %v5451_v56 = vadd.f32 %v5450_v3, %v5402_v41  ;;  %v5499_v39 = vpop.f32.mrf.mxu3  ;;  %v5355_v15 = vpop.f32.mrf.mxu0 }
 0x693   : > { %v5356_v8 = vadd.f32 %v5355_v15, %v18269_v10 }
 0x694   : > { %v5404_v25 = vpop.f32.mrf.mxu1  ;;  %v15842_v45 = vadd.f32 %v5499_v39, %v5451_v56  ;;  %v18271_v56 = vld [vmem:[#allocation43_spill] sm:$0xff] }
 0x695   : > { %v5405_v6 = vadd.f32 %v5404_v25, %v5356_v8  ;;  %5550 = vmatmul.bf16.gmra.mxu0 %v18229_v42  ;;  %v10661_v8 = vld [vmem:[%s17604_s3 + $0x8e0] sm:$0xf]  ;;  %v11749_v25 = vld [vmem:[%s17604_s3 + $0x8ec] sm:$0xf0] }
 0x696   : > { %18270 = vst [vmem:[#allocation67_spill] sm:$0xff] %v15842_v45  ;;  %5648 = vmatmul.bf16.gmra.mxu2 %v18231_v26  ;;  %v10662_v43 = vor.u32 %v11749_v25, %v10661_v8  ;;  %v11841_v25 = vld [vmem:[%s17604_s3 + $0xbcc] sm:$0xf0] }
 0x697   : > { %5599 = vmatmul.bf16.gmra.mxu1 %v18230_v35  ;;  %5697 = vmatmul.bf16.gmra.mxu3 %v18232_v63 }
 0x698   : > { %6673 = vmatpush.bf16.msrb.mxu0 %v10662_v43 }
 0x699   : > { %v5453_v41 = vpop.f32.mrf.mxu2 }
 0x69a   : > { %v5454_v21 = vadd.f32 %v5453_v41, %v5405_v6  ;;  %v5502_v46 = vpop.f32.mrf.mxu3  ;;  %v5357_v3 = vpop.f32.mrf.mxu0  ;;  %v10789_v6 = vld [vmem:[%s17604_s3 + $0x9e0] sm:$0xf] }
 0x69b   : > { %v5358_v39 = vadd.f32 %v5357_v3, %v18271_v56  ;;  %v10790_v60 = vor.u32 %v11781_v40, %v10789_v6 }
 0x69c   : > { %v5406_v15 = vpop.f32.mrf.mxu1  ;;  %v15861_v10 = vadd.f32 %v5502_v46, %v5454_v21 }
 0x69d   : > { %v5407_v37 = vadd.f32 %v5406_v15, %v5358_v39  ;;  %6722 = vmatpush.bf16.msrb.mxu1 %v10790_v60  ;;  %v10901_v39 = vld [vmem:[%s17604_s3 + $0xac0] sm:$0xf] }
 0x69e   : > { %18272 = vst [vmem:[#allocation171_spill] sm:$0xff] %v15861_v10  ;;  %v11029_v15 = vld [vmem:[%s17604_s3 + $0xbc0] sm:$0xf] }
 0x6a1   : > { %v5455_v62 = vpop.f32.mrf.mxu2 }
 0x6a2   : > { %v5456_v41 = vadd.f32 %v5455_v62, %v5407_v37  ;;  %v5504_v53 = vpop.f32.mrf.mxu3  ;;  %v5360_v21 = vpop.f32.mrf.mxu0  ;;  %v11030_v37 = vor.u32 %v11841_v25, %v11029_v15 }
 0x6a3   : > { %v5361_v46 = vadd.f32 %v5360_v21, %v14823_v4  ;;  %v11809_v4 = vld [vmem:[%s17604_s3 + $0xacc] sm:$0xf0]  ;;  %v10645_v21 = vld [vmem:[%s17604_s3 + $0x8c0] sm:$0xf] }
 0x6a4   : > { %v5409_v3 = vpop.f32.mrf.mxu1  ;;  %v15876_v56 = vadd.f32 %v5504_v53, %v5456_v41  ;;  %v10902_v8 = vor.u32 %v11809_v4, %v10901_v39  ;;  %6821 = vmatpush.bf16.msrb.mxu3 %v11030_v37 }
 0x6a5   : > { %v5410_v10 = vadd.f32 %v5409_v3, %v5361_v46  ;;  %5555 = vmatmul.bf16.gmra.mxu0 %v14287_v20  ;;  %v11745_v46 = vld [vmem:[%s17604_s3 + $0x8cc] sm:$0xf0] }
 0x6a6   : > { %18273 = vst [vmem:[#allocation68_spill] sm:$0xff] %v15876_v56  ;;  %5653 = vmatmul.bf16.gmra.mxu2 %v14311_v50  ;;  %v10646_v39 = vor.u32 %v11745_v46, %v10645_v21 }
 0x6a7   : > { %5604 = vmatmul.bf16.gmra.mxu1 %v14291_v55  ;;  %5702 = vmatmul.bf16.gmra.mxu3 %v14315_v36 }
 0x6a8   : > { %6772 = vmatpush.bf16.msrb.mxu2 %v10902_v8  ;;  %6674 = vmatpush.bf16.msrb.mxu0 %v10646_v39 }
 0x6a9   : > { %v5458_v6 = vpop.f32.mrf.mxu2 }
 0x6aa   : > { %v5459_v43 = vadd.f32 %v5458_v6, %v5410_v10  ;;  %v5507_v40 = vpop.f32.mrf.mxu3  ;;  %v5362_v60 = vpop.f32.mrf.mxu0  ;;  %v10773_v10 = vld [vmem:[%s17604_s3 + $0x9c0] sm:$0xf] }
 0x6ab   : > { %v5363_v62 = vadd.f32 %v5362_v60, %v14837_v54  ;;  %v11777_v54 = vld [vmem:[%s17604_s3 + $0x9cc] sm:$0xf0] }
 0x6ac   : > { %v5411_v41 = vpop.f32.mrf.mxu1  ;;  %v15895_v53 = vadd.f32 %v5507_v40, %v5459_v43  ;;  %v10774_v4 = vor.u32 %v11777_v54, %v10773_v10 }
 0x6ad   : > { %v5412_v3 = vadd.f32 %v5411_v41, %v5363_v62  ;;  %v10885_v62 = vld [vmem:[%s17604_s3 + $0xaa0] sm:$0xf] }
 0x6ae   : > { %18274 = vst [vmem:[#allocation172_spill] sm:$0xff] %v15895_v53  ;;  %6723 = vmatpush.bf16.msrb.mxu1 %v10774_v4  ;;  %v11013_v41 = vld [vmem:[%s17604_s3 + $0xba0] sm:$0xf] }
 0x6af   : > { %v10629_v4 = vld [vmem:[%s17604_s3 + $0x8a0] sm:$0xf] }
 0x6b1   : > { %v5460_v15 = vpop.f32.mrf.mxu2 }
 0x6b2   : > { %v5461_v8 = vadd.f32 %v5460_v15, %v5412_v3  ;;  %v5509_v25 = vpop.f32.mrf.mxu3  ;;  %v5521_v6 = vpop.f32.mrf.mxu0  ;;  %v11741_v15 = vld [vmem:[%s17604_s3 + $0x8ac] sm:$0xf0] }
 0x6b3   : > { %v5522_v37 = vadd.f32 %v5521_v6, %v14855_v34  ;;  %v11805_v34 = vld [vmem:[%s17604_s3 + $0xaac] sm:$0xf0]  ;;  %v10630_v6 = vor.u32 %v11741_v15, %v10629_v4  ;;  %v18279_v15 = vld [vmem:[#allocation44_spill] sm:$0xff] }
 0x6b4   : > { %v5570_v43 = vpop.f32.mrf.mxu1  ;;  %v15910_v40 = vadd.f32 %v5509_v25, %v5461_v8  ;;  %v10886_v21 = vor.u32 %v11805_v34, %v10885_v62  ;;  %v10757_v8 = vld [vmem:[%s17604_s3 + $0x9a0] sm:$0xf] }
 0x6b5   : > { %v5571_v60 = vadd.f32 %v5570_v43, %v5522_v37  ;;  %5716 = vmatmul.bf16.vlgmr.msra.gmra.mxu0 %v15095_v31  ;;  %v11837_v31 = vld [vmem:[%s17604_s3 + $0xbac] sm:$0xf0] }
 0x6b6   : > { %18275 = vst [vmem:[#allocation69_spill] sm:$0xff] %v15910_v40  ;;  %5814 = vmatmul.bf16.vlgmr.msra.gmra.mxu2 %v15103_v16  ;;  %v11014_v16 = vor.u32 %v11837_v31, %v11013_v41  ;;  %6675 = vmatpush.bf16.msrb.mxu0 %v10630_v6  ;;  %v18277_v41 = vld [vmem:[#allocation147_spill] sm:$0xff] }
 0x6b7   : > { %5765 = vmatmul.bf16.vlgmr.msra.gmra.mxu1 %v15099_v33  ;;  %5863 = vmatmul.bf16.vlgmr.msra.gmra.mxu3 %v15109_v38 }
 0x6b8   : > { %6773 = vmatpush.bf16.msrb.mxu2 %v10886_v21  ;;  %6822 = vmatpush.bf16.msrb.mxu3 %v11014_v16 }
 0x6b9   : > { %v5619_v33 = vpop.f32.mrf.mxu2 }
 0x6ba   : > { %v5620_v38 = vadd.f32 %v5619_v33, %v5571_v60  ;;  %v5668_v46 = vpop.f32.mrf.mxu3  ;;  %v5523_v10 = vpop.f32.mrf.mxu0 }
 0x6bb   : > { %v5524_v3 = vadd.f32 %v5523_v10, %v14869_v27  ;;  %v11773_v27 = vld [vmem:[%s17604_s3 + $0x9ac] sm:$0xf0]  ;;  %v10997_v10 = vld [vmem:[%s17604_s3 + $0xb80] sm:$0xf] }
 0x6bc   : > { %v5572_v39 = vpop.f32.mrf.mxu1  ;;  %v15929_v54 = vadd.f32 %v5668_v46, %v5620_v38  ;;  %v10758_v37 = vor.u32 %v11773_v27, %v10757_v8  ;;  %v10869_v38 = vld [vmem:[%s17604_s3 + $0xa80] sm:$0xf]  ;;  %v11801_v46 = vld [vmem:[%s17604_s3 + $0xa8c] sm:$0xf0] }
 0x6bd   : > { %v5573_v25 = vadd.f32 %v5572_v39, %v5524_v3  ;;  %v10870_v3 = vor.u32 %v11801_v46, %v10869_v38  ;;  %v10613_v27 = vld [vmem:[%s17604_s3 + $0x880] sm:$0xf]  ;;  %v18281_v46 = vld [vmem:[#allocation148_spill] sm:$0xff] }
 0x6be   : > { %18276 = vst [vmem:[#allocation173_spill] sm:$0xff] %v15929_v54  ;;  %6724 = vmatpush.bf16.msrb.mxu1 %v10758_v37  ;;  %v11737_v37 = vld [vmem:[%s17604_s3 + $0x88c] sm:$0xf0] }
 0x6bf   : > { %6774 = vmatpush.bf16.msrb.mxu2 %v10870_v3 }
 0x6c1   : > { %v5621_v43 = vpop.f32.mrf.mxu2 }
 0x6c2   : > { %v5622_v60 = vadd.f32 %v5621_v43, %v5573_v25  ;;  %v5670_v62 = vpop.f32.mrf.mxu3  ;;  %v5526_v34 = vpop.f32.mrf.mxu0  ;;  %v10741_v43 = vld [vmem:[%s17604_s3 + $0x980] sm:$0xf] }
 0x6c3   : > { %v5527_v21 = vadd.f32 %v5526_v34, %v18277_v41  ;;  %v11769_v34 = vld [vmem:[%s17604_s3 + $0x98c] sm:$0xf0] }
 0x6c4   : > { %v5575_v31 = vpop.f32.mrf.mxu1  ;;  %v15944_v33 = vadd.f32 %v5670_v62, %v5622_v60  ;;  %v10614_v62 = vor.u32 %v11737_v37, %v10613_v27  ;;  %v10742_v41 = vor.u32 %v11769_v34, %v10741_v43  ;;  %v10725_v34 = vld [vmem:[%s17604_s3 + $0x960] sm:$0xf] }
 0x6c5   : > { %v5576_v16 = vadd.f32 %v5575_v31, %v5527_v21  ;;  %5721 = vmatmul.bf16.gmra.mxu0 %v18199_v14  ;;  %v11833_v14 = vld [vmem:[%s17604_s3 + $0xb8c] sm:$0xf0] }
 0x6c6   : > { %18278 = vst [vmem:[#allocation70_spill] sm:$0xff] %v15944_v33  ;;  %5819 = vmatmul.bf16.gmra.mxu2 %v18201_v30  ;;  %v10998_v30 = vor.u32 %v11833_v14, %v10997_v10  ;;  %6676 = vmatpush.bf16.msrb.mxu0 %v10614_v62  ;;  %v11733_v62 = vld [vmem:[%s17604_s3 + $0x86c] sm:$0xf0]  ;;  %v16475_v33 = vld [vmem:[%s17605_s4] sm:$0xf] }
 0x6c7   : > { %5770 = vmatmul.bf16.gmra.mxu1 %v18200_v52  ;;  %5868 = vmatmul.bf16.gmra.mxu3 %v18202_v58 }
 0x6c8   : > { %6823 = vmatpush.bf16.msrb.mxu3 %v10998_v30  ;;  %6725 = vmatpush.bf16.msrb.mxu1 %v10742_v41  ;;  %v10853_v30 = vld [vmem:[%s17604_s3 + $0xa60] sm:$0xf] }
 0x6c9   : > { %v5624_v52 = vpop.f32.mrf.mxu2 }
 0x6ca   : > { %v5625_v58 = vadd.f32 %v5624_v52, %v5576_v16  ;;  %v5673_v39 = vpop.f32.mrf.mxu3  ;;  %v5528_v4 = vpop.f32.mrf.mxu0 }
 0x6cb   : > { %v5529_v8 = vadd.f32 %v5528_v4, %v18279_v15 }
 0x6cc   : > { %v5577_v25 = vpop.f32.mrf.mxu1  ;;  %v15963_v6 = vadd.f32 %v5673_v39, %v5625_v58  ;;  %v11797_v58 = vld [vmem:[%s17604_s3 + $0xa6c] sm:$0xf0]  ;;  %v10981_v39 = vld [vmem:[%s17604_s3 + $0xb60] sm:$0xf] }
 0x6cd   : > { %v5578_v60 = vadd.f32 %v5577_v25, %v5529_v8  ;;  %v10854_v4 = vor.u32 %v11797_v58, %v10853_v30  ;;  %v18283_v25 = vld [vmem:[#allocation45_spill] sm:$0xff] }
 0x6ce   : > { %18280 = vst [vmem:[#allocation174_spill] sm:$0xff] %v15963_v6 }
 0x6cf   : > { %6775 = vmatpush.bf16.msrb.mxu2 %v10854_v4 }
 0x6d1   : > { %v5626_v21 = vpop.f32.mrf.mxu2 }
 0x6d2   : > { %v5627_v31 = vadd.f32 %v5626_v21, %v5578_v60  ;;  %v5675_v16 = vpop.f32.mrf.mxu3  ;;  %v5531_v38 = vpop.f32.mrf.mxu0  ;;  %v10597_v60 = vld [vmem:[%s17604_s3 + $0x860] sm:$0xf] }
 0x6d3   : > { %v5532_v10 = vadd.f32 %v5531_v38, %v18281_v46  ;;  %v10598_v21 = vor.u32 %v11733_v62, %v10597_v60  ;;  %v10581_v62 = vld [vmem:[%s17604_s3 + $0x840] sm:$0xf] }
 0x6d4   : > { %v5580_v3 = vpop.f32.mrf.mxu1  ;;  %v15978_v14 = vadd.f32 %v5675_v16, %v5627_v31  ;;  %v11765_v31 = vld [vmem:[%s17604_s3 + $0x96c] sm:$0xf0] }
 0x6d5   : > { %v5581_v52 = vadd.f32 %v5580_v3, %v5532_v10  ;;  %5726 = vmatmul.bf16.gmra.mxu0 %v18205_v49  ;;  %v11829_v49 = vld [vmem:[%s17604_s3 + $0xb6c] sm:$0xf0]  ;;  %v10726_v16 = vor.u32 %v11765_v31, %v10725_v34 }
 0x6d6   : > { %18282 = vst [vmem:[#allocation71_spill] sm:$0xff] %v15978_v14  ;;  %5824 = vmatmul.bf16.gmra.mxu2 %v18207_v22  ;;  %v10982_v22 = vor.u32 %v11829_v49, %v10981_v39  ;;  %6677 = vmatpush.bf16.msrb.mxu0 %v10598_v21  ;;  %v10837_v49 = vld [vmem:[%s17604_s3 + $0xa40] sm:$0xf]  ;;  %v11729_v34 = vld [vmem:[%s17604_s3 + $0x84c] sm:$0xf0] }
 0x6d7   : > { %5775 = vmatmul.bf16.gmra.mxu1 %v18206_v47  ;;  %5873 = vmatmul.bf16.gmra.mxu3 %v18208_v19  ;;  %v10582_v31 = vor.u32 %v11729_v34, %v10581_v62  ;;  %v11725_v62 = vld [vmem:[%s17604_s3 + $0x82c] sm:$0xf0]  ;;  %v10693_v34 = vld [vmem:[%s17604_s3 + $0x920] sm:$0xf]  ;;  %v10669_v14 = vld [vmem:[%s17604_s3 + $0x8e8] sm:$0xf] }
 0x6d8   : > { %6824 = vmatpush.bf16.msrb.mxu3 %v10982_v22  ;;  %6726 = vmatpush.bf16.msrb.mxu1 %v10726_v16  ;;  %v10965_v22 = vld [vmem:[%s17604_s3 + $0xb40] sm:$0xf]  ;;  %v11761_v16 = vld [vmem:[%s17604_s3 + $0x94c] sm:$0xf0] }
 0x6d9   : > { %v5629_v47 = vpop.f32.mrf.mxu2 }
 0x6da   : > { %v5630_v19 = vadd.f32 %v5629_v47, %v5581_v52  ;;  %v5678_v15 = vpop.f32.mrf.mxu3  ;;  %v5533_v8 = vpop.f32.mrf.mxu0  ;;  %v18285_v52 = vld [vmem:[#allocation149_spill] sm:$0xff]  ;;  %6678 = vmatpush.bf16.msrb.mxu0 %v10582_v31 }
 0x6db   : > { %v5534_v27 = vadd.f32 %v5533_v8, %v18283_v25  ;;  %v11793_v47 = vld [vmem:[%s17604_s3 + $0xa4c] sm:$0xf0]  ;;  %v18287_v25 = vld [vmem:[#allocation46_spill] sm:$0xff] }
 0x6dc   : > { %v5582_v37 = vpop.f32.mrf.mxu1  ;;  %v15997_v43 = vadd.f32 %v5678_v15, %v5630_v19  ;;  %v10838_v19 = vor.u32 %v11793_v47, %v10837_v49  ;;  %v11757_v31 = vld [vmem:[%s17604_s3 + $0x92c] sm:$0xf0] }
 0x6dd   : > { %v5583_v41 = vadd.f32 %v5582_v37, %v5534_v27 }
 0x6de   : > { %18284 = vst [vmem:[#allocation175_spill] sm:$0xff] %v15997_v43  ;;  %6776 = vmatpush.bf16.msrb.mxu2 %v10838_v19  ;;  %v11789_v19 = vld [vmem:[%s17604_s3 + $0xa2c] sm:$0xf0] }
 0x6e1   : > { %v5631_v38 = vpop.f32.mrf.mxu2 }
 0x6e2   : > { %v5632_v46 = vadd.f32 %v5631_v38, %v5583_v41  ;;  %v5680_v10 = vpop.f32.mrf.mxu3  ;;  %v5536_v3 = vpop.f32.mrf.mxu0  ;;  %v10709_v41 = vld [vmem:[%s17604_s3 + $0x940] sm:$0xf] }
 0x6e3   : > { %v5537_v30 = vadd.f32 %v5536_v3, %v18285_v52  ;;  %v10710_v38 = vor.u32 %v11761_v16, %v10709_v41  ;;  %v10694_v16 = vor.u32 %v11757_v31, %v10693_v34  ;;  %v11753_v34 = vld [vmem:[%s17604_s3 + $0x90c] sm:$0xf0] }
 0x6e4   : > { %v5585_v58 = vpop.f32.mrf.mxu1  ;;  %v16012_v39 = vadd.f32 %v5680_v10, %v5632_v46 }
 0x6e5   : > { %v5586_v4 = vadd.f32 %v5585_v58, %v5537_v30  ;;  %5731 = vmatmul.bf16.gmra.mxu0 %v18211_v2  ;;  %6727 = vmatpush.bf16.msrb.mxu1 %v10710_v38  ;;  %v18289_v30 = vld [vmem:[#allocation150_spill] sm:$0xff] }
 0x6e6   : > { %18286 = vst [vmem:[#allocation72_spill] sm:$0xff] %v16012_v39  ;;  %5829 = vmatmul.bf16.gmra.mxu2 %v18213_v1 }
 0x6e7   : > { %5780 = vmatmul.bf16.gmra.mxu1 %v18212_v17  ;;  %5878 = vmatmul.bf16.gmra.mxu3 %v18214_v51  ;;  %v11825_v17 = vld [vmem:[%s17604_s3 + $0xb4c] sm:$0xf0] }
 0x6e8   : > { %v10966_v1 = vor.u32 %v11825_v17, %v10965_v22  ;;  %v10821_v22 = vld [vmem:[%s17604_s3 + $0xa20] sm:$0xf] }
 0x6e9   : > { %v5634_v2 = vpop.f32.mrf.mxu2  ;;  %v10949_v17 = vld [vmem:[%s17604_s3 + $0xb20] sm:$0xf]  ;;  %6728 = vmatpush.bf16.msrb.mxu1 %v10694_v16 }
 0x6ea   : > { %v5635_v51 = vadd.f32 %v5634_v2, %v5586_v4  ;;  %v5683_v15 = vpop.f32.mrf.mxu3  ;;  %v5538_v8 = vpop.f32.mrf.mxu0  ;;  %6825 = vmatpush.bf16.msrb.mxu3 %v10966_v1  ;;  %v10822_v2 = vor.u32 %v11789_v19, %v10821_v22  ;;  %v10805_v22 = vld [vmem:[%s17604_s3 + $0xa00] sm:$0xf]  ;;  %v11785_v19 = vld [vmem:[%s17604_s3 + $0xa0c] sm:$0xf0] }
 0x6eb   : > { %v5539_v27 = vadd.f32 %v5538_v8, %v18287_v25 }
 0x6ec   : > { %v5587_v37 = vpop.f32.mrf.mxu1  ;;  %v16031_v60 = vadd.f32 %v5683_v15, %v5635_v51  ;;  %6777 = vmatpush.bf16.msrb.mxu2 %v10822_v2  ;;  %v18291_v15 = vld [vmem:[#allocation47_spill] sm:$0xff]  ;;  %v10806_v2 = vor.u32 %v11785_v19, %v10805_v22 }
 0x6ed   : > { %v5588_v21 = vadd.f32 %v5587_v37, %v5539_v27  ;;  %v10565_v37 = vld [vmem:[%s17604_s3 + $0x820] sm:$0xf]  ;;  %v11843_v22 = vld [vmem:[%s17604_s3 + $0xbe4] sm:$0xf] }
 0x6ee   : > { %18288 = vst [vmem:[#allocation176_spill] sm:$0xff] %v16031_v60 }
 0x6f0   : > { %6778 = vmatpush.bf16.msrb.mxu2 %v10806_v2 }
 0x6f1   : > { %v5636_v46 = vpop.f32.mrf.mxu2 }
 0x6f2   : > { %v5637_v10 = vadd.f32 %v5636_v46, %v5588_v21  ;;  %v5685_v3 = vpop.f32.mrf.mxu3  ;;  %v5541_v52 = vpop.f32.mrf.mxu0  ;;  %v10566_v21 = vor.u32 %v11725_v62, %v10565_v37 }
 0x6f3   : > { %v5542_v58 = vadd.f32 %v5541_v52, %v18289_v30  ;;  %v18293_v52 = vld [vmem:[#allocation151_spill] sm:$0xff] }
 0x6f4   : > { %v5590_v4 = vpop.f32.mrf.mxu1  ;;  %v16046_v49 = vadd.f32 %v5685_v3, %v5637_v10  ;;  %6679 = vmatpush.bf16.msrb.mxu0 %v10566_v21 }
 0x6f5   : > { %v5591_v47 = vadd.f32 %v5590_v4, %v5542_v58  ;;  %5736 = vmatmul.bf16.gmra.mxu0 %v18217_v29 }
 0x6f6   : > { %18290 = vst [vmem:[#allocation73_spill] sm:$0xff] %v16046_v49  ;;  %5834 = vmatmul.bf16.gmra.mxu2 %v18219_v59  ;;  %v18355_v49 = vld [vmem:[#allocation31_spill] sm:$0xff] }
 0x6f7   : > { %5785 = vmatmul.bf16.gmra.mxu1 %v18218_v32  ;;  %5883 = vmatmul.bf16.gmra.mxu3 %v18220_v7  ;;  %v11821_v32 = vld [vmem:[%s17604_s3 + $0xb2c] sm:$0xf0] }
 0x6f8   : > { %v10950_v59 = vor.u32 %v11821_v32, %v10949_v17  ;;  %v10933_v17 = vld [vmem:[%s17604_s3 + $0xb00] sm:$0xf] }
 0x6f9   : > { %v5639_v29 = vpop.f32.mrf.mxu2 }
 0x6fa   : > { %v5640_v7 = vadd.f32 %v5639_v29, %v5591_v47  ;;  %v5688_v1 = vpop.f32.mrf.mxu3  ;;  %v5543_v51 = vpop.f32.mrf.mxu0  ;;  %6826 = vmatpush.bf16.msrb.mxu3 %v10950_v59  ;;  %v18295_v59 = vld [vmem:[#allocation48_spill] sm:$0xff] }
 0x6fb   : > { %v5544_v8 = vadd.f32 %v5543_v51, %v18291_v15  ;;  %v10549_v15 = vld [vmem:[%s17604_s3 + $0x800] sm:$0xf] }
 0x6fc   : > { %v5592_v25 = vpop.f32.mrf.mxu1  ;;  %v16065_v27 = vadd.f32 %v5688_v1, %v5640_v7 }
 0x6fd   : > { %v5593_v41 = vadd.f32 %v5592_v25, %v5544_v8  ;;  %v11721_v8 = vld [vmem:[%s17604_s3 + $0x80c] sm:$0xf0]  ;;  %v10677_v25 = vld [vmem:[%s17604_s3 + $0x900] sm:$0xf] }
 0x6fe   : > { %18292 = vst [vmem:[#allocation177_spill] sm:$0xff] %v16065_v27  ;;  %v10550_v62 = vor.u32 %v11721_v8, %v10549_v15  ;;  %v10791_v15 = vld [vmem:[%s17604_s3 + $0x9f0] sm:$0xf0] }
 0x700   : > { %6680 = vmatpush.bf16.msrb.mxu0 %v10550_v62 }
 0x701   : > { %v5641_v38 = vpop.f32.mrf.mxu2 }
 0x702   : > { %v5642_v46 = vadd.f32 %v5641_v38, %v5593_v41  ;;  %v5690_v10 = vpop.f32.mrf.mxu3  ;;  %v5546_v3 = vpop.f32.mrf.mxu0  ;;  %v10678_v41 = vor.u32 %v11753_v34, %v10677_v25 }
 0x703   : > { %v5547_v30 = vadd.f32 %v5546_v3, %v18293_v52 }
 0x704   : > { %v5595_v58 = vpop.f32.mrf.mxu1  ;;  %v16080_v4 = vadd.f32 %v5690_v10, %v5642_v46  ;;  %6729 = vmatpush.bf16.msrb.mxu1 %v10678_v41  ;;  %v18297_v46 = vld [vmem:[#allocation152_spill] sm:$0xff]  ;;  %v18301_v41 = vld [vmem:[#allocation153_spill] sm:$0xff] }
 0x705   : > { %v5596_v47 = vadd.f32 %v5595_v58, %v5547_v30  ;;  %5741 = vmatmul.bf16.gmra.mxu0 %v18223_v48  ;;  %v11811_v58 = vld [vmem:[%s17604_s3 + $0xae4] sm:$0xf] }
 0x706   : > { %18294 = vst [vmem:[#allocation74_spill] sm:$0xff] %v16080_v4  ;;  %5839 = vmatmul.bf16.gmra.mxu2 %v18225_v57 }
 0x707   : > { %5790 = vmatmul.bf16.gmra.mxu1 %v18224_v61  ;;  %5888 = vmatmul.bf16.gmra.mxu3 %v18226_v9  ;;  %v11817_v61 = vld [vmem:[%s17604_s3 + $0xb0c] sm:$0xf0] }
 0x708   : > { %v10934_v57 = vor.u32 %v11817_v61, %v10933_v17  ;;  %v18299_v61 = vld [vmem:[#allocation49_spill] sm:$0xff] }
 0x709   : > { %v5644_v48 = vpop.f32.mrf.mxu2 }
 0x70a   : > { %v5645_v9 = vadd.f32 %v5644_v48, %v5596_v47  ;;  %v5693_v32 = vpop.f32.mrf.mxu3  ;;  %v5548_v29 = vpop.f32.mrf.mxu0  ;;  %6827 = vmatpush.bf16.msrb.mxu3 %v10934_v57  ;;  %v10919_v47 = vld [vmem:[%s17604_s3 + $0xaf0] sm:$0xf0] }
 0x70b   : > { %v5549_v7 = vadd.f32 %v5548_v29, %v18295_v59  ;;  %v10922_v19 = vor.u32 %v11811_v58, %v10919_v47  ;;  %v10663_v29 = vld [vmem:[%s17604_s3 + $0x8f0] sm:$0xf0]  ;;  %v11779_v59 = vld [vmem:[%s17604_s3 + $0x9e4] sm:$0xf] }
 0x70c   : > { %v5597_v1 = vpop.f32.mrf.mxu1  ;;  %v16099_v51 = vadd.f32 %v5693_v32, %v5645_v9  ;;  %v11747_v32 = vld [vmem:[%s17604_s3 + $0x8e4] sm:$0xf]  ;;  %v10794_v8 = vor.u32 %v11779_v59, %v10791_v15 }
 0x70d   : > { %v5598_v37 = vadd.f32 %v5597_v1, %v5549_v7  ;;  %6967 = vmatpush.bf16.msra.mxu2 %v10922_v19  ;;  %v10666_v1 = vor.u32 %v11747_v32, %v10663_v29 }
 0x70e   : > { %18296 = vst [vmem:[#allocation178_spill] sm:$0xff] %v16099_v51  ;;  %6918 = vmatpush.bf16.msra.mxu1 %v10794_v8 }
 0x70f   : > { %6869 = vmatpush.bf16.msra.mxu0 %v10666_v1  ;;  %v18305_v1 = vld [vmem:[#allocation154_spill] sm:$0xff] }
 0x711   : > { %v5646_v21 = vpop.f32.mrf.mxu2 }
 0x712   : > { %v5647_v31 = vadd.f32 %v5646_v21, %v5598_v37  ;;  %v5695_v16 = vpop.f32.mrf.mxu3  ;;  %v5551_v38 = vpop.f32.mrf.mxu0 }
 0x713   : > { %v5552_v10 = vadd.f32 %v5551_v38, %v18297_v46  ;;  %v11807_v46 = vld [vmem:[%s17604_s3 + $0xac4] sm:$0xf] }
 0x714   : > { %v5600_v3 = vpop.f32.mrf.mxu1  ;;  %v16114_v52 = vadd.f32 %v5695_v16, %v5647_v31 }
 0x715   : > { %v5601_v30 = vadd.f32 %v5600_v3, %v5552_v10  ;;  %5746 = vmatmul.bf16.gmra.mxu0 %v18229_v42  ;;  %v10903_v10 = vld [vmem:[%s17604_s3 + $0xad0] sm:$0xf0]  ;;  %v11839_v3 = vld [vmem:[%s17604_s3 + $0xbc4] sm:$0xf] }
 0x716   : > { %18298 = vst [vmem:[#allocation75_spill] sm:$0xff] %v16114_v52  ;;  %5844 = vmatmul.bf16.gmra.mxu2 %v18231_v26  ;;  %v18347_v52 = vld [vmem:[#allocation27_spill] sm:$0xff] }
 0x717   : > { %5795 = vmatmul.bf16.gmra.mxu1 %v18230_v35  ;;  %5893 = vmatmul.bf16.gmra.mxu3 %v18232_v63  ;;  %v11047_v35 = vld [vmem:[%s17604_s3 + $0xbf0] sm:$0xf0] }
 0x718   : > { %v11050_v26 = vor.u32 %v11843_v22, %v11047_v35  ;;  %v18303_v22 = vld [vmem:[#allocation50_spill] sm:$0xff] }
 0x719   : > { %v5649_v42 = vpop.f32.mrf.mxu2 }
 0x71a   : > { %v5650_v63 = vadd.f32 %v5649_v42, %v5601_v30  ;;  %v5698_v17 = vpop.f32.mrf.mxu3  ;;  %v5553_v2 = vpop.f32.mrf.mxu0  ;;  %7016 = vmatpush.bf16.msra.mxu3 %v11050_v26  ;;  %v10906_v30 = vor.u32 %v11807_v46, %v10903_v10  ;;  %v11743_v26 = vld [vmem:[%s17604_s3 + $0x8c4] sm:$0xf] }
 0x71b   : > { %v5554_v48 = vadd.f32 %v5553_v2, %v18299_v61  ;;  %v11835_v46 = vld [vmem:[%s17604_s3 + $0xba4] sm:$0xf] }
 0x71c   : > { %v5602_v57 = vpop.f32.mrf.mxu1  ;;  %v16133_v9 = vadd.f32 %v5698_v17, %v5650_v63  ;;  %6968 = vmatpush.bf16.msra.mxu2 %v10906_v30  ;;  %v10647_v63 = vld [vmem:[%s17604_s3 + $0x8d0] sm:$0xf0]  ;;  %v11775_v17 = vld [vmem:[%s17604_s3 + $0x9c4] sm:$0xf] }
 0x71d   : > { %v5603_v7 = vadd.f32 %v5602_v57, %v5554_v48  ;;  %v10650_v61 = vor.u32 %v11743_v26, %v10647_v63  ;;  %v10775_v48 = vld [vmem:[%s17604_s3 + $0x9d0] sm:$0xf0]  ;;  %v11771_v63 = vld [vmem:[%s17604_s3 + $0x9a4] sm:$0xf] }
 0x71e   : > { %18300 = vst [vmem:[#allocation179_spill] sm:$0xff] %v16133_v9  ;;  %v10778_v57 = vor.u32 %v11775_v17, %v10775_v48  ;;  %v10631_v26 = vld [vmem:[%s17604_s3 + $0x8b0] sm:$0xf0] }
 0x71f   : > { %6870 = vmatpush.bf16.msra.mxu0 %v10650_v61  ;;  %v10759_v61 = vld [vmem:[%s17604_s3 + $0x9b0] sm:$0xf0] }
 0x720   : > { %6919 = vmatpush.bf16.msra.mxu1 %v10778_v57  ;;  %v10762_v48 = vor.u32 %v11771_v63, %v10759_v61  ;;  %v11735_v61 = vld [vmem:[%s17604_s3 + $0x884] sm:$0xf] }
 0x721   : > { %v5651_v25 = vpop.f32.mrf.mxu2 }
 0x722   : > { %v5652_v37 = vadd.f32 %v5651_v25, %v5603_v7  ;;  %v5700_v62 = vpop.f32.mrf.mxu3  ;;  %v5556_v34 = vpop.f32.mrf.mxu0 }
 0x723   : > { %v5557_v21 = vadd.f32 %v5556_v34, %v18301_v41  ;;  %v18308_v34 = vld [vmem:[#allocation7_spill] sm:$0xff]  ;;  %v18309_v41 = vld [vmem:[#allocation8_spill] sm:$0xff] }
 0x724   : > { %v5605_v31 = vpop.f32.mrf.mxu1  ;;  %v16148_v16 = vadd.f32 %v5700_v62, %v5652_v37  ;;  %v18307_v62 = vld [vmem:[#allocation6_spill] sm:$0xff]  ;;  %6920 = vmatpush.bf16.msra.mxu1 %v10762_v48  ;;  %v10615_v48 = vld [vmem:[%s17604_s3 + $0x890] sm:$0xf0] }
 0x725   : > { %v5606_v38 = vadd.f32 %v5605_v31, %v5557_v21  ;;  %5751 = vmatmul.bf16.gmra.mxu0 %v14287_v20  ;;  %v11031_v20 = vld [vmem:[%s17604_s3 + $0xbd0] sm:$0xf0]  ;;  %v18310_v21 = vld [vmem:[#allocation112_spill] sm:$0xff]  ;;  %v11803_v31 = vld [vmem:[%s17604_s3 + $0xaa4] sm:$0xf] }
 0x726   : > { %18302 = vst [vmem:[#allocation76_spill] sm:$0xff] %v16148_v16  ;;  %5849 = vmatmul.bf16.gmra.mxu2 %v14311_v50  ;;  %v11034_v50 = vor.u32 %v11839_v3, %v11031_v20  ;;  %v11015_v3 = vld [vmem:[%s17604_s3 + $0xbb0] sm:$0xf0] }
 0x727   : > { %5800 = vmatmul.bf16.gmra.mxu1 %v14291_v55  ;;  %5898 = vmatmul.bf16.gmra.mxu3 %v14315_v36  ;;  %v11018_v20 = vor.u32 %v11835_v46, %v11015_v3  ;;  %v18317_v46 = vld [vmem:[#allocation12_spill] sm:$0xff]  ;;  %v11799_v3 = vld [vmem:[%s17604_s3 + $0xa84] sm:$0xf] }
 0x728   : > { %7017 = vmatpush.bf16.msra.mxu3 %v11034_v50 }
 0x729   : > { %v5654_v55 = vpop.f32.mrf.mxu2 }
 0x72a   : > { %v5655_v36 = vadd.f32 %v5654_v55, %v5606_v38  ;;  %v5703_v58 = vpop.f32.mrf.mxu3  ;;  %v5558_v47 = vpop.f32.mrf.mxu0  ;;  %v10887_v38 = vld [vmem:[%s17604_s3 + $0xab0] sm:$0xf0] }
 0x72b   : > { %v5559_v19 = vadd.f32 %v5558_v47, %v18303_v22  ;;  %v10890_v10 = vor.u32 %v11803_v31, %v10887_v38  ;;  %v18315_v31 = vld [vmem:[#allocation11_spill] sm:$0xff] }
 0x72c   : > { %v5607_v35 = vpop.f32.mrf.mxu1  ;;  %v16167_v42 = vadd.f32 %v5703_v58, %v5655_v36  ;;  %v18311_v58 = vld [vmem:[#allocation51_spill] sm:$0xff]  ;;  %7018 = vmatpush.bf16.msra.mxu3 %v11018_v20 }
 0x72d   : > { %v5608_v2 = vadd.f32 %v5607_v35, %v5559_v19  ;;  %6969 = vmatpush.bf16.msra.mxu2 %v10890_v10  ;;  %v11739_v35 = vld [vmem:[%s17604_s3 + $0x8a4] sm:$0xf]  ;;  %v18318_v10 = vld [vmem:[#allocation116_spill] sm:$0xff] }
 0x72e   : > { %18304 = vst [vmem:[#allocation180_spill] sm:$0xff] %v16167_v42  ;;  %v18316_v38 = vld [vmem:[#allocation115_spill] sm:$0xff] }
 0x72f   : > { %v11831_v20 = vld [vmem:[%s17604_s3 + $0xb84] sm:$0xf] }
 0x731   : > { %v5656_v32 = vpop.f32.mrf.mxu2 }
 0x732   : > { %v5657_v29 = vadd.f32 %v5656_v32, %v5608_v2  ;;  %v5705_v59 = vpop.f32.mrf.mxu3  ;;  %v5717_v7 = vpop.f32.mrf.mxu0  ;;  %v10634_v2 = vor.u32 %v11739_v35, %v10631_v26  ;;  %v18319_v26 = vld [vmem:[#allocation52_spill] sm:$0xff] }
 0x733   : > { %v5718_v15 = vadd.f32 %v5717_v7, %v18305_v1  ;;  %v18313_v7 = vld [vmem:[#allocation155_spill] sm:$0xff] }
 0x734   : > { %v5766_v8 = vpop.f32.mrf.mxu1  ;;  %v16182_v25 = vadd.f32 %v5705_v59, %v5657_v29  ;;  %6871 = vmatpush.bf16.msra.mxu0 %v10634_v2 }
 0x735   : > { %v5767_v37 = vadd.f32 %v5766_v8, %v5718_v15  ;;  %6681 = vmatmul.bf16.vlgmr.msrb.gmra.mxu0 %v18307_v62 }
 0x736   : > { %18306 = vst [vmem:[#allocation77_spill] sm:$0xff] %v16182_v25  ;;  %6779 = vmatmul.bf16.vlgmr.msrb.gmra.mxu2 %v18309_v41  ;;  %v18339_v25 = vld [vmem:[#allocation23_spill] sm:$0xff] }
 0x737   : > { %6730 = vmatmul.bf16.vlgmr.msrb.gmra.mxu1 %v18308_v34  ;;  %6828 = vmatmul.bf16.vlgmr.msrb.gmra.mxu3 %v18310_v21 }
 0x739   : > { %v5815_v30 = vpop.f32.mrf.mxu2 }
 0x73a   : > { %v5816_v55 = vadd.f32 %v5815_v30, %v5767_v37  ;;  %v5864_v50 = vpop.f32.mrf.mxu3  ;;  %v5719_v36 = vpop.f32.mrf.mxu0  ;;  %v10871_v30 = vld [vmem:[%s17604_s3 + $0xa90] sm:$0xf0] }
 0x73b   : > { %v5720_v47 = vadd.f32 %v5719_v36, %v18311_v58 }
 0x73c   : > { %v5768_v22 = vpop.f32.mrf.mxu1  ;;  %v16201_v19 = vadd.f32 %v5864_v50, %v5816_v55  ;;  %v10874_v55 = vor.u32 %v11799_v3, %v10871_v30  ;;  %v10999_v50 = vld [vmem:[%s17604_s3 + $0xb90] sm:$0xf0]  ;;  %v18321_v30 = vld [vmem:[#allocation156_spill] sm:$0xff] }
 0x73d   : > { %v5769_v17 = vadd.f32 %v5768_v22, %v5720_v47  ;;  %v11002_v58 = vor.u32 %v11831_v20, %v10999_v50 }
 0x73e   : > { %18312 = vst [vmem:[#allocation181_spill] sm:$0xff] %v16201_v19  ;;  %6970 = vmatpush.bf16.msra.mxu2 %v10874_v55 }
 0x73f   : > { %7019 = vmatpush.bf16.msra.mxu3 %v11002_v58  ;;  %v18323_v58 = vld [vmem:[#allocation15_spill] sm:$0xff] }
 0x741   : > { %v5817_v57 = vpop.f32.mrf.mxu2 }
 0x742   : > { %v5818_v32 = vadd.f32 %v5817_v57, %v5769_v17  ;;  %v5866_v29 = vpop.f32.mrf.mxu3  ;;  %v5722_v59 = vpop.f32.mrf.mxu0  ;;  %v11767_v57 = vld [vmem:[%s17604_s3 + $0x984] sm:$0xf] }
 0x743   : > { %v5723_v1 = vadd.f32 %v5722_v59, %v18313_v7  ;;  %v10743_v59 = vld [vmem:[%s17604_s3 + $0x990] sm:$0xf0] }
 0x744   : > { %v5771_v15 = vpop.f32.mrf.mxu1  ;;  %v16216_v8 = vadd.f32 %v5866_v29, %v5818_v32  ;;  %v10618_v29 = vor.u32 %v11735_v61, %v10615_v48  ;;  %v10746_v7 = vor.u32 %v11767_v57, %v10743_v59  ;;  %v10983_v48 = vld [vmem:[%s17604_s3 + $0xb70] sm:$0xf0] }
 0x745   : > { %v5772_v37 = vadd.f32 %v5771_v15, %v5723_v1  ;;  %6686 = vmatmul.bf16.gmra.mxu0 %v18315_v31 }
 0x746   : > { %18314 = vst [vmem:[#allocation78_spill] sm:$0xff] %v16216_v8  ;;  %6784 = vmatmul.bf16.gmra.mxu2 %v18317_v46  ;;  %6872 = vmatpush.bf16.msra.mxu0 %v10618_v29 }
 0x747   : > { %6735 = vmatmul.bf16.gmra.mxu1 %v18316_v38  ;;  %6833 = vmatmul.bf16.gmra.mxu3 %v18318_v10 }
 0x748   : > { %6921 = vmatpush.bf16.msra.mxu1 %v10746_v7 }
 0x749   : > { %v5820_v36 = vpop.f32.mrf.mxu2 }
 0x74a   : > { %v5821_v47 = vadd.f32 %v5820_v36, %v5772_v37  ;;  %v5869_v22 = vpop.f32.mrf.mxu3  ;;  %v5724_v35 = vpop.f32.mrf.mxu0 }
 0x74b   : > { %v5725_v63 = vadd.f32 %v5724_v35, %v18319_v26  ;;  %v18326_v35 = vld [vmem:[#allocation120_spill] sm:$0xff]  ;;  %v11795_v26 = vld [vmem:[%s17604_s3 + $0xa64] sm:$0xf] }
 0x74c   : > { %v5773_v17 = vpop.f32.mrf.mxu1  ;;  %v16235_v2 = vadd.f32 %v5869_v22, %v5821_v47  ;;  %v18324_v47 = vld [vmem:[#allocation119_spill] sm:$0xff]  ;;  %v18325_v22 = vld [vmem:[#allocation16_spill] sm:$0xff] }
 0x74d   : > { %v5774_v32 = vadd.f32 %v5773_v17, %v5725_v63  ;;  %v10855_v63 = vld [vmem:[%s17604_s3 + $0xa70] sm:$0xf0]  ;;  %v11827_v17 = vld [vmem:[%s17604_s3 + $0xb64] sm:$0xf] }
 0x74e   : > { %18320 = vst [vmem:[#allocation182_spill] sm:$0xff] %v16235_v2  ;;  %v10858_v61 = vor.u32 %v11795_v26, %v10855_v63  ;;  %v10727_v63 = vld [vmem:[%s17604_s3 + $0x970] sm:$0xf0] }
 0x750   : > { %6971 = vmatpush.bf16.msra.mxu2 %v10858_v61 }
 0x751   : > { %v5822_v1 = vpop.f32.mrf.mxu2 }
 0x752   : > { %v5823_v15 = vadd.f32 %v5822_v1, %v5774_v32  ;;  %v5871_v37 = vpop.f32.mrf.mxu3  ;;  %v5727_v3 = vpop.f32.mrf.mxu0  ;;  %v10986_v32 = vor.u32 %v11827_v17, %v10983_v48  ;;  %v18327_v1 = vld [vmem:[#allocation53_spill] sm:$0xff] }
 0x753   : > { %v5728_v20 = vadd.f32 %v5727_v3, %v18321_v30  ;;  %v11731_v30 = vld [vmem:[%s17604_s3 + $0x864] sm:$0xf] }
 0x754   : > { %v5776_v55 = vpop.f32.mrf.mxu1  ;;  %v16250_v50 = vadd.f32 %v5871_v37, %v5823_v15  ;;  %7020 = vmatpush.bf16.msra.mxu3 %v10986_v32 }
 0x755   : > { %v5777_v36 = vadd.f32 %v5776_v55, %v5728_v20  ;;  %6691 = vmatmul.bf16.gmra.mxu0 %v18323_v58  ;;  %v10599_v20 = vld [vmem:[%s17604_s3 + $0x870] sm:$0xf0]  ;;  %v11763_v55 = vld [vmem:[%s17604_s3 + $0x964] sm:$0xf] }
 0x756   : > { %18322 = vst [vmem:[#allocation79_spill] sm:$0xff] %v16250_v50  ;;  %6789 = vmatmul.bf16.gmra.mxu2 %v18325_v22  ;;  %v10602_v26 = vor.u32 %v11731_v30, %v10599_v20  ;;  %v10730_v17 = vor.u32 %v11763_v55, %v10727_v63  ;;  %v18331_v50 = vld [vmem:[#allocation19_spill] sm:$0xff]  ;;  %v18334_v30 = vld [vmem:[#allocation124_spill] sm:$0xff]  ;;  %v10839_v55 = vld [vmem:[%s17604_s3 + $0xa50] sm:$0xf0] }
 0x757   : > { %6740 = vmatmul.bf16.gmra.mxu1 %v18324_v47  ;;  %6838 = vmatmul.bf16.gmra.mxu3 %v18326_v35  ;;  %v11791_v20 = vld [vmem:[%s17604_s3 + $0xa44] sm:$0xf]  ;;  %v10967_v63 = vld [vmem:[%s17604_s3 + $0xb50] sm:$0xf0] }
 0x758   : > { %6873 = vmatpush.bf16.msra.mxu0 %v10602_v26  ;;  %6922 = vmatpush.bf16.msra.mxu1 %v10730_v17  ;;  %v10842_v26 = vor.u32 %v11791_v20, %v10839_v55  ;;  %v11727_v20 = vld [vmem:[%s17604_s3 + $0x844] sm:$0xf]  ;;  %v10583_v55 = vld [vmem:[%s17604_s3 + $0x850] sm:$0xf0] }
 0x759   : > { %v5825_v57 = vpop.f32.mrf.mxu2 }
 0x75a   : > { %v5826_v29 = vadd.f32 %v5825_v57, %v5777_v36  ;;  %v5874_v59 = vpop.f32.mrf.mxu3  ;;  %v5729_v7 = vpop.f32.mrf.mxu0  ;;  %6972 = vmatpush.bf16.msra.mxu2 %v10842_v26  ;;  %v10586_v26 = vor.u32 %v11727_v20, %v10583_v55  ;;  %v18342_v20 = vld [vmem:[#allocation128_spill] sm:$0xff]  ;;  %v11787_v55 = vld [vmem:[%s17604_s3 + $0xa24] sm:$0xf] }
 0x75b   : > { %v5730_v15 = vadd.f32 %v5729_v7, %v18327_v1 }
 0x75c   : > { %v5778_v37 = vpop.f32.mrf.mxu1  ;;  %v16269_v3 = vadd.f32 %v5874_v59, %v5826_v29  ;;  %v18329_v29 = vld [vmem:[#allocation157_spill] sm:$0xff]  ;;  %6874 = vmatpush.bf16.msra.mxu0 %v10586_v26 }
 0x75d   : > { %v5779_v36 = vadd.f32 %v5778_v37, %v5730_v15  ;;  %v18332_v15 = vld [vmem:[#allocation123_spill] sm:$0xff]  ;;  %v18333_v37 = vld [vmem:[#allocation20_spill] sm:$0xff] }
 0x75e   : > { %18328 = vst [vmem:[#allocation183_spill] sm:$0xff] %v16269_v3 }
 0x761   : > { %v5827_v61 = vpop.f32.mrf.mxu2 }
 0x762   : > { %v5828_v48 = vadd.f32 %v5827_v61, %v5779_v36  ;;  %v5876_v57 = vpop.f32.mrf.mxu3  ;;  %v5732_v32 = vpop.f32.mrf.mxu0  ;;  %v11823_v36 = vld [vmem:[%s17604_s3 + $0xb44] sm:$0xf] }
 0x763   : > { %v5733_v59 = vadd.f32 %v5732_v32, %v18329_v29  ;;  %v10970_v61 = vor.u32 %v11823_v36, %v10967_v63  ;;  %v18335_v29 = vld [vmem:[#allocation54_spill] sm:$0xff]  ;;  %v10711_v63 = vld [vmem:[%s17604_s3 + $0x950] sm:$0xf0] }
 0x764   : > { %v5781_v7 = vpop.f32.mrf.mxu1  ;;  %v16284_v1 = vadd.f32 %v5876_v57, %v5828_v48 }
 0x765   : > { %v5782_v3 = vadd.f32 %v5781_v7, %v5733_v59  ;;  %6696 = vmatmul.bf16.gmra.mxu0 %v18331_v50  ;;  %7021 = vmatpush.bf16.msra.mxu3 %v10970_v61 }
 0x766   : > { %18330 = vst [vmem:[#allocation80_spill] sm:$0xff] %v16284_v1  ;;  %6794 = vmatmul.bf16.gmra.mxu2 %v18333_v37 }
 0x767   : > { %6745 = vmatmul.bf16.gmra.mxu1 %v18332_v15  ;;  %6843 = vmatmul.bf16.gmra.mxu3 %v18334_v30 }
 0x769   : > { %v5830_v17 = vpop.f32.mrf.mxu2 }
 0x76a   : > { %v5831_v48 = vadd.f32 %v5830_v17, %v5782_v3  ;;  %v5879_v57 = vpop.f32.mrf.mxu3  ;;  %v5734_v32 = vpop.f32.mrf.mxu0  ;;  %v11759_v3 = vld [vmem:[%s17604_s3 + $0x944] sm:$0xf] }
 0x76b   : > { %v5735_v59 = vadd.f32 %v5734_v32, %v18335_v29  ;;  %v10714_v17 = vor.u32 %v11759_v3, %v10711_v63  ;;  %v18337_v29 = vld [vmem:[#allocation158_spill] sm:$0xff]  ;;  %v10823_v3 = vld [vmem:[%s17604_s3 + $0xa30] sm:$0xf0] }
 0x76c   : > { %v5783_v7 = vpop.f32.mrf.mxu1  ;;  %v16303_v1 = vadd.f32 %v5879_v57, %v5831_v48 }
 0x76d   : > { %v5784_v36 = vadd.f32 %v5783_v7, %v5735_v59  ;;  %6923 = vmatpush.bf16.msra.mxu1 %v10714_v17  ;;  %v18340_v59 = vld [vmem:[#allocation127_spill] sm:$0xff]  ;;  %v18341_v7 = vld [vmem:[#allocation24_spill] sm:$0xff] }
 0x76e   : > { %18336 = vst [vmem:[#allocation184_spill] sm:$0xff] %v16303_v1 }
 0x771   : > { %v5832_v61 = vpop.f32.mrf.mxu2 }
 0x772   : > { %v5833_v48 = vadd.f32 %v5832_v61, %v5784_v36  ;;  %v5881_v57 = vpop.f32.mrf.mxu3  ;;  %v5737_v32 = vpop.f32.mrf.mxu0  ;;  %v10951_v36 = vld [vmem:[%s17604_s3 + $0xb30] sm:$0xf0] }
 0x773   : > { %v5738_v1 = vadd.f32 %v5737_v32, %v18337_v29 }
 0x774   : > { %v5786_v2 = vpop.f32.mrf.mxu1  ;;  %v16318_v8 = vadd.f32 %v5881_v57, %v5833_v48  ;;  %v18343_v57 = vld [vmem:[#allocation55_spill] sm:$0xff] }
 0x775   : > { %v5787_v19 = vadd.f32 %v5786_v2, %v5738_v1  ;;  %6701 = vmatmul.bf16.gmra.mxu0 %v18339_v25  ;;  %v11819_v2 = vld [vmem:[%s17604_s3 + $0xb24] sm:$0xf]  ;;  %v10826_v1 = vor.u32 %v11787_v55, %v10823_v3  ;;  %v10567_v3 = vld [vmem:[%s17604_s3 + $0x830] sm:$0xf0] }
 0x776   : > { %18338 = vst [vmem:[#allocation81_spill] sm:$0xff] %v16318_v8  ;;  %6799 = vmatmul.bf16.gmra.mxu2 %v18341_v7  ;;  %v10954_v63 = vor.u32 %v11819_v2, %v10951_v36  ;;  %v11723_v55 = vld [vmem:[%s17604_s3 + $0x824] sm:$0xf]  ;;  %v10695_v36 = vld [vmem:[%s17604_s3 + $0x930] sm:$0xf0] }
 0x777   : > { %6750 = vmatmul.bf16.gmra.mxu1 %v18340_v59  ;;  %6848 = vmatmul.bf16.gmra.mxu3 %v18342_v20 }
 0x778   : > { %6973 = vmatpush.bf16.msra.mxu2 %v10826_v1  ;;  %7022 = vmatpush.bf16.msra.mxu3 %v10954_v63  ;;  %v10570_v1 = vor.u32 %v11723_v55, %v10567_v3  ;;  %v18350_v55 = vld [vmem:[#allocation132_spill] sm:$0xff]  ;;  %v11783_v3 = vld [vmem:[%s17604_s3 + $0xa04] sm:$0xf] }
 0x779   : > { %v5835_v26 = vpop.f32.mrf.mxu2 }
 0x77a   : > { %v5836_v17 = vadd.f32 %v5835_v26, %v5787_v19  ;;  %v5884_v61 = vpop.f32.mrf.mxu3  ;;  %v5739_v48 = vpop.f32.mrf.mxu0  ;;  %v11755_v19 = vld [vmem:[%s17604_s3 + $0x924] sm:$0xf]  ;;  %6875 = vmatpush.bf16.msra.mxu0 %v10570_v1 }
 0x77b   : > { %v5740_v32 = vadd.f32 %v5739_v48, %v18343_v57  ;;  %v10698_v26 = vor.u32 %v11755_v19, %v10695_v36  ;;  %v18345_v57 = vld [vmem:[#allocation159_spill] sm:$0xff]  ;;  %v10807_v19 = vld [vmem:[%s17604_s3 + $0xa10] sm:$0xf0] }
 0x77c   : > { %v5788_v29 = vpop.f32.mrf.mxu1  ;;  %v16337_v8 = vadd.f32 %v5884_v61, %v5836_v17 }
 0x77d   : > { %v5789_v2 = vadd.f32 %v5788_v29, %v5740_v32  ;;  %6924 = vmatpush.bf16.msra.mxu1 %v10698_v26  ;;  %v18348_v32 = vld [vmem:[#allocation131_spill] sm:$0xff]  ;;  %v18349_v29 = vld [vmem:[#allocation28_spill] sm:$0xff] }
 0x77e   : > { %18344 = vst [vmem:[#allocation185_spill] sm:$0xff] %v16337_v8 }
 0x781   : > { %v5837_v63 = vpop.f32.mrf.mxu2 }
 0x782   : > { %v5838_v17 = vadd.f32 %v5837_v63, %v5789_v2  ;;  %v5886_v61 = vpop.f32.mrf.mxu3  ;;  %v5742_v48 = vpop.f32.mrf.mxu0  ;;  %v10935_v2 = vld [vmem:[%s17604_s3 + $0xb10] sm:$0xf0] }
 0x783   : > { %v5743_v8 = vadd.f32 %v5742_v48, %v18345_v57 }
 0x784   : > { %v5791_v42 = vpop.f32.mrf.mxu1  ;;  %v16352_v16 = vadd.f32 %v5886_v61, %v5838_v17  ;;  %v18351_v61 = vld [vmem:[#allocation56_spill] sm:$0xff] }
 0x785   : > { %v5792_v9 = vadd.f32 %v5791_v42, %v5743_v8  ;;  %6706 = vmatmul.bf16.gmra.mxu0 %v18347_v52  ;;  %v11815_v42 = vld [vmem:[%s17604_s3 + $0xb04] sm:$0xf]  ;;  %v10810_v8 = vor.u32 %v11783_v3, %v10807_v19  ;;  %v10551_v19 = vld [vmem:[%s17604_s3 + $0x810] sm:$0xf0] }
 0x786   : > { %18346 = vst [vmem:[#allocation82_spill] sm:$0xff] %v16352_v16  ;;  %6804 = vmatmul.bf16.gmra.mxu2 %v18349_v29  ;;  %v10938_v36 = vor.u32 %v11815_v42, %v10935_v2  ;;  %v11719_v3 = vld [vmem:[%s17604_s3 + $0x804] sm:$0xf]  ;;  %v10679_v2 = vld [vmem:[%s17604_s3 + $0x910] sm:$0xf0] }
 0x787   : > { %6755 = vmatmul.bf16.gmra.mxu1 %v18348_v32  ;;  %6853 = vmatmul.bf16.gmra.mxu3 %v18350_v55 }
 0x788   : > { %6974 = vmatpush.bf16.msra.mxu2 %v10810_v8  ;;  %7023 = vmatpush.bf16.msra.mxu3 %v10938_v36  ;;  %v10554_v8 = vor.u32 %v11719_v3, %v10551_v19  ;;  %v18358_v3 = vld [vmem:[#allocation136_spill] sm:$0xff] }
 0x789   : > { %v5840_v1 = vpop.f32.mrf.mxu2  ;;  %v10925_v19 = vld [vmem:[%s17604_s3 + $0xae8] sm:$0xf] }
 0x78a   : > { %v5841_v26 = vadd.f32 %v5840_v1, %v5792_v9  ;;  %v5889_v63 = vpop.f32.mrf.mxu3  ;;  %v5744_v17 = vpop.f32.mrf.mxu0  ;;  %v11751_v9 = vld [vmem:[%s17604_s3 + $0x904] sm:$0xf]  ;;  %6876 = vmatpush.bf16.msra.mxu0 %v10554_v8 }
 0x78b   : > { %v5745_v48 = vadd.f32 %v5744_v17, %v18351_v61  ;;  %v10682_v1 = vor.u32 %v11751_v9, %v10679_v2  ;;  %v18353_v61 = vld [vmem:[#allocation160_spill] sm:$0xff]  ;;  %v11814_v9 = vld [vmem:[%s17604_s3 + $0xaf4] sm:$0xf0] }
 0x78c   : > { %v5793_v57 = vpop.f32.mrf.mxu1  ;;  %v16371_v16 = vadd.f32 %v5889_v63, %v5841_v26 }
 0x78d   : > { %v5794_v42 = vadd.f32 %v5793_v57, %v5745_v48  ;;  %6925 = vmatpush.bf16.msra.mxu1 %v10682_v1  ;;  %v18356_v48 = vld [vmem:[#allocation135_spill] sm:$0xff]  ;;  %v18357_v57 = vld [vmem:[#allocation32_spill] sm:$0xff] }
 0x78e   : > { %18352 = vst [vmem:[#allocation186_spill] sm:$0xff] %v16371_v16 }
 0x791   : > { %v5842_v36 = vpop.f32.mrf.mxu2 }
 0x792   : > { %v5843_v26 = vadd.f32 %v5842_v36, %v5794_v42  ;;  %v5891_v63 = vpop.f32.mrf.mxu3  ;;  %v5747_v17 = vpop.f32.mrf.mxu0  ;;  %v11846_v42 = vld [vmem:[%s17604_s3 + $0xbf4] sm:$0xf0] }
 0x793   : > { %v5748_v16 = vadd.f32 %v5747_v17, %v18353_v61 }
 0x794   : > { %v5796_v51 = vpop.f32.mrf.mxu1  ;;  %v16386_v4 = vadd.f32 %v5891_v63, %v5843_v26  ;;  %v18359_v63 = vld [vmem:[#allocation57_spill] sm:$0xff] }
 0x795   : > { %v5797_v27 = vadd.f32 %v5796_v51, %v5748_v16  ;;  %6711 = vmatmul.bf16.gmra.mxu0 %v18355_v49  ;;  %v11053_v51 = vld [vmem:[%s17604_s3 + $0xbe8] sm:$0xf]  ;;  %v10926_v16 = vor.u32 %v11814_v9, %v10925_v19 }
 0x796   : > { %18354 = vst [vmem:[#allocation83_spill] sm:$0xff] %v16386_v4  ;;  %6809 = vmatmul.bf16.gmra.mxu2 %v18357_v57  ;;  %v11054_v2 = vor.u32 %v11846_v42, %v11053_v51  ;;  %v10797_v51 = vld [vmem:[%s17604_s3 + $0x9e8] sm:$0xf] }
 0x797   : > { %6760 = vmatmul.bf16.gmra.mxu1 %v18356_v48  ;;  %6858 = vmatmul.bf16.gmra.mxu3 %v18358_v3 }
 0x798   : > { %7163 = vmatpush.bf16.msrb.mxu2 %v10926_v16  ;;  %7212 = vmatpush.bf16.msrb.mxu3 %v11054_v2  ;;  %v18361_v16 = vld [vmem:[#allocation161_spill] sm:$0xff] }
 0x799   : > { %v5845_v8 = vpop.f32.mrf.mxu2 }
 0x79a   : > { %v5846_v1 = vadd.f32 %v5845_v8, %v5797_v27  ;;  %v5894_v36 = vpop.f32.mrf.mxu3  ;;  %v5749_v26 = vpop.f32.mrf.mxu0  ;;  %v11750_v27 = vld [vmem:[%s17604_s3 + $0x8f4] sm:$0xf0] }
 0x79b   : > { %v5750_v17 = vadd.f32 %v5749_v26, %v18359_v63  ;;  %v10670_v2 = vor.u32 %v11750_v27, %v10669_v14  ;;  %v18363_v26 = vld [vmem:[#allocation33_spill] sm:$0xff] }
 0x79c   : > { %v5798_v61 = vpop.f32.mrf.mxu1  ;;  %v16405_v4 = vadd.f32 %v5894_v36, %v5846_v1  ;;  %v18364_v63 = vld [vmem:[#allocation137_spill] sm:$0xff] }
 0x79d   : > { %v5799_v60 = vadd.f32 %v5798_v61, %v5750_v17  ;;  %v18365_v17 = vld [vmem:[#allocation34_spill] sm:$0xff]  ;;  %7065 = vmatpush.bf16.msrb.mxu0 %v10670_v2 }
 0x79e   : > { %18360 = vst [vmem:[#allocation187_spill] sm:$0xff] %v16405_v4  ;;  %v18366_v61 = vld [vmem:[#allocation138_spill] sm:$0xff] }
 0x79f   : > { %v18367_v4 = vld [vmem:[#allocation58_spill] sm:$0xff] }
 0x7a1   : > { %v5847_v39 = vpop.f32.mrf.mxu2 }
 0x7a2   : > { %v5848_v43 = vadd.f32 %v5847_v39, %v5799_v60  ;;  %v5896_v19 = vpop.f32.mrf.mxu3  ;;  %v5752_v9 = vpop.f32.mrf.mxu0  ;;  %v11782_v39 = vld [vmem:[%s17604_s3 + $0x9f4] sm:$0xf0] }
 0x7a3   : > { %v5753_v42 = vadd.f32 %v5752_v9, %v18361_v16  ;;  %v10798_v1 = vor.u32 %v11782_v39, %v10797_v51  ;;  %v10909_v51 = vld [vmem:[%s17604_s3 + $0xac8] sm:$0xf] }
 0x7a4   : > { %v5801_v8 = vpop.f32.mrf.mxu1  ;;  %v16420_v60 = vadd.f32 %v5896_v19, %v5848_v43 }
 0x7a5   : > { %v5802_v36 = vadd.f32 %v5801_v8, %v5753_v42  ;;  %6716 = vmatmul.bf16.gmra.mxu0 %v18363_v26  ;;  %7114 = vmatpush.bf16.msrb.mxu1 %v10798_v1  ;;  %v11810_v42 = vld [vmem:[%s17604_s3 + $0xad4] sm:$0xf0]  ;;  %v11037_v8 = vld [vmem:[%s17604_s3 + $0xbc8] sm:$0xf] }
 0x7a6   : > { %18362 = vst [vmem:[#allocation84_spill] sm:$0xff] %v16420_v60  ;;  %6814 = vmatmul.bf16.gmra.mxu2 %v18365_v17  ;;  %v10910_v39 = vor.u32 %v11810_v42, %v10909_v51 }
 0x7a7   : > { %6765 = vmatmul.bf16.gmra.mxu1 %v18364_v63  ;;  %6863 = vmatmul.bf16.gmra.mxu3 %v18366_v61 }
 0x7a8   : > { %7164 = vmatpush.bf16.msrb.mxu2 %v10910_v39 }
 0x7a9   : > { %v5850_v9 = vpop.f32.mrf.mxu2 }
 0x7aa   : > { %v5851_v14 = vadd.f32 %v5850_v9, %v5802_v36  ;;  %v5899_v27 = vpop.f32.mrf.mxu3  ;;  %v5754_v16 = vpop.f32.mrf.mxu0 }
 0x7ab   : > { %v5755_v6 = vadd.f32 %v5754_v16, %v18367_v4  ;;  %v11842_v4 = vld [vmem:[%s17604_s3 + $0xbd4] sm:$0xf0]  ;;  %v10653_v16 = vld [vmem:[%s17604_s3 + $0x8c8] sm:$0xf] }
 0x7ac   : > { %v5803_v43 = vpop.f32.mrf.mxu1  ;;  %v16427_v19 = vadd.f32 %v5899_v27, %v5851_v14  ;;  %v11038_v1 = vor.u32 %v11842_v4, %v11037_v8  ;;  %v11778_v8 = vld [vmem:[%s17604_s3 + $0x9d4] sm:$0xf0] }
 0x7ad   : > { %v5804_v2 = vadd.f32 %v5803_v43, %v5755_v6  ;;  %v11746_v6 = vld [vmem:[%s17604_s3 + $0x8d4] sm:$0xf0]  ;;  %v10781_v43 = vld [vmem:[%s17604_s3 + $0x9c8] sm:$0xf] }
 0x7ae   : > { %18368 = vst [vmem:[#allocation188_spill] sm:$0xff] %v16427_v19  ;;  %7213 = vmatpush.bf16.msrb.mxu3 %v11038_v1  ;;  %v10654_v42 = vor.u32 %v11746_v6, %v10653_v16  ;;  %v10782_v4 = vor.u32 %v11778_v8, %v10781_v43  ;;  %v10893_v1 = vld [vmem:[%s17604_s3 + $0xaa8] sm:$0xf]  ;;  %v11838_v16 = vld [vmem:[%s17604_s3 + $0xbb4] sm:$0xf0] }
 0x7af   : > { %v18370_v19 = vld [vmem:[#allocation162_spill] sm:$0xff] }
 0x7b0   : > { %7066 = vmatpush.bf16.msrb.mxu0 %v10654_v42  ;;  %7115 = vmatpush.bf16.msrb.mxu1 %v10782_v4 }
 0x7b1   : > { %v5852_v36 = vpop.f32.mrf.mxu2 }
 0x7b2   : > { %v5853_v9 = vadd.f32 %v5852_v36, %v5804_v2  ;;  %v5901_v14 = vpop.f32.mrf.mxu3  ;;  %v6682_v27 = vpop.f32.mrf.mxu0  ;;  %v11806_v36 = vld [vmem:[%s17604_s3 + $0xab4] sm:$0xf0] }
 0x7b4   : > { %v6731_v51 = vpop.f32.mrf.mxu1  ;;  %v16453_v2 = vadd.f32 %v5901_v14, %v5853_v9  ;;  %v11021_v9 = vld [vmem:[%s17604_s3 + $0xba8] sm:$0xf] }
 0x7b5   : > { %v6732_v39 = vadd.f32 %v6731_v51, %v6682_v27  ;;  %6877 = vmatmul.bf16.vlgmr.msra.gmra.mxu0 %v18307_v62  ;;  %v10894_v27 = vor.u32 %v11806_v36, %v10893_v1  ;;  %v11022_v42 = vor.u32 %v11838_v16, %v11021_v9  ;;  %v16478_v36 = vperm.slane %v16475_v33, 0  ;;  %v10637_v9 = vld [vmem:[%s17604_s3 + $0x8a8] sm:$0xf] }
 0x7b6   : > { %18369 = vst [vmem:[#allocation85_spill] sm:$0xff] %v16453_v2  ;;  %6975 = vmatmul.bf16.vlgmr.msra.gmra.mxu2 %v18309_v41 }
 0x7b7   : > { %6926 = vmatmul.bf16.vlgmr.msra.gmra.mxu1 %v18308_v34  ;;  %7024 = vmatmul.bf16.vlgmr.msra.gmra.mxu3 %v18310_v21 }
 0x7b8   : > { %7165 = vmatpush.bf16.msrb.mxu2 %v10894_v27  ;;  %7214 = vmatpush.bf16.msrb.mxu3 %v11022_v42 }
 0x7b9   : > { %v6780_v14 = vpop.f32.mrf.mxu2 }
 0x7ba   : > { %v6781_v6 = vadd.f32 %v6780_v14, %v6732_v39  ;;  %v6829_v43 = vpop.f32.mrf.mxu3  ;;  %v6684_v51 = vpop.f32.mrf.mxu0 }
 0x7bc   : > { %v6733_v8 = vpop.f32.mrf.mxu1  ;;  %v6830_v4 = vadd.f32 %v6829_v43, %v6781_v6  ;;  %v10765_v6 = vld [vmem:[%s17604_s3 + $0x9a8] sm:$0xf] }
 0x7bd   : > { %v6734_v2 = vadd.f32 %v6733_v8, %v6684_v51 }
 0x7be   : > { %v7457_v60 = vadd.f32 %v6830_v4, %v18370_v19  ;;  %v11742_v19 = vld [vmem:[%s17604_s3 + $0x8b4] sm:$0xf0] }
 0x7bf   : > { %v10638_v16 = vor.u32 %v11742_v19, %v10637_v9  ;;  %v11834_v9 = vld [vmem:[%s17604_s3 + $0xb94] sm:$0xf0] }
 0x7c0   : > { %v7531_v8 = vadd.f32 %v16478_v36, %v7457_v60  ;;  %v11802_v60 = vld [vmem:[%s17604_s3 + $0xa94] sm:$0xf0] }
 0x7c1   : > { %v6782_v1 = vpop.f32.mrf.mxu2  ;;  %7067 = vmatpush.bf16.msrb.mxu0 %v10638_v16 }
 0x7c2   : > { %v6783_v39 = vadd.f32 %v6782_v1, %v6734_v2  ;;  %v6831_v14 = vpop.f32.mrf.mxu3  ;;  %v6687_v54 = vpop.f32.mrf.mxu0  ;;  %v11774_v2 = vld [vmem:[%s17604_s3 + $0x9b4] sm:$0xf0]  ;;  %v7595_v19 = vmax.f32 %v7531_v8, 0.0 }
 0x7c3   : > { %v10766_v42 = vor.u32 %v11774_v2, %v10765_v6  ;;  %v11738_v8 = vld [vmem:[%s17604_s3 + $0x894] sm:$0xf0] }
 0x7c4   : > { %v6736_v27 = vpop.f32.mrf.mxu1  ;;  %v6832_v43 = vadd.f32 %v6831_v14, %v6783_v39 }
 0x7c5   : > { %v6737_v51 = vadd.f32 %v6736_v27, %v6687_v54  ;;  %6882 = vmatmul.bf16.gmra.mxu0 %v18315_v31  ;;  %7116 = vmatpush.bf16.msrb.mxu1 %v10766_v42  ;;  %v10877_v54 = vld [vmem:[%s17604_s3 + $0xa88] sm:$0xf] }
 0x7c6   : > { %v7461_v4 = vadd.f32 %v6832_v43, %v15400_v0  ;;  %6980 = vmatmul.bf16.gmra.mxu2 %v18317_v46  ;;  %v11005_v0 = vld [vmem:[%s17604_s3 + $0xb88] sm:$0xf]  ;;  %v10878_v14 = vor.u32 %v11802_v60, %v10877_v54 }
 0x7c7   : > { %6931 = vmatmul.bf16.gmra.mxu1 %v18316_v38  ;;  %7029 = vmatmul.bf16.gmra.mxu3 %v18318_v10  ;;  %v11006_v43 = vor.u32 %v11834_v9, %v11005_v0 }
 0x7c8   : > { %v7535_v1 = vadd.f32 %v16478_v36, %v7461_v4  ;;  %7166 = vmatpush.bf16.msrb.mxu2 %v10878_v14 }
 0x7c9   : > { %v6785_v39 = vpop.f32.mrf.mxu2  ;;  %7215 = vmatpush.bf16.msrb.mxu3 %v11006_v43 }
 0x7ca   : > { %v7599_v27 = vmax.f32 %v7535_v1, 0.0  ;;  %v6786_v16 = vadd.f32 %v6785_v39, %v6737_v51  ;;  %v6834_v6 = vpop.f32.mrf.mxu3  ;;  %v6689_v2 = vpop.f32.mrf.mxu0  ;;  %v10621_v51 = vld [vmem:[%s17604_s3 + $0x888] sm:$0xf] }
 0x7cb   : > { %v10622_v0 = vor.u32 %v11738_v8, %v10621_v51  ;;  %v10749_v39 = vld [vmem:[%s17604_s3 + $0x988] sm:$0xf] }
 0x7cc   : > { %v6738_v42 = vpop.f32.mrf.mxu1  ;;  %v16511_v4 = vpack.c.bf16 %v7599_v27, %v7595_v19  ;;  %v6835_v40 = vadd.f32 %v6834_v6, %v6786_v16  ;;  %v11830_v6 = vld [vmem:[%s17604_s3 + $0xb74] sm:$0xf0] }
 0x7cd   : > { %v6739_v53 = vadd.f32 %v6738_v42, %v6689_v2  ;;  %7068 = vmatpush.bf16.msrb.mxu0 %v10622_v0 }
 0x7ce   : > { %v7465_v56 = vadd.f32 %v6835_v40, %v15419_v23  ;;  %v11770_v23 = vld [vmem:[%s17604_s3 + $0x994] sm:$0xf0] }
 0x7cf   : > { %v10750_v14 = vor.u32 %v11770_v23, %v10749_v39 }
 0x7d0   : > { %v7539_v9 = vadd.f32 %v16478_v36, %v7465_v56  ;;  %v11798_v56 = vld [vmem:[%s17604_s3 + $0xa74] sm:$0xf0] }
 0x7d1   : > { %v6787_v54 = vpop.f32.mrf.mxu2  ;;  %7117 = vmatpush.bf16.msrb.mxu1 %v10750_v14 }
 0x7d2   : > { %v6788_v60 = vadd.f32 %v6787_v54, %v6739_v53  ;;  %v6836_v45 = vpop.f32.mrf.mxu3  ;;  %v6692_v10 = vpop.f32.mrf.mxu0  ;;  %v7603_v2 = vmax.f32 %v7539_v9, 0.0  ;;  %v11734_v9 = vld [vmem:[%s17604_s3 + $0x874] sm:$0xf0] }
 0x7d4   : > { %v6741_v1 = vpop.f32.mrf.mxu1  ;;  %v6837_v53 = vadd.f32 %v6836_v45, %v6788_v60  ;;  %v10861_v45 = vld [vmem:[%s17604_s3 + $0xa68] sm:$0xf] }
 0x7d5   : > { %v6742_v40 = vadd.f32 %v6741_v1, %v6692_v10  ;;  %6887 = vmatmul.bf16.gmra.mxu0 %v18323_v58  ;;  %v10862_v16 = vor.u32 %v11798_v56, %v10861_v45 }
 0x7d6   : > { %v7469_v19 = vadd.f32 %v6837_v53, %v15434_v24  ;;  %6985 = vmatmul.bf16.gmra.mxu2 %v18325_v22  ;;  %v10989_v24 = vld [vmem:[%s17604_s3 + $0xb68] sm:$0xf] }
 0x7d7   : > { %6936 = vmatmul.bf16.gmra.mxu1 %v18324_v47  ;;  %7034 = vmatmul.bf16.gmra.mxu3 %v18326_v35  ;;  %v10990_v60 = vor.u32 %v11830_v6, %v10989_v24  ;;  %v10733_v24 = vld [vmem:[%s17604_s3 + $0x968] sm:$0xf] }
 0x7d8   : > { %v7543_v27 = vadd.f32 %v16478_v36, %v7469_v19  ;;  %7167 = vmatpush.bf16.msrb.mxu2 %v10862_v16 }
 0x7d9   : > { %v6790_v10 = vpop.f32.mrf.mxu2  ;;  %7216 = vmatpush.bf16.msrb.mxu3 %v10990_v60  ;;  %v11794_v60 = vld [vmem:[%s17604_s3 + $0xa54] sm:$0xf0] }
 0x7da   : > { %v6791_v43 = vadd.f32 %v6790_v10, %v6742_v40  ;;  %v6839_v42 = vpop.f32.mrf.mxu3  ;;  %v6694_v54 = vpop.f32.mrf.mxu0  ;;  %v7607_v51 = vmax.f32 %v7543_v27, 0.0  ;;  %v10605_v40 = vld [vmem:[%s17604_s3 + $0x868] sm:$0xf] }
 0x7db   : > { %v10606_v56 = vor.u32 %v11734_v9, %v10605_v40 }
 0x7dc   : > { %v6743_v8 = vpop.f32.mrf.mxu1  ;;  %v6840_v1 = vadd.f32 %v6839_v42, %v6791_v43  ;;  %v16545_v39 = vpack.c.bf16 %v7607_v51, %v7603_v2 }
 0x7dd   : > { %v6744_v0 = vadd.f32 %v6743_v8, %v6694_v54  ;;  %7069 = vmatpush.bf16.msrb.mxu0 %v10606_v56  ;;  %v10845_v54 = vld [vmem:[%s17604_s3 + $0xa48] sm:$0xf] }
 0x7de   : > { %v7473_v23 = vadd.f32 %v6840_v1, %v15453_v44  ;;  %v11766_v44 = vld [vmem:[%s17604_s3 + $0x974] sm:$0xf0]  ;;  %v10846_v8 = vor.u32 %v11794_v60, %v10845_v54  ;;  %v10717_v60 = vld [vmem:[%s17604_s3 + $0x948] sm:$0xf] }
 0x7df   : > { %v10734_v6 = vor.u32 %v11766_v44, %v10733_v24  ;;  %v11826_v1 = vld [vmem:[%s17604_s3 + $0xb54] sm:$0xf0] }
 0x7e0   : > { %v7547_v2 = vadd.f32 %v16478_v36, %v7473_v23  ;;  %7168 = vmatpush.bf16.msrb.mxu2 %v10846_v8 }
 0x7e1   : > { %v6792_v53 = vpop.f32.mrf.mxu2  ;;  %7118 = vmatpush.bf16.msrb.mxu1 %v10734_v6 }
 0x7e2   : > { %v6793_v14 = vadd.f32 %v6792_v53, %v6744_v0  ;;  %v6841_v19 = vpop.f32.mrf.mxu3  ;;  %v6697_v45 = vpop.f32.mrf.mxu0  ;;  %v7611_v0 = vmax.f32 %v7547_v2, 0.0  ;;  %v11730_v2 = vld [vmem:[%s17604_s3 + $0x854] sm:$0xf0] }
 0x7e4   : > { %v6746_v27 = vpop.f32.mrf.mxu1  ;;  %v6842_v10 = vadd.f32 %v6841_v19, %v6793_v14 }
 0x7e5   : > { %v6747_v16 = vadd.f32 %v6746_v27, %v6697_v45  ;;  %6892 = vmatmul.bf16.gmra.mxu0 %v18331_v50 }
 0x7e6   : > { %v7477_v43 = vadd.f32 %v6842_v10, %v15468_v5  ;;  %6990 = vmatmul.bf16.gmra.mxu2 %v18333_v37  ;;  %v10973_v5 = vld [vmem:[%s17604_s3 + $0xb48] sm:$0xf] }
 0x7e7   : > { %6941 = vmatmul.bf16.gmra.mxu1 %v18332_v15  ;;  %7039 = vmatmul.bf16.gmra.mxu3 %v18334_v30  ;;  %v10974_v19 = vor.u32 %v11826_v1, %v10973_v5 }
 0x7e8   : > { %v7551_v42 = vadd.f32 %v16478_v36, %v7477_v43 }
 0x7e9   : > { %v6795_v51 = vpop.f32.mrf.mxu2  ;;  %7217 = vmatpush.bf16.msrb.mxu3 %v10974_v19 }
 0x7ea   : > { %v6796_v23 = vadd.f32 %v6795_v51, %v6747_v16  ;;  %v6844_v53 = vpop.f32.mrf.mxu3  ;;  %v6699_v14 = vpop.f32.mrf.mxu0  ;;  %v7615_v45 = vmax.f32 %v7551_v42, 0.0  ;;  %v10589_v16 = vld [vmem:[%s17604_s3 + $0x848] sm:$0xf] }
 0x7eb   : > { %v10590_v54 = vor.u32 %v11730_v2, %v10589_v16 }
 0x7ec   : > { %v6748_v40 = vpop.f32.mrf.mxu1  ;;  %v6845_v9 = vadd.f32 %v6844_v53, %v6796_v23  ;;  %v16579_v56 = vpack.c.bf16 %v7615_v45, %v7611_v0  ;;  %v10829_v53 = vld [vmem:[%s17604_s3 + $0xa28] sm:$0xf] }
 0x7ed   : > { %v6749_v27 = vadd.f32 %v6748_v40, %v6699_v14  ;;  %7070 = vmatpush.bf16.msrb.mxu0 %v10590_v54  ;;  %v11790_v14 = vld [vmem:[%s17604_s3 + $0xa34] sm:$0xf0] }
 0x7ee   : > { %v7481_v24 = vadd.f32 %v6845_v9, %v15487_v13  ;;  %v11762_v13 = vld [vmem:[%s17604_s3 + $0x954] sm:$0xf0]  ;;  %v10830_v45 = vor.u32 %v11790_v14, %v10829_v53  ;;  %v10701_v53 = vld [vmem:[%s17604_s3 + $0x928] sm:$0xf] }
 0x7ef   : > { %v10718_v8 = vor.u32 %v11762_v13, %v10717_v60  ;;  %v11822_v40 = vld [vmem:[%s17604_s3 + $0xb34] sm:$0xf0] }
 0x7f0   : > { %v7555_v1 = vadd.f32 %v16478_v36, %v7481_v24  ;;  %7169 = vmatpush.bf16.msrb.mxu2 %v10830_v45 }
 0x7f1   : > { %v6797_v44 = vpop.f32.mrf.mxu2  ;;  %7119 = vmatpush.bf16.msrb.mxu1 %v10718_v8 }
 0x7f2   : > { %v6798_v10 = vadd.f32 %v6797_v44, %v6749_v27  ;;  %v6846_v6 = vpop.f32.mrf.mxu3  ;;  %v6702_v43 = vpop.f32.mrf.mxu0  ;;  %v7619_v9 = vmax.f32 %v7555_v1, 0.0  ;;  %v11726_v1 = vld [vmem:[%s17604_s3 + $0x834] sm:$0xf0] }
 0x7f4   : > { %v6751_v42 = vpop.f32.mrf.mxu1  ;;  %v6847_v5 = vadd.f32 %v6846_v6, %v6798_v10 }
 0x7f5   : > { %v6752_v51 = vadd.f32 %v6751_v42, %v6702_v43  ;;  %6897 = vmatmul.bf16.gmra.mxu0 %v18339_v25 }
 0x7f6   : > { %v7485_v0 = vadd.f32 %v6847_v5, %v15502_v11  ;;  %6995 = vmatmul.bf16.gmra.mxu2 %v18341_v7  ;;  %v10957_v11 = vld [vmem:[%s17604_s3 + $0xb28] sm:$0xf] }
 0x7f7   : > { %6946 = vmatmul.bf16.gmra.mxu1 %v18340_v59  ;;  %7044 = vmatmul.bf16.gmra.mxu3 %v18342_v20  ;;  %v10958_v10 = vor.u32 %v11822_v40, %v10957_v11 }
 0x7f8   : > { %v7559_v23 = vadd.f32 %v16478_v36, %v7485_v0 }
 0x7f9   : > { %v6800_v19 = vpop.f32.mrf.mxu2  ;;  %7218 = vmatpush.bf16.msrb.mxu3 %v10958_v10 }
 0x7fa   : > { %v6801_v27 = vadd.f32 %v6800_v19, %v6752_v51  ;;  %v6849_v24 = vpop.f32.mrf.mxu3  ;;  %v6704_v44 = vpop.f32.mrf.mxu0  ;;  %v7623_v6 = vmax.f32 %v7559_v23, 0.0  ;;  %v10573_v51 = vld [vmem:[%s17604_s3 + $0x828] sm:$0xf] }
 0x7fb   : > { %v10574_v23 = vor.u32 %v11726_v1, %v10573_v51 }
 0x7fc   : > { %v6753_v43 = vpop.f32.mrf.mxu1  ;;  %v6850_v16 = vadd.f32 %v6849_v24, %v6801_v27  ;;  %v16613_v42 = vpack.c.bf16 %v7623_v6, %v7619_v9  ;;  %v10813_v27 = vld [vmem:[%s17604_s3 + $0xa08] sm:$0xf]  ;;  %v11786_v24 = vld [vmem:[%s17604_s3 + $0xa14] sm:$0xf0] }
 0x7fd   : > { %v6754_v2 = vadd.f32 %v6753_v43, %v6704_v44  ;;  %7071 = vmatpush.bf16.msrb.mxu0 %v10574_v23  ;;  %v10814_v10 = vor.u32 %v11786_v24, %v10813_v27  ;;  %v11818_v6 = vld [vmem:[%s17604_s3 + $0xb14] sm:$0xf0] }
 0x7fe   : > { %v7489_v54 = vadd.f32 %v6850_v16, %v15521_v18  ;;  %v11758_v18 = vld [vmem:[%s17604_s3 + $0x934] sm:$0xf0] }
 0x7ff   : > { %v10702_v19 = vor.u32 %v11758_v18, %v10701_v53  ;;  %7170 = vmatpush.bf16.msrb.mxu2 %v10814_v10  ;;  %v10557_v53 = vld [vmem:[%s17604_s3 + $0x808] sm:$0xf]  ;;  %v11722_v18 = vld [vmem:[%s17604_s3 + $0x814] sm:$0xf0]  ;;  %v18371_v10 = vld [vmem:[#allocation59_spill] sm:$0xff] }
 0x800   : > { %v7563_v45 = vadd.f32 %v16478_v36, %v7489_v54 }
 0x801   : > { %v6802_v60 = vpop.f32.mrf.mxu2  ;;  %7120 = vmatpush.bf16.msrb.mxu1 %v10702_v19 }
 0x802   : > { %v6803_v13 = vadd.f32 %v6802_v60, %v6754_v2  ;;  %v6851_v5 = vpop.f32.mrf.mxu3  ;;  %v6707_v8 = vpop.f32.mrf.mxu0  ;;  %v7627_v43 = vmax.f32 %v7563_v45, 0.0 }
 0x804   : > { %v6756_v0 = vpop.f32.mrf.mxu1  ;;  %v6852_v14 = vadd.f32 %v6851_v5, %v6803_v13 }
 0x805   : > { %v6757_v11 = vadd.f32 %v6756_v0, %v6707_v8  ;;  %6902 = vmatmul.bf16.gmra.mxu0 %v18347_v52 }
 0x806   : > { %v7493_v40 = vadd.f32 %v6852_v14, %v15536_v12  ;;  %7000 = vmatmul.bf16.gmra.mxu2 %v18349_v29  ;;  %v10941_v12 = vld [vmem:[%s17604_s3 + $0xb08] sm:$0xf] }
 0x807   : > { %6951 = vmatmul.bf16.gmra.mxu1 %v18348_v32  ;;  %7049 = vmatmul.bf16.gmra.mxu3 %v18350_v55  ;;  %v10942_v60 = vor.u32 %v11818_v6, %v10941_v12  ;;  %v10685_v14 = vld [vmem:[%s17604_s3 + $0x908] sm:$0xf] }
 0x808   : > { %v7567_v9 = vadd.f32 %v16478_v36, %v7493_v40  ;;  %v10558_v40 = vor.u32 %v11722_v18, %v10557_v53 }
 0x809   : > { %v6805_v44 = vpop.f32.mrf.mxu2  ;;  %7219 = vmatpush.bf16.msrb.mxu3 %v10942_v60 }
 0x80a   : > { %v6806_v16 = vadd.f32 %v6805_v44, %v6757_v11  ;;  %v6854_v2 = vpop.f32.mrf.mxu3  ;;  %v6709_v54 = vpop.f32.mrf.mxu0  ;;  %v7631_v13 = vmax.f32 %v7567_v9, 0.0  ;;  %7072 = vmatpush.bf16.msrb.mxu0 %v10558_v40  ;;  %v18373_v40 = vld [vmem:[#allocation163_spill] sm:$0xff] }
 0x80c   : > { %v6758_v5 = vpop.f32.mrf.mxu1  ;;  %v6855_v8 = vadd.f32 %v6854_v2, %v6806_v16  ;;  %v16647_v1 = vpack.c.bf16 %v7631_v13, %v7627_v43  ;;  %v11812_v16 = vld [vmem:[%s17604_s3 + $0xaec] sm:$0xf]  ;;  %v10927_v2 = vld [vmem:[%s17604_s3 + $0xaf8] sm:$0xf0] }
 0x80d   : > { %v6759_v51 = vadd.f32 %v6758_v5, %v6709_v54  ;;  %v11844_v54 = vld [vmem:[%s17604_s3 + $0xbec] sm:$0xf]  ;;  %v10930_v13 = vor.u32 %v11812_v16, %v10927_v2  ;;  %v11055_v5 = vld [vmem:[%s17604_s3 + $0xbf8] sm:$0xf0] }
 0x80e   : > { %v7497_v0 = vadd.f32 %v6855_v8, %v15555_v28  ;;  %v11754_v28 = vld [vmem:[%s17604_s3 + $0x914] sm:$0xf0]  ;;  %v11058_v53 = vor.u32 %v11844_v54, %v11055_v5  ;;  %v11780_v16 = vld [vmem:[%s17604_s3 + $0x9ec] sm:$0xf]  ;;  %v10799_v2 = vld [vmem:[%s17604_s3 + $0x9f8] sm:$0xf0] }
 0x80f   : > { %v10686_v27 = vor.u32 %v11754_v28, %v10685_v14  ;;  %7359 = vmatpush.bf16.msra.mxu2 %v10930_v13  ;;  %v10802_v13 = vor.u32 %v11780_v16, %v10799_v2 }
 0x810   : > { %v7571_v44 = vadd.f32 %v16478_v36, %v7497_v0  ;;  %7408 = vmatpush.bf16.msra.mxu3 %v11058_v53 }
 0x811   : > { %v6807_v23 = vpop.f32.mrf.mxu2  ;;  %7121 = vmatpush.bf16.msrb.mxu1 %v10686_v27 }
 0x812   : > { %v6808_v11 = vadd.f32 %v6807_v23, %v6759_v51  ;;  %v6856_v19 = vpop.f32.mrf.mxu3  ;;  %v6712_v45 = vpop.f32.mrf.mxu0  ;;  %v7635_v8 = vmax.f32 %v7571_v44, 0.0  ;;  %v10671_v44 = vld [vmem:[%s17604_s3 + $0x8f8] sm:$0xf0] }
 0x814   : > { %v6761_v9 = vpop.f32.mrf.mxu1  ;;  %v6857_v24 = vadd.f32 %v6856_v19, %v6808_v11 }
 0x815   : > { %v6762_v12 = vadd.f32 %v6761_v9, %v6712_v45  ;;  %6907 = vmatmul.bf16.gmra.mxu0 %v18355_v49  ;;  %7310 = vmatpush.bf16.msra.mxu1 %v10802_v13 }
 0x816   : > { %v7501_v6 = vadd.f32 %v6857_v24, %v18371_v10  ;;  %7005 = vmatmul.bf16.gmra.mxu2 %v18357_v57 }
 0x817   : > { %6956 = vmatmul.bf16.gmra.mxu1 %v18356_v48  ;;  %7054 = vmatmul.bf16.gmra.mxu3 %v18358_v3 }
 0x818   : > { %v7575_v43 = vadd.f32 %v16478_v36, %v7501_v6 }
 0x819   : > { %v6810_v60 = vpop.f32.mrf.mxu2 }
 0x81a   : > { %v6811_v51 = vadd.f32 %v6810_v60, %v6762_v12  ;;  %v6859_v0 = vpop.f32.mrf.mxu3  ;;  %v6714_v23 = vpop.f32.mrf.mxu0  ;;  %v7639_v18 = vmax.f32 %v7575_v43, 0.0  ;;  %v11748_v12 = vld [vmem:[%s17604_s3 + $0x8ec] sm:$0xf] }
 0x81b   : > { %v10674_v43 = vor.u32 %v11748_v12, %v10671_v44 }
 0x81c   : > { %v6763_v14 = vpop.f32.mrf.mxu1  ;;  %v6860_v11 = vadd.f32 %v6859_v0, %v6811_v51  ;;  %v16681_v45 = vpack.c.bf16 %v7639_v18, %v7635_v8  ;;  %v18374_v8 = vld [vmem:[#allocation60_spill] sm:$0xff] }
 0x81d   : > { %v6764_v19 = vadd.f32 %v6763_v14, %v6714_v23  ;;  %7261 = vmatpush.bf16.msra.mxu0 %v10674_v43  ;;  %v18376_v43 = vld [vmem:[#allocation164_spill] sm:$0xff] }
 0x81e   : > { %18372 = vst [vmem:[#allocation189_spill] sm:$0xff] %v16681_v45  ;;  %v7505_v28 = vadd.f32 %v6860_v11, %v18373_v40 }
 0x820   : > { %v7579_v5 = vadd.f32 %v16478_v36, %v7505_v28 }
 0x821   : > { %v6812_v9 = vpop.f32.mrf.mxu2 }
 0x822   : > { %v6813_v27 = vadd.f32 %v6812_v9, %v6764_v19  ;;  %v6861_v24 = vpop.f32.mrf.mxu3  ;;  %v6717_v10 = vpop.f32.mrf.mxu0  ;;  %v7643_v53 = vmax.f32 %v7579_v5, 0.0 }
 0x824   : > { %v6766_v6 = vpop.f32.mrf.mxu1  ;;  %v6862_v54 = vadd.f32 %v6861_v24, %v6813_v27  ;;  %v11808_v27 = vld [vmem:[%s17604_s3 + $0xacc] sm:$0xf]  ;;  %v10911_v24 = vld [vmem:[%s17604_s3 + $0xad8] sm:$0xf0] }
 0x825   : > { %v6767_v60 = vadd.f32 %v6766_v6, %v6717_v10  ;;  %6912 = vmatmul.bf16.gmra.mxu0 %v18363_v26  ;;  %v11840_v10 = vld [vmem:[%s17604_s3 + $0xbcc] sm:$0xf]  ;;  %v10914_v44 = vor.u32 %v11808_v27, %v10911_v24  ;;  %v11039_v6 = vld [vmem:[%s17604_s3 + $0xbd8] sm:$0xf0] }
 0x826   : > { %v7509_v51 = vadd.f32 %v6862_v54, %v18374_v8  ;;  %7010 = vmatmul.bf16.gmra.mxu2 %v18365_v17  ;;  %v11042_v2 = vor.u32 %v11840_v10, %v11039_v6  ;;  %v11744_v8 = vld [vmem:[%s17604_s3 + $0x8cc] sm:$0xf]  ;;  %v10895_v10 = vld [vmem:[%s17604_s3 + $0xab8] sm:$0xf0] }
 0x827   : > { %6961 = vmatmul.bf16.gmra.mxu1 %v18364_v63  ;;  %7059 = vmatmul.bf16.gmra.mxu3 %v18366_v61  ;;  %v11804_v24 = vld [vmem:[%s17604_s3 + $0xaac] sm:$0xf] }
 0x828   : > { %v7583_v0 = vadd.f32 %v16478_v36, %v7509_v51  ;;  %7360 = vmatpush.bf16.msra.mxu2 %v10914_v44  ;;  %7409 = vmatpush.bf16.msra.mxu3 %v11042_v2  ;;  %v10655_v51 = vld [vmem:[%s17604_s3 + $0x8d8] sm:$0xf0]  ;;  %v11836_v44 = vld [vmem:[%s17604_s3 + $0xbac] sm:$0xf] }
 0x829   : > { %v6815_v23 = vpop.f32.mrf.mxu2 }
 0x82a   : > { %v6816_v18 = vadd.f32 %v6815_v23, %v6767_v60  ;;  %v6864_v14 = vpop.f32.mrf.mxu3  ;;  %v6719_v11 = vpop.f32.mrf.mxu0  ;;  %v7647_v19 = vmax.f32 %v7583_v0, 0.0  ;;  %v10658_v23 = vor.u32 %v11744_v8, %v10655_v51 }
 0x82c   : > { %v6768_v40 = vpop.f32.mrf.mxu1  ;;  %v6865_v28 = vadd.f32 %v6864_v14, %v6816_v18  ;;  %v16712_v12 = vpack.c.bf16 %v7647_v19, %v7643_v53  ;;  %v11776_v53 = vld [vmem:[%s17604_s3 + $0x9cc] sm:$0xf]  ;;  %v10783_v18 = vld [vmem:[%s17604_s3 + $0x9d8] sm:$0xf0]  ;;  %7262 = vmatpush.bf16.msra.mxu0 %v10658_v23 }
 0x82d   : > { %v6769_v9 = vadd.f32 %v6768_v40, %v6719_v11  ;;  %v10786_v19 = vor.u32 %v11776_v53, %v10783_v18  ;;  %v18379_v53 = vld [vmem:[#allocation165_spill] sm:$0xff] }
 0x82e   : > { %18375 = vst [vmem:[#allocation86_spill] sm:$0xff] %v16712_v12  ;;  %v7513_v16 = vadd.f32 %v6865_v28, %v18376_v43  ;;  %v18377_v28 = vld [vmem:[#allocation61_spill] sm:$0xff]  ;;  %v10898_v43 = vor.u32 %v11804_v24, %v10895_v10 }
 0x82f   : > { %7311 = vmatpush.bf16.msra.mxu1 %v10786_v19  ;;  %v16753_v19 = vperm.slane %v16475_v33, 1  ;;  %v10767_v33 = vld [vmem:[%s17604_s3 + $0x9b8] sm:$0xf0] }
 0x830   : > { %v7587_v40 = vadd.f32 %v16478_v36, %v7513_v16  ;;  %v11023_v16 = vld [vmem:[%s17604_s3 + $0xbb8] sm:$0xf0]  ;;  %7361 = vmatpush.bf16.msra.mxu2 %v10898_v43 }
 0x831   : > { %v6817_v54 = vpop.f32.mrf.mxu2 }
 0x832   : > { %v6818_v60 = vadd.f32 %v6817_v54, %v6769_v9  ;;  %v6866_v13 = vpop.f32.mrf.mxu3  ;;  %v6878_v5 = vpop.f32.mrf.mxu0 }
 0x834   : > { %v6927_v0 = vpop.f32.mrf.mxu1  ;;  %v6867_v14 = vadd.f32 %v6866_v13, %v6818_v60  ;;  %v11026_v13 = vor.u32 %v11836_v44, %v11023_v16  ;;  %v11772_v44 = vld [vmem:[%s17604_s3 + $0x9ac] sm:$0xf] }
 0x835   : > { %v6928_v11 = vadd.f32 %v6927_v0, %v6878_v5  ;;  %7073 = vmatmul.bf16.vlgmr.msrb.gmra.mxu0 %v18307_v62  ;;  %v10770_v16 = vor.u32 %v11772_v44, %v10767_v33 }
 0x836   : > { %v7517_v9 = vadd.f32 %v6867_v14, %v18377_v28  ;;  %7171 = vmatmul.bf16.vlgmr.msrb.gmra.mxu2 %v18309_v41  ;;  %7410 = vmatpush.bf16.msra.mxu3 %v11026_v13 }
 0x837   : > { %7122 = vmatmul.bf16.vlgmr.msrb.gmra.mxu1 %v18308_v34  ;;  %7220 = vmatmul.bf16.vlgmr.msrb.gmra.mxu3 %v18310_v21 }
 0x838   : > { %v7591_v27 = vadd.f32 %v16478_v36, %v7517_v9  ;;  %v7651_v36 = vmax.f32 %v7587_v40, 0.0  ;;  %v11740_v9 = vld [vmem:[%s17604_s3 + $0x8ac] sm:$0xf]  ;;  %7312 = vmatpush.bf16.msra.mxu1 %v10770_v16 }
 0x839   : > { %v6976_v6 = vpop.f32.mrf.mxu2 }
 0x83a   : > { %v6977_v2 = vadd.f32 %v6976_v6, %v6928_v11  ;;  %v7025_v54 = vpop.f32.mrf.mxu3  ;;  %v6880_v60 = vpop.f32.mrf.mxu0  ;;  %v7655_v5 = vmax.f32 %v7591_v27, 0.0  ;;  %v10639_v27 = vld [vmem:[%s17604_s3 + $0x8b8] sm:$0xf0] }
 0x83b   : > { %v10642_v10 = vor.u32 %v11740_v9, %v10639_v27 }
 0x83c   : > { %v6929_v8 = vpop.f32.mrf.mxu1  ;;  %v7026_v51 = vadd.f32 %v7025_v54, %v6977_v2  ;;  %v16749_v23 = vpack.c.bf16 %v7655_v5, %v7651_v36  ;;  %v18380_v2 = vld [vmem:[#allocation62_spill] sm:$0xff]  ;;  %v11800_v5 = vld [vmem:[%s17604_s3 + $0xa8c] sm:$0xf] }
 0x83d   : > { %v6930_v0 = vadd.f32 %v6929_v8, %v6880_v60  ;;  %v18381_v60 = vld [vmem:[#allocation116_spill] sm:$0xff]  ;;  %7263 = vmatpush.bf16.msra.mxu0 %v10642_v10  ;;  %v10879_v8 = vld [vmem:[%s17604_s3 + $0xa98] sm:$0xf0] }
 0x83e   : > { %18378 = vst [vmem:[#allocation190_spill] sm:$0xff] %v16749_v23  ;;  %v7458_v18 = vadd.f32 %v7026_v51, %v18379_v53  ;;  %v11832_v51 = vld [vmem:[%s17604_s3 + $0xb8c] sm:$0xf]  ;;  %v10882_v53 = vor.u32 %v11800_v5, %v10879_v8 }
 0x840   : > { %v7532_v36 = vadd.f32 %v16753_v19, %v7458_v18  ;;  %v11007_v18 = vld [vmem:[%s17604_s3 + $0xb98] sm:$0xf0]  ;;  %7362 = vmatpush.bf16.msra.mxu2 %v10882_v53 }
 0x841   : > { %v6978_v14 = vpop.f32.mrf.mxu2  ;;  %v11010_v27 = vor.u32 %v11832_v51, %v11007_v18  ;;  %v10751_v53 = vld [vmem:[%s17604_s3 + $0x998] sm:$0xf0] }
 0x842   : > { %v6979_v28 = vadd.f32 %v6978_v14, %v6930_v0  ;;  %v7027_v40 = vpop.f32.mrf.mxu3  ;;  %v6883_v11 = vpop.f32.mrf.mxu0  ;;  %v7596_v14 = vmax.f32 %v7532_v36, 0.0  ;;  %v10623_v36 = vld [vmem:[%s17604_s3 + $0x898] sm:$0xf0] }
 0x843   : > { %7411 = vmatpush.bf16.msra.mxu3 %v11010_v27 }
 0x844   : > { %v6932_v24 = vpop.f32.mrf.mxu1  ;;  %v7028_v6 = vadd.f32 %v7027_v40, %v6979_v28 }
 0x845   : > { %v6933_v43 = vadd.f32 %v6932_v24, %v6883_v11  ;;  %7078 = vmatmul.bf16.gmra.mxu0 %v18315_v31 }
 0x846   : > { %v7462_v54 = vadd.f32 %v7028_v6, %v18380_v2  ;;  %7176 = vmatmul.bf16.gmra.mxu2 %v18317_v46  ;;  %v18382_v6 = vld [vmem:[#allocation166_spill] sm:$0xff] }
 0x847   : > { %7127 = vmatmul.bf16.gmra.mxu1 %v18316_v38  ;;  %7225 = vmatmul.bf16.gmra.mxu3 %v18381_v60 }
 0x848   : > { %v7536_v13 = vadd.f32 %v16753_v19, %v7462_v54 }
 0x849   : > { %v6981_v0 = vpop.f32.mrf.mxu2 }
 0x84a   : > { %v7600_v28 = vmax.f32 %v7536_v13, 0.0  ;;  %v6982_v40 = vadd.f32 %v6981_v0, %v6933_v43  ;;  %v7030_v11 = vpop.f32.mrf.mxu3  ;;  %v6885_v9 = vpop.f32.mrf.mxu0  ;;  %v11736_v43 = vld [vmem:[%s17604_s3 + $0x88c] sm:$0xf] }
 0x84b   : > { %v10626_v51 = vor.u32 %v11736_v43, %v10623_v36  ;;  %v11768_v0 = vld [vmem:[%s17604_s3 + $0x98c] sm:$0xf] }
 0x84c   : > { %v6934_v24 = vpop.f32.mrf.mxu1  ;;  %v16786_v10 = vpack.c.bf16 %v7600_v28, %v7596_v14  ;;  %v7031_v44 = vadd.f32 %v7030_v11, %v6982_v40  ;;  %v10754_v28 = vor.u32 %v11768_v0, %v10751_v53  ;;  %v18383_v11 = vld [vmem:[#allocation63_spill] sm:$0xff] }
 0x84d   : > { %v6935_v33 = vadd.f32 %v6934_v24, %v6885_v9  ;;  %7264 = vmatpush.bf16.msra.mxu0 %v10626_v51  ;;  %v11796_v24 = vld [vmem:[%s17604_s3 + $0xa6c] sm:$0xf] }
 0x84e   : > { %v7466_v16 = vadd.f32 %v7031_v44, %v18382_v6  ;;  %7313 = vmatpush.bf16.msra.mxu1 %v10754_v28  ;;  %v10863_v44 = vld [vmem:[%s17604_s3 + $0xa78] sm:$0xf0]  ;;  %v18384_v28 = vld [vmem:[#allocation167_spill] sm:$0xff] }
 0x850   : > { %v7540_v40 = vadd.f32 %v16753_v19, %v7466_v16  ;;  %v10866_v16 = vor.u32 %v11796_v24, %v10863_v44 }
 0x851   : > { %v6983_v2 = vpop.f32.mrf.mxu2 }
 0x852   : > { %v6984_v54 = vadd.f32 %v6983_v2, %v6935_v33  ;;  %v7032_v5 = vpop.f32.mrf.mxu3  ;;  %v6888_v8 = vpop.f32.mrf.mxu0  ;;  %v11828_v33 = vld [vmem:[%s17604_s3 + $0xb6c] sm:$0xf]  ;;  %v10991_v2 = vld [vmem:[%s17604_s3 + $0xb78] sm:$0xf0]  ;;  %7363 = vmatpush.bf16.msra.mxu2 %v10866_v16 }
 0x853   : > { %v10994_v36 = vor.u32 %v11828_v33, %v10991_v2  ;;  %v10735_v16 = vld [vmem:[%s17604_s3 + $0x978] sm:$0xf0] }
 0x854   : > { %v6937_v13 = vpop.f32.mrf.mxu1  ;;  %v7033_v18 = vadd.f32 %v7032_v5, %v6984_v54  ;;  %v7604_v54 = vmax.f32 %v7540_v40, 0.0  ;;  %v10607_v40 = vld [vmem:[%s17604_s3 + $0x878] sm:$0xf0] }
 0x855   : > { %v6938_v14 = vadd.f32 %v6937_v13, %v6888_v8  ;;  %7083 = vmatmul.bf16.gmra.mxu0 %v18323_v58  ;;  %7412 = vmatpush.bf16.msra.mxu3 %v10994_v36 }
 0x856   : > { %v7470_v9 = vadd.f32 %v7033_v18, %v18383_v11  ;;  %7181 = vmatmul.bf16.gmra.mxu2 %v18325_v22 }
 0x857   : > { %7132 = vmatmul.bf16.gmra.mxu1 %v18324_v47  ;;  %7230 = vmatmul.bf16.gmra.mxu3 %v18326_v35 }
 0x858   : > { %v7544_v27 = vadd.f32 %v16753_v19, %v7470_v9 }
 0x859   : > { %v6986_v6 = vpop.f32.mrf.mxu2 }
 0x85a   : > { %v6987_v5 = vadd.f32 %v6986_v6, %v6938_v14  ;;  %v7035_v8 = vpop.f32.mrf.mxu3  ;;  %v6890_v43 = vpop.f32.mrf.mxu0  ;;  %v7608_v13 = vmax.f32 %v7544_v27, 0.0  ;;  %v11732_v14 = vld [vmem:[%s17604_s3 + $0x86c] sm:$0xf] }
 0x85b   : > { %v10610_v33 = vor.u32 %v11732_v14, %v10607_v40  ;;  %v11764_v6 = vld [vmem:[%s17604_s3 + $0x96c] sm:$0xf] }
 0x85c   : > { %v6939_v51 = vpop.f32.mrf.mxu1  ;;  %v7036_v0 = vadd.f32 %v7035_v8, %v6987_v5  ;;  %v16820_v18 = vpack.c.bf16 %v7608_v13, %v7604_v54  ;;  %v10738_v5 = vor.u32 %v11764_v6, %v10735_v16 }
 0x85d   : > { %v6940_v53 = vadd.f32 %v6939_v51, %v6890_v43  ;;  %v18385_v43 = vld [vmem:[#allocation64_spill] sm:$0xff]  ;;  %7265 = vmatpush.bf16.msra.mxu0 %v10610_v33  ;;  %v10847_v51 = vld [vmem:[%s17604_s3 + $0xa58] sm:$0xf0] }
 0x85e   : > { %v7474_v11 = vadd.f32 %v7036_v0, %v18384_v28  ;;  %7314 = vmatpush.bf16.msra.mxu1 %v10738_v5  ;;  %v11824_v0 = vld [vmem:[%s17604_s3 + $0xb4c] sm:$0xf] }
 0x85f   : > { %v18386_v5 = vld [vmem:[#allocation168_spill] sm:$0xff] }
 0x860   : > { %v7548_v8 = vadd.f32 %v16753_v19, %v7474_v11  ;;  %v10975_v11 = vld [vmem:[%s17604_s3 + $0xb58] sm:$0xf0] }
 0x861   : > { %v6988_v9 = vpop.f32.mrf.mxu2  ;;  %v10978_v40 = vor.u32 %v11824_v0, %v10975_v11 }
 0x862   : > { %v6989_v24 = vadd.f32 %v6988_v9, %v6940_v53  ;;  %v7037_v44 = vpop.f32.mrf.mxu3  ;;  %v6893_v23 = vpop.f32.mrf.mxu0  ;;  %v7612_v9 = vmax.f32 %v7548_v8, 0.0  ;;  %v10591_v8 = vld [vmem:[%s17604_s3 + $0x858] sm:$0xf0] }
 0x863   : > { %7413 = vmatpush.bf16.msra.mxu3 %v10978_v40 }
 0x864   : > { %v6942_v27 = vpop.f32.mrf.mxu1  ;;  %v7038_v2 = vadd.f32 %v7037_v44, %v6989_v24 }
 0x865   : > { %v6943_v54 = vadd.f32 %v6942_v27, %v6893_v23  ;;  %7088 = vmatmul.bf16.gmra.mxu0 %v18331_v50  ;;  %v11792_v23 = vld [vmem:[%s17604_s3 + $0xa4c] sm:$0xf] }
 0x866   : > { %v7478_v36 = vadd.f32 %v7038_v2, %v18385_v43  ;;  %7186 = vmatmul.bf16.gmra.mxu2 %v18333_v37  ;;  %v10850_v28 = vor.u32 %v11792_v23, %v10847_v51 }
 0x867   : > { %7137 = vmatmul.bf16.gmra.mxu1 %v18332_v15  ;;  %7235 = vmatmul.bf16.gmra.mxu3 %v18334_v30 }
 0x868   : > { %v7552_v13 = vadd.f32 %v16753_v19, %v7478_v36  ;;  %7364 = vmatpush.bf16.msra.mxu2 %v10850_v28  ;;  %v10719_v28 = vld [vmem:[%s17604_s3 + $0x958] sm:$0xf0] }
 0x869   : > { %v6991_v53 = vpop.f32.mrf.mxu2 }
 0x86a   : > { %v6992_v24 = vadd.f32 %v6991_v53, %v6943_v54  ;;  %v7040_v44 = vpop.f32.mrf.mxu3  ;;  %v6895_v14 = vpop.f32.mrf.mxu0  ;;  %v7616_v27 = vmax.f32 %v7552_v13, 0.0  ;;  %v11728_v54 = vld [vmem:[%s17604_s3 + $0x84c] sm:$0xf] }
 0x86b   : > { %v10594_v0 = vor.u32 %v11728_v54, %v10591_v8  ;;  %v11760_v53 = vld [vmem:[%s17604_s3 + $0x94c] sm:$0xf] }
 0x86c   : > { %v6944_v33 = vpop.f32.mrf.mxu1  ;;  %v7041_v6 = vadd.f32 %v7040_v44, %v6992_v24  ;;  %v16854_v2 = vpack.c.bf16 %v7616_v27, %v7612_v9  ;;  %v10722_v24 = vor.u32 %v11760_v53, %v10719_v28 }
 0x86d   : > { %v6945_v16 = vadd.f32 %v6944_v33, %v6895_v14  ;;  %v18387_v14 = vld [vmem:[#allocation65_spill] sm:$0xff]  ;;  %7266 = vmatpush.bf16.msra.mxu0 %v10594_v0  ;;  %v10831_v33 = vld [vmem:[%s17604_s3 + $0xa38] sm:$0xf0] }
 0x86e   : > { %v7482_v43 = vadd.f32 %v7041_v6, %v18386_v5  ;;  %7315 = vmatpush.bf16.msra.mxu1 %v10722_v24  ;;  %v11820_v6 = vld [vmem:[%s17604_s3 + $0xb2c] sm:$0xf]  ;;  %v18388_v24 = vld [vmem:[#allocation169_spill] sm:$0xff] }
 0x870   : > { %v7556_v44 = vadd.f32 %v16753_v19, %v7482_v43  ;;  %v10959_v43 = vld [vmem:[%s17604_s3 + $0xb38] sm:$0xf0] }
 0x871   : > { %v6993_v36 = vpop.f32.mrf.mxu2  ;;  %v10962_v8 = vor.u32 %v11820_v6, %v10959_v43 }
 0x872   : > { %v6994_v23 = vadd.f32 %v6993_v36, %v6945_v16  ;;  %v7042_v51 = vpop.f32.mrf.mxu3  ;;  %v6898_v12 = vpop.f32.mrf.mxu0  ;;  %v7620_v36 = vmax.f32 %v7556_v44, 0.0  ;;  %v10575_v44 = vld [vmem:[%s17604_s3 + $0x838] sm:$0xf0] }
 0x873   : > { %7414 = vmatpush.bf16.msra.mxu3 %v10962_v8 }
 0x874   : > { %v6947_v13 = vpop.f32.mrf.mxu1  ;;  %v7043_v11 = vadd.f32 %v7042_v51, %v6994_v23 }
 0x875   : > { %v6948_v9 = vadd.f32 %v6947_v13, %v6898_v12  ;;  %7093 = vmatmul.bf16.gmra.mxu0 %v18339_v25  ;;  %v11788_v12 = vld [vmem:[%s17604_s3 + $0xa2c] sm:$0xf] }
 0x876   : > { %v7486_v40 = vadd.f32 %v7043_v11, %v18387_v14  ;;  %7191 = vmatmul.bf16.gmra.mxu2 %v18341_v7  ;;  %v10834_v5 = vor.u32 %v11788_v12, %v10831_v33 }
 0x877   : > { %7142 = vmatmul.bf16.gmra.mxu1 %v18340_v59  ;;  %7240 = vmatmul.bf16.gmra.mxu3 %v18342_v20 }
 0x878   : > { %v7560_v27 = vadd.f32 %v16753_v19, %v7486_v40  ;;  %7365 = vmatpush.bf16.msra.mxu2 %v10834_v5  ;;  %v10703_v5 = vld [vmem:[%s17604_s3 + $0x938] sm:$0xf0] }
 0x879   : > { %v6996_v16 = vpop.f32.mrf.mxu2 }
 0x87a   : > { %v6997_v23 = vadd.f32 %v6996_v16, %v6948_v9  ;;  %v7045_v51 = vpop.f32.mrf.mxu3  ;;  %v6900_v54 = vpop.f32.mrf.mxu0  ;;  %v7624_v13 = vmax.f32 %v7560_v27, 0.0  ;;  %v11724_v9 = vld [vmem:[%s17604_s3 + $0x82c] sm:$0xf] }
 0x87b   : > { %v10578_v6 = vor.u32 %v11724_v9, %v10575_v44  ;;  %v11756_v16 = vld [vmem:[%s17604_s3 + $0x92c] sm:$0xf] }
 0x87c   : > { %v6949_v0 = vpop.f32.mrf.mxu1  ;;  %v7046_v53 = vadd.f32 %v7045_v51, %v6997_v23  ;;  %v16888_v11 = vpack.c.bf16 %v7624_v13, %v7620_v36  ;;  %v10706_v23 = vor.u32 %v11756_v16, %v10703_v5 }
 0x87d   : > { %v6950_v28 = vadd.f32 %v6949_v0, %v6900_v54  ;;  %v18389_v54 = vld [vmem:[#allocation66_spill] sm:$0xff]  ;;  %7267 = vmatpush.bf16.msra.mxu0 %v10578_v6 }
 0x87e   : > { %v7490_v14 = vadd.f32 %v7046_v53, %v18388_v24  ;;  %7316 = vmatpush.bf16.msra.mxu1 %v10706_v23  ;;  %v10815_v0 = vld [vmem:[%s17604_s3 + $0xa18] sm:$0xf0]  ;;  %v11816_v53 = vld [vmem:[%s17604_s3 + $0xb0c] sm:$0xf] }
 0x87f   : > { %v18391_v23 = vld [vmem:[#allocation170_spill] sm:$0xff] }
 0x880   : > { %v7564_v51 = vadd.f32 %v16753_v19, %v7490_v14  ;;  %v10943_v14 = vld [vmem:[%s17604_s3 + $0xb18] sm:$0xf0] }
 0x881   : > { %v6998_v40 = vpop.f32.mrf.mxu2  ;;  %v10946_v44 = vor.u32 %v11816_v53, %v10943_v14 }
 0x882   : > { %v6999_v12 = vadd.f32 %v6998_v40, %v6950_v28  ;;  %v7047_v33 = vpop.f32.mrf.mxu3  ;;  %v6903_v45 = vpop.f32.mrf.mxu0  ;;  %v7628_v40 = vmax.f32 %v7564_v51, 0.0  ;;  %v11752_v51 = vld [vmem:[%s17604_s3 + $0x90c] sm:$0xf] }
 0x883   : > { %7415 = vmatpush.bf16.msra.mxu3 %v10946_v44  ;;  %v18392_v44 = vld [vmem:[#allocation67_spill] sm:$0xff] }
 0x884   : > { %v6952_v27 = vpop.f32.mrf.mxu1  ;;  %v7048_v43 = vadd.f32 %v7047_v33, %v6999_v12 }
 0x885   : > { %v6953_v36 = vadd.f32 %v6952_v27, %v6903_v45  ;;  %7098 = vmatmul.bf16.gmra.mxu0 %v18347_v52  ;;  %v11784_v45 = vld [vmem:[%s17604_s3 + $0xa0c] sm:$0xf] }
 0x886   : > { %v7494_v8 = vadd.f32 %v7048_v43, %v18389_v54  ;;  %7196 = vmatmul.bf16.gmra.mxu2 %v18349_v29  ;;  %v10818_v24 = vor.u32 %v11784_v45, %v10815_v0  ;;  %v11720_v45 = vld [vmem:[%s17604_s3 + $0x80c] sm:$0xf] }
 0x887   : > { %7147 = vmatmul.bf16.gmra.mxu1 %v18348_v32  ;;  %7245 = vmatmul.bf16.gmra.mxu3 %v18350_v55 }
 0x888   : > { %v7568_v13 = vadd.f32 %v16753_v19, %v7494_v8  ;;  %7366 = vmatpush.bf16.msra.mxu2 %v10818_v24  ;;  %v10687_v24 = vld [vmem:[%s17604_s3 + $0x918] sm:$0xf0] }
 0x889   : > { %v7001_v28 = vpop.f32.mrf.mxu2 }
 0x88a   : > { %v7002_v12 = vadd.f32 %v7001_v28, %v6953_v36  ;;  %v7050_v33 = vpop.f32.mrf.mxu3  ;;  %v6905_v9 = vpop.f32.mrf.mxu0  ;;  %v7632_v27 = vmax.f32 %v7568_v13, 0.0  ;;  %v10559_v36 = vld [vmem:[%s17604_s3 + $0x818] sm:$0xf0] }
 0x88b   : > { %v10562_v28 = vor.u32 %v11720_v45, %v10559_v36 }
 0x88c   : > { %v6954_v6 = vpop.f32.mrf.mxu1  ;;  %v7051_v16 = vadd.f32 %v7050_v33, %v7002_v12  ;;  %v16922_v43 = vpack.c.bf16 %v7632_v27, %v7628_v40  ;;  %v10690_v40 = vor.u32 %v11752_v51, %v10687_v24 }
 0x88d   : > { %v6955_v5 = vadd.f32 %v6954_v6, %v6905_v9  ;;  %7268 = vmatpush.bf16.msra.mxu0 %v10562_v28 }
 0x88e   : > { %18390 = vst [vmem:[#allocation87_spill] sm:$0xff] %v16922_v43  ;;  %v7498_v54 = vadd.f32 %v7051_v16, %v18391_v23  ;;  %7317 = vmatpush.bf16.msra.mxu1 %v10690_v40 }
 0x890   : > { %v7572_v9 = vadd.f32 %v16753_v19, %v7498_v54 }
 0x891   : > { %v7003_v8 = vpop.f32.mrf.mxu2 }
 0x892   : > { %v7004_v13 = vadd.f32 %v7003_v8, %v6955_v5  ;;  %v7052_v0 = vpop.f32.mrf.mxu3  ;;  %v6908_v53 = vpop.f32.mrf.mxu0  ;;  %v7636_v5 = vmax.f32 %v7572_v9, 0.0  ;;  %v18394_v9 = vld [vmem:[#allocation68_spill] sm:$0xff] }
 0x894   : > { %v6957_v14 = vpop.f32.mrf.mxu1  ;;  %v7053_v12 = vadd.f32 %v7052_v0, %v7004_v13 }
 0x895   : > { %v6958_v33 = vadd.f32 %v6957_v14, %v6908_v53  ;;  %7103 = vmatmul.bf16.gmra.mxu0 %v18355_v49  ;;  %v18393_v53 = vld [vmem:[#allocation171_spill] sm:$0xff] }
 0x896   : > { %v7502_v27 = vadd.f32 %v7053_v12, %v18392_v44  ;;  %7201 = vmatmul.bf16.gmra.mxu2 %v18357_v57 }
 0x897   : > { %7152 = vmatmul.bf16.gmra.mxu1 %v18356_v48  ;;  %7250 = vmatmul.bf16.gmra.mxu3 %v18358_v3 }
 0x898   : > { %v7576_v6 = vadd.f32 %v16753_v19, %v7502_v27 }
 0x899   : > { %v7006_v16 = vpop.f32.mrf.mxu2 }
 0x89a   : > { %v7007_v23 = vadd.f32 %v7006_v16, %v6958_v33  ;;  %v7055_v8 = vpop.f32.mrf.mxu3  ;;  %v6910_v45 = vpop.f32.mrf.mxu0  ;;  %v7640_v36 = vmax.f32 %v7576_v6, 0.0 }
 0x89c   : > { %v6959_v51 = vpop.f32.mrf.mxu1  ;;  %v7056_v13 = vadd.f32 %v7055_v8, %v7007_v23  ;;  %v16944_v54 = vpack.c.bf16 %v7640_v36, %v7636_v5 }
 0x89d   : > { %v6960_v0 = vadd.f32 %v6959_v51, %v6910_v45 }
 0x89e   : > { %v7506_v28 = vadd.f32 %v7056_v13, %v18393_v53 }
 0x8a0   : > { %v7580_v33 = vadd.f32 %v16753_v19, %v7506_v28 }
 0x8a1   : > { %v7008_v24 = vpop.f32.mrf.mxu2 }
 0x8a2   : > { %v7009_v14 = vadd.f32 %v7008_v24, %v6960_v0  ;;  %v7057_v40 = vpop.f32.mrf.mxu3  ;;  %v6913_v12 = vpop.f32.mrf.mxu0  ;;  %v7644_v23 = vmax.f32 %v7580_v33, 0.0 }
 0x8a4   : > { %v6962_v44 = vpop.f32.mrf.mxu1  ;;  %v7058_v43 = vadd.f32 %v7057_v40, %v7009_v14 }
 0x8a5   : > { %v6963_v27 = vadd.f32 %v6962_v44, %v6913_v12  ;;  %7108 = vmatmul.bf16.gmra.mxu0 %v18363_v26 }
 0x8a6   : > { %v7510_v6 = vadd.f32 %v7058_v43, %v18394_v9  ;;  %7206 = vmatmul.bf16.gmra.mxu2 %v18365_v17  ;;  %v18395_v43 = vld [vmem:[#allocation172_spill] sm:$0xff]  ;;  %v11245_v9 = vld [vmem:[%s17606_s5 + $0x170] sm:$0xf] }
 0x8a7   : > { %7157 = vmatmul.bf16.gmra.mxu1 %v18364_v63  ;;  %7255 = vmatmul.bf16.gmra.mxu3 %v18366_v61 }
 0x8a8   : > { %v7584_v16 = vadd.f32 %v16753_v19, %v7510_v6 }
 0x8a9   : > { %v7011_v5 = vpop.f32.mrf.mxu2 }
 0x8aa   : > { %v7012_v8 = vadd.f32 %v7011_v5, %v6963_v27  ;;  %v7060_v45 = vpop.f32.mrf.mxu3  ;;  %v6915_v36 = vpop.f32.mrf.mxu0  ;;  %v7648_v51 = vmax.f32 %v7584_v16, 0.0  ;;  %v11894_v27 = vld [vmem:[%s17606_s5 + $0x174] sm:$0xf0]  ;;  %v11309_v16 = vld [vmem:[%s17606_s5 + $0x1f0] sm:$0xf] }
 0x8ab   : > { %v11246_v6 = vor.u32 %v11894_v27, %v11245_v9  ;;  %v11910_v5 = vld [vmem:[%s17606_s5 + $0x1f4] sm:$0xf0] }
 0x8ac   : > { %v6964_v13 = vpop.f32.mrf.mxu1  ;;  %v7061_v0 = vadd.f32 %v7060_v45, %v7012_v8  ;;  %v16954_v28 = vpack.c.bf16 %v7648_v51, %v7644_v23  ;;  %v11117_v23 = vld [vmem:[%s17606_s5 + $0x70] sm:$0xf]  ;;  %v11862_v51 = vld [vmem:[%s17606_s5 + $0x74] sm:$0xf0] }
 0x8ad   : > { %v6965_v53 = vadd.f32 %v6964_v13, %v6915_v36  ;;  %v11310_v36 = vor.u32 %v11910_v5, %v11309_v16  ;;  %v11181_v13 = vld [vmem:[%s17606_s5 + $0xf0] sm:$0xf]  ;;  %8157 = vmatpush.bf16.msrb.mxu2 %v11246_v6 }
 0x8ae   : > { %v7514_v24 = vadd.f32 %v7061_v0, %v18395_v43  ;;  %v11878_v0 = vld [vmem:[%s17606_s5 + $0xf4] sm:$0xf0] }
 0x8af   : > { %v11182_v43 = vor.u32 %v11878_v0, %v11181_v13  ;;  %8198 = vmatpush.bf16.msrb.mxu3 %v11310_v36  ;;  %v11237_v0 = vld [vmem:[%s17606_s5 + $0x160] sm:$0xf] }
 0x8b1   : > { %v7013_v14 = vpop.f32.mrf.mxu2  ;;  %8116 = vmatpush.bf16.msrb.mxu1 %v11182_v43 }
 0x8b2   : > { %v7014_v40 = vadd.f32 %v7013_v14, %v6965_v53  ;;  %v7062_v12 = vpop.f32.mrf.mxu3  ;;  %v7074_v44 = vpop.f32.mrf.mxu0  ;;  %v11118_v53 = vor.u32 %v11862_v51, %v11117_v23  ;;  %v7588_v14 = vadd.f32 %v16753_v19, %v7514_v24 }
 0x8b4   : > { %v7123_v33 = vpop.f32.mrf.mxu1  ;;  %v7063_v8 = vadd.f32 %v7062_v12, %v7014_v40  ;;  %v18396_v40 = vld [vmem:[#allocation69_spill] sm:$0xff]  ;;  %8075 = vmatpush.bf16.msrb.mxu0 %v11118_v53  ;;  %v11892_v53 = vld [vmem:[%s17606_s5 + $0x164] sm:$0xf0] }
 0x8b5   : > { %v7124_v45 = vadd.f32 %v7123_v33, %v7074_v44  ;;  %7269 = vmatmul.bf16.vlgmr.msra.gmra.mxu0 %v18307_v62  ;;  %v7652_v62 = vmax.f32 %v7588_v14, 0.0  ;;  %v11238_v14 = vor.u32 %v11892_v53, %v11237_v0 }
 0x8b6   : > { %v7518_v12 = vadd.f32 %v7063_v8, %v18396_v40  ;;  %7367 = vmatmul.bf16.vlgmr.msra.gmra.mxu2 %v18309_v41  ;;  %v11301_v40 = vld [vmem:[%s17606_s5 + $0x1e0] sm:$0xf] }
 0x8b7   : > { %7318 = vmatmul.bf16.vlgmr.msra.gmra.mxu1 %v18308_v34  ;;  %7416 = vmatmul.bf16.vlgmr.msra.gmra.mxu3 %v18310_v21  ;;  %v18397_v34 = vld [vmem:[#allocation173_spill] sm:$0xff]  ;;  %v16994_v21 = vld [vmem:[%s17605_s4] sm:$0xf] }
 0x8b8   : > { %v7592_v44 = vadd.f32 %v16753_v19, %v7518_v12  ;;  %v16997_v19 = vperm.slane %v16994_v21, 2  ;;  %v11908_v12 = vld [vmem:[%s17606_s5 + $0x1e4] sm:$0xf0]  ;;  %8158 = vmatpush.bf16.msrb.mxu2 %v11238_v14 }
 0x8b9   : > { %v7172_v9 = vpop.f32.mrf.mxu2 }
 0x8ba   : > { %v7173_v27 = vadd.f32 %v7172_v9, %v7124_v45  ;;  %v7221_v33 = vpop.f32.mrf.mxu3  ;;  %v7076_v6 = vpop.f32.mrf.mxu0  ;;  %v7656_v16 = vmax.f32 %v7592_v44, 0.0  ;;  %v11109_v44 = vld [vmem:[%s17606_s5 + $0x60] sm:$0xf] }
 0x8bc   : > { %v7125_v24 = vpop.f32.mrf.mxu1  ;;  %v7222_v5 = vadd.f32 %v7221_v33, %v7173_v27  ;;  %v16988_v8 = vpack.c.bf16 %v7656_v16, %v7652_v62  ;;  %v11302_v27 = vor.u32 %v11908_v12, %v11301_v40  ;;  %v11860_v33 = vld [vmem:[%s17606_s5 + $0x64] sm:$0xf0]  ;;  %v18399_v12 = vld [vmem:[#allocation174_spill] sm:$0xff] }
 0x8bd   : > { %v7126_v23 = vadd.f32 %v7125_v24, %v7076_v6  ;;  %v11173_v6 = vld [vmem:[%s17606_s5 + $0xe0] sm:$0xf]  ;;  %v11876_v16 = vld [vmem:[%s17606_s5 + $0xe4] sm:$0xf0]  ;;  %v11110_v24 = vor.u32 %v11860_v33, %v11109_v44 }
 0x8be   : > { %v7459_v41 = vadd.f32 %v7222_v5, %v18397_v34  ;;  %v11174_v5 = vor.u32 %v11876_v16, %v11173_v6  ;;  %v18398_v34 = vld [vmem:[#allocation70_spill] sm:$0xff]  ;;  %8199 = vmatpush.bf16.msrb.mxu3 %v11302_v27  ;;  %v11229_v27 = vld [vmem:[%s17606_s5 + $0x150] sm:$0xf] }
 0x8bf   : > { %8076 = vmatpush.bf16.msrb.mxu0 %v11110_v24  ;;  %v11293_v24 = vld [vmem:[%s17606_s5 + $0x1d0] sm:$0xf] }
 0x8c0   : > { %8117 = vmatpush.bf16.msrb.mxu1 %v11174_v5  ;;  %v11906_v5 = vld [vmem:[%s17606_s5 + $0x1d4] sm:$0xf0] }
 0x8c1   : > { %v7174_v51 = vpop.f32.mrf.mxu2 }
 0x8c2   : > { %v7175_v45 = vadd.f32 %v7174_v51, %v7126_v23  ;;  %v7223_v36 = vpop.f32.mrf.mxu3  ;;  %v7079_v13 = vpop.f32.mrf.mxu0  ;;  %v7533_v23 = vadd.f32 %v16997_v19, %v7459_v41 }
 0x8c4   : > { %v7128_v43 = vpop.f32.mrf.mxu1  ;;  %v7224_v9 = vadd.f32 %v7223_v36, %v7175_v45 }
 0x8c5   : > { %v7129_v62 = vadd.f32 %v7128_v43, %v7079_v13  ;;  %7274 = vmatmul.bf16.gmra.mxu0 %v18315_v31  ;;  %v7597_v31 = vmax.f32 %v7533_v23, 0.0  ;;  %v11101_v23 = vld [vmem:[%s17606_s5 + $0x50] sm:$0xf] }
 0x8c6   : > { %v7463_v51 = vadd.f32 %v7224_v9, %v18398_v34  ;;  %7372 = vmatmul.bf16.gmra.mxu2 %v18317_v46 }
 0x8c7   : > { %7323 = vmatmul.bf16.gmra.mxu1 %v18316_v38  ;;  %7421 = vmatmul.bf16.gmra.mxu3 %v18381_v60 }
 0x8c8   : > { %v7537_v45 = vadd.f32 %v16997_v19, %v7463_v51 }
 0x8c9   : > { %v7177_v36 = vpop.f32.mrf.mxu2 }
 0x8ca   : > { %v7601_v13 = vmax.f32 %v7537_v45, 0.0  ;;  %v7178_v0 = vadd.f32 %v7177_v36, %v7129_v62  ;;  %v7226_v53 = vpop.f32.mrf.mxu3  ;;  %v7081_v43 = vpop.f32.mrf.mxu0  ;;  %v11890_v62 = vld [vmem:[%s17606_s5 + $0x154] sm:$0xf0]  ;;  %v11294_v45 = vor.u32 %v11906_v5, %v11293_v24 }
 0x8cb   : > { %v11230_v16 = vor.u32 %v11890_v62, %v11229_v27  ;;  %v11858_v36 = vld [vmem:[%s17606_s5 + $0x54] sm:$0xf0] }
 0x8cc   : > { %v7130_v41 = vpop.f32.mrf.mxu1  ;;  %v17030_v14 = vpack.c.bf16 %v7601_v13, %v7597_v31  ;;  %v7227_v40 = vadd.f32 %v7226_v53, %v7178_v0  ;;  %v11165_v31 = vld [vmem:[%s17606_s5 + $0xd0] sm:$0xf]  ;;  %v11874_v13 = vld [vmem:[%s17606_s5 + $0xd4] sm:$0xf0]  ;;  %v11102_v0 = vor.u32 %v11858_v36, %v11101_v23  ;;  %8200 = vmatpush.bf16.msrb.mxu3 %v11294_v45  ;;  %v11221_v23 = vld [vmem:[%s17606_s5 + $0x140] sm:$0xf] }
 0x8cd   : > { %v7131_v38 = vadd.f32 %v7130_v41, %v7081_v43  ;;  %8159 = vmatpush.bf16.msrb.mxu2 %v11230_v16  ;;  %v11166_v53 = vor.u32 %v11874_v13, %v11165_v31  ;;  %v18400_v41 = vld [vmem:[#allocation71_spill] sm:$0xff]  ;;  %v11904_v31 = vld [vmem:[%s17606_s5 + $0x1c4] sm:$0xf0] }
 0x8ce   : > { %v7467_v46 = vadd.f32 %v7227_v40, %v18399_v12  ;;  %8077 = vmatpush.bf16.msrb.mxu0 %v11102_v0  ;;  %v11285_v36 = vld [vmem:[%s17606_s5 + $0x1c0] sm:$0xf] }
 0x8cf   : > { %8118 = vmatpush.bf16.msrb.mxu1 %v11166_v53  ;;  %v11093_v13 = vld [vmem:[%s17606_s5 + $0x40] sm:$0xf] }
 0x8d0   : > { %v7541_v43 = vadd.f32 %v16997_v19, %v7467_v46 }
 0x8d1   : > { %v7179_v44 = vpop.f32.mrf.mxu2 }
 0x8d2   : > { %v7180_v60 = vadd.f32 %v7179_v44, %v7131_v38  ;;  %v7228_v9 = vpop.f32.mrf.mxu3  ;;  %v7084_v33 = vpop.f32.mrf.mxu0 }
 0x8d4   : > { %v7133_v6 = vpop.f32.mrf.mxu1  ;;  %v7229_v34 = vadd.f32 %v7228_v9, %v7180_v60 }
 0x8d5   : > { %v7134_v51 = vadd.f32 %v7133_v6, %v7084_v33  ;;  %7279 = vmatmul.bf16.gmra.mxu0 %v18323_v58  ;;  %v7605_v58 = vmax.f32 %v7541_v43, 0.0  ;;  %v11286_v43 = vor.u32 %v11904_v31, %v11285_v36  ;;  %v11886_v36 = vld [vmem:[%s17606_s5 + $0x134] sm:$0xf0] }
 0x8d6   : > { %v7471_v40 = vadd.f32 %v7229_v34, %v18400_v41  ;;  %7377 = vmatmul.bf16.gmra.mxu2 %v18325_v22  ;;  %v11888_v34 = vld [vmem:[%s17606_s5 + $0x144] sm:$0xf0] }
 0x8d7   : > { %7328 = vmatmul.bf16.gmra.mxu1 %v18324_v47  ;;  %7426 = vmatmul.bf16.gmra.mxu3 %v18326_v35  ;;  %v18401_v47 = vld [vmem:[#allocation175_spill] sm:$0xff]  ;;  %v11222_v45 = vor.u32 %v11888_v34, %v11221_v23  ;;  %v11856_v41 = vld [vmem:[%s17606_s5 + $0x44] sm:$0xf0] }
 0x8d8   : > { %v7545_v38 = vadd.f32 %v16997_v19, %v7471_v40  ;;  %v11157_v40 = vld [vmem:[%s17606_s5 + $0xc0] sm:$0xf]  ;;  %8201 = vmatpush.bf16.msrb.mxu3 %v11286_v43  ;;  %v11085_v43 = vld [vmem:[%s17606_s5 + $0x30] sm:$0xf] }
 0x8d9   : > { %v7182_v12 = vpop.f32.mrf.mxu2  ;;  %8160 = vmatpush.bf16.msrb.mxu2 %v11222_v45  ;;  %v11213_v45 = vld [vmem:[%s17606_s5 + $0x130] sm:$0xf] }
 0x8da   : > { %v7183_v44 = vadd.f32 %v7182_v12, %v7134_v51  ;;  %v7231_v60 = vpop.f32.mrf.mxu3  ;;  %v7086_v9 = vpop.f32.mrf.mxu0  ;;  %v7609_v33 = vmax.f32 %v7545_v38, 0.0  ;;  %v11872_v38 = vld [vmem:[%s17606_s5 + $0xc4] sm:$0xf0]  ;;  %v11094_v12 = vor.u32 %v11856_v41, %v11093_v13  ;;  %v11214_v13 = vor.u32 %v11886_v36, %v11213_v45  ;;  %v11205_v45 = vld [vmem:[%s17606_s5 + $0x120] sm:$0xf] }
 0x8db   : > { %v11884_v36 = vld [vmem:[%s17606_s5 + $0x124] sm:$0xf0] }
 0x8dc   : > { %v7135_v46 = vpop.f32.mrf.mxu1  ;;  %v7232_v27 = vadd.f32 %v7231_v60, %v7183_v44  ;;  %v17064_v6 = vpack.c.bf16 %v7609_v33, %v7605_v58  ;;  %v11158_v58 = vor.u32 %v11872_v38, %v11157_v40  ;;  %v18402_v60 = vld [vmem:[#allocation72_spill] sm:$0xff]  ;;  %8078 = vmatpush.bf16.msrb.mxu0 %v11094_v12  ;;  %v11854_v12 = vld [vmem:[%s17606_s5 + $0x34] sm:$0xf0] }
 0x8dd   : > { %v7136_v62 = vadd.f32 %v7135_v46, %v7086_v9  ;;  %8161 = vmatpush.bf16.msrb.mxu2 %v11214_v13  ;;  %v11206_v13 = vor.u32 %v11884_v36, %v11205_v45 }
 0x8de   : > { %v7475_v22 = vadd.f32 %v7232_v27, %v18401_v47  ;;  %8119 = vmatpush.bf16.msrb.mxu1 %v11158_v58  ;;  %v11149_v58 = vld [vmem:[%s17606_s5 + $0xb0] sm:$0xf] }
 0x8e0   : > { %v7549_v44 = vadd.f32 %v16997_v19, %v7475_v22 }
 0x8e1   : > { %v7184_v16 = vpop.f32.mrf.mxu2  ;;  %8162 = vmatpush.bf16.msrb.mxu2 %v11206_v13  ;;  %v11061_v13 = vld [vmem:[%s17606_s5] sm:$0xf] }
 0x8e2   : > { %v7185_v35 = vadd.f32 %v7184_v16, %v7136_v62  ;;  %v7233_v24 = vpop.f32.mrf.mxu3  ;;  %v7089_v5 = vpop.f32.mrf.mxu0 }
 0x8e4   : > { %v7138_v51 = vpop.f32.mrf.mxu1  ;;  %v7234_v0 = vadd.f32 %v7233_v24, %v7185_v35 }
 0x8e5   : > { %v7139_v53 = vadd.f32 %v7138_v51, %v7089_v5  ;;  %7284 = vmatmul.bf16.gmra.mxu0 %v18331_v50  ;;  %v7613_v50 = vmax.f32 %v7549_v44, 0.0  ;;  %v11870_v44 = vld [vmem:[%s17606_s5 + $0xb4] sm:$0xf0] }
 0x8e6   : > { %v7479_v9 = vadd.f32 %v7234_v0, %v18402_v60  ;;  %7382 = vmatmul.bf16.gmra.mxu2 %v18333_v37  ;;  %v11277_v0 = vld [vmem:[%s17606_s5 + $0x1b0] sm:$0xf]  ;;  %v11086_v60 = vor.u32 %v11854_v12, %v11085_v43  ;;  %v11077_v43 = vld [vmem:[%s17606_s5 + $0x20] sm:$0xf]  ;;  %v11852_v12 = vld [vmem:[%s17606_s5 + $0x24] sm:$0xf0] }
 0x8e7   : > { %7333 = vmatmul.bf16.gmra.mxu1 %v18332_v15  ;;  %7431 = vmatmul.bf16.gmra.mxu3 %v18334_v30  ;;  %v18403_v15 = vld [vmem:[#allocation176_spill] sm:$0xff] }
 0x8e8   : > { %v7553_v33 = vadd.f32 %v16997_v19, %v7479_v9  ;;  %v11150_v9 = vor.u32 %v11870_v44, %v11149_v58  ;;  %8079 = vmatpush.bf16.msrb.mxu0 %v11086_v60  ;;  %v11141_v58 = vld [vmem:[%s17606_s5 + $0xa0] sm:$0xf]  ;;  %v11868_v44 = vld [vmem:[%s17606_s5 + $0xa4] sm:$0xf0]  ;;  %v11078_v60 = vor.u32 %v11852_v12, %v11077_v43  ;;  %v11898_v12 = vld [vmem:[%s17606_s5 + $0x194] sm:$0xf0] }
 0x8e9   : > { %v7187_v46 = vpop.f32.mrf.mxu2 }
 0x8ea   : > { %v7188_v27 = vadd.f32 %v7187_v46, %v7139_v53  ;;  %v7236_v62 = vpop.f32.mrf.mxu3  ;;  %v7091_v47 = vpop.f32.mrf.mxu0  ;;  %v7617_v16 = vmax.f32 %v7553_v33, 0.0  ;;  %v11902_v53 = vld [vmem:[%s17606_s5 + $0x1b4] sm:$0xf0]  ;;  %v18404_v46 = vld [vmem:[#allocation73_spill] sm:$0xff]  ;;  %8120 = vmatpush.bf16.msrb.mxu1 %v11150_v9  ;;  %v11142_v9 = vor.u32 %v11868_v44, %v11141_v58 }
 0x8eb   : > { %v11278_v38 = vor.u32 %v11902_v53, %v11277_v0  ;;  %v11269_v0 = vld [vmem:[%s17606_s5 + $0x1a0] sm:$0xf]  ;;  %v11900_v53 = vld [vmem:[%s17606_s5 + $0x1a4] sm:$0xf0] }
 0x8ec   : > { %v7140_v22 = vpop.f32.mrf.mxu1  ;;  %v7237_v35 = vadd.f32 %v7236_v62, %v7188_v27  ;;  %v17098_v5 = vpack.c.bf16 %v7617_v16, %v7613_v50  ;;  %8080 = vmatpush.bf16.msrb.mxu0 %v11078_v60 }
 0x8ed   : > { %v7141_v24 = vadd.f32 %v7140_v22, %v7091_v47  ;;  %8202 = vmatpush.bf16.msrb.mxu3 %v11278_v38  ;;  %v11270_v38 = vor.u32 %v11900_v53, %v11269_v0  ;;  %v11848_v0 = vld [vmem:[%s17606_s5 + $0x4] sm:$0xf0]  ;;  %v11125_v53 = vld [vmem:[%s17606_s5 + $0x80] sm:$0xf] }
 0x8ee   : > { %v7483_v37 = vadd.f32 %v7237_v35, %v18403_v15  ;;  %8121 = vmatpush.bf16.msrb.mxu1 %v11142_v9  ;;  %v11062_v60 = vor.u32 %v11848_v0, %v11061_v13  ;;  %v11864_v9 = vld [vmem:[%s17606_s5 + $0x84] sm:$0xf0] }
 0x8f0   : > { %v7557_v33 = vadd.f32 %v16997_v19, %v7483_v37 }
 0x8f1   : > { %v7189_v23 = vpop.f32.mrf.mxu2  ;;  %8203 = vmatpush.bf16.msrb.mxu3 %v11270_v38  ;;  %v11261_v38 = vld [vmem:[%s17606_s5 + $0x190] sm:$0xf] }
 0x8f2   : > { %v7190_v30 = vadd.f32 %v7189_v23, %v7141_v24  ;;  %v7238_v34 = vpop.f32.mrf.mxu3  ;;  %v7094_v51 = vpop.f32.mrf.mxu0  ;;  %v11262_v44 = vor.u32 %v11898_v12, %v11261_v38 }
 0x8f4   : > { %v7143_v31 = vpop.f32.mrf.mxu1  ;;  %v7239_v41 = vadd.f32 %v7238_v34, %v7190_v30 }
 0x8f5   : > { %v7144_v40 = vadd.f32 %v7143_v31, %v7094_v51  ;;  %7289 = vmatmul.bf16.gmra.mxu0 %v18339_v25  ;;  %v7621_v25 = vmax.f32 %v7557_v33, 0.0  ;;  %8204 = vmatpush.bf16.msrb.mxu3 %v11262_v44 }
 0x8f6   : > { %v7487_v50 = vadd.f32 %v7239_v41, %v18404_v46  ;;  %7387 = vmatmul.bf16.gmra.mxu2 %v18341_v7  ;;  %v18406_v46 = vld [vmem:[#allocation74_spill] sm:$0xff] }
 0x8f7   : > { %7338 = vmatmul.bf16.gmra.mxu1 %v18340_v59  ;;  %7436 = vmatmul.bf16.gmra.mxu3 %v18342_v20  ;;  %v18405_v59 = vld [vmem:[#allocation177_spill] sm:$0xff] }
 0x8f8   : > { %v7561_v27 = vadd.f32 %v16997_v19, %v7487_v50 }
 0x8f9   : > { %v7192_v62 = vpop.f32.mrf.mxu2 }
 0x8fa   : > { %v7193_v47 = vadd.f32 %v7192_v62, %v7144_v40  ;;  %v7241_v16 = vpop.f32.mrf.mxu3  ;;  %v7096_v22 = vpop.f32.mrf.mxu0  ;;  %v7625_v35 = vmax.f32 %v7561_v27, 0.0 }
 0x8fc   : > { %v7145_v24 = vpop.f32.mrf.mxu1  ;;  %v7242_v15 = vadd.f32 %v7241_v16, %v7193_v47  ;;  %v17132_v23 = vpack.c.bf16 %v7625_v35, %v7621_v25 }
 0x8fd   : > { %v7146_v37 = vadd.f32 %v7145_v24, %v7096_v22 }
 0x8fe   : > { %v7491_v7 = vadd.f32 %v7242_v15, %v18405_v59  ;;  %v18407_v59 = vld [vmem:[#allocation178_spill] sm:$0xff] }
 0x900   : > { %v7565_v33 = vadd.f32 %v16997_v19, %v7491_v7 }
 0x901   : > { %v7194_v30 = vpop.f32.mrf.mxu2 }
 0x902   : > { %v7195_v20 = vadd.f32 %v7194_v30, %v7146_v37  ;;  %v7243_v34 = vpop.f32.mrf.mxu3  ;;  %v7099_v51 = vpop.f32.mrf.mxu0 }
 0x904   : > { %v7148_v31 = vpop.f32.mrf.mxu1  ;;  %v7244_v41 = vadd.f32 %v7243_v34, %v7195_v20  ;;  %v11850_v20 = vld [vmem:[%s17606_s5 + $0x14] sm:$0xf0]  ;;  %v11133_v34 = vld [vmem:[%s17606_s5 + $0x90] sm:$0xf] }
 0x905   : > { %v7149_v40 = vadd.f32 %v7148_v31, %v7099_v51  ;;  %7294 = vmatmul.bf16.gmra.mxu0 %v18347_v52  ;;  %v7629_v52 = vmax.f32 %v7565_v33, 0.0  ;;  %v11866_v51 = vld [vmem:[%s17606_s5 + $0x94] sm:$0xf0]  ;;  %v11189_v33 = vld [vmem:[%s17606_s5 + $0x100] sm:$0xf] }
 0x906   : > { %v7495_v50 = vadd.f32 %v7244_v41, %v18406_v46  ;;  %7392 = vmatmul.bf16.gmra.mxu2 %v18349_v29  ;;  %v11882_v29 = vld [vmem:[%s17606_s5 + $0x114] sm:$0xf0]  ;;  %v11134_v36 = vor.u32 %v11866_v51, %v11133_v34  ;;  %v11880_v46 = vld [vmem:[%s17606_s5 + $0x104] sm:$0xf0] }
 0x907   : > { %7343 = vmatmul.bf16.gmra.mxu1 %v18348_v32  ;;  %7441 = vmatmul.bf16.gmra.mxu3 %v18350_v55  ;;  %v11197_v32 = vld [vmem:[%s17606_s5 + $0x110] sm:$0xf] }
 0x908   : > { %v7569_v27 = vadd.f32 %v16997_v19, %v7495_v50  ;;  %v11069_v55 = vld [vmem:[%s17606_s5 + $0x10] sm:$0xf]  ;;  %v11198_v30 = vor.u32 %v11882_v29, %v11197_v32  ;;  %8122 = vmatpush.bf16.msrb.mxu1 %v11134_v36  ;;  %v11896_v36 = vld [vmem:[%s17606_s5 + $0x184] sm:$0xf0] }
 0x909   : > { %v7197_v62 = vpop.f32.mrf.mxu2  ;;  %v11070_v45 = vor.u32 %v11850_v20, %v11069_v55 }
 0x90a   : > { %v7198_v25 = vadd.f32 %v7197_v62, %v7149_v40  ;;  %v7246_v47 = vpop.f32.mrf.mxu3  ;;  %v7101_v16 = vpop.f32.mrf.mxu0  ;;  %v7633_v22 = vmax.f32 %v7569_v27, 0.0  ;;  %8163 = vmatpush.bf16.msrb.mxu2 %v11198_v30  ;;  %v11126_v62 = vor.u32 %v11864_v9, %v11125_v53 }
 0x90b   : > { %8081 = vmatpush.bf16.msrb.mxu0 %v11070_v45  ;;  %v11253_v45 = vld [vmem:[%s17606_s5 + $0x180] sm:$0xf] }
 0x90c   : > { %v7150_v35 = vpop.f32.mrf.mxu1  ;;  %v7247_v24 = vadd.f32 %v7246_v47, %v7198_v25  ;;  %v17166_v37 = vpack.c.bf16 %v7633_v22, %v7629_v52  ;;  %v11190_v52 = vor.u32 %v11880_v46, %v11189_v33  ;;  %v18408_v47 = vld [vmem:[#allocation75_spill] sm:$0xff]  ;;  %8123 = vmatpush.bf16.msrb.mxu1 %v11126_v62  ;;  %v11254_v13 = vor.u32 %v11896_v36, %v11253_v45  ;;  %v18411_v62 = vld [vmem:[#allocation180_spill] sm:$0xff] }
 0x90d   : > { %v7151_v15 = vadd.f32 %v7150_v35, %v7101_v16 }
 0x90e   : > { %v7499_v7 = vadd.f32 %v7247_v24, %v18407_v59  ;;  %8164 = vmatpush.bf16.msrb.mxu2 %v11190_v52  ;;  %8205 = vmatpush.bf16.msrb.mxu3 %v11254_v13 }
 0x90f   : > { %8082 = vmatpush.bf16.msrb.mxu0 %v11062_v60 }
 0x910   : > { %v7573_v25 = vadd.f32 %v16997_v19, %v7499_v7 }
 0x911   : > { %v7199_v31 = vpop.f32.mrf.mxu2 }
 0x912   : > { %v7200_v43 = vadd.f32 %v7199_v31, %v7151_v15  ;;  %v7248_v41 = vpop.f32.mrf.mxu3  ;;  %v7104_v40 = vpop.f32.mrf.mxu0  ;;  %v7637_v24 = vmax.f32 %v7573_v25, 0.0 }
 0x914   : > { %v7153_v58 = vpop.f32.mrf.mxu1  ;;  %v7249_v50 = vadd.f32 %v7248_v41, %v7200_v43  ;;  %v18410_v41 = vld [vmem:[#allocation76_spill] sm:$0xff] }
 0x915   : > { %v7154_v27 = vadd.f32 %v7153_v58, %v7104_v40  ;;  %7299 = vmatmul.bf16.gmra.mxu0 %v18355_v49 }
 0x916   : > { %v7503_v16 = vadd.f32 %v7249_v50, %v18408_v47  ;;  %7397 = vmatmul.bf16.gmra.mxu2 %v18357_v57 }
 0x917   : > { %7348 = vmatmul.bf16.gmra.mxu1 %v18356_v48  ;;  %7446 = vmatmul.bf16.gmra.mxu3 %v18358_v3  ;;  %v18409_v48 = vld [vmem:[#allocation179_spill] sm:$0xff] }
 0x918   : > { %v7577_v22 = vadd.f32 %v16997_v19, %v7503_v16  ;;  %v11247_v16 = vld [vmem:[%s17606_s5 + $0x178] sm:$0xf0] }
 0x919   : > { %v7202_v35 = vpop.f32.mrf.mxu2 }
 0x91a   : > { %v7203_v15 = vadd.f32 %v7202_v35, %v7154_v27  ;;  %v7251_v49 = vpop.f32.mrf.mxu3  ;;  %v7106_v32 = vpop.f32.mrf.mxu0  ;;  %v7641_v29 = vmax.f32 %v7577_v22, 0.0 }
 0x91c   : > { %v7155_v55 = vpop.f32.mrf.mxu1  ;;  %v7252_v59 = vadd.f32 %v7251_v49, %v7203_v15  ;;  %v17218_v30 = vpack.c.bf16 %v7641_v29, %v7637_v24  ;;  %v11909_v24 = vld [vmem:[%s17606_s5 + $0x1f4] sm:$0xf]  ;;  %v11311_v15 = vld [vmem:[%s17606_s5 + $0x1f8] sm:$0xf0] }
 0x91d   : > { %v7156_v7 = vadd.f32 %v7155_v55, %v7106_v32  ;;  %v11861_v49 = vld [vmem:[%s17606_s5 + $0x74] sm:$0xf]  ;;  %v11314_v29 = vor.u32 %v11909_v24, %v11311_v15  ;;  %v11119_v55 = vld [vmem:[%s17606_s5 + $0x78] sm:$0xf0] }
 0x91e   : > { %v7507_v57 = vadd.f32 %v7252_v59, %v18409_v48  ;;  %v11877_v59 = vld [vmem:[%s17606_s5 + $0xf4] sm:$0xf]  ;;  %v11122_v48 = vor.u32 %v11861_v49, %v11119_v55  ;;  %v18414_v49 = vld [vmem:[#allocation78_spill] sm:$0xff] }
 0x91f   : > { %8362 = vmatpush.bf16.msra.mxu3 %v11314_v29 }
 0x920   : > { %v7581_v43 = vadd.f32 %v16997_v19, %v7507_v57  ;;  %8239 = vmatpush.bf16.msra.mxu0 %v11122_v48 }
 0x921   : > { %v7204_v20 = vpop.f32.mrf.mxu2 }
 0x922   : > { %v7205_v3 = vadd.f32 %v7204_v20, %v7156_v7  ;;  %v7253_v34 = vpop.f32.mrf.mxu3  ;;  %v7109_v51 = vpop.f32.mrf.mxu0  ;;  %v7645_v58 = vmax.f32 %v7581_v43, 0.0  ;;  %v11183_v7 = vld [vmem:[%s17606_s5 + $0xf8] sm:$0xf0] }
 0x923   : > { %v11186_v57 = vor.u32 %v11877_v59, %v11183_v7 }
 0x924   : > { %v7158_v31 = vpop.f32.mrf.mxu1  ;;  %v7254_v0 = vadd.f32 %v7253_v34, %v7205_v3  ;;  %v18412_v3 = vld [vmem:[#allocation77_spill] sm:$0xff] }
 0x925   : > { %v7159_v53 = vadd.f32 %v7158_v31, %v7109_v51  ;;  %7304 = vmatmul.bf16.gmra.mxu0 %v18363_v26  ;;  %8280 = vmatpush.bf16.msra.mxu1 %v11186_v57 }
 0x926   : > { %v7511_v40 = vadd.f32 %v7254_v0, %v18410_v41  ;;  %7402 = vmatmul.bf16.gmra.mxu2 %v18365_v17 }
 0x927   : > { %7353 = vmatmul.bf16.gmra.mxu1 %v18364_v63  ;;  %7451 = vmatmul.bf16.gmra.mxu3 %v18366_v61  ;;  %v11893_v61 = vld [vmem:[%s17606_s5 + $0x174] sm:$0xf] }
 0x928   : > { %v7585_v38 = vadd.f32 %v16997_v19, %v7511_v40  ;;  %v11250_v35 = vor.u32 %v11893_v61, %v11247_v16  ;;  %v11111_v61 = vld [vmem:[%s17606_s5 + $0x68] sm:$0xf0]  ;;  %v11875_v16 = vld [vmem:[%s17606_s5 + $0xe4] sm:$0xf] }
 0x929   : > { %v7207_v12 = vpop.f32.mrf.mxu2 }
 0x92a   : > { %v7208_v44 = vadd.f32 %v7207_v12, %v7159_v53  ;;  %v7256_v60 = vpop.f32.mrf.mxu3  ;;  %v7111_v9 = vpop.f32.mrf.mxu0  ;;  %v7649_v33 = vmax.f32 %v7585_v38, 0.0  ;;  %8321 = vmatpush.bf16.msra.mxu2 %v11250_v35 }
 0x92c   : > { %v7160_v26 = vpop.f32.mrf.mxu1  ;;  %v7257_v46 = vadd.f32 %v7256_v60, %v7208_v44  ;;  %v17234_v27 = vpack.c.bf16 %v7649_v33, %v7645_v58  ;;  %v18413_v44 = vld [vmem:[#allocation181_spill] sm:$0xff] }
 0x92d   : > { %v7161_v50 = vadd.f32 %v7160_v26, %v7111_v9  ;;  %v17271_v9 = vperm.slane %v16994_v21, 3  ;;  %v11303_v21 = vld [vmem:[%s17606_s5 + $0x1e8] sm:$0xf0] }
 0x92e   : > { %v7515_v52 = vadd.f32 %v7257_v46, %v18411_v62  ;;  %v11891_v46 = vld [vmem:[%s17606_s5 + $0x164] sm:$0xf] }
 0x930   : > { %v7589_v20 = vadd.f32 %v16997_v19, %v7515_v52 }
 0x931   : > { %v7209_v63 = vpop.f32.mrf.mxu2 }
 0x932   : > { %v7210_v25 = vadd.f32 %v7209_v63, %v7161_v50  ;;  %v7258_v17 = vpop.f32.mrf.mxu3  ;;  %v7270_v47 = vpop.f32.mrf.mxu0  ;;  %v7653_v31 = vmax.f32 %v7589_v20, 0.0  ;;  %v11239_v50 = vld [vmem:[%s17606_s5 + $0x168] sm:$0xf0]  ;;  %v11907_v63 = vld [vmem:[%s17606_s5 + $0x1e4] sm:$0xf] }
 0x933   : > { %v11242_v52 = vor.u32 %v11891_v46, %v11239_v50  ;;  %v11103_v50 = vld [vmem:[%s17606_s5 + $0x58] sm:$0xf0] }
 0x934   : > { %v7319_v22 = vpop.f32.mrf.mxu1  ;;  %v7259_v32 = vadd.f32 %v7258_v17, %v7210_v25  ;;  %v11859_v25 = vld [vmem:[%s17606_s5 + $0x64] sm:$0xf] }
 0x935   : > { %8083 = vmatmul.bf16.vlgmr.msrb.gmra.mxu0 %v16511_v4  ;;  %v7320_v45 = vadd.f32 %v7319_v22, %v7270_v47  ;;  %v11306_v47 = vor.u32 %v11907_v63, %v11303_v21  ;;  %v11175_v22 = vld [vmem:[%s17606_s5 + $0xe8] sm:$0xf0]  ;;  %8322 = vmatpush.bf16.msra.mxu2 %v11242_v52  ;;  %v11114_v35 = vor.u32 %v11859_v25, %v11111_v61  ;;  %v11167_v52 = vld [vmem:[%s17606_s5 + $0xd8] sm:$0xf0] }
 0x936   : > { %v7519_v34 = vadd.f32 %v7259_v32, %v18412_v3  ;;  %8165 = vmatmul.bf16.vlgmr.msrb.gmra.mxu2 %v17030_v14  ;;  %v11178_v24 = vor.u32 %v11875_v16, %v11175_v22 }
 0x937   : > { %8124 = vmatmul.bf16.vlgmr.msrb.gmra.mxu1 %v16786_v10  ;;  %8363 = vmatpush.bf16.msra.mxu3 %v11306_v47 }
 0x938   : > { %v7593_v51 = vadd.f32 %v16997_v19, %v7519_v34  ;;  %8240 = vmatpush.bf16.msra.mxu0 %v11114_v35  ;;  %8281 = vmatpush.bf16.msra.mxu1 %v11178_v24 }
 0x939   : > { %v7368_v36 = vpop.f32.mrf.mxu2 }
 0x93a   : > { %v7369_v13 = vadd.f32 %v7368_v36, %v7320_v45  ;;  %v7417_v0 = vpop.f32.mrf.mxu3  ;;  %v7272_v53 = vpop.f32.mrf.mxu0  ;;  %v7657_v43 = vmax.f32 %v7593_v51, 0.0 }
 0x93c   : > { %v7321_v41 = vpop.f32.mrf.mxu1  ;;  %v17267_v40 = vpack.c.bf16 %v7657_v43, %v7653_v31  ;;  %v7418_v38 = vadd.f32 %v7417_v0, %v7369_v13  ;;  %v18415_v13 = vld [vmem:[#allocation182_spill] sm:$0xff] }
 0x93d   : > { %v7322_v12 = vadd.f32 %v7321_v41, %v7272_v53 }
 0x93e   : > { %v7460_v60 = vadd.f32 %v7418_v38, %v18413_v44  ;;  %v11889_v38 = vld [vmem:[%s17606_s5 + $0x154] sm:$0xf] }
 0x940   : > { %v7534_v15 = vadd.f32 %v17271_v9, %v7460_v60  ;;  %v11905_v60 = vld [vmem:[%s17606_s5 + $0x1d4] sm:$0xf] }
 0x941   : > { %v7370_v58 = vpop.f32.mrf.mxu2 }
 0x942   : > { %v7371_v19 = vadd.f32 %v7370_v58, %v7322_v12  ;;  %v7419_v33 = vpop.f32.mrf.mxu3  ;;  %v7275_v26 = vpop.f32.mrf.mxu0  ;;  %v7598_v7 = vmax.f32 %v7534_v15, 0.0  ;;  %v11231_v12 = vld [vmem:[%s17606_s5 + $0x158] sm:$0xf0] }
 0x943   : > { %v11234_v44 = vor.u32 %v11889_v38, %v11231_v12 }
 0x944   : > { %v7324_v62 = vpop.f32.mrf.mxu1  ;;  %v7420_v17 = vadd.f32 %v7419_v33, %v7371_v19  ;;  %v11295_v19 = vld [vmem:[%s17606_s5 + $0x1d8] sm:$0xf0]  ;;  %v11857_v33 = vld [vmem:[%s17606_s5 + $0x54] sm:$0xf] }
 0x945   : > { %8088 = vmatmul.bf16.gmra.mxu0 %v16545_v39  ;;  %v7325_v55 = vadd.f32 %v7324_v62, %v7275_v26  ;;  %v11298_v46 = vor.u32 %v11905_v60, %v11295_v19  ;;  %v11873_v62 = vld [vmem:[%s17606_s5 + $0xd4] sm:$0xf]  ;;  %8323 = vmatpush.bf16.msra.mxu2 %v11234_v44  ;;  %v11106_v63 = vor.u32 %v11857_v33, %v11103_v50  ;;  %v11871_v44 = vld [vmem:[%s17606_s5 + $0xc4] sm:$0xf]  ;;  %v11159_v60 = vld [vmem:[%s17606_s5 + $0xc8] sm:$0xf0] }
 0x946   : > { %v7464_v32 = vadd.f32 %v7420_v17, %v18414_v49  ;;  %8170 = vmatmul.bf16.gmra.mxu2 %v17064_v6  ;;  %v11170_v21 = vor.u32 %v11873_v62, %v11167_v52  ;;  %v18416_v17 = vld [vmem:[#allocation79_spill] sm:$0xff]  ;;  %v11162_v33 = vor.u32 %v11871_v44, %v11159_v60 }
 0x947   : > { %8129 = vmatmul.bf16.gmra.mxu1 %v16820_v18  ;;  %8364 = vmatpush.bf16.msra.mxu3 %v11298_v46  ;;  %v18418_v46 = vld [vmem:[#allocation80_spill] sm:$0xff]  ;;  %v18421_v60 = vld [vmem:[#allocation87_spill] sm:$0xff] }
 0x948   : > { %v7538_v29 = vadd.f32 %v17271_v9, %v7464_v32  ;;  %8241 = vmatpush.bf16.msra.mxu0 %v11106_v63  ;;  %8282 = vmatpush.bf16.msra.mxu1 %v11170_v21 }
 0x949   : > { %v7373_v59 = vpop.f32.mrf.mxu2 }
 0x94a   : > { %v7602_v48 = vmax.f32 %v7538_v29, 0.0  ;;  %v7374_v57 = vadd.f32 %v7373_v59, %v7325_v55  ;;  %v7422_v20 = vpop.f32.mrf.mxu3  ;;  %v7277_v3 = vpop.f32.mrf.mxu0 }
 0x94c   : > { %v7326_v34 = vpop.f32.mrf.mxu1  ;;  %v17303_v51 = vpack.c.bf16 %v7602_v48, %v7598_v7  ;;  %v7423_v45 = vadd.f32 %v7422_v20, %v7374_v57  ;;  %v18417_v57 = vld [vmem:[#allocation183_spill] sm:$0xff]  ;;  %8283 = vmatpush.bf16.msra.mxu1 %v11162_v33 }
 0x94d   : > { %v7327_v36 = vadd.f32 %v7326_v34, %v7277_v3 }
 0x94e   : > { %8206 = vmatmul.bf16.vlgmr.msrb.gmra.mxu3 %v17303_v51  ;;  %v7468_v0 = vadd.f32 %v7423_v45, %v18415_v13 }
 0x950   : > { %v7542_v25 = vadd.f32 %v17271_v9, %v7468_v0 }
 0x951   : > { %v7375_v31 = vpop.f32.mrf.mxu2 }
 0x952   : > { %v7376_v53 = vadd.f32 %v7375_v31, %v7327_v36  ;;  %v7424_v43 = vpop.f32.mrf.mxu3  ;;  %v7280_v41 = vpop.f32.mrf.mxu0  ;;  %v7606_v35 = vmax.f32 %v7542_v25, 0.0  ;;  %v11887_v36 = vld [vmem:[%s17606_s5 + $0x144] sm:$0xf]  ;;  %v11223_v31 = vld [vmem:[%s17606_s5 + $0x148] sm:$0xf0] }
 0x953   : > { %v11226_v0 = vor.u32 %v11887_v36, %v11223_v31  ;;  %v11853_v36 = vld [vmem:[%s17606_s5 + $0x34] sm:$0xf] }
 0x954   : > { %v7329_v58 = vpop.f32.mrf.mxu1  ;;  %v7425_v26 = vadd.f32 %v7424_v43, %v7376_v53  ;;  %v11903_v53 = vld [vmem:[%s17606_s5 + $0x1c4] sm:$0xf]  ;;  %v11287_v43 = vld [vmem:[%s17606_s5 + $0x1c8] sm:$0xf0] }
 0x955   : > { %8093 = vmatmul.bf16.gmra.mxu0 %v16579_v56  ;;  %v7330_v16 = vadd.f32 %v7329_v58, %v7280_v41  ;;  %v11855_v41 = vld [vmem:[%s17606_s5 + $0x44] sm:$0xf]  ;;  %v11290_v12 = vor.u32 %v11903_v53, %v11287_v43  ;;  %v11095_v58 = vld [vmem:[%s17606_s5 + $0x48] sm:$0xf0]  ;;  %8324 = vmatpush.bf16.msra.mxu2 %v11226_v0  ;;  %v11087_v0 = vld [vmem:[%s17606_s5 + $0x38] sm:$0xf0] }
 0x956   : > { %v7472_v47 = vadd.f32 %v7425_v26, %v18416_v17  ;;  %8175 = vmatmul.bf16.gmra.mxu2 %v17098_v5  ;;  %v11098_v19 = vor.u32 %v11855_v41, %v11095_v58  ;;  %v11869_v53 = vld [vmem:[%s17606_s5 + $0xb4] sm:$0xf]  ;;  %v11151_v43 = vld [vmem:[%s17606_s5 + $0xb8] sm:$0xf0]  ;;  %v11090_v41 = vor.u32 %v11853_v36, %v11087_v0  ;;  %v11867_v36 = vld [vmem:[%s17606_s5 + $0xa4] sm:$0xf] }
 0x957   : > { %8134 = vmatmul.bf16.gmra.mxu1 %v16854_v2  ;;  %8365 = vmatpush.bf16.msra.mxu3 %v11290_v12  ;;  %v18420_v58 = vld [vmem:[#allocation81_spill] sm:$0xff] }
 0x958   : > { %v7546_v61 = vadd.f32 %v17271_v9, %v7472_v47  ;;  %8242 = vmatpush.bf16.msra.mxu0 %v11098_v19 }
 0x959   : > { %v7378_v22 = vpop.f32.mrf.mxu2 }
 0x95a   : > { %v7379_v24 = vadd.f32 %v7378_v22, %v7330_v16  ;;  %v7427_v15 = vpop.f32.mrf.mxu3  ;;  %v7282_v49 = vpop.f32.mrf.mxu0  ;;  %v7610_v32 = vmax.f32 %v7546_v61, 0.0 }
 0x95c   : > { %v7331_v29 = vpop.f32.mrf.mxu1  ;;  %v17337_v55 = vpack.c.bf16 %v7610_v32, %v7606_v35  ;;  %v7428_v59 = vadd.f32 %v7427_v15, %v7379_v24  ;;  %8243 = vmatpush.bf16.msra.mxu0 %v11090_v41  ;;  %v18424_v41 = vld [vmem:[#allocation82_spill] sm:$0xff] }
 0x95d   : > { %v7332_v7 = vadd.f32 %v7331_v29, %v7282_v49  ;;  %v18419_v49 = vld [vmem:[#allocation184_spill] sm:$0xff] }
 0x95e   : > { %8211 = vmatmul.bf16.gmra.mxu3 %v17337_v55  ;;  %v7476_v20 = vadd.f32 %v7428_v59, %v18417_v57  ;;  %v11215_v57 = vld [vmem:[%s17606_s5 + $0x138] sm:$0xf0] }
 0x960   : > { %v7550_v26 = vadd.f32 %v17271_v9, %v7476_v20 }
 0x961   : > { %v7380_v48 = vpop.f32.mrf.mxu2 }
 0x962   : > { %v7381_v3 = vadd.f32 %v7380_v48, %v7332_v7  ;;  %v7429_v34 = vpop.f32.mrf.mxu3  ;;  %v7285_v45 = vpop.f32.mrf.mxu0  ;;  %v7614_v21 = vmax.f32 %v7550_v26, 0.0  ;;  %v11885_v48 = vld [vmem:[%s17606_s5 + $0x134] sm:$0xf] }
 0x964   : > { %v7334_v13 = vpop.f32.mrf.mxu1  ;;  %v7430_v38 = vadd.f32 %v7429_v34, %v7381_v3  ;;  %v11218_v3 = vor.u32 %v11885_v48, %v11215_v57  ;;  %v11901_v34 = vld [vmem:[%s17606_s5 + $0x1b4] sm:$0xf]  ;;  %v11899_v48 = vld [vmem:[%s17606_s5 + $0x1a4] sm:$0xf]  ;;  %v11271_v57 = vld [vmem:[%s17606_s5 + $0x1a8] sm:$0xf0] }
 0x965   : > { %8098 = vmatmul.bf16.gmra.mxu0 %v16613_v42  ;;  %v7335_v52 = vadd.f32 %v7334_v13, %v7285_v45  ;;  %v11279_v45 = vld [vmem:[%s17606_s5 + $0x1b8] sm:$0xf0] }
 0x966   : > { %v7480_v50 = vadd.f32 %v7430_v38, %v18418_v46  ;;  %8180 = vmatmul.bf16.gmra.mxu2 %v17132_v23  ;;  %v11282_v13 = vor.u32 %v11901_v34, %v11279_v45  ;;  %v11154_v38 = vor.u32 %v11869_v53, %v11151_v43  ;;  %v11274_v34 = vor.u32 %v11899_v48, %v11271_v57  ;;  %v11079_v45 = vld [vmem:[%s17606_s5 + $0x28] sm:$0xf0]  ;;  %v11863_v48 = vld [vmem:[%s17606_s5 + $0x84] sm:$0xf]  ;;  %v18425_v57 = vld [vmem:[#allocation186_spill] sm:$0xff] }
 0x967   : > { %8139 = vmatmul.bf16.gmra.mxu1 %v16888_v11  ;;  %8325 = vmatpush.bf16.msra.mxu2 %v11218_v3 }
 0x968   : > { %v7554_v62 = vadd.f32 %v17271_v9, %v7480_v50  ;;  %8366 = vmatpush.bf16.msra.mxu3 %v11282_v13  ;;  %8284 = vmatpush.bf16.msra.mxu1 %v11154_v38  ;;  %v18423_v13 = vld [vmem:[#allocation189_spill] sm:$0xff] }
 0x969   : > { %v7383_v63 = vpop.f32.mrf.mxu2 }
 0x96a   : > { %v7384_v25 = vadd.f32 %v7383_v63, %v7335_v52  ;;  %v7432_v17 = vpop.f32.mrf.mxu3  ;;  %v7287_v47 = vpop.f32.mrf.mxu0  ;;  %v7618_v61 = vmax.f32 %v7554_v62, 0.0 }
 0x96c   : > { %v7336_v16 = vpop.f32.mrf.mxu1  ;;  %v17371_v22 = vpack.c.bf16 %v7618_v61, %v7614_v21  ;;  %v7433_v35 = vadd.f32 %v7432_v17, %v7384_v25  ;;  %8367 = vmatpush.bf16.msra.mxu3 %v11274_v34 }
 0x96d   : > { %v7337_v24 = vadd.f32 %v7336_v16, %v7287_v47  ;;  %v18422_v16 = vld [vmem:[#allocation185_spill] sm:$0xff] }
 0x96e   : > { %8216 = vmatmul.bf16.gmra.mxu3 %v17371_v22  ;;  %v7484_v32 = vadd.f32 %v7433_v35, %v18419_v49 }
 0x970   : > { %v7558_v12 = vadd.f32 %v17271_v9, %v7484_v32  ;;  %v11883_v32 = vld [vmem:[%s17606_s5 + $0x124] sm:$0xf] }
 0x971   : > { %v7385_v15 = vpop.f32.mrf.mxu2 }
 0x972   : > { %v7386_v29 = vadd.f32 %v7385_v15, %v7337_v24  ;;  %v7434_v59 = vpop.f32.mrf.mxu3  ;;  %v7290_v7 = vpop.f32.mrf.mxu0  ;;  %v7622_v46 = vmax.f32 %v7558_v12, 0.0 }
 0x974   : > { %v7339_v20 = vpop.f32.mrf.mxu1  ;;  %v7435_v31 = vadd.f32 %v7434_v59, %v7386_v29  ;;  %v11207_v29 = vld [vmem:[%s17606_s5 + $0x128] sm:$0xf0] }
 0x975   : > { %8103 = vmatmul.bf16.gmra.mxu0 %v16647_v1  ;;  %v7340_v33 = vadd.f32 %v7339_v20, %v7290_v7  ;;  %v11210_v7 = vor.u32 %v11883_v32, %v11207_v29  ;;  %v11851_v20 = vld [vmem:[%s17606_s5 + $0x24] sm:$0xf] }
 0x976   : > { %v7488_v44 = vadd.f32 %v7435_v31, %v18420_v58  ;;  %8185 = vmatmul.bf16.gmra.mxu2 %v17166_v37  ;;  %v11143_v31 = vld [vmem:[%s17606_s5 + $0xa8] sm:$0xf0]  ;;  %v11082_v0 = vor.u32 %v11851_v20, %v11079_v45 }
 0x977   : > { %8144 = vmatmul.bf16.gmra.mxu1 %v18421_v60  ;;  %8326 = vmatpush.bf16.msra.mxu2 %v11210_v7  ;;  %v11146_v53 = vor.u32 %v11867_v36, %v11143_v31  ;;  %v11063_v7 = vld [vmem:[%s17606_s5 + $0x8] sm:$0xf0]  ;;  %v11897_v36 = vld [vmem:[%s17606_s5 + $0x194] sm:$0xf]  ;;  %v11263_v31 = vld [vmem:[%s17606_s5 + $0x198] sm:$0xf0] }
 0x978   : > { %v7562_v19 = vadd.f32 %v17271_v9, %v7488_v44  ;;  %8244 = vmatpush.bf16.msra.mxu0 %v11082_v0 }
 0x979   : > { %v7388_v26 = vpop.f32.mrf.mxu2  ;;  %8285 = vmatpush.bf16.msra.mxu1 %v11146_v53  ;;  %v11266_v53 = vor.u32 %v11897_v36, %v11263_v31 }
 0x97a   : > { %v7389_v50 = vadd.f32 %v7388_v26, %v7340_v33  ;;  %v7437_v62 = vpop.f32.mrf.mxu3  ;;  %v7292_v52 = vpop.f32.mrf.mxu0  ;;  %v7626_v63 = vmax.f32 %v7562_v19, 0.0 }
 0x97b   : > { %8368 = vmatpush.bf16.msra.mxu3 %v11266_v53 }
 0x97c   : > { %v7341_v21 = vpop.f32.mrf.mxu1  ;;  %v17405_v25 = vpack.c.bf16 %v7626_v63, %v7622_v46  ;;  %v7438_v17 = vadd.f32 %v7437_v62, %v7389_v50  ;;  %v11881_v63 = vld [vmem:[%s17606_s5 + $0x114] sm:$0xf] }
 0x97d   : > { %v7342_v47 = vadd.f32 %v7341_v21, %v7292_v52  ;;  %v11199_v21 = vld [vmem:[%s17606_s5 + $0x118] sm:$0xf0] }
 0x97e   : > { %8221 = vmatmul.bf16.gmra.mxu3 %v17405_v25  ;;  %v7492_v35 = vadd.f32 %v7438_v17, %v18422_v16  ;;  %v11849_v17 = vld [vmem:[%s17606_s5 + $0x14] sm:$0xf]  ;;  %v11071_v16 = vld [vmem:[%s17606_s5 + $0x18] sm:$0xf0] }
 0x980   : > { %v7566_v43 = vadd.f32 %v17271_v9, %v7492_v35  ;;  %v11865_v35 = vld [vmem:[%s17606_s5 + $0x94] sm:$0xf] }
 0x981   : > { %v7390_v61 = vpop.f32.mrf.mxu2 }
 0x982   : > { %v7391_v24 = vadd.f32 %v7390_v61, %v7342_v47  ;;  %v7439_v15 = vpop.f32.mrf.mxu3  ;;  %v7295_v49 = vpop.f32.mrf.mxu0  ;;  %v7630_v19 = vmax.f32 %v7566_v43, 0.0  ;;  %v11202_v61 = vor.u32 %v11881_v63, %v11199_v21 }
 0x984   : > { %v7344_v59 = vpop.f32.mrf.mxu1  ;;  %v7440_v3 = vadd.f32 %v7439_v15, %v7391_v24  ;;  %v11135_v24 = vld [vmem:[%s17606_s5 + $0x98] sm:$0xf0]  ;;  %v11074_v15 = vor.u32 %v11849_v17, %v11071_v16  ;;  %8327 = vmatpush.bf16.msra.mxu2 %v11202_v61 }
 0x985   : > { %8106 = vmatmul.bf16.gmra.mxu0 %v18423_v13  ;;  %v7345_v58 = vadd.f32 %v7344_v59, %v7295_v49  ;;  %v11138_v49 = vor.u32 %v11865_v35, %v11135_v24  ;;  %v11847_v59 = vld [vmem:[%s17606_s5 + $0x4] sm:$0xf] }
 0x986   : > { %v7496_v38 = vadd.f32 %v7440_v3, %v18424_v41  ;;  %8188 = vmatmul.bf16.gmra.mxu2 %v17218_v30  ;;  %8245 = vmatpush.bf16.msra.mxu0 %v11074_v15  ;;  %v11066_v43 = vor.u32 %v11847_v59, %v11063_v7  ;;  %v11127_v41 = vld [vmem:[%s17606_s5 + $0x88] sm:$0xf0] }
 0x987   : > { %8147 = vmatmul.bf16.gmra.mxu1 %v16944_v54 }
 0x988   : > { %v7570_v12 = vadd.f32 %v17271_v9, %v7496_v38  ;;  %8286 = vmatpush.bf16.msra.mxu1 %v11138_v49  ;;  %v11879_v38 = vld [vmem:[%s17606_s5 + $0x104] sm:$0xf] }
 0x989   : > { %v7393_v44 = vpop.f32.mrf.mxu2 }
 0x98a   : > { %v7394_v33 = vadd.f32 %v7393_v44, %v7345_v58  ;;  %v7442_v26 = vpop.f32.mrf.mxu3  ;;  %v7297_v46 = vpop.f32.mrf.mxu0  ;;  %v7634_v50 = vmax.f32 %v7570_v12, 0.0  ;;  %v11191_v12 = vld [vmem:[%s17606_s5 + $0x108] sm:$0xf0]  ;;  %v11130_v44 = vor.u32 %v11863_v48, %v11127_v41  ;;  %8246 = vmatpush.bf16.msra.mxu0 %v11066_v43 }
 0x98b   : > { %v18430_v43 = vld [vmem:[#allocation84_spill] sm:$0xff] }
 0x98c   : > { %v7346_v62 = vpop.f32.mrf.mxu1  ;;  %v17439_v52 = vpack.c.bf16 %v7634_v50, %v7630_v19  ;;  %v7443_v47 = vadd.f32 %v7442_v26, %v7394_v33  ;;  %v11194_v19 = vor.u32 %v11879_v38, %v11191_v12  ;;  %v18426_v33 = vld [vmem:[#allocation86_spill] sm:$0xff]  ;;  %8287 = vmatpush.bf16.msra.mxu1 %v11130_v44 }
 0x98d   : > { %v7347_v32 = vadd.f32 %v7346_v62, %v7297_v46  ;;  %v18427_v46 = vld [vmem:[#allocation83_spill] sm:$0xff] }
 0x98e   : > { %8226 = vmatmul.bf16.gmra.mxu3 %v17439_v52  ;;  %v7500_v20 = vadd.f32 %v7443_v47, %v18425_v57  ;;  %8328 = vmatpush.bf16.msra.mxu2 %v11194_v19  ;;  %v18428_v57 = vld [vmem:[#allocation187_spill] sm:$0xff] }
 0x990   : > { %v7574_v26 = vadd.f32 %v17271_v9, %v7500_v20 }
 0x991   : > { %v7395_v29 = vpop.f32.mrf.mxu2 }
 0x992   : > { %v7396_v3 = vadd.f32 %v7395_v29, %v7347_v32  ;;  %v7444_v34 = vpop.f32.mrf.mxu3  ;;  %v7300_v45 = vpop.f32.mrf.mxu0  ;;  %v7638_v17 = vmax.f32 %v7574_v26, 0.0  ;;  %v11895_v32 = vld [vmem:[%s17606_s5 + $0x184] sm:$0xf]  ;;  %v11255_v29 = vld [vmem:[%s17606_s5 + $0x188] sm:$0xf0] }
 0x993   : > { %v11258_v59 = vor.u32 %v11895_v32, %v11255_v29 }
 0x994   : > { %v7349_v0 = vpop.f32.mrf.mxu1  ;;  %v7445_v58 = vadd.f32 %v7444_v34, %v7396_v3 }
 0x995   : > { %8109 = vmatmul.bf16.gmra.mxu0 %v18426_v33  ;;  %v7350_v63 = vadd.f32 %v7349_v0, %v7300_v45  ;;  %8369 = vmatpush.bf16.msra.mxu3 %v11258_v59  ;;  %v18429_v0 = vld [vmem:[#allocation190_spill] sm:$0xff] }
 0x996   : > { %v7504_v50 = vadd.f32 %v7445_v58, %v18427_v46  ;;  %8191 = vmatmul.bf16.gmra.mxu2 %v17234_v27 }
 0x997   : > { %8150 = vmatmul.bf16.gmra.mxu1 %v16954_v28 }
 0x998   : > { %v7578_v62 = vadd.f32 %v17271_v9, %v7504_v50 }
 0x999   : > { %v7398_v21 = vpop.f32.mrf.mxu2 }
 0x99a   : > { %v7399_v47 = vadd.f32 %v7398_v21, %v7350_v63  ;;  %v7447_v61 = vpop.f32.mrf.mxu3  ;;  %v7302_v16 = vpop.f32.mrf.mxu0  ;;  %v7642_v35 = vmax.f32 %v7578_v62, 0.0 }
 0x99c   : > { %v7351_v24 = vpop.f32.mrf.mxu1  ;;  %v17491_v15 = vpack.c.bf16 %v7642_v35, %v7638_v17  ;;  %v7448_v49 = vadd.f32 %v7447_v61, %v7399_v47  ;;  %v18431_v61 = vld [vmem:[#allocation188_spill] sm:$0xff] }
 0x99d   : > { %v7352_v7 = vadd.f32 %v7351_v24, %v7302_v16 }
 0x99e   : > { %8229 = vmatmul.bf16.gmra.mxu3 %v17491_v15  ;;  %v7508_v20 = vadd.f32 %v7448_v49, %v18428_v57 }
 0x9a0   : > { %v7582_v53 = vadd.f32 %v17271_v9, %v7508_v20 }
 0x9a1   : > { %v7400_v48 = vpop.f32.mrf.mxu2 }
 0x9a2   : > { %v7401_v3 = vadd.f32 %v7400_v48, %v7352_v7  ;;  %v7449_v34 = vpop.f32.mrf.mxu3  ;;  %v7305_v45 = vpop.f32.mrf.mxu0  ;;  %v7646_v44 = vmax.f32 %v7582_v53, 0.0  ;;  %v18432_v48 = vld [vmem:[#allocation85_spill] sm:$0xff] }
 0x9a4   : > { %v7354_v36 = vpop.f32.mrf.mxu1  ;;  %v7450_v31 = vadd.f32 %v7449_v34, %v7401_v3 }
 0x9a5   : > { %8112 = vmatmul.bf16.gmra.mxu0 %v18429_v0  ;;  %v7355_v12 = vadd.f32 %v7354_v36, %v7305_v45 }
 0x9a6   : > { %v7512_v41 = vadd.f32 %v7450_v31, %v18430_v43  ;;  %8194 = vmatmul.bf16.gmra.mxu2 %v17267_v40 }
 0x9a7   : > { %8153 = vmatmul.bf16.gmra.mxu1 %v16988_v8 }
 0x9a8   : > { %v7586_v38 = vadd.f32 %v17271_v9, %v7512_v41 }
 0x9a9   : > { %v7403_v58 = vpop.f32.mrf.mxu2 }
 0x9aa   : > { %v7404_v19 = vadd.f32 %v7403_v58, %v7355_v12  ;;  %v7452_v26 = vpop.f32.mrf.mxu3  ;;  %v7307_v46 = vpop.f32.mrf.mxu0  ;;  %v7650_v50 = vmax.f32 %v7586_v38, 0.0 }
 0x9ac   : > { %v7356_v62 = vpop.f32.mrf.mxu1  ;;  %v17507_v63 = vpack.c.bf16 %v7650_v50, %v7646_v44  ;;  %v7453_v21 = vadd.f32 %v7452_v26, %v7404_v19 }
 0x9ad   : > { %v7357_v17 = vadd.f32 %v7356_v62, %v7307_v46 }
 0x9ae   : > { %8232 = vmatmul.bf16.gmra.mxu3 %v17507_v63  ;;  %v7516_v16 = vadd.f32 %v7453_v21, %v18431_v61 }
 0x9b0   : > { %v7590_v7 = vadd.f32 %v17271_v9, %v7516_v16 }
 0x9b1   : > { %v7405_v47 = vpop.f32.mrf.mxu2 }
 0x9b2   : > { %v7406_v35 = vadd.f32 %v7405_v47, %v7357_v17  ;;  %v8084_v24 = vpop.f32.mrf.mxu0  ;;  %v7454_v49 = vpop.f32.mrf.mxu3  ;;  %v7654_v34 = vmax.f32 %v7590_v7, 0.0 }
 0x9b4   : > { %v8125_v32 = vpop.f32.mrf.mxu1  ;;  %v7455_v29 = vadd.f32 %v7454_v49, %v7406_v35 }
 0x9b5   : > { %v8126_v59 = vadd.f32 %v8125_v32, %v8084_v24  ;;  %8247 = vmatmul.bf16.vlgmr.msra.gmra.mxu0 %v16511_v4 }
 0x9b6   : > { %v7520_v57 = vadd.f32 %v7455_v29, %v18432_v48  ;;  %8329 = vmatmul.bf16.vlgmr.msra.gmra.mxu2 %v17030_v14 }
 0x9b7   : > { %8288 = vmatmul.bf16.vlgmr.msra.gmra.mxu1 %v16786_v10 }
 0x9b8   : > { %v7594_v20 = vadd.f32 %v17271_v9, %v7520_v57 }
 0x9b9   : > { %v8166_v3 = vpop.f32.mrf.mxu2 }
 0x9ba   : > { %v8167_v45 = vadd.f32 %v8166_v3, %v8126_v59  ;;  %v8086_v36 = vpop.f32.mrf.mxu0  ;;  %v7658_v31 = vmax.f32 %v7594_v20, 0.0 }
 0x9bc   : > { %v8127_v53 = vpop.f32.mrf.mxu1  ;;  %v17517_v43 = vpack.c.bf16 %v7658_v31, %v7654_v34 }
 0x9bd   : > { %v8128_v46 = vadd.f32 %v8127_v53, %v8086_v36 }
 0x9be   : > { %8235 = vmatmul.bf16.gmra.mxu3 %v17517_v43 }
 0x9c1   : > { %v8168_v4 = vpop.f32.mrf.mxu2 }
 0x9c2   : > { %v8089_v41 = vpop.f32.mrf.mxu0 }
 0x9c4   : > { %v8130_v38 = vpop.f32.mrf.mxu1 }
 0x9c5   : > { %8250 = vmatmul.bf16.gmra.mxu0 %v16545_v39  ;;  %v8169_v39 = vadd.f32 %v8168_v4, %v8128_v46 }
 0x9c6   : > { %8332 = vmatmul.bf16.gmra.mxu2 %v17064_v6 }
 0x9c7   : > { %8291 = vmatmul.bf16.gmra.mxu1 %v16820_v18 }
 0x9c9   : > { %v8171_v10 = vpop.f32.mrf.mxu2 }
 0x9ca   : > { %v8091_v14 = vpop.f32.mrf.mxu0 }
 0x9cc   : > { %v8132_v9 = vpop.f32.mrf.mxu1 }
 0x9ce   : > { %8370 = vmatmul.bf16.vlgmr.msra.gmra.mxu3 %v17303_v51  ;;  %v8131_v51 = vadd.f32 %v8130_v38, %v8089_v41 }
 0x9d0   : > { %v8172_v17 = vadd.f32 %v8171_v10, %v8131_v51 }
 0x9d1   : > { %v8173_v12 = vpop.f32.mrf.mxu2  ;;  %v8207_v58 = vpop.f32.mrf.mxu3 }
 0x9d2   : > { %v17524_v44 = vadd.f32 %v8207_v58, %v8167_v45  ;;  %v8094_v19 = vpop.f32.mrf.mxu0 }
 0x9d4   : > { %v8135_v26 = vpop.f32.mrf.mxu1 }
 0x9d5   : > { %8253 = vmatmul.bf16.gmra.mxu0 %v16579_v56  ;;  %v8136_v59 = vadd.f32 %v8135_v26, %v8094_v19 }
 0x9d6   : > { %8335 = vmatmul.bf16.gmra.mxu2 %v17098_v5  ;;  %v8133_v5 = vadd.f32 %v8132_v9, %v8091_v14 }
 0x9d7   : > { %8294 = vmatmul.bf16.gmra.mxu1 %v16854_v2 }
 0x9d8   : > { %v8174_v35 = vadd.f32 %v8173_v12, %v8133_v5 }
 0x9d9   : > { %v8176_v18 = vpop.f32.mrf.mxu2  ;;  %v8209_v6 = vpop.f32.mrf.mxu3 }
 0x9da   : > { %v8096_v50 = vpop.f32.mrf.mxu0  ;;  %v8210_v62 = vadd.f32 %v8209_v6, %v8169_v39  ;;  %v8177_v7 = vadd.f32 %v8176_v18, %v8136_v59 }
 0x9dc   : > { %v8137_v21 = vpop.f32.mrf.mxu1  ;;  %8404 = vrot.lane.b32.xlu0 %v8210_v62, %s12026_s17 }
 0x9de   : > { %8373 = vmatmul.bf16.gmra.mxu3 %v17337_v55 }
 0x9e1   : > { %v8178_v47 = vpop.f32.mrf.mxu2  ;;  %v8212_v56 = vpop.f32.mrf.mxu3 }
 0x9e2   : > { %v8213_v61 = vadd.f32 %v8212_v56, %v8172_v17  ;;  %v8099_v16 = vpop.f32.mrf.mxu0 }
 0x9e4   : > { %v8140_v2 = vpop.f32.mrf.mxu1  ;;  %8409 = vrot.lane.b32.xlu0 %v8213_v61, %s12027_s18 }
 0x9e5   : > { %8256 = vmatmul.bf16.gmra.mxu0 %v16613_v42  ;;  %v8141_v53 = vadd.f32 %v8140_v2, %v8099_v16 }
 0x9e6   : > { %8338 = vmatmul.bf16.gmra.mxu2 %v17132_v23  ;;  %v8138_v23 = vadd.f32 %v8137_v21, %v8096_v50 }
 0x9e7   : > { %8297 = vmatmul.bf16.gmra.mxu1 %v16888_v11 }
 0x9e8   : > { %v8179_v3 = vadd.f32 %v8178_v47, %v8138_v23 }
 0x9e9   : > { %v8181_v24 = vpop.f32.mrf.mxu2  ;;  %v8214_v49 = vpop.f32.mrf.mxu3 }
 0x9ea   : > { %v8101_v55 = vpop.f32.mrf.mxu0  ;;  %v8215_v32 = vadd.f32 %v8214_v49, %v8174_v35  ;;  %v8182_v4 = vadd.f32 %v8181_v24, %v8141_v53 }
 0x9ec   : > { %v8142_v29 = vpop.f32.mrf.mxu1  ;;  %8414 = vrot.lane.b32.xlu1 %v8215_v32, %s12028_s20 }
 0x9ee   : > { %8376 = vmatmul.bf16.gmra.mxu3 %v17371_v22 }
 0x9f1   : > { %v8183_v48 = vpop.f32.mrf.mxu2  ;;  %v8217_v42 = vpop.f32.mrf.mxu3 }
 0x9f2   : > { %v8218_v57 = vadd.f32 %v8217_v42, %v8177_v7  ;;  %v8104_v20 = vpop.f32.mrf.mxu0 }
 0x9f4   : > { %v8145_v11 = vpop.f32.mrf.mxu1  ;;  %8419 = vrot.lane.b32.xlu1 %v8218_v57, %s12029_s21 }
 0x9f5   : > { %8259 = vmatmul.bf16.gmra.mxu0 %v16647_v1 }
 0x9f6   : > { %8341 = vmatmul.bf16.gmra.mxu2 %v17166_v37  ;;  %v8143_v37 = vadd.f32 %v8142_v29, %v8101_v55 }
 0x9f7   : > { %8300 = vmatmul.bf16.gmra.mxu1 %v18421_v60 }
 0x9f8   : > { %v8184_v14 = vadd.f32 %v8183_v48, %v8143_v37 }
 0x9f9   : > { %v8186_v34 = vpop.f32.mrf.mxu2  ;;  %v8219_v45 = vpop.f32.mrf.mxu3 }
 0x9fa   : > { %v8105_v22 = vpop.f32.mrf.mxu0  ;;  %v8220_v36 = vadd.f32 %v8219_v45, %v8179_v3 }
 0x9fc   : > { %v8146_v31 = vpop.f32.mrf.mxu1  ;;  %8424 = vrot.lane.b32.xlu2 %v8220_v36, %s12030_s22 }
 0x9fe   : > { %8379 = vmatmul.bf16.gmra.mxu3 %v17405_v25 }
 0xa01   : > { %v8187_v41 = vpop.f32.mrf.mxu2  ;;  %v8222_v1 = vpop.f32.mrf.mxu3 }
 0xa02   : > { %v8223_v38 = vadd.f32 %v8222_v1, %v8182_v4  ;;  %v8107_v10 = vpop.f32.mrf.mxu0 }
 0xa04   : > { %v8148_v60 = vpop.f32.mrf.mxu1  ;;  %8429 = vrot.lane.b32.xlu2 %v8223_v38, %s12031_s23 }
 0xa05   : > { %8264 = vmatmul.bf16.gmra.mxu0 %v18423_v13 }
 0xa06   : > { %8346 = vmatmul.bf16.gmra.mxu2 %v17218_v30 }
 0xa07   : > { %8305 = vmatmul.bf16.gmra.mxu1 %v16944_v54 }
 0xa09   : > { %v8189_v9 = vpop.f32.mrf.mxu2  ;;  %v8224_v12 = vpop.f32.mrf.mxu3 }
 0xa0a   : > { %v8225_v25 = vadd.f32 %v8224_v12, %v8184_v14  ;;  %v8108_v58 = vpop.f32.mrf.mxu0 }
 0xa0c   : > { %v8149_v19 = vpop.f32.mrf.mxu1  ;;  %8434 = vrot.lane.b32.xlu0 %v8225_v25, %s12032_s19 }
 0xa0e   : > { %8382 = vmatmul.bf16.gmra.mxu3 %v17439_v52 }
 0xa11   : > { %v8190_v26 = vpop.f32.mrf.mxu2  ;;  %v8227_v46 = vpop.f32.mrf.mxu3 }
 0xa12   : > { %v8110_v39 = vpop.f32.mrf.mxu0 }
 0xa14   : > { %v8151_v13 = vpop.f32.mrf.mxu1 }
 0xa15   : > { %8269 = vmatmul.bf16.gmra.mxu0 %v18426_v33 }
 0xa16   : > { %8351 = vmatmul.bf16.gmra.mxu2 %v17234_v27 }
 0xa17   : > { %8310 = vmatmul.bf16.gmra.mxu1 %v16954_v28 }
 0xa19   : > { %v8192_v54 = vpop.f32.mrf.mxu2  ;;  %v8228_v30 = vpop.f32.mrf.mxu3 }
 0xa1a   : > { %v8111_v18 = vpop.f32.mrf.mxu0 }
 0xa1c   : > { %v8152_v6 = vpop.f32.mrf.mxu1 }
 0xa1e   : > { %8387 = vmatmul.bf16.gmra.mxu3 %v17491_v15 }
 0xa21   : > { %v8193_v50 = vpop.f32.mrf.mxu2  ;;  %v8230_v62 = vpop.f32.mrf.mxu3 }
 0xa22   : > { %v8113_v21 = vpop.f32.mrf.mxu0 }
 0xa24   : > { %v8154_v52 = vpop.f32.mrf.mxu1 }
 0xa25   : > { %8274 = vmatmul.bf16.gmra.mxu0 %v18429_v0 }
 0xa26   : > { %8356 = vmatmul.bf16.gmra.mxu2 %v17267_v40 }
 0xa27   : > { %8315 = vmatmul.bf16.gmra.mxu1 %v16988_v8 }
 0xa29   : > { %v8195_v33 = vpop.f32.mrf.mxu2  ;;  %v8231_v28 = vpop.f32.mrf.mxu3 }
 0xa2a   : > { %v8114_v51 = vpop.f32.mrf.mxu0 }
 0xa2c   : > { %v8155_v27 = vpop.f32.mrf.mxu1 }
 0xa2e   : > { %8392 = vmatmul.bf16.gmra.mxu3 %v17507_v63 }
 0xa31   : > { %v8196_v17 = vpop.f32.mrf.mxu2  ;;  %v8233_v47 = vpop.f32.mrf.mxu3 }
 0xa32   : > { %v8248_v56 = vpop.f32.mrf.mxu0 }
 0xa34   : > { %v8289_v15 = vpop.f32.mrf.mxu1 }
 0xa39   : > { %v8234_v61 = vpop.f32.mrf.mxu3  ;;  %v8330_v16 = vpop.f32.mrf.mxu2 }
 0xa3a   : > { %v8249_v2 = vpop.f32.mrf.mxu0 }
 0xa3c   : > { %v8290_v5 = vpop.f32.mrf.mxu1 }
 0xa3e   : > { %8397 = vmatmul.bf16.gmra.mxu3 %v17517_v43 }
 0xa41   : > { %v8236_v0 = vpop.f32.mrf.mxu3  ;;  %v8331_v8 = vpop.f32.mrf.mxu2 }
 0xa42   : > { %v8251_v35 = vpop.f32.mrf.mxu0 }
 0xa44   : > { %v8292_v40 = vpop.f32.mrf.mxu1 }
 0xa49   : > { %v8237_v24 = vpop.f32.mrf.mxu3  ;;  %v8333_v49 = vpop.f32.mrf.mxu2 }
 0xa4a   : > { %v8252_v55 = vpop.f32.mrf.mxu0 }
 0xa4c   : > { %v8293_v32 = vpop.f32.mrf.mxu1 }
 0xa4e   : > { %v8405_v38 = vpop.permute.xlu0 %8404 }
 0xa4f   : > { %v8407_v25 = vadd.f32 %v8405_v38, %v17524_v44 }
 0xa51   : > { %v8334_v29 = vpop.f32.mrf.mxu2  ;;  %v8371_v63 = vpop.f32.mrf.mxu3 }
 0xa52   : > { %v8254_v59 = vpop.f32.mrf.mxu0 }
 0xa54   : > { %v8295_v7 = vpop.f32.mrf.mxu1 }
 0xa56   : > { %v8410_v9 = vpop.permute.xlu0 %8409  ;;  %v8425_v19 = vpop.permute.xlu2 %8424 }
 0xa57   : > { %v8412_v58 = vadd.f32 %v8410_v9, %v8407_v25 }
 0xa59   : > { %v8336_v48 = vpop.f32.mrf.mxu2  ;;  %v8372_v42 = vpop.f32.mrf.mxu3 }
 0xa5a   : > { %v8255_v57 = vpop.f32.mrf.mxu0 }
 0xa5c   : > { %v8296_v20 = vpop.f32.mrf.mxu1 }
 0xa5e   : > { %v8415_v14 = vpop.permute.xlu1 %8414  ;;  %v8430_v50 = vpop.permute.xlu2 %8429 }
 0xa5f   : > { %v8417_v46 = vadd.f32 %v8415_v14, %v8412_v58 }
 0xa61   : > { %v8337_v11 = vpop.f32.mrf.mxu2  ;;  %v8374_v23 = vpop.f32.mrf.mxu3 }
 0xa62   : > { %v8257_v3 = vpop.f32.mrf.mxu0 }
 0xa64   : > { %v8298_v43 = vpop.f32.mrf.mxu1 }
 0xa66   : > { %v8420_v26 = vpop.permute.xlu1 %8419 }
 0xa67   : > { %v8422_v54 = vadd.f32 %v8420_v26, %v8417_v46 }
 0xa69   : > { %v8339_v34 = vpop.f32.mrf.mxu2  ;;  %v8375_v45 = vpop.f32.mrf.mxu3  ;;  %v8427_v6 = vadd.f32 %v8425_v19, %v8422_v54 }
 0xa6a   : > { %v8258_v22 = vpop.f32.mrf.mxu0 }
 0xa6b   : > { %v8432_v21 = vadd.f32 %v8430_v50, %v8427_v6 }
 0xa6c   : > { %v8299_v36 = vpop.f32.mrf.mxu1 }
 0xa71   : > { %v8340_v31 = vpop.f32.mrf.mxu2  ;;  %v8377_v53 = vpop.f32.mrf.mxu3 }
 0xa72   : > { %v8260_v4 = vpop.f32.mrf.mxu0 }
 0xa74   : > { %v8301_v41 = vpop.f32.mrf.mxu1 }
 0xa75   : > { %v8302_v1 = vadd.f32 %v8301_v41, %v8260_v4 }
 0xa79   : > { %v8342_v10 = vpop.f32.mrf.mxu2  ;;  %v8378_v60 = vpop.f32.mrf.mxu3 }
 0xa7a   : > { %v8343_v37 = vadd.f32 %v8342_v10, %v8302_v1  ;;  %v8262_v39 = vpop.f32.mrf.mxu0 }
 0xa7c   : > { %v8303_v13 = vpop.f32.mrf.mxu1 }
 0xa7d   : > { %v8304_v47 = vadd.f32 %v8303_v13, %v8262_v39 }
 0xa7e   : > { %v8435_v62 = vpop.permute.xlu0 %8434 }
 0xa7f   : > { %v8437_v51 = vadd.f32 %v8435_v62, %v8432_v21  ;;  %v11959_v62 = vld [vmem:[%s17607_s6] ss:$0 sm:$0xff] }
 0xa81   : > { %v8380_v12 = vpop.f32.mrf.mxu3  ;;  %v8344_v30 = vpop.f32.mrf.mxu2 }
 0xa82   : > { %v8265_v52 = vpop.f32.mrf.mxu0  ;;  %v8345_v56 = vadd.f32 %v8344_v30, %v8304_v47 }
 0xa84   : > { %v8306_v33 = vpop.f32.mrf.mxu1 }
 0xa85   : > { %v8307_v0 = vadd.f32 %v8306_v33, %v8265_v52 }
 0xa89   : > { %v8381_v18 = vpop.f32.mrf.mxu3  ;;  %v8347_v17 = vpop.f32.mrf.mxu2 }
 0xa8a   : > { %v8267_v61 = vpop.f32.mrf.mxu0  ;;  %v8348_v8 = vadd.f32 %v8347_v17, %v8307_v0 }
 0xa8c   : > { %v8308_v2 = vpop.f32.mrf.mxu1 }
 0xa8d   : > { %v8309_v55 = vadd.f32 %v8308_v2, %v8267_v61 }
 0xa91   : > { %v8383_v28 = vpop.f32.mrf.mxu3  ;;  %v8349_v5 = vpop.f32.mrf.mxu2 }
 0xa92   : > { %v8384_v27 = vadd.f32 %v8383_v28, %v8343_v37  ;;  %v8270_v24 = vpop.f32.mrf.mxu0  ;;  %v8350_v29 = vadd.f32 %v8349_v5, %v8309_v55 }
 0xa94   : > { %v8438_v44 = vadd.f32 %v8437_v51, %v8384_v27  ;;  %v8311_v49 = vpop.f32.mrf.mxu1 }
 0xa95   : > { %v8312_v7 = vadd.f32 %v8311_v49, %v8270_v24 }
 0xa99   : > { %v8385_v15 = vpop.f32.mrf.mxu3  ;;  %v8352_v32 = vpop.f32.mrf.mxu2 }
 0xa9a   : > { %v8386_v16 = vadd.f32 %v8385_v15, %v8345_v56  ;;  %v8272_v48 = vpop.f32.mrf.mxu0  ;;  %v8353_v57 = vadd.f32 %v8352_v32, %v8312_v7 }
 0xa9c   : > { %8440 = vrot.lane.b32.xlu1 %v8386_v16, %s12026_s17  ;;  %v8313_v42 = vpop.f32.mrf.mxu1 }
 0xa9d   : > { %v8314_v3 = vadd.f32 %v8313_v42, %v8272_v48 }
 0xaa1   : > { %v8388_v35 = vpop.f32.mrf.mxu3  ;;  %v8354_v20 = vpop.f32.mrf.mxu2 }
 0xaa2   : > { %v8389_v40 = vadd.f32 %v8388_v35, %v8348_v8  ;;  %v8355_v43 = vadd.f32 %v8354_v20, %v8314_v3  ;;  %v8275_v34 = vpop.f32.mrf.mxu0 }
 0xaa4   : > { %8445 = vrot.lane.b32.xlu2 %v8389_v40, %s12027_s18  ;;  %v8316_v45 = vpop.f32.mrf.mxu1  ;;  %s271_s18 = scalar_lea.vmem [#allocation2], %s8561_s9 }
 0xaa5   : > { %v8317_v53 = vadd.f32 %v8316_v45, %v8275_v34 }
 0xaa9   : > { %v8390_v63 = vpop.f32.mrf.mxu3  ;;  %v8357_v31 = vpop.f32.mrf.mxu2 }
 0xaaa   : > { %v8391_v59 = vadd.f32 %v8390_v63, %v8350_v29  ;;  %v8358_v4 = vadd.f32 %v8357_v31, %v8317_v53  ;;  %v8277_v38 = vpop.f32.mrf.mxu0 }
 0xaac   : > { %8450 = vrot.lane.b32.xlu0 %v8391_v59, %s12028_s20  ;;  %v8318_v10 = vpop.f32.mrf.mxu1  ;;  %s8495_s20 = sshll.u32 %s271_s18, 4  ;;  %s8496_s20 = int_to_ptr.vmem [resolvable:$true] %s8495_s20 }
 0xaad   : > { %v8319_v37 = vadd.f32 %v8318_v10, %v8277_v38 }
 0xab1   : > { %v8393_v11 = vpop.f32.mrf.mxu3  ;;  %v8359_v60 = vpop.f32.mrf.mxu2 }
 0xab2   : > { %v8394_v23 = vadd.f32 %v8393_v11, %v8353_v57  ;;  %v8360_v14 = vadd.f32 %v8359_v60, %v8319_v37 }
 0xab4   : > { %8455 = vrot.lane.b32.xlu1 %v8394_v23, %s12029_s21  ;;  %s8497_s21 = sshll.u32 %s8493_s16, 4  ;;  %s8498_s21 = int_to_ptr.hbm [resolvable:$true] %s8497_s21 }
 0xab9   : > { %v8395_v22 = vpop.f32.mrf.mxu3 }
 0xaba   : > { %v8396_v36 = vadd.f32 %v8395_v22, %v8355_v43 }
 0xabc   : > { %8460 = vrot.lane.b32.xlu2 %v8396_v36, %s12030_s22  ;;  %s11975_s22 = sshra.s32 %s8498_s21, 4  ;;  %s11976_s22 = int_to_ptr.hbm [resolvable:$true] %s11975_s22 }
 0xabd   : > { %p11982_p0 = scmp.lt.s32.totalorder %s11976_s22, %s17608_s7 }
 0xac1   : > { %v8398_v41 = vpop.f32.mrf.mxu3 }
 0xac2   : > { %v8399_v1 = vadd.f32 %v8398_v41, %v8358_v4 }
 0xac4   : > { %8465 = vrot.lane.b32.xlu0 %v8399_v1, %s12031_s23  ;;  %s11977_s23 = scalar_lea.hbm %s11976_s22, 8 }
 0xac5   : > { %p11978_p11 = scmp.ne.s32.totalorder %s11976_s22, %s11977_s23  ;;  %p11983_p1 = scmp.lt.s32.totalorder %s11981_s29, %s11977_s23 }
 0xac7   : > { %p11979_p12 = pnand %p11978_p11, %p12111_p5  ;;  %p11984_p2 = por %p11983_p1, %p11982_p0 }
 0xac9   : > { %v8400_v9 = vpop.f32.mrf.mxu3  ;;  %p11980_p13 = pneg %p11979_p12 }
 0xaca   : > { %v8401_v12 = vadd.f32 %v8400_v9, %v8360_v14 }
 0xacb   : > { %p11985_p3 = pnand %p11984_p2, %p11980_p13 }
 0xacc   : > { %8470 = vrot.lane.b32.xlu1 %v8401_v12, %s12032_s19 }
 0xafe   : > { %v8446_v19 = vpop.permute.xlu2 %8445 }
 0xb0e   : > { %v8441_v25 = vpop.permute.xlu1 %8440 }
 0xb0f   : > { %v8443_v58 = vadd.f32 %v8441_v25, %v8438_v44 }
 0xb11   : > { %v8448_v46 = vadd.f32 %v8446_v19, %v8443_v58 }
 0xb16   : > { %v8461_v30 = vpop.permute.xlu2 %8460 }
 0xb1e   : > { %v8451_v26 = vpop.permute.xlu0 %8450 }
 0xb1f   : > { %v8453_v13 = vadd.f32 %v8451_v26, %v8448_v46 }
 0xb26   : > { %v8456_v39 = vpop.permute.xlu1 %8455 }
 0xb27   : > { %v8458_v54 = vadd.f32 %v8456_v39, %v8453_v13 }
 0xb29   : > { %v8463_v6 = vadd.f32 %v8461_v30, %v8458_v54 }
 0xb36   : > { %v8466_v18 = vpop.permute.xlu0 %8465 }
 0xb37   : > { %v8468_v50 = vadd.f32 %v8466_v18, %v8463_v6 }
 0xb3e   : > { %v8471_v21 = vpop.permute.xlu1 %8470 }
 0xb3f   : > { %v8473_v52 = vadd.f32 %v8471_v21, %v8468_v50 }
 0xb41   : > { %v8475_v33 = vsel %vm8474_vm0, %v8473_v52, 0.0 }
 0xb42   : > { %v8480_v28 = vadd.f32 %v11959_v62, %v8475_v33 }
 0xb44   : > { %8481 = vst [vmem:[%s271_s18] sm:$0xff] %v8480_v28 }
 0xb45   : > { %11988 = shalt.err (!%p11985_p3)
}
 0xb46   : > { %11912 = dma.vmem_to_hbm [thread:$0]  (%p12111_p5), %s8496_s20, 128, %s8498_s21, %s8483_s28  }
 0xb47 PF: > { %p11918_p4 = scmp.ge.s32.totalorder %s12023_s27, 2  ;;  %s8509_s8 = sand.u32 1, %s12011_s24  }
 0xb48   : > { %s8510_s16 = scalar_lea.sflag [#allocation3], %s8509_s8 }
 0xb49   : > { %p11915_p7 = pnand %p11918_p4, %p12115_p6 }
 0xb4b   : > { %p11916_p8 = pneg %p11915_p7 }
 0xb4d   : > { %12006 = dma.done.wait (%p11916_p8), %s8510_s16, 128  }
 0xb4e   : > { %12008 = vsyncadd (%p11916_p8), %s8510_s16, 4294967168  ;;  %p17_p9 = scmp.ge.s32.totalorder %s12098_s30, 4   ;;  %s18433_s24 = smov %s12015_s25 }
 0xb4f   : > { %s18434_s25 = smov %s12019_s26  ;;  %s18435_s26 = smov %s12109_s10 }
 0xb50   : > { %s18436_s27 = smov %s12098_s30  ;;  %19 = sbr.rel (!%p17_p9) target bundleno = 3 (0x3), region = 89 }
 0xb55   :  { %8516 = vsyncpa [#allocation3], 1 }
 0xb56   :  { %8518 = vsyncpa [#allocation3 + $0x1], 1 }

</bundles_post_ra>
